<compile_context>
chip_gen: v7x
topology: tpu7x:2x2x1
jax: 0.10.0
libtpu: 0.0.40
codegen_flags: <defaults>
</compile_context>

<pallas_src>
import functools
import math

import jax
import jax.numpy as jnp
from jax.experimental import pallas as pl
from jax.experimental.pallas import tpu as pltpu


def _sigmoid(x):
    # One EUP tanh instead of exp + reciprocal (review item: halve EUP pressure).
    return 0.5 * (jnp.tanh(0.5 * x) + 1.0)


def _divisor_leq(n, target):
    """Largest divisor of n that is <= target (>=1)."""
    b = max(1, min(n, target))
    while n % b:
        b -= 1
    return b


# ---------------------------------------------------------------------------
# Kernel 1: hoisted input projection   gx = x @ Wx + (b_ih + b_hh)     (f32)
# ---------------------------------------------------------------------------
def _proj_kernel(x_ref, w_ref, b_ref, o_ref):
    o_ref[...] = (
        jnp.dot(x_ref[...], w_ref[...], preferred_element_type=jnp.float32)
        + b_ref[...]
    )


def input_projection(x_tm, wx, b, *, row_block=512):
    """x_tm: (T, B, D) bf16, wx: (D, 4H) bf16, b: (1, 4H) f32  ->  (T, B, 4H) f32."""
    T, B, D = x_tm.shape
    G = wx.shape[1]
    n = T * B
    x2 = x_tm.reshape(n, D)
    if n <= row_block:
        rb = n
    elif n % 8 == 0:
        rb = _divisor_leq(n // 8, row_block // 8) * 8
    else:
        rb = n  # fall back to a single full-row block
    grid = (n // rb,)
    gx = pl.pallas_call(
        _proj_kernel,
        out_shape=jax.ShapeDtypeStruct((n, G), jnp.float32),
        grid_spec=pltpu.PrefetchScalarGridSpec(
            num_scalar_prefetch=0,
            grid=grid,
            in_specs=[
                pl.BlockSpec((rb, D), lambda r: (r, 0)),
                pl.BlockSpec((D, G), lambda r: (0, 0)),
                pl.BlockSpec((1, G), lambda r: (0, 0)),
            ],
            out_specs=pl.BlockSpec((rb, G), lambda r: (r, 0)),
        ),
        compiler_params=pltpu.CompilerParams(
            dimension_semantics=("parallel",),
            vmem_limit_bytes=32 * 1024 * 1024,
        ),
    )(x2, wx, b)
    return gx.reshape(T, B, G)


# ---------------------------------------------------------------------------
# Kernel 2: one LSTM direction, `tb_size` time steps per grid iteration.
# Outputs the hidden sequence (optional, bf16) and the time-mean (f32),
# the latter accumulated in a resident output block (fused mean).
# ---------------------------------------------------------------------------
def _lstm_dir_kernel(gx_ref, wh_ref, *refs, emit_seq, tb_size, inv_t, reverse):
    """gx_ref : (tb, Bb, 4H) f32   precomputed x@Wx + bias for this time block
       wh_ref : (H, 4H)      bf16  recurrent weights
       seq_ref: (tb, Bb, H)  bf16  hidden sequence (only if emit_seq)
       mean_ref: (Bb, H)     f32   resident accumulator -> mean over time
       h_scr, c_scr: (Bb, H) f32   recurrent carries (persist across time blocks)
    """
    if emit_seq:
        seq_ref, mean_ref, h_scr, c_scr = refs
    else:
        seq_ref = None
        mean_ref, h_scr, c_scr = refs

    t_blk = pl.program_id(1)

    @pl.when(t_blk == 0)
    def _():
        h_scr[...] = jnp.zeros_like(h_scr)
        c_scr[...] = jnp.zeros_like(c_scr)
        mean_ref[...] = jnp.zeros_like(mean_ref)

    wh = wh_ref[...]
    nh = h_scr.shape[-1]

    def step(i, carry):
        h, c, acc = carry
        t_loc = (tb_size - 1 - i) if reverse else i
        gates = gx_ref[t_loc] + jnp.dot(
            h.astype(wh.dtype), wh, preferred_element_type=jnp.float32)
        # Static slices; lane-aligned when H is a multiple of 128 (demo uses H=128).
        i_g = _sigmoid(gates[:, 0 * nh:1 * nh])
        f_g = _sigmoid(gates[:, 1 * nh:2 * nh])
        g_g = jnp.tanh(gates[:, 2 * nh:3 * nh])
        o_g = _sigmoid(gates[:, 3 * nh:4 * nh])
        c = f_g * c + i_g * g_g
        h = o_g * jnp.tanh(c)
        if emit_seq:
            seq_ref[t_loc] = h.astype(seq_ref.dtype)
        return h, c, acc + h

    h0 = h_scr[...]
    c0 = c_scr[...]
    acc0 = jnp.zeros_like(h0)
    h, c, acc = jax.lax.fori_loop(0, tb_size, step, (h0, c0, acc0), unroll=True)
    h_scr[...] = h
    c_scr[...] = c
    mean_ref[...] = mean_ref[...] + acc * inv_t


def lstm_direction(gx, wh, *, reverse, emit_seq, time_block=8, batch_block=None,
                   seq_dtype=jnp.bfloat16):
    """gx: (T, B, 4H) f32, wh: (H, 4H) bf16.

    Returns ((T,B,H) bf16 sequence, (B,H) f32 time-mean) if emit_seq else the mean.
    Pass batch_block=B//2 (multiple of 8) on v7x to split the batch over both TCs.
    """
    T, B, G = gx.shape
    H = wh.shape[0]
    assert G == 4 * H
    tb = _divisor_leq(T, time_block)
    bb = B if batch_block is None else batch_block
    assert B % bb == 0
    n_tb = T // tb
    n_bb = B // bb

    if reverse:
        def t_map(b_, t_):
            return (n_tb - 1 - t_, b_, 0)
    else:
        def t_map(b_, t_):
            return (t_, b_, 0)

    kernel = functools.partial(
        _lstm_dir_kernel, emit_seq=emit_seq, tb_size=tb, inv_t=1.0 / T,
        reverse=reverse)

    mean_shape = jax.ShapeDtypeStruct((B, H), jnp.float32)
    mean_spec = pl.BlockSpec((bb, H), lambda b_, t_: (b_, 0))
    if emit_seq:
        out_shape = (jax.ShapeDtypeStruct((T, B, H), seq_dtype), mean_shape)
        out_specs = (pl.BlockSpec((tb, bb, H), t_map), mean_spec)
    else:
        out_shape = mean_shape
        out_specs = mean_spec

    return pl.pallas_call(
        kernel,
        out_shape=out_shape,
        grid_spec=pltpu.PrefetchScalarGridSpec(
            num_scalar_prefetch=0,
            grid=(n_bb, n_tb),
            in_specs=[
                pl.BlockSpec((tb, bb, G), t_map),
                pl.BlockSpec((H, G), lambda b_, t_: (0, 0)),
            ],
            out_specs=out_specs,
            scratch_shapes=[
                pltpu.VMEM((bb, H), jnp.float32),   # h carry
                pltpu.VMEM((bb, H), jnp.float32),   # c carry
            ],
        ),
        compiler_params=pltpu.CompilerParams(
            dimension_semantics=("parallel", "arbitrary"),
            vmem_limit_bytes=32 * 1024 * 1024,
        ),
    )(gx, wh)


# ---------------------------------------------------------------------------
# Kernel 3: head — concat'ed time-mean -> Linear -> ReLU -> Linear
# ---------------------------------------------------------------------------
def _head_kernel(m_ref, w1_ref, b1_ref, w2_ref, b2_ref, o_ref):
    z = (jnp.dot(m_ref[...].astype(w1_ref.dtype), w1_ref[...],
                 preferred_element_type=jnp.float32) + b1_ref[...])
    z = jnp.maximum(z, 0.0)                                     # ReLU
    # TODO(synk): nn.Dropout after the ReLU is train-mode only; identity here.
    o_ref[...] = (jnp.dot(z.astype(w2_ref.dtype), w2_ref[...],
                          preferred_element_type=jnp.float32) + b2_ref[...])


def head(mean_cat, w1, b1, w2, b2):
    B, H2 = mean_cat.shape
    Hm = w1.shape[1]
    C = w2.shape[1]
    return pl.pallas_call(
        _head_kernel,
        out_shape=jax.ShapeDtypeStruct((B, C), jnp.float32),
        in_specs=[
            pl.BlockSpec((B, H2), lambda: (0, 0)),
            pl.BlockSpec((H2, Hm), lambda: (0, 0)),
            pl.BlockSpec((1, Hm), lambda: (0, 0)),
            pl.BlockSpec((Hm, C), lambda: (0, 0)),
            pl.BlockSpec((1, C), lambda: (0, 0)),
        ],
        out_specs=pl.BlockSpec((B, C), lambda: (0, 0)),
    )(mean_cat, w1, b1, w2, b2)


# ---------------------------------------------------------------------------
# Full forward (matches BLSTM_RELU.forward, eval mode)
# ---------------------------------------------------------------------------
@jax.jit
def blstm_relu_forward(params, batch):
    """batch: (B, T, idim) batch_first  ->  (B, num_classes)."""
    x = jnp.transpose(batch, (1, 0, 2)).astype(jnp.bfloat16)    # (T, B, D) time-major
    nlay = len(params["layers"])
    mean_cat = None
    for li, lyr in enumerate(params["layers"]):
        last = li == nlay - 1
        seqs, means = [], []
        for name, rev in (("fwd", False), ("bwd", True)):
            p = lyr[name]
            gx = input_projection(x, p["wx"], p["b"])            # (T, B, 4H) f32
            out = lstm_direction(gx, p["wh"], reverse=rev, emit_seq=not last)
            if last:
                means.append(out)                                # (B, H) f32 time-mean
            else:
                seq, _ = out
                seqs.append(seq)                                 # (T, B, H) bf16
        if last:
            mean_cat = jnp.concatenate(means, axis=-1)           # (B, 2H) f32
        else:
            x = jnp.concatenate(seqs, axis=-1)                   # (T, B, 2H) bf16
    return head(mean_cat, params["w1"], params["b1"], params["w2"], params["b2"])


# ---------------------------------------------------------------------------
# Pure-JAX reference with the identical bf16/f32 mixed precision (lax.scan)
# ---------------------------------------------------------------------------
def blstm_relu_forward_ref(params, batch):
    x = jnp.transpose(batch, (1, 0, 2)).astype(jnp.bfloat16)
    T, B, _ = x.shape
    nlay = len(params["layers"])
    mean_cat = None
    for li, lyr in enumerate(params["layers"]):
        last = li == nlay - 1
        seqs, means = [], []
        for name, rev in (("fwd", False), ("bwd", True)):
            p = lyr[name]
            H = p["wh"].shape[0]
            D = p["wx"].shape[0]
            gx = (jnp.dot(x.reshape(T * B, D), p["wx"],
                          preferred_element_type=jnp.float32)
                  .reshape(T, B, 4 * H) + p["b"])

            def step(carry, g_t, wh=p["wh"], H=H):
                h, c = carry
                g = g_t + jnp.dot(h.astype(wh.dtype), wh,
                                  preferred_element_type=jnp.float32)
                i = _sigmoid(g[:, 0 * H:1 * H])
                f = _sigmoid(g[:, 1 * H:2 * H])
                gg = jnp.tanh(g[:, 2 * H:3 * H])
                o = _sigmoid(g[:, 3 * H:4 * H])
                c = f * c + i * gg
                h = o * jnp.tanh(c)
                return (h, c), h

            init = (jnp.zeros((B, H), jnp.float32), jnp.zeros((B, H), jnp.float32))
            gs = gx[::-1] if rev else gx
            _, hs = jax.lax.scan(step, init, gs)
            if rev:
                hs = hs[::-1]
            if last:
                means.append(jnp.mean(hs, axis=0))
            else:
                seqs.append(hs.astype(jnp.bfloat16))
        if last:
            mean_cat = jnp.concatenate(means, axis=-1)
        else:
            x = jnp.concatenate(seqs, axis=-1)
    z = (jnp.dot(mean_cat.astype(params["w1"].dtype), params["w1"],
                 preferred_element_type=jnp.float32) + params["b1"])
    z = jnp.maximum(z, 0.0)
    return (jnp.dot(z.astype(params["w2"].dtype), params["w2"],
                    preferred_element_type=jnp.float32) + params["b2"])


# ---------------------------------------------------------------------------
# Parameter init (PyTorch-style uniform; i,f,g,o gate order; weights in bf16)
# ---------------------------------------------------------------------------
def init_params(key, idim, num_classes, nhu, nhu2, nlay, w_dtype=jnp.bfloat16):
    params = {"layers": []}
    bound = 1.0 / math.sqrt(nhu)
    for layer in range(nlay):
        din = idim if layer == 0 else 2 * nhu
        ldict = {}
        for name in ("fwd", "bwd"):
            key, k1, k2, k3, k4 = jax.random.split(key, 5)
            w_ih = jax.random.uniform(k1, (4 * nhu, din), jnp.float32, -bound, bound)
            w_hh = jax.random.uniform(k2, (4 * nhu, nhu), jnp.float32, -bound, bound)
            b_ih = jax.random.uniform(k3, (4 * nhu,), jnp.float32, -bound, bound)
            b_hh = jax.random.uniform(k4, (4 * nhu,), jnp.float32, -bound, bound)
            ldict[name] = {
                "wx": w_ih.T.astype(w_dtype),                    # (din, 4H)
                "wh": w_hh.T.astype(w_dtype),                    # (H, 4H)
                "b": (b_ih + b_hh).reshape(1, 4 * nhu),          # (1, 4H) f32
            }
        params["layers"].append(ldict)
    key, k1, k2, k3, k4 = jax.random.split(key, 5)
    b1 = 1.0 / math.sqrt(2 * nhu)
    b2 = 1.0 / math.sqrt(nhu2)
    params["w1"] = jax.random.uniform(k1, (2 * nhu, nhu2), jnp.float32,
                                      -b1, b1).astype(w_dtype)
    params["b1"] = jax.random.uniform(k2, (1, nhu2), jnp.float32, -b1, b1)
    params["w2"] = jax.random.uniform(k3, (nhu2, num_classes), jnp.float32,
                                      -b2, b2).astype(w_dtype)
    params["b2"] = jax.random.uniform(k4, (1, num_classes), jnp.float32, -b2, b2)
    return params


if __name__ == "__main__":
    # Small shapes: batch=8 (full f32 sublane), seq=16, idim=16, nhu=128
    # (lane-aligned gate slices), nhu2=64, 2 layers, 10 classes.
    B, T, IDIM, NHU, NHU2, NLAY, NCLASS = 8, 16, 16, 128, 64, 2, 10

    key = jax.random.PRNGKey(0)
    kp, kx = jax.random.split(key)
    params = init_params(kp, IDIM, NCLASS, NHU, NHU2, NLAY)
    batch = jax.random.normal(kx, (B, T, IDIM), jnp.float32)

    out = jax.block_until_ready(blstm_relu_forward(params, batch))
    assert out.shape == (B, NCLASS), out.shape

    ref = blstm_relu_forward_ref(params, batch)
    max_err = float(jnp.max(jnp.abs(out - ref)))
    assert jnp.allclose(out, ref, atol=2e-2, rtol=2e-2), \
        f"mismatch: max err {max_err}"

    print("KERNEL_OK")
</pallas_src>

<mosaic_0001>
module attributes {stable_mosaic.version = 11 : i64} {
  func.func @_proj_kernel(%arg0: i32, %arg1: memref<128x16xbf16, #tpu.memory_space<vmem>>, %arg2: memref<16x512xbf16, #tpu.memory_space<vmem>>, %arg3: memref<1x512xf32, #tpu.memory_space<vmem>>, %arg4: memref<128x512xf32, #tpu.memory_space<vmem>>) attributes {dimension_semantics = [#tpu.dimension_semantics<parallel>], iteration_bounds = array<i64: 1>, scalar_prefetch = 0 : i64, scratch_operands = 0 : i64, tpu.core_type = #tpu.core_type<tc>, window_params = [{transform_indices = @transform_0, window_bounds = array<i64: 128, 16>}, {pipeline_mode = #tpu.pipeline_mode<synchronous>, transform_indices = @transform_1, window_bounds = array<i64: 16, 512>}, {pipeline_mode = #tpu.pipeline_mode<synchronous>, transform_indices = @transform_2, window_bounds = array<i64: 1, 512>}, {transform_indices = @transform_3, window_bounds = array<i64: 128, 512>}]} {
    %c0 = arith.constant 0 : index
    %c0_0 = arith.constant 0 : index
    %0 = vector.load %arg1[%c0, %c0_0] : memref<128x16xbf16, #tpu.memory_space<vmem>>, vector<128x16xbf16>
    %c0_1 = arith.constant 0 : index
    %c0_2 = arith.constant 0 : index
    %1 = vector.load %arg2[%c0_1, %c0_2] : memref<16x512xbf16, #tpu.memory_space<vmem>>, vector<16x512xbf16>
    %cst = arith.constant dense<0.000000e+00> : vector<128x512xf32>
    %2 = tpu.matmul %0, %1, %cst {dimension_numbers = #tpu.dot_dimension_numbers<[1], [0], [0], [1], [0, 0, 1, 1], [], []>} : vector<128x16xbf16>, vector<16x512xbf16>, vector<128x512xf32> -> vector<128x512xf32>
    %c0_3 = arith.constant 0 : index
    %c0_4 = arith.constant 0 : index
    %3 = vector.load %arg3[%c0_3, %c0_4] : memref<1x512xf32, #tpu.memory_space<vmem>>, vector<1x512xf32>
    %4 = vector.broadcast %3 : vector<1x512xf32> to vector<128x512xf32>
    %5 = arith.addf %2, %4 : vector<128x512xf32>
    %c0_5 = arith.constant 0 : index
    %c0_6 = arith.constant 0 : index
    %6 = vector.load %arg4[%c0_5, %c0_6] : memref<128x512xf32, #tpu.memory_space<vmem>>, vector<128x512xf32>
    tpu.vector_store %arg4[%c0_5, %c0_6], %5 {strides = array<i32>} : memref<128x512xf32, #tpu.memory_space<vmem>>, vector<128x512xf32>,
    return
  }
  func.func @transform_0(%arg0: i32) -> (i32, i32) {
    %c0_i32 = arith.constant 0 : i32
    %c0_i32_0 = arith.constant 0 : i32
    return %arg0, %c0_i32 : i32, i32
  }
  func.func @transform_1(%arg0: i32) -> (i32, i32) {
    %c0_i32 = arith.constant 0 : i32
    %c0_i32_0 = arith.constant 0 : i32
    %c0_i32_1 = arith.constant 0 : i32
    return %c0_i32, %c0_i32_0 : i32, i32
  }
  func.func @transform_2(%arg0: i32) -> (i32, i32) {
    %c0_i32 = arith.constant 0 : i32
    %c0_i32_0 = arith.constant 0 : i32
    %c0_i32_1 = arith.constant 0 : i32
    return %c0_i32, %c0_i32_0 : i32, i32
  }
  func.func @transform_3(%arg0: i32) -> (i32, i32) {
    %c0_i32 = arith.constant 0 : i32
    %c0_i32_0 = arith.constant 0 : i32
    return %arg0, %c0_i32 : i32, i32
  }
}

module attributes {stable_mosaic.version = 11 : i64} {
  func.func @_lstm_dir_kernel(%arg0: i32, %arg1: i32, %arg2: memref<8x8x512xf32, #tpu.memory_space<vmem>>, %arg3: memref<128x512xbf16, #tpu.memory_space<vmem>>, %arg4: memref<8x8x128xbf16, #tpu.memory_space<vmem>>, %arg5: memref<8x128xf32, #tpu.memory_space<vmem>>, %arg6: memref<8x128xf32, #tpu.memory_space<vmem>>, %arg7: memref<8x128xf32, #tpu.memory_space<vmem>>) attributes {dimension_semantics = [#tpu.dimension_semantics<parallel>, #tpu.dimension_semantics<arbitrary>], iteration_bounds = array<i64: 1, 2>, scalar_prefetch = 0 : i64, scratch_operands = 2 : i64, tpu.core_type = #tpu.core_type<tc>, window_params = [{transform_indices = @transform_0, window_bounds = array<i64: 8, 8, 512>}, {pipeline_mode = #tpu.pipeline_mode<synchronous>, transform_indices = @transform_1, window_bounds = array<i64: 128, 512>}, {transform_indices = @transform_2, window_bounds = array<i64: 8, 8, 128>}, {transform_indices = @transform_3, window_bounds = array<i64: 8, 128>}]} {
    %c0_i32 = arith.constant 0 : i32
    %0 = arith.cmpi eq, %arg1, %c0_i32 : i32
    %1 = arith.extui %0 : i1 to i32
    %c0_i32_0 = arith.constant 0 : i32
    %2 = arith.cmpi ne, %1, %c0_i32_0 : i32
    scf.if %2 {
      %cst_128 = arith.constant 0.000000e+00 : f32
      %358 = vector.broadcast %cst_128 : f32 to vector<8x128xf32>
      %c0_129 = arith.constant 0 : index
      %c0_130 = arith.constant 0 : index
      %359 = vector.load %arg6[%c0_129, %c0_130] : memref<8x128xf32, #tpu.memory_space<vmem>>, vector<8x128xf32>
      tpu.vector_store %arg6[%c0_129, %c0_130], %358 {strides = array<i32>} : memref<8x128xf32, #tpu.memory_space<vmem>>, vector<8x128xf32>,
      %cst_131 = arith.constant 0.000000e+00 : f32
      %360 = vector.broadcast %cst_131 : f32 to vector<8x128xf32>
      %c0_132 = arith.constant 0 : index
      %c0_133 = arith.constant 0 : index
      %361 = vector.load %arg7[%c0_132, %c0_133] : memref<8x128xf32, #tpu.memory_space<vmem>>, vector<8x128xf32>
      tpu.vector_store %arg7[%c0_132, %c0_133], %360 {strides = array<i32>} : memref<8x128xf32, #tpu.memory_space<vmem>>, vector<8x128xf32>,
      %cst_134 = arith.constant 0.000000e+00 : f32
      %362 = vector.broadcast %cst_134 : f32 to vector<8x128xf32>
      %c0_135 = arith.constant 0 : index
      %c0_136 = arith.constant 0 : index
      %363 = vector.load %arg5[%c0_135, %c0_136] : memref<8x128xf32, #tpu.memory_space<vmem>>, vector<8x128xf32>
      tpu.vector_store %arg5[%c0_135, %c0_136], %362 {strides = array<i32>} : memref<8x128xf32, #tpu.memory_space<vmem>>, vector<8x128xf32>,
    } else {
    }
    %c0 = arith.constant 0 : index
    %c0_1 = arith.constant 0 : index
    %3 = vector.load %arg3[%c0, %c0_1] : memref<128x512xbf16, #tpu.memory_space<vmem>>, vector<128x512xbf16>
    %c0_2 = arith.constant 0 : index
    %c0_3 = arith.constant 0 : index
    %4 = vector.load %arg6[%c0_2, %c0_3] : memref<8x128xf32, #tpu.memory_space<vmem>>, vector<8x128xf32>
    %c0_4 = arith.constant 0 : index
    %c0_5 = arith.constant 0 : index
    %5 = vector.load %arg7[%c0_4, %c0_5] : memref<8x128xf32, #tpu.memory_space<vmem>>, vector<8x128xf32>
    %cst = arith.constant 0.000000e+00 : f32
    %6 = vector.broadcast %cst : f32 to vector<8x128xf32>
    %c0_i32_6 = arith.constant 0 : i32
    %7 = arith.index_cast %c0_i32_6 : i32 to index
    %c0_7 = arith.constant 0 : index
    %c0_8 = arith.constant 0 : index
    %8 = vector.load %arg2[%7, %c0_7, %c0_8] : memref<8x8x512xf32, #tpu.memory_space<vmem>>, vector<1x8x512xf32>
    %9 = vector.shape_cast %8 : vector<1x8x512xf32> to vector<8x512xf32>
    %10 = arith.truncf %4 : vector<8x128xf32> to vector<8x128xbf16>
    %cst_9 = arith.constant dense<0.000000e+00> : vector<8x512xf32>
    %11 = tpu.matmul %10, %3, %cst_9 {dimension_numbers = #tpu.dot_dimension_numbers<[1], [0], [0], [1], [0, 0, 1, 1], [], []>} : vector<8x128xbf16>, vector<128x512xbf16>, vector<8x512xf32> -> vector<8x512xf32>
    %12 = arith.addf %9, %11 : vector<8x512xf32>
    %13 = vector.extract_strided_slice %12 {offsets = [0, 0], sizes = [8, 128], strides = [1, 1]} : vector<8x512xf32> to vector<8x128xf32>
    %cst_10 = arith.constant 5.000000e-01 : f32
    %14 = vector.broadcast %cst_10 : f32 to vector<8x128xf32>
    %15 = arith.mulf %14, %13 : vector<8x128xf32>
    %16 = math.tanh %15 : vector<8x128xf32>
    %cst_11 = arith.constant 1.000000e+00 : f32
    %17 = vector.broadcast %cst_11 : f32 to vector<8x128xf32>
    %18 = arith.addf %16, %17 : vector<8x128xf32>
    %cst_12 = arith.constant 5.000000e-01 : f32
    %19 = vector.broadcast %cst_12 : f32 to vector<8x128xf32>
    %20 = arith.mulf %19, %18 : vector<8x128xf32>
    %21 = vector.extract_strided_slice %12 {offsets = [0, 128], sizes = [8, 128], strides = [1, 1]} : vector<8x512xf32> to vector<8x128xf32>
    %cst_13 = arith.constant 5.000000e-01 : f32
    %22 = vector.broadcast %cst_13 : f32 to vector<8x128xf32>
    %23 = arith.mulf %22, %21 : vector<8x128xf32>
    %24 = math.tanh %23 : vector<8x128xf32>
    %cst_14 = arith.constant 1.000000e+00 : f32
    %25 = vector.broadcast %cst_14 : f32 to vector<8x128xf32>
    %26 = arith.addf %24, %25 : vector<8x128xf32>
    %cst_15 = arith.constant 5.000000e-01 : f32
    %27 = vector.broadcast %cst_15 : f32 to vector<8x128xf32>
    %28 = arith.mulf %27, %26 : vector<8x128xf32>
    %29 = vector.extract_strided_slice %12 {offsets = [0, 256], sizes = [8, 128], strides = [1, 1]} : vector<8x512xf32> to vector<8x128xf32>
    %30 = math.tanh %29 : vector<8x128xf32>
    %31 = vector.extract_strided_slice %12 {offsets = [0, 384], sizes = [8, 128], strides = [1, 1]} : vector<8x512xf32> to vector<8x128xf32>
    %cst_16 = arith.constant 5.000000e-01 : f32
    %32 = vector.broadcast %cst_16 : f32 to vector<8x128xf32>
    %33 = arith.mulf %32, %31 : vector<8x128xf32>
    %34 = math.tanh %33 : vector<8x128xf32>
    %cst_17 = arith.constant 1.000000e+00 : f32
    %35 = vector.broadcast %cst_17 : f32 to vector<8x128xf32>
    %36 = arith.addf %34, %35 : vector<8x128xf32>
    %cst_18 = arith.constant 5.000000e-01 : f32
    %37 = vector.broadcast %cst_18 : f32 to vector<8x128xf32>
    %38 = arith.mulf %37, %36 : vector<8x128xf32>
    %39 = arith.mulf %28, %5 : vector<8x128xf32>
    %40 = arith.mulf %20, %30 : vector<8x128xf32>
    %41 = arith.addf %39, %40 : vector<8x128xf32>
    %42 = math.tanh %41 : vector<8x128xf32>
    %43 = arith.mulf %38, %42 : vector<8x128xf32>
    %44 = arith.truncf %43 : vector<8x128xf32> to vector<8x128xbf16>
    %45 = arith.index_cast %c0_i32_6 : i32 to index
    %c0_19 = arith.constant 0 : index
    %c0_20 = arith.constant 0 : index
    %46 = vector.load %arg4[%45, %c0_19, %c0_20] : memref<8x8x128xbf16, #tpu.memory_space<vmem>>, vector<1x8x128xbf16>
    %47 = vector.shape_cast %46 : vector<1x8x128xbf16> to vector<8x128xbf16>
    %48 = vector.shape_cast %44 : vector<8x128xbf16> to vector<1x8x128xbf16>
    tpu.vector_store %arg4[%45, %c0_19, %c0_20], %48 {strides = array<i32>} : memref<8x8x128xbf16, #tpu.memory_space<vmem>>, vector<1x8x128xbf16>,
    %49 = arith.addf %6, %43 : vector<8x128xf32>
    %c1_i32 = arith.constant 1 : i32
    %50 = arith.index_cast %c1_i32 : i32 to index
    %c0_21 = arith.constant 0 : index
    %c0_22 = arith.constant 0 : index
    %51 = vector.load %arg2[%50, %c0_21, %c0_22] : memref<8x8x512xf32, #tpu.memory_space<vmem>>, vector<1x8x512xf32>
    %52 = vector.shape_cast %51 : vector<1x8x512xf32> to vector<8x512xf32>
    %53 = arith.truncf %43 : vector<8x128xf32> to vector<8x128xbf16>
    %cst_23 = arith.constant dense<0.000000e+00> : vector<8x512xf32>
    %54 = tpu.matmul %53, %3, %cst_23 {dimension_numbers = #tpu.dot_dimension_numbers<[1], [0], [0], [1], [0, 0, 1, 1], [], []>} : vector<8x128xbf16>, vector<128x512xbf16>, vector<8x512xf32> -> vector<8x512xf32>
    %55 = arith.addf %52, %54 : vector<8x512xf32>
    %56 = vector.extract_strided_slice %55 {offsets = [0, 0], sizes = [8, 128], strides = [1, 1]} : vector<8x512xf32> to vector<8x128xf32>
    %cst_24 = arith.constant 5.000000e-01 : f32
    %57 = vector.broadcast %cst_24 : f32 to vector<8x128xf32>
    %58 = arith.mulf %57, %56 : vector<8x128xf32>
    %59 = math.tanh %58 : vector<8x128xf32>
    %cst_25 = arith.constant 1.000000e+00 : f32
    %60 = vector.broadcast %cst_25 : f32 to vector<8x128xf32>
    %61 = arith.addf %59, %60 : vector<8x128xf32>
    %cst_26 = arith.constant 5.000000e-01 : f32
    %62 = vector.broadcast %cst_26 : f32 to vector<8x128xf32>
    %63 = arith.mulf %62, %61 : vector<8x128xf32>
    %64 = vector.extract_strided_slice %55 {offsets = [0, 128], sizes = [8, 128], strides = [1, 1]} : vector<8x512xf32> to vector<8x128xf32>
    %cst_27 = arith.constant 5.000000e-01 : f32
    %65 = vector.broadcast %cst_27 : f32 to vector<8x128xf32>
    %66 = arith.mulf %65, %64 : vector<8x128xf32>
    %67 = math.tanh %66 : vector<8x128xf32>
    %cst_28 = arith.constant 1.000000e+00 : f32
    %68 = vector.broadcast %cst_28 : f32 to vector<8x128xf32>
    %69 = arith.addf %67, %68 : vector<8x128xf32>
    %cst_29 = arith.constant 5.000000e-01 : f32
    %70 = vector.broadcast %cst_29 : f32 to vector<8x128xf32>
    %71 = arith.mulf %70, %69 : vector<8x128xf32>
    %72 = vector.extract_strided_slice %55 {offsets = [0, 256], sizes = [8, 128], strides = [1, 1]} : vector<8x512xf32> to vector<8x128xf32>
    %73 = math.tanh %72 : vector<8x128xf32>
    %74 = vector.extract_strided_slice %55 {offsets = [0, 384], sizes = [8, 128], strides = [1, 1]} : vector<8x512xf32> to vector<8x128xf32>
    %cst_30 = arith.constant 5.000000e-01 : f32
    %75 = vector.broadcast %cst_30 : f32 to vector<8x128xf32>
    %76 = arith.mulf %75, %74 : vector<8x128xf32>
    %77 = math.tanh %76 : vector<8x128xf32>
    %cst_31 = arith.constant 1.000000e+00 : f32
    %78 = vector.broadcast %cst_31 : f32 to vector<8x128xf32>
    %79 = arith.addf %77, %78 : vector<8x128xf32>
    %cst_32 = arith.constant 5.000000e-01 : f32
    %80 = vector.broadcast %cst_32 : f32 to vector<8x128xf32>
    %81 = arith.mulf %80, %79 : vector<8x128xf32>
    %82 = arith.mulf %71, %41 : vector<8x128xf32>
    %83 = arith.mulf %63, %73 : vector<8x128xf32>
    %84 = arith.addf %82, %83 : vector<8x128xf32>
    %85 = math.tanh %84 : vector<8x128xf32>
    %86 = arith.mulf %81, %85 : vector<8x128xf32>
    %87 = arith.truncf %86 : vector<8x128xf32> to vector<8x128xbf16>
    %88 = arith.index_cast %c1_i32 : i32 to index
    %c0_33 = arith.constant 0 : index
    %c0_34 = arith.constant 0 : index
    %89 = vector.load %arg4[%88, %c0_33, %c0_34] : memref<8x8x128xbf16, #tpu.memory_space<vmem>>, vector<1x8x128xbf16>
    %90 = vector.shape_cast %89 : vector<1x8x128xbf16> to vector<8x128xbf16>
    %91 = vector.shape_cast %87 : vector<8x128xbf16> to vector<1x8x128xbf16>
    tpu.vector_store %arg4[%88, %c0_33, %c0_34], %91 {strides = array<i32>} : memref<8x8x128xbf16, #tpu.memory_space<vmem>>, vector<1x8x128xbf16>,
    %92 = arith.addf %49, %86 : vector<8x128xf32>
    %c2_i32 = arith.constant 2 : i32
    %93 = arith.index_cast %c2_i32 : i32 to index
    %c0_35 = arith.constant 0 : index
    %c0_36 = arith.constant 0 : index
    %94 = vector.load %arg2[%93, %c0_35, %c0_36] : memref<8x8x512xf32, #tpu.memory_space<vmem>>, vector<1x8x512xf32>
    %95 = vector.shape_cast %94 : vector<1x8x512xf32> to vector<8x512xf32>
    %96 = arith.truncf %86 : vector<8x128xf32> to vector<8x128xbf16>
    %cst_37 = arith.constant dense<0.000000e+00> : vector<8x512xf32>
    %97 = tpu.matmul %96, %3, %cst_37 {dimension_numbers = #tpu.dot_dimension_numbers<[1], [0], [0], [1], [0, 0, 1, 1], [], []>} : vector<8x128xbf16>, vector<128x512xbf16>, vector<8x512xf32> -> vector<8x512xf32>
    %98 = arith.addf %95, %97 : vector<8x512xf32>
    %99 = vector.extract_strided_slice %98 {offsets = [0, 0], sizes = [8, 128], strides = [1, 1]} : vector<8x512xf32> to vector<8x128xf32>
    %cst_38 = arith.constant 5.000000e-01 : f32
    %100 = vector.broadcast %cst_38 : f32 to vector<8x128xf32>
    %101 = arith.mulf %100, %99 : vector<8x128xf32>
    %102 = math.tanh %101 : vector<8x128xf32>
    %cst_39 = arith.constant 1.000000e+00 : f32
    %103 = vector.broadcast %cst_39 : f32 to vector<8x128xf32>
    %104 = arith.addf %102, %103 : vector<8x128xf32>
    %cst_40 = arith.constant 5.000000e-01 : f32
    %105 = vector.broadcast %cst_40 : f32 to vector<8x128xf32>
    %106 = arith.mulf %105, %104 : vector<8x128xf32>
    %107 = vector.extract_strided_slice %98 {offsets = [0, 128], sizes = [8, 128], strides = [1, 1]} : vector<8x512xf32> to vector<8x128xf32>
    %cst_41 = arith.constant 5.000000e-01 : f32
    %108 = vector.broadcast %cst_41 : f32 to vector<8x128xf32>
    %109 = arith.mulf %108, %107 : vector<8x128xf32>
    %110 = math.tanh %109 : vector<8x128xf32>
    %cst_42 = arith.constant 1.000000e+00 : f32
    %111 = vector.broadcast %cst_42 : f32 to vector<8x128xf32>
    %112 = arith.addf %110, %111 : vector<8x128xf32>
    %cst_43 = arith.constant 5.000000e-01 : f32
    %113 = vector.broadcast %cst_43 : f32 to vector<8x128xf32>
    %114 = arith.mulf %113, %112 : vector<8x128xf32>
    %115 = vector.extract_strided_slice %98 {offsets = [0, 256], sizes = [8, 128], strides = [1, 1]} : vector<8x512xf32> to vector<8x128xf32>
    %116 = math.tanh %115 : vector<8x128xf32>
    %117 = vector.extract_strided_slice %98 {offsets = [0, 384], sizes = [8, 128], strides = [1, 1]} : vector<8x512xf32> to vector<8x128xf32>
    %cst_44 = arith.constant 5.000000e-01 : f32
    %118 = vector.broadcast %cst_44 : f32 to vector<8x128xf32>
    %119 = arith.mulf %118, %117 : vector<8x128xf32>
    %120 = math.tanh %119 : vector<8x128xf32>
    %cst_45 = arith.constant 1.000000e+00 : f32
    %121 = vector.broadcast %cst_45 : f32 to vector<8x128xf32>
    %122 = arith.addf %120, %121 : vector<8x128xf32>
    %cst_46 = arith.constant 5.000000e-01 : f32
    %123 = vector.broadcast %cst_46 : f32 to vector<8x128xf32>
    %124 = arith.mulf %123, %122 : vector<8x128xf32>
    %125 = arith.mulf %114, %84 : vector<8x128xf32>
    %126 = arith.mulf %106, %116 : vector<8x128xf32>
    %127 = arith.addf %125, %126 : vector<8x128xf32>
    %128 = math.tanh %127 : vector<8x128xf32>
    %129 = arith.mulf %124, %128 : vector<8x128xf32>
    %130 = arith.truncf %129 : vector<8x128xf32> to vector<8x128xbf16>
    %131 = arith.index_cast %c2_i32 : i32 to index
    %c0_47 = arith.constant 0 : index
    %c0_48 = arith.constant 0 : index
    %132 = vector.load %arg4[%131, %c0_47, %c0_48] : memref<8x8x128xbf16, #tpu.memory_space<vmem>>, vector<1x8x128xbf16>
    %133 = vector.shape_cast %132 : vector<1x8x128xbf16> to vector<8x128xbf16>
    %134 = vector.shape_cast %130 : vector<8x128xbf16> to vector<1x8x128xbf16>
    tpu.vector_store %arg4[%131, %c0_47, %c0_48], %134 {strides = array<i32>} : memref<8x8x128xbf16, #tpu.memory_space<vmem>>, vector<1x8x128xbf16>,
    %135 = arith.addf %92, %129 : vector<8x128xf32>
    %c3_i32 = arith.constant 3 : i32
    %136 = arith.index_cast %c3_i32 : i32 to index
    %c0_49 = arith.constant 0 : index
    %c0_50 = arith.constant 0 : index
    %137 = vector.load %arg2[%136, %c0_49, %c0_50] : memref<8x8x512xf32, #tpu.memory_space<vmem>>, vector<1x8x512xf32>
    %138 = vector.shape_cast %137 : vector<1x8x512xf32> to vector<8x512xf32>
    %139 = arith.truncf %129 : vector<8x128xf32> to vector<8x128xbf16>
    %cst_51 = arith.constant dense<0.000000e+00> : vector<8x512xf32>
    %140 = tpu.matmul %139, %3, %cst_51 {dimension_numbers = #tpu.dot_dimension_numbers<[1], [0], [0], [1], [0, 0, 1, 1], [], []>} : vector<8x128xbf16>, vector<128x512xbf16>, vector<8x512xf32> -> vector<8x512xf32>
    %141 = arith.addf %138, %140 : vector<8x512xf32>
    %142 = vector.extract_strided_slice %141 {offsets = [0, 0], sizes = [8, 128], strides = [1, 1]} : vector<8x512xf32> to vector<8x128xf32>
    %cst_52 = arith.constant 5.000000e-01 : f32
    %143 = vector.broadcast %cst_52 : f32 to vector<8x128xf32>
    %144 = arith.mulf %143, %142 : vector<8x128xf32>
    %145 = math.tanh %144 : vector<8x128xf32>
    %cst_53 = arith.constant 1.000000e+00 : f32
    %146 = vector.broadcast %cst_53 : f32 to vector<8x128xf32>
    %147 = arith.addf %145, %146 : vector<8x128xf32>
    %cst_54 = arith.constant 5.000000e-01 : f32
    %148 = vector.broadcast %cst_54 : f32 to vector<8x128xf32>
    %149 = arith.mulf %148, %147 : vector<8x128xf32>
    %150 = vector.extract_strided_slice %141 {offsets = [0, 128], sizes = [8, 128], strides = [1, 1]} : vector<8x512xf32> to vector<8x128xf32>
    %cst_55 = arith.constant 5.000000e-01 : f32
    %151 = vector.broadcast %cst_55 : f32 to vector<8x128xf32>
    %152 = arith.mulf %151, %150 : vector<8x128xf32>
    %153 = math.tanh %152 : vector<8x128xf32>
    %cst_56 = arith.constant 1.000000e+00 : f32
    %154 = vector.broadcast %cst_56 : f32 to vector<8x128xf32>
    %155 = arith.addf %153, %154 : vector<8x128xf32>
    %cst_57 = arith.constant 5.000000e-01 : f32
    %156 = vector.broadcast %cst_57 : f32 to vector<8x128xf32>
    %157 = arith.mulf %156, %155 : vector<8x128xf32>
    %158 = vector.extract_strided_slice %141 {offsets = [0, 256], sizes = [8, 128], strides = [1, 1]} : vector<8x512xf32> to vector<8x128xf32>
    %159 = math.tanh %158 : vector<8x128xf32>
    %160 = vector.extract_strided_slice %141 {offsets = [0, 384], sizes = [8, 128], strides = [1, 1]} : vector<8x512xf32> to vector<8x128xf32>
    %cst_58 = arith.constant 5.000000e-01 : f32
    %161 = vector.broadcast %cst_58 : f32 to vector<8x128xf32>
    %162 = arith.mulf %161, %160 : vector<8x128xf32>
    %163 = math.tanh %162 : vector<8x128xf32>
    %cst_59 = arith.constant 1.000000e+00 : f32
    %164 = vector.broadcast %cst_59 : f32 to vector<8x128xf32>
    %165 = arith.addf %163, %164 : vector<8x128xf32>
    %cst_60 = arith.constant 5.000000e-01 : f32
    %166 = vector.broadcast %cst_60 : f32 to vector<8x128xf32>
    %167 = arith.mulf %166, %165 : vector<8x128xf32>
    %168 = arith.mulf %157, %127 : vector<8x128xf32>
    %169 = arith.mulf %149, %159 : vector<8x128xf32>
    %170 = arith.addf %168, %169 : vector<8x128xf32>
    %171 = math.tanh %170 : vector<8x128xf32>
    %172 = arith.mulf %167, %171 : vector<8x128xf32>
    %173 = arith.truncf %172 : vector<8x128xf32> to vector<8x128xbf16>
    %174 = arith.index_cast %c3_i32 : i32 to index
    %c0_61 = arith.constant 0 : index
    %c0_62 = arith.constant 0 : index
    %175 = vector.load %arg4[%174, %c0_61, %c0_62] : memref<8x8x128xbf16, #tpu.memory_space<vmem>>, vector<1x8x128xbf16>
    %176 = vector.shape_cast %175 : vector<1x8x128xbf16> to vector<8x128xbf16>
    %177 = vector.shape_cast %173 : vector<8x128xbf16> to vector<1x8x128xbf16>
    tpu.vector_store %arg4[%174, %c0_61, %c0_62], %177 {strides = array<i32>} : memref<8x8x128xbf16, #tpu.memory_space<vmem>>, vector<1x8x128xbf16>,
    %178 = arith.addf %135, %172 : vector<8x128xf32>
    %c4_i32 = arith.constant 4 : i32
    %179 = arith.index_cast %c4_i32 : i32 to index
    %c0_63 = arith.constant 0 : index
    %c0_64 = arith.constant 0 : index
    %180 = vector.load %arg2[%179, %c0_63, %c0_64] : memref<8x8x512xf32, #tpu.memory_space<vmem>>, vector<1x8x512xf32>
    %181 = vector.shape_cast %180 : vector<1x8x512xf32> to vector<8x512xf32>
    %182 = arith.truncf %172 : vector<8x128xf32> to vector<8x128xbf16>
    %cst_65 = arith.constant dense<0.000000e+00> : vector<8x512xf32>
    %183 = tpu.matmul %182, %3, %cst_65 {dimension_numbers = #tpu.dot_dimension_numbers<[1], [0], [0], [1], [0, 0, 1, 1], [], []>} : vector<8x128xbf16>, vector<128x512xbf16>, vector<8x512xf32> -> vector<8x512xf32>
    %184 = arith.addf %181, %183 : vector<8x512xf32>
    %185 = vector.extract_strided_slice %184 {offsets = [0, 0], sizes = [8, 128], strides = [1, 1]} : vector<8x512xf32> to vector<8x128xf32>
    %cst_66 = arith.constant 5.000000e-01 : f32
    %186 = vector.broadcast %cst_66 : f32 to vector<8x128xf32>
    %187 = arith.mulf %186, %185 : vector<8x128xf32>
    %188 = math.tanh %187 : vector<8x128xf32>
    %cst_67 = arith.constant 1.000000e+00 : f32
    %189 = vector.broadcast %cst_67 : f32 to vector<8x128xf32>
    %190 = arith.addf %188, %189 : vector<8x128xf32>
    %cst_68 = arith.constant 5.000000e-01 : f32
    %191 = vector.broadcast %cst_68 : f32 to vector<8x128xf32>
    %192 = arith.mulf %191, %190 : vector<8x128xf32>
    %193 = vector.extract_strided_slice %184 {offsets = [0, 128], sizes = [8, 128], strides = [1, 1]} : vector<8x512xf32> to vector<8x128xf32>
    %cst_69 = arith.constant 5.000000e-01 : f32
    %194 = vector.broadcast %cst_69 : f32 to vector<8x128xf32>
    %195 = arith.mulf %194, %193 : vector<8x128xf32>
    %196 = math.tanh %195 : vector<8x128xf32>
    %cst_70 = arith.constant 1.000000e+00 : f32
    %197 = vector.broadcast %cst_70 : f32 to vector<8x128xf32>
    %198 = arith.addf %196, %197 : vector<8x128xf32>
    %cst_71 = arith.constant 5.000000e-01 : f32
    %199 = vector.broadcast %cst_71 : f32 to vector<8x128xf32>
    %200 = arith.mulf %199, %198 : vector<8x128xf32>
    %201 = vector.extract_strided_slice %184 {offsets = [0, 256], sizes = [8, 128], strides = [1, 1]} : vector<8x512xf32> to vector<8x128xf32>
    %202 = math.tanh %201 : vector<8x128xf32>
    %203 = vector.extract_strided_slice %184 {offsets = [0, 384], sizes = [8, 128], strides = [1, 1]} : vector<8x512xf32> to vector<8x128xf32>
    %cst_72 = arith.constant 5.000000e-01 : f32
    %204 = vector.broadcast %cst_72 : f32 to vector<8x128xf32>
    %205 = arith.mulf %204, %203 : vector<8x128xf32>
    %206 = math.tanh %205 : vector<8x128xf32>
    %cst_73 = arith.constant 1.000000e+00 : f32
    %207 = vector.broadcast %cst_73 : f32 to vector<8x128xf32>
    %208 = arith.addf %206, %207 : vector<8x128xf32>
    %cst_74 = arith.constant 5.000000e-01 : f32
    %209 = vector.broadcast %cst_74 : f32 to vector<8x128xf32>
    %210 = arith.mulf %209, %208 : vector<8x128xf32>
    %211 = arith.mulf %200, %170 : vector<8x128xf32>
    %212 = arith.mulf %192, %202 : vector<8x128xf32>
    %213 = arith.addf %211, %212 : vector<8x128xf32>
    %214 = math.tanh %213 : vector<8x128xf32>
    %215 = arith.mulf %210, %214 : vector<8x128xf32>
    %216 = arith.truncf %215 : vector<8x128xf32> to vector<8x128xbf16>
    %217 = arith.index_cast %c4_i32 : i32 to index
    %c0_75 = arith.constant 0 : index
    %c0_76 = arith.constant 0 : index
    %218 = vector.load %arg4[%217, %c0_75, %c0_76] : memref<8x8x128xbf16, #tpu.memory_space<vmem>>, vector<1x8x128xbf16>
    %219 = vector.shape_cast %218 : vector<1x8x128xbf16> to vector<8x128xbf16>
    %220 = vector.shape_cast %216 : vector<8x128xbf16> to vector<1x8x128xbf16>
    tpu.vector_store %arg4[%217, %c0_75, %c0_76], %220 {strides = array<i32>} : memref<8x8x128xbf16, #tpu.memory_space<vmem>>, vector<1x8x128xbf16>,
    %221 = arith.addf %178, %215 : vector<8x128xf32>
    %c5_i32 = arith.constant 5 : i32
    %222 = arith.index_cast %c5_i32 : i32 to index
    %c0_77 = arith.constant 0 : index
    %c0_78 = arith.constant 0 : index
    %223 = vector.load %arg2[%222, %c0_77, %c0_78] : memref<8x8x512xf32, #tpu.memory_space<vmem>>, vector<1x8x512xf32>
    %224 = vector.shape_cast %223 : vector<1x8x512xf32> to vector<8x512xf32>
    %225 = arith.truncf %215 : vector<8x128xf32> to vector<8x128xbf16>
    %cst_79 = arith.constant dense<0.000000e+00> : vector<8x512xf32>
    %226 = tpu.matmul %225, %3, %cst_79 {dimension_numbers = #tpu.dot_dimension_numbers<[1], [0], [0], [1], [0, 0, 1, 1], [], []>} : vector<8x128xbf16>, vector<128x512xbf16>, vector<8x512xf32> -> vector<8x512xf32>
    %227 = arith.addf %224, %226 : vector<8x512xf32>
    %228 = vector.extract_strided_slice %227 {offsets = [0, 0], sizes = [8, 128], strides = [1, 1]} : vector<8x512xf32> to vector<8x128xf32>
    %cst_80 = arith.constant 5.000000e-01 : f32
    %229 = vector.broadcast %cst_80 : f32 to vector<8x128xf32>
    %230 = arith.mulf %229, %228 : vector<8x128xf32>
    %231 = math.tanh %230 : vector<8x128xf32>
    %cst_81 = arith.constant 1.000000e+00 : f32
    %232 = vector.broadcast %cst_81 : f32 to vector<8x128xf32>
    %233 = arith.addf %231, %232 : vector<8x128xf32>
    %cst_82 = arith.constant 5.000000e-01 : f32
    %234 = vector.broadcast %cst_82 : f32 to vector<8x128xf32>
    %235 = arith.mulf %234, %233 : vector<8x128xf32>
    %236 = vector.extract_strided_slice %227 {offsets = [0, 128], sizes = [8, 128], strides = [1, 1]} : vector<8x512xf32> to vector<8x128xf32>
    %cst_83 = arith.constant 5.000000e-01 : f32
    %237 = vector.broadcast %cst_83 : f32 to vector<8x128xf32>
    %238 = arith.mulf %237, %236 : vector<8x128xf32>
    %239 = math.tanh %238 : vector<8x128xf32>
    %cst_84 = arith.constant 1.000000e+00 : f32
    %240 = vector.broadcast %cst_84 : f32 to vector<8x128xf32>
    %241 = arith.addf %239, %240 : vector<8x128xf32>
    %cst_85 = arith.constant 5.000000e-01 : f32
    %242 = vector.broadcast %cst_85 : f32 to vector<8x128xf32>
    %243 = arith.mulf %242, %241 : vector<8x128xf32>
    %244 = vector.extract_strided_slice %227 {offsets = [0, 256], sizes = [8, 128], strides = [1, 1]} : vector<8x512xf32> to vector<8x128xf32>
    %245 = math.tanh %244 : vector<8x128xf32>
    %246 = vector.extract_strided_slice %227 {offsets = [0, 384], sizes = [8, 128], strides = [1, 1]} : vector<8x512xf32> to vector<8x128xf32>
    %cst_86 = arith.constant 5.000000e-01 : f32
    %247 = vector.broadcast %cst_86 : f32 to vector<8x128xf32>
    %248 = arith.mulf %247, %246 : vector<8x128xf32>
    %249 = math.tanh %248 : vector<8x128xf32>
    %cst_87 = arith.constant 1.000000e+00 : f32
    %250 = vector.broadcast %cst_87 : f32 to vector<8x128xf32>
    %251 = arith.addf %249, %250 : vector<8x128xf32>
    %cst_88 = arith.constant 5.000000e-01 : f32
    %252 = vector.broadcast %cst_88 : f32 to vector<8x128xf32>
    %253 = arith.mulf %252, %251 : vector<8x128xf32>
    %254 = arith.mulf %243, %213 : vector<8x128xf32>
    %255 = arith.mulf %235, %245 : vector<8x128xf32>
    %256 = arith.addf %254, %255 : vector<8x128xf32>
    %257 = math.tanh %256 : vector<8x128xf32>
    %258 = arith.mulf %253, %257 : vector<8x128xf32>
    %259 = arith.truncf %258 : vector<8x128xf32> to vector<8x128xbf16>
    %260 = arith.index_cast %c5_i32 : i32 to index
    %c0_89 = arith.constant 0 : index
    %c0_90 = arith.constant 0 : index
    %261 = vector.load %arg4[%260, %c0_89, %c0_90] : memref<8x8x128xbf16, #tpu.memory_space<vmem>>, vector<1x8x128xbf16>
    %262 = vector.shape_cast %261 : vector<1x8x128xbf16> to vector<8x128xbf16>
    %263 = vector.shape_cast %259 : vector<8x128xbf16> to vector<1x8x128xbf16>
    tpu.vector_store %arg4[%260, %c0_89, %c0_90], %263 {strides = array<i32>} : memref<8x8x128xbf16, #tpu.memory_space<vmem>>, vector<1x8x128xbf16>,
    %264 = arith.addf %221, %258 : vector<8x128xf32>
    %c6_i32 = arith.constant 6 : i32
    %265 = arith.index_cast %c6_i32 : i32 to index
    %c0_91 = arith.constant 0 : index
    %c0_92 = arith.constant 0 : index
    %266 = vector.load %arg2[%265, %c0_91, %c0_92] : memref<8x8x512xf32, #tpu.memory_space<vmem>>, vector<1x8x512xf32>
    %267 = vector.shape_cast %266 : vector<1x8x512xf32> to vector<8x512xf32>
    %268 = arith.truncf %258 : vector<8x128xf32> to vector<8x128xbf16>
    %cst_93 = arith.constant dense<0.000000e+00> : vector<8x512xf32>
    %269 = tpu.matmul %268, %3, %cst_93 {dimension_numbers = #tpu.dot_dimension_numbers<[1], [0], [0], [1], [0, 0, 1, 1], [], []>} : vector<8x128xbf16>, vector<128x512xbf16>, vector<8x512xf32> -> vector<8x512xf32>
    %270 = arith.addf %267, %269 : vector<8x512xf32>
    %271 = vector.extract_strided_slice %270 {offsets = [0, 0], sizes = [8, 128], strides = [1, 1]} : vector<8x512xf32> to vector<8x128xf32>
    %cst_94 = arith.constant 5.000000e-01 : f32
    %272 = vector.broadcast %cst_94 : f32 to vector<8x128xf32>
    %273 = arith.mulf %272, %271 : vector<8x128xf32>
    %274 = math.tanh %273 : vector<8x128xf32>
    %cst_95 = arith.constant 1.000000e+00 : f32
    %275 = vector.broadcast %cst_95 : f32 to vector<8x128xf32>
    %276 = arith.addf %274, %275 : vector<8x128xf32>
    %cst_96 = arith.constant 5.000000e-01 : f32
    %277 = vector.broadcast %cst_96 : f32 to vector<8x128xf32>
    %278 = arith.mulf %277, %276 : vector<8x128xf32>
    %279 = vector.extract_strided_slice %270 {offsets = [0, 128], sizes = [8, 128], strides = [1, 1]} : vector<8x512xf32> to vector<8x128xf32>
    %cst_97 = arith.constant 5.000000e-01 : f32
    %280 = vector.broadcast %cst_97 : f32 to vector<8x128xf32>
    %281 = arith.mulf %280, %279 : vector<8x128xf32>
    %282 = math.tanh %281 : vector<8x128xf32>
    %cst_98 = arith.constant 1.000000e+00 : f32
    %283 = vector.broadcast %cst_98 : f32 to vector<8x128xf32>
    %284 = arith.addf %282, %283 : vector<8x128xf32>
    %cst_99 = arith.constant 5.000000e-01 : f32
    %285 = vector.broadcast %cst_99 : f32 to vector<8x128xf32>
    %286 = arith.mulf %285, %284 : vector<8x128xf32>
    %287 = vector.extract_strided_slice %270 {offsets = [0, 256], sizes = [8, 128], strides = [1, 1]} : vector<8x512xf32> to vector<8x128xf32>
    %288 = math.tanh %287 : vector<8x128xf32>
    %289 = vector.extract_strided_slice %270 {offsets = [0, 384], sizes = [8, 128], strides = [1, 1]} : vector<8x512xf32> to vector<8x128xf32>
    %cst_100 = arith.constant 5.000000e-01 : f32
    %290 = vector.broadcast %cst_100 : f32 to vector<8x128xf32>
    %291 = arith.mulf %290, %289 : vector<8x128xf32>
    %292 = math.tanh %291 : vector<8x128xf32>
    %cst_101 = arith.constant 1.000000e+00 : f32
    %293 = vector.broadcast %cst_101 : f32 to vector<8x128xf32>
    %294 = arith.addf %292, %293 : vector<8x128xf32>
    %cst_102 = arith.constant 5.000000e-01 : f32
    %295 = vector.broadcast %cst_102 : f32 to vector<8x128xf32>
    %296 = arith.mulf %295, %294 : vector<8x128xf32>
    %297 = arith.mulf %286, %256 : vector<8x128xf32>
    %298 = arith.mulf %278, %288 : vector<8x128xf32>
    %299 = arith.addf %297, %298 : vector<8x128xf32>
    %300 = math.tanh %299 : vector<8x128xf32>
    %301 = arith.mulf %296, %300 : vector<8x128xf32>
    %302 = arith.truncf %301 : vector<8x128xf32> to vector<8x128xbf16>
    %303 = arith.index_cast %c6_i32 : i32 to index
    %c0_103 = arith.constant 0 : index
    %c0_104 = arith.constant 0 : index
    %304 = vector.load %arg4[%303, %c0_103, %c0_104] : memref<8x8x128xbf16, #tpu.memory_space<vmem>>, vector<1x8x128xbf16>
    %305 = vector.shape_cast %304 : vector<1x8x128xbf16> to vector<8x128xbf16>
    %306 = vector.shape_cast %302 : vector<8x128xbf16> to vector<1x8x128xbf16>
    tpu.vector_store %arg4[%303, %c0_103, %c0_104], %306 {strides = array<i32>} : memref<8x8x128xbf16, #tpu.memory_space<vmem>>, vector<1x8x128xbf16>,
    %307 = arith.addf %264, %301 : vector<8x128xf32>
    %c7_i32 = arith.constant 7 : i32
    %308 = arith.index_cast %c7_i32 : i32 to index
    %c0_105 = arith.constant 0 : index
    %c0_106 = arith.constant 0 : index
    %309 = vector.load %arg2[%308, %c0_105, %c0_106] : memref<8x8x512xf32, #tpu.memory_space<vmem>>, vector<1x8x512xf32>
    %310 = vector.shape_cast %309 : vector<1x8x512xf32> to vector<8x512xf32>
    %311 = arith.truncf %301 : vector<8x128xf32> to vector<8x128xbf16>
    %cst_107 = arith.constant dense<0.000000e+00> : vector<8x512xf32>
    %312 = tpu.matmul %311, %3, %cst_107 {dimension_numbers = #tpu.dot_dimension_numbers<[1], [0], [0], [1], [0, 0, 1, 1], [], []>} : vector<8x128xbf16>, vector<128x512xbf16>, vector<8x512xf32> -> vector<8x512xf32>
    %313 = arith.addf %310, %312 : vector<8x512xf32>
    %314 = vector.extract_strided_slice %313 {offsets = [0, 0], sizes = [8, 128], strides = [1, 1]} : vector<8x512xf32> to vector<8x128xf32>
    %cst_108 = arith.constant 5.000000e-01 : f32
    %315 = vector.broadcast %cst_108 : f32 to vector<8x128xf32>
    %316 = arith.mulf %315, %314 : vector<8x128xf32>
    %317 = math.tanh %316 : vector<8x128xf32>
    %cst_109 = arith.constant 1.000000e+00 : f32
    %318 = vector.broadcast %cst_109 : f32 to vector<8x128xf32>
    %319 = arith.addf %317, %318 : vector<8x128xf32>
    %cst_110 = arith.constant 5.000000e-01 : f32
    %320 = vector.broadcast %cst_110 : f32 to vector<8x128xf32>
    %321 = arith.mulf %320, %319 : vector<8x128xf32>
    %322 = vector.extract_strided_slice %313 {offsets = [0, 128], sizes = [8, 128], strides = [1, 1]} : vector<8x512xf32> to vector<8x128xf32>
    %cst_111 = arith.constant 5.000000e-01 : f32
    %323 = vector.broadcast %cst_111 : f32 to vector<8x128xf32>
    %324 = arith.mulf %323, %322 : vector<8x128xf32>
    %325 = math.tanh %324 : vector<8x128xf32>
    %cst_112 = arith.constant 1.000000e+00 : f32
    %326 = vector.broadcast %cst_112 : f32 to vector<8x128xf32>
    %327 = arith.addf %325, %326 : vector<8x128xf32>
    %cst_113 = arith.constant 5.000000e-01 : f32
    %328 = vector.broadcast %cst_113 : f32 to vector<8x128xf32>
    %329 = arith.mulf %328, %327 : vector<8x128xf32>
    %330 = vector.extract_strided_slice %313 {offsets = [0, 256], sizes = [8, 128], strides = [1, 1]} : vector<8x512xf32> to vector<8x128xf32>
    %331 = math.tanh %330 : vector<8x128xf32>
    %332 = vector.extract_strided_slice %313 {offsets = [0, 384], sizes = [8, 128], strides = [1, 1]} : vector<8x512xf32> to vector<8x128xf32>
    %cst_114 = arith.constant 5.000000e-01 : f32
    %333 = vector.broadcast %cst_114 : f32 to vector<8x128xf32>
    %334 = arith.mulf %333, %332 : vector<8x128xf32>
    %335 = math.tanh %334 : vector<8x128xf32>
    %cst_115 = arith.constant 1.000000e+00 : f32
    %336 = vector.broadcast %cst_115 : f32 to vector<8x128xf32>
    %337 = arith.addf %335, %336 : vector<8x128xf32>
    %cst_116 = arith.constant 5.000000e-01 : f32
    %338 = vector.broadcast %cst_116 : f32 to vector<8x128xf32>
    %339 = arith.mulf %338, %337 : vector<8x128xf32>
    %340 = arith.mulf %329, %299 : vector<8x128xf32>
    %341 = arith.mulf %321, %331 : vector<8x128xf32>
    %342 = arith.addf %340, %341 : vector<8x128xf32>
    %343 = math.tanh %342 : vector<8x128xf32>
    %344 = arith.mulf %339, %343 : vector<8x128xf32>
    %345 = arith.truncf %344 : vector<8x128xf32> to vector<8x128xbf16>
    %346 = arith.index_cast %c7_i32 : i32 to index
    %c0_117 = arith.constant 0 : index
    %c0_118 = arith.constant 0 : index
    %347 = vector.load %arg4[%346, %c0_117, %c0_118] : memref<8x8x128xbf16, #tpu.memory_space<vmem>>, vector<1x8x128xbf16>
    %348 = vector.shape_cast %347 : vector<1x8x128xbf16> to vector<8x128xbf16>
    %349 = vector.shape_cast %345 : vector<8x128xbf16> to vector<1x8x128xbf16>
    tpu.vector_store %arg4[%346, %c0_117, %c0_118], %349 {strides = array<i32>} : memref<8x8x128xbf16, #tpu.memory_space<vmem>>, vector<1x8x128xbf16>,
    %350 = arith.addf %307, %344 : vector<8x128xf32>
    %c8_i32 = arith.constant 8 : i32
    %c0_119 = arith.constant 0 : index
    %c0_120 = arith.constant 0 : index
    %351 = vector.load %arg6[%c0_119, %c0_120] : memref<8x128xf32, #tpu.memory_space<vmem>>, vector<8x128xf32>
    tpu.vector_store %arg6[%c0_119, %c0_120], %344 {strides = array<i32>} : memref<8x128xf32, #tpu.memory_space<vmem>>, vector<8x128xf32>,
    %c0_121 = arith.constant 0 : index
    %c0_122 = arith.constant 0 : index
    %352 = vector.load %arg7[%c0_121, %c0_122] : memref<8x128xf32, #tpu.memory_space<vmem>>, vector<8x128xf32>
    tpu.vector_store %arg7[%c0_121, %c0_122], %342 {strides = array<i32>} : memref<8x128xf32, #tpu.memory_space<vmem>>, vector<8x128xf32>,
    %c0_123 = arith.constant 0 : index
    %c0_124 = arith.constant 0 : index
    %353 = vector.load %arg5[%c0_123, %c0_124] : memref<8x128xf32, #tpu.memory_space<vmem>>, vector<8x128xf32>
    %cst_125 = arith.constant 6.250000e-02 : f32
    %354 = vector.broadcast %cst_125 : f32 to vector<8x128xf32>
    %355 = arith.mulf %350, %354 : vector<8x128xf32>
    %356 = arith.addf %353, %355 : vector<8x128xf32>
    %c0_126 = arith.constant 0 : index
    %c0_127 = arith.constant 0 : index
    %357 = vector.load %arg5[%c0_126, %c0_127] : memref<8x128xf32, #tpu.memory_space<vmem>>, vector<8x128xf32>
    tpu.vector_store %arg5[%c0_126, %c0_127], %356 {strides = array<i32>} : memref<8x128xf32, #tpu.memory_space<vmem>>, vector<8x128xf32>,
    return
  }
  func.func @transform_0(%arg0: i32, %arg1: i32) -> (i32, i32, i32) {
    %c0_i32 = arith.constant 0 : i32
    %c0_i32_0 = arith.constant 0 : i32
    return %arg1, %arg0, %c0_i32 : i32, i32, i32
  }
  func.func @transform_1(%arg0: i32, %arg1: i32) -> (i32, i32) {
    %c0_i32 = arith.constant 0 : i32
    %c0_i32_0 = arith.constant 0 : i32
    %c0_i32_1 = arith.constant 0 : i32
    return %c0_i32, %c0_i32_0 : i32, i32
  }
  func.func @transform_2(%arg0: i32, %arg1: i32) -> (i32, i32, i32) {
    %c0_i32 = arith.constant 0 : i32
    %c0_i32_0 = arith.constant 0 : i32
    return %arg1, %arg0, %c0_i32 : i32, i32, i32
  }
  func.func @transform_3(%arg0: i32, %arg1: i32) -> (i32, i32) {
    %c0_i32 = arith.constant 0 : i32
    %c0_i32_0 = arith.constant 0 : i32
    return %arg0, %c0_i32 : i32, i32
  }
}

module attributes {stable_mosaic.version = 11 : i64} {
  func.func @_proj_kernel(%arg0: i32, %arg1: memref<128x256xbf16, #tpu.memory_space<vmem>>, %arg2: memref<256x512xbf16, #tpu.memory_space<vmem>>, %arg3: memref<1x512xf32, #tpu.memory_space<vmem>>, %arg4: memref<128x512xf32, #tpu.memory_space<vmem>>) attributes {dimension_semantics = [#tpu.dimension_semantics<parallel>], iteration_bounds = array<i64: 1>, scalar_prefetch = 0 : i64, scratch_operands = 0 : i64, tpu.core_type = #tpu.core_type<tc>, window_params = [{transform_indices = @transform_0, window_bounds = array<i64: 128, 256>}, {pipeline_mode = #tpu.pipeline_mode<synchronous>, transform_indices = @transform_1, window_bounds = array<i64: 256, 512>}, {pipeline_mode = #tpu.pipeline_mode<synchronous>, transform_indices = @transform_2, window_bounds = array<i64: 1, 512>}, {transform_indices = @transform_3, window_bounds = array<i64: 128, 512>}]} {
    %c0 = arith.constant 0 : index
    %c0_0 = arith.constant 0 : index
    %0 = vector.load %arg1[%c0, %c0_0] : memref<128x256xbf16, #tpu.memory_space<vmem>>, vector<128x256xbf16>
    %c0_1 = arith.constant 0 : index
    %c0_2 = arith.constant 0 : index
    %1 = vector.load %arg2[%c0_1, %c0_2] : memref<256x512xbf16, #tpu.memory_space<vmem>>, vector<256x512xbf16>
    %cst = arith.constant dense<0.000000e+00> : vector<128x512xf32>
    %2 = tpu.matmul %0, %1, %cst {dimension_numbers = #tpu.dot_dimension_numbers<[1], [0], [0], [1], [0, 0, 1, 1], [], []>} : vector<128x256xbf16>, vector<256x512xbf16>, vector<128x512xf32> -> vector<128x512xf32>
    %c0_3 = arith.constant 0 : index
    %c0_4 = arith.constant 0 : index
    %3 = vector.load %arg3[%c0_3, %c0_4] : memref<1x512xf32, #tpu.memory_space<vmem>>, vector<1x512xf32>
    %4 = vector.broadcast %3 : vector<1x512xf32> to vector<128x512xf32>
    %5 = arith.addf %2, %4 : vector<128x512xf32>
    %c0_5 = arith.constant 0 : index
    %c0_6 = arith.constant 0 : index
    %6 = vector.load %arg4[%c0_5, %c0_6] : memref<128x512xf32, #tpu.memory_space<vmem>>, vector<128x512xf32>
    tpu.vector_store %arg4[%c0_5, %c0_6], %5 {strides = array<i32>} : memref<128x512xf32, #tpu.memory_space<vmem>>, vector<128x512xf32>,
    return
  }
  func.func @transform_0(%arg0: i32) -> (i32, i32) {
    %c0_i32 = arith.constant 0 : i32
    %c0_i32_0 = arith.constant 0 : i32
    return %arg0, %c0_i32 : i32, i32
  }
  func.func @transform_1(%arg0: i32) -> (i32, i32) {
    %c0_i32 = arith.constant 0 : i32
    %c0_i32_0 = arith.constant 0 : i32
    %c0_i32_1 = arith.constant 0 : i32
    return %c0_i32, %c0_i32_0 : i32, i32
  }
  func.func @transform_2(%arg0: i32) -> (i32, i32) {
    %c0_i32 = arith.constant 0 : i32
    %c0_i32_0 = arith.constant 0 : i32
    %c0_i32_1 = arith.constant 0 : i32
    return %c0_i32, %c0_i32_0 : i32, i32
  }
  func.func @transform_3(%arg0: i32) -> (i32, i32) {
    %c0_i32 = arith.constant 0 : i32
    %c0_i32_0 = arith.constant 0 : i32
    return %arg0, %c0_i32 : i32, i32
  }
}

module attributes {stable_mosaic.version = 11 : i64} {
  func.func @_lstm_dir_kernel(%arg0: i32, %arg1: i32, %arg2: memref<8x8x512xf32, #tpu.memory_space<vmem>>, %arg3: memref<128x512xbf16, #tpu.memory_space<vmem>>, %arg4: memref<8x8x128xbf16, #tpu.memory_space<vmem>>, %arg5: memref<8x128xf32, #tpu.memory_space<vmem>>, %arg6: memref<8x128xf32, #tpu.memory_space<vmem>>, %arg7: memref<8x128xf32, #tpu.memory_space<vmem>>) attributes {dimension_semantics = [#tpu.dimension_semantics<parallel>, #tpu.dimension_semantics<arbitrary>], iteration_bounds = array<i64: 1, 2>, scalar_prefetch = 0 : i64, scratch_operands = 2 : i64, tpu.core_type = #tpu.core_type<tc>, window_params = [{transform_indices = @transform_0, window_bounds = array<i64: 8, 8, 512>}, {pipeline_mode = #tpu.pipeline_mode<synchronous>, transform_indices = @transform_1, window_bounds = array<i64: 128, 512>}, {transform_indices = @transform_2, window_bounds = array<i64: 8, 8, 128>}, {transform_indices = @transform_3, window_bounds = array<i64: 8, 128>}]} {
    %c0_i32 = arith.constant 0 : i32
    %0 = arith.cmpi eq, %arg1, %c0_i32 : i32
    %1 = arith.extui %0 : i1 to i32
    %c0_i32_0 = arith.constant 0 : i32
    %2 = arith.cmpi ne, %1, %c0_i32_0 : i32
    scf.if %2 {
      %cst_136 = arith.constant 0.000000e+00 : f32
      %366 = vector.broadcast %cst_136 : f32 to vector<8x128xf32>
      %c0_137 = arith.constant 0 : index
      %c0_138 = arith.constant 0 : index
      %367 = vector.load %arg6[%c0_137, %c0_138] : memref<8x128xf32, #tpu.memory_space<vmem>>, vector<8x128xf32>
      tpu.vector_store %arg6[%c0_137, %c0_138], %366 {strides = array<i32>} : memref<8x128xf32, #tpu.memory_space<vmem>>, vector<8x128xf32>,
      %cst_139 = arith.constant 0.000000e+00 : f32
      %368 = vector.broadcast %cst_139 : f32 to vector<8x128xf32>
      %c0_140 = arith.constant 0 : index
      %c0_141 = arith.constant 0 : index
      %369 = vector.load %arg7[%c0_140, %c0_141] : memref<8x128xf32, #tpu.memory_space<vmem>>, vector<8x128xf32>
      tpu.vector_store %arg7[%c0_140, %c0_141], %368 {strides = array<i32>} : memref<8x128xf32, #tpu.memory_space<vmem>>, vector<8x128xf32>,
      %cst_142 = arith.constant 0.000000e+00 : f32
      %370 = vector.broadcast %cst_142 : f32 to vector<8x128xf32>
      %c0_143 = arith.constant 0 : index
      %c0_144 = arith.constant 0 : index
      %371 = vector.load %arg5[%c0_143, %c0_144] : memref<8x128xf32, #tpu.memory_space<vmem>>, vector<8x128xf32>
      tpu.vector_store %arg5[%c0_143, %c0_144], %370 {strides = array<i32>} : memref<8x128xf32, #tpu.memory_space<vmem>>, vector<8x128xf32>,
    } else {
    }
    %c0 = arith.constant 0 : index
    %c0_1 = arith.constant 0 : index
    %3 = vector.load %arg3[%c0, %c0_1] : memref<128x512xbf16, #tpu.memory_space<vmem>>, vector<128x512xbf16>
    %c0_2 = arith.constant 0 : index
    %c0_3 = arith.constant 0 : index
    %4 = vector.load %arg6[%c0_2, %c0_3] : memref<8x128xf32, #tpu.memory_space<vmem>>, vector<8x128xf32>
    %c0_4 = arith.constant 0 : index
    %c0_5 = arith.constant 0 : index
    %5 = vector.load %arg7[%c0_4, %c0_5] : memref<8x128xf32, #tpu.memory_space<vmem>>, vector<8x128xf32>
    %cst = arith.constant 0.000000e+00 : f32
    %6 = vector.broadcast %cst : f32 to vector<8x128xf32>
    %c0_i32_6 = arith.constant 0 : i32
    %c7_i32 = arith.constant 7 : i32
    %7 = arith.subi %c7_i32, %c0_i32_6 : i32
    %8 = arith.index_cast %7 : i32 to index
    %c0_7 = arith.constant 0 : index
    %c0_8 = arith.constant 0 : index
    %9 = vector.load %arg2[%8, %c0_7, %c0_8] : memref<8x8x512xf32, #tpu.memory_space<vmem>>, vector<1x8x512xf32>
    %10 = vector.shape_cast %9 : vector<1x8x512xf32> to vector<8x512xf32>
    %11 = arith.truncf %4 : vector<8x128xf32> to vector<8x128xbf16>
    %cst_9 = arith.constant dense<0.000000e+00> : vector<8x512xf32>
    %12 = tpu.matmul %11, %3, %cst_9 {dimension_numbers = #tpu.dot_dimension_numbers<[1], [0], [0], [1], [0, 0, 1, 1], [], []>} : vector<8x128xbf16>, vector<128x512xbf16>, vector<8x512xf32> -> vector<8x512xf32>
    %13 = arith.addf %10, %12 : vector<8x512xf32>
    %14 = vector.extract_strided_slice %13 {offsets = [0, 0], sizes = [8, 128], strides = [1, 1]} : vector<8x512xf32> to vector<8x128xf32>
    %cst_10 = arith.constant 5.000000e-01 : f32
    %15 = vector.broadcast %cst_10 : f32 to vector<8x128xf32>
    %16 = arith.mulf %15, %14 : vector<8x128xf32>
    %17 = math.tanh %16 : vector<8x128xf32>
    %cst_11 = arith.constant 1.000000e+00 : f32
    %18 = vector.broadcast %cst_11 : f32 to vector<8x128xf32>
    %19 = arith.addf %17, %18 : vector<8x128xf32>
    %cst_12 = arith.constant 5.000000e-01 : f32
    %20 = vector.broadcast %cst_12 : f32 to vector<8x128xf32>
    %21 = arith.mulf %20, %19 : vector<8x128xf32>
    %22 = vector.extract_strided_slice %13 {offsets = [0, 128], sizes = [8, 128], strides = [1, 1]} : vector<8x512xf32> to vector<8x128xf32>
    %cst_13 = arith.constant 5.000000e-01 : f32
    %23 = vector.broadcast %cst_13 : f32 to vector<8x128xf32>
    %24 = arith.mulf %23, %22 : vector<8x128xf32>
    %25 = math.tanh %24 : vector<8x128xf32>
    %cst_14 = arith.constant 1.000000e+00 : f32
    %26 = vector.broadcast %cst_14 : f32 to vector<8x128xf32>
    %27 = arith.addf %25, %26 : vector<8x128xf32>
    %cst_15 = arith.constant 5.000000e-01 : f32
    %28 = vector.broadcast %cst_15 : f32 to vector<8x128xf32>
    %29 = arith.mulf %28, %27 : vector<8x128xf32>
    %30 = vector.extract_strided_slice %13 {offsets = [0, 256], sizes = [8, 128], strides = [1, 1]} : vector<8x512xf32> to vector<8x128xf32>
    %31 = math.tanh %30 : vector<8x128xf32>
    %32 = vector.extract_strided_slice %13 {offsets = [0, 384], sizes = [8, 128], strides = [1, 1]} : vector<8x512xf32> to vector<8x128xf32>
    %cst_16 = arith.constant 5.000000e-01 : f32
    %33 = vector.broadcast %cst_16 : f32 to vector<8x128xf32>
    %34 = arith.mulf %33, %32 : vector<8x128xf32>
    %35 = math.tanh %34 : vector<8x128xf32>
    %cst_17 = arith.constant 1.000000e+00 : f32
    %36 = vector.broadcast %cst_17 : f32 to vector<8x128xf32>
    %37 = arith.addf %35, %36 : vector<8x128xf32>
    %cst_18 = arith.constant 5.000000e-01 : f32
    %38 = vector.broadcast %cst_18 : f32 to vector<8x128xf32>
    %39 = arith.mulf %38, %37 : vector<8x128xf32>
    %40 = arith.mulf %29, %5 : vector<8x128xf32>
    %41 = arith.mulf %21, %31 : vector<8x128xf32>
    %42 = arith.addf %40, %41 : vector<8x128xf32>
    %43 = math.tanh %42 : vector<8x128xf32>
    %44 = arith.mulf %39, %43 : vector<8x128xf32>
    %45 = arith.truncf %44 : vector<8x128xf32> to vector<8x128xbf16>
    %46 = arith.index_cast %7 : i32 to index
    %c0_19 = arith.constant 0 : index
    %c0_20 = arith.constant 0 : index
    %47 = vector.load %arg4[%46, %c0_19, %c0_20] : memref<8x8x128xbf16, #tpu.memory_space<vmem>>, vector<1x8x128xbf16>
    %48 = vector.shape_cast %47 : vector<1x8x128xbf16> to vector<8x128xbf16>
    %49 = vector.shape_cast %45 : vector<8x128xbf16> to vector<1x8x128xbf16>
    tpu.vector_store %arg4[%46, %c0_19, %c0_20], %49 {strides = array<i32>} : memref<8x8x128xbf16, #tpu.memory_space<vmem>>, vector<1x8x128xbf16>,
    %50 = arith.addf %6, %44 : vector<8x128xf32>
    %c1_i32 = arith.constant 1 : i32
    %c7_i32_21 = arith.constant 7 : i32
    %51 = arith.subi %c7_i32_21, %c1_i32 : i32
    %52 = arith.index_cast %51 : i32 to index
    %c0_22 = arith.constant 0 : index
    %c0_23 = arith.constant 0 : index
    %53 = vector.load %arg2[%52, %c0_22, %c0_23] : memref<8x8x512xf32, #tpu.memory_space<vmem>>, vector<1x8x512xf32>
    %54 = vector.shape_cast %53 : vector<1x8x512xf32> to vector<8x512xf32>
    %55 = arith.truncf %44 : vector<8x128xf32> to vector<8x128xbf16>
    %cst_24 = arith.constant dense<0.000000e+00> : vector<8x512xf32>
    %56 = tpu.matmul %55, %3, %cst_24 {dimension_numbers = #tpu.dot_dimension_numbers<[1], [0], [0], [1], [0, 0, 1, 1], [], []>} : vector<8x128xbf16>, vector<128x512xbf16>, vector<8x512xf32> -> vector<8x512xf32>
    %57 = arith.addf %54, %56 : vector<8x512xf32>
    %58 = vector.extract_strided_slice %57 {offsets = [0, 0], sizes = [8, 128], strides = [1, 1]} : vector<8x512xf32> to vector<8x128xf32>
    %cst_25 = arith.constant 5.000000e-01 : f32
    %59 = vector.broadcast %cst_25 : f32 to vector<8x128xf32>
    %60 = arith.mulf %59, %58 : vector<8x128xf32>
    %61 = math.tanh %60 : vector<8x128xf32>
    %cst_26 = arith.constant 1.000000e+00 : f32
    %62 = vector.broadcast %cst_26 : f32 to vector<8x128xf32>
    %63 = arith.addf %61, %62 : vector<8x128xf32>
    %cst_27 = arith.constant 5.000000e-01 : f32
    %64 = vector.broadcast %cst_27 : f32 to vector<8x128xf32>
    %65 = arith.mulf %64, %63 : vector<8x128xf32>
    %66 = vector.extract_strided_slice %57 {offsets = [0, 128], sizes = [8, 128], strides = [1, 1]} : vector<8x512xf32> to vector<8x128xf32>
    %cst_28 = arith.constant 5.000000e-01 : f32
    %67 = vector.broadcast %cst_28 : f32 to vector<8x128xf32>
    %68 = arith.mulf %67, %66 : vector<8x128xf32>
    %69 = math.tanh %68 : vector<8x128xf32>
    %cst_29 = arith.constant 1.000000e+00 : f32
    %70 = vector.broadcast %cst_29 : f32 to vector<8x128xf32>
    %71 = arith.addf %69, %70 : vector<8x128xf32>
    %cst_30 = arith.constant 5.000000e-01 : f32
    %72 = vector.broadcast %cst_30 : f32 to vector<8x128xf32>
    %73 = arith.mulf %72, %71 : vector<8x128xf32>
    %74 = vector.extract_strided_slice %57 {offsets = [0, 256], sizes = [8, 128], strides = [1, 1]} : vector<8x512xf32> to vector<8x128xf32>
    %75 = math.tanh %74 : vector<8x128xf32>
    %76 = vector.extract_strided_slice %57 {offsets = [0, 384], sizes = [8, 128], strides = [1, 1]} : vector<8x512xf32> to vector<8x128xf32>
    %cst_31 = arith.constant 5.000000e-01 : f32
    %77 = vector.broadcast %cst_31 : f32 to vector<8x128xf32>
    %78 = arith.mulf %77, %76 : vector<8x128xf32>
    %79 = math.tanh %78 : vector<8x128xf32>
    %cst_32 = arith.constant 1.000000e+00 : f32
    %80 = vector.broadcast %cst_32 : f32 to vector<8x128xf32>
    %81 = arith.addf %79, %80 : vector<8x128xf32>
    %cst_33 = arith.constant 5.000000e-01 : f32
    %82 = vector.broadcast %cst_33 : f32 to vector<8x128xf32>
    %83 = arith.mulf %82, %81 : vector<8x128xf32>
    %84 = arith.mulf %73, %42 : vector<8x128xf32>
    %85 = arith.mulf %65, %75 : vector<8x128xf32>
    %86 = arith.addf %84, %85 : vector<8x128xf32>
    %87 = math.tanh %86 : vector<8x128xf32>
    %88 = arith.mulf %83, %87 : vector<8x128xf32>
    %89 = arith.truncf %88 : vector<8x128xf32> to vector<8x128xbf16>
    %90 = arith.index_cast %51 : i32 to index
    %c0_34 = arith.constant 0 : index
    %c0_35 = arith.constant 0 : index
    %91 = vector.load %arg4[%90, %c0_34, %c0_35] : memref<8x8x128xbf16, #tpu.memory_space<vmem>>, vector<1x8x128xbf16>
    %92 = vector.shape_cast %91 : vector<1x8x128xbf16> to vector<8x128xbf16>
    %93 = vector.shape_cast %89 : vector<8x128xbf16> to vector<1x8x128xbf16>
    tpu.vector_store %arg4[%90, %c0_34, %c0_35], %93 {strides = array<i32>} : memref<8x8x128xbf16, #tpu.memory_space<vmem>>, vector<1x8x128xbf16>,
    %94 = arith.addf %50, %88 : vector<8x128xf32>
    %c2_i32 = arith.constant 2 : i32
    %c7_i32_36 = arith.constant 7 : i32
    %95 = arith.subi %c7_i32_36, %c2_i32 : i32
    %96 = arith.index_cast %95 : i32 to index
    %c0_37 = arith.constant 0 : index
    %c0_38 = arith.constant 0 : index
    %97 = vector.load %arg2[%96, %c0_37, %c0_38] : memref<8x8x512xf32, #tpu.memory_space<vmem>>, vector<1x8x512xf32>
    %98 = vector.shape_cast %97 : vector<1x8x512xf32> to vector<8x512xf32>
    %99 = arith.truncf %88 : vector<8x128xf32> to vector<8x128xbf16>
    %cst_39 = arith.constant dense<0.000000e+00> : vector<8x512xf32>
    %100 = tpu.matmul %99, %3, %cst_39 {dimension_numbers = #tpu.dot_dimension_numbers<[1], [0], [0], [1], [0, 0, 1, 1], [], []>} : vector<8x128xbf16>, vector<128x512xbf16>, vector<8x512xf32> -> vector<8x512xf32>
    %101 = arith.addf %98, %100 : vector<8x512xf32>
    %102 = vector.extract_strided_slice %101 {offsets = [0, 0], sizes = [8, 128], strides = [1, 1]} : vector<8x512xf32> to vector<8x128xf32>
    %cst_40 = arith.constant 5.000000e-01 : f32
    %103 = vector.broadcast %cst_40 : f32 to vector<8x128xf32>
    %104 = arith.mulf %103, %102 : vector<8x128xf32>
    %105 = math.tanh %104 : vector<8x128xf32>
    %cst_41 = arith.constant 1.000000e+00 : f32
    %106 = vector.broadcast %cst_41 : f32 to vector<8x128xf32>
    %107 = arith.addf %105, %106 : vector<8x128xf32>
    %cst_42 = arith.constant 5.000000e-01 : f32
    %108 = vector.broadcast %cst_42 : f32 to vector<8x128xf32>
    %109 = arith.mulf %108, %107 : vector<8x128xf32>
    %110 = vector.extract_strided_slice %101 {offsets = [0, 128], sizes = [8, 128], strides = [1, 1]} : vector<8x512xf32> to vector<8x128xf32>
    %cst_43 = arith.constant 5.000000e-01 : f32
    %111 = vector.broadcast %cst_43 : f32 to vector<8x128xf32>
    %112 = arith.mulf %111, %110 : vector<8x128xf32>
    %113 = math.tanh %112 : vector<8x128xf32>
    %cst_44 = arith.constant 1.000000e+00 : f32
    %114 = vector.broadcast %cst_44 : f32 to vector<8x128xf32>
    %115 = arith.addf %113, %114 : vector<8x128xf32>
    %cst_45 = arith.constant 5.000000e-01 : f32
    %116 = vector.broadcast %cst_45 : f32 to vector<8x128xf32>
    %117 = arith.mulf %116, %115 : vector<8x128xf32>
    %118 = vector.extract_strided_slice %101 {offsets = [0, 256], sizes = [8, 128], strides = [1, 1]} : vector<8x512xf32> to vector<8x128xf32>
    %119 = math.tanh %118 : vector<8x128xf32>
    %120 = vector.extract_strided_slice %101 {offsets = [0, 384], sizes = [8, 128], strides = [1, 1]} : vector<8x512xf32> to vector<8x128xf32>
    %cst_46 = arith.constant 5.000000e-01 : f32
    %121 = vector.broadcast %cst_46 : f32 to vector<8x128xf32>
    %122 = arith.mulf %121, %120 : vector<8x128xf32>
    %123 = math.tanh %122 : vector<8x128xf32>
    %cst_47 = arith.constant 1.000000e+00 : f32
    %124 = vector.broadcast %cst_47 : f32 to vector<8x128xf32>
    %125 = arith.addf %123, %124 : vector<8x128xf32>
    %cst_48 = arith.constant 5.000000e-01 : f32
    %126 = vector.broadcast %cst_48 : f32 to vector<8x128xf32>
    %127 = arith.mulf %126, %125 : vector<8x128xf32>
    %128 = arith.mulf %117, %86 : vector<8x128xf32>
    %129 = arith.mulf %109, %119 : vector<8x128xf32>
    %130 = arith.addf %128, %129 : vector<8x128xf32>
    %131 = math.tanh %130 : vector<8x128xf32>
    %132 = arith.mulf %127, %131 : vector<8x128xf32>
    %133 = arith.truncf %132 : vector<8x128xf32> to vector<8x128xbf16>
    %134 = arith.index_cast %95 : i32 to index
    %c0_49 = arith.constant 0 : index
    %c0_50 = arith.constant 0 : index
    %135 = vector.load %arg4[%134, %c0_49, %c0_50] : memref<8x8x128xbf16, #tpu.memory_space<vmem>>, vector<1x8x128xbf16>
    %136 = vector.shape_cast %135 : vector<1x8x128xbf16> to vector<8x128xbf16>
    %137 = vector.shape_cast %133 : vector<8x128xbf16> to vector<1x8x128xbf16>
    tpu.vector_store %arg4[%134, %c0_49, %c0_50], %137 {strides = array<i32>} : memref<8x8x128xbf16, #tpu.memory_space<vmem>>, vector<1x8x128xbf16>,
    %138 = arith.addf %94, %132 : vector<8x128xf32>
    %c3_i32 = arith.constant 3 : i32
    %c7_i32_51 = arith.constant 7 : i32
    %139 = arith.subi %c7_i32_51, %c3_i32 : i32
    %140 = arith.index_cast %139 : i32 to index
    %c0_52 = arith.constant 0 : index
    %c0_53 = arith.constant 0 : index
    %141 = vector.load %arg2[%140, %c0_52, %c0_53] : memref<8x8x512xf32, #tpu.memory_space<vmem>>, vector<1x8x512xf32>
    %142 = vector.shape_cast %141 : vector<1x8x512xf32> to vector<8x512xf32>
    %143 = arith.truncf %132 : vector<8x128xf32> to vector<8x128xbf16>
    %cst_54 = arith.constant dense<0.000000e+00> : vector<8x512xf32>
    %144 = tpu.matmul %143, %3, %cst_54 {dimension_numbers = #tpu.dot_dimension_numbers<[1], [0], [0], [1], [0, 0, 1, 1], [], []>} : vector<8x128xbf16>, vector<128x512xbf16>, vector<8x512xf32> -> vector<8x512xf32>
    %145 = arith.addf %142, %144 : vector<8x512xf32>
    %146 = vector.extract_strided_slice %145 {offsets = [0, 0], sizes = [8, 128], strides = [1, 1]} : vector<8x512xf32> to vector<8x128xf32>
    %cst_55 = arith.constant 5.000000e-01 : f32
    %147 = vector.broadcast %cst_55 : f32 to vector<8x128xf32>
    %148 = arith.mulf %147, %146 : vector<8x128xf32>
    %149 = math.tanh %148 : vector<8x128xf32>
    %cst_56 = arith.constant 1.000000e+00 : f32
    %150 = vector.broadcast %cst_56 : f32 to vector<8x128xf32>
    %151 = arith.addf %149, %150 : vector<8x128xf32>
    %cst_57 = arith.constant 5.000000e-01 : f32
    %152 = vector.broadcast %cst_57 : f32 to vector<8x128xf32>
    %153 = arith.mulf %152, %151 : vector<8x128xf32>
    %154 = vector.extract_strided_slice %145 {offsets = [0, 128], sizes = [8, 128], strides = [1, 1]} : vector<8x512xf32> to vector<8x128xf32>
    %cst_58 = arith.constant 5.000000e-01 : f32
    %155 = vector.broadcast %cst_58 : f32 to vector<8x128xf32>
    %156 = arith.mulf %155, %154 : vector<8x128xf32>
    %157 = math.tanh %156 : vector<8x128xf32>
    %cst_59 = arith.constant 1.000000e+00 : f32
    %158 = vector.broadcast %cst_59 : f32 to vector<8x128xf32>
    %159 = arith.addf %157, %158 : vector<8x128xf32>
    %cst_60 = arith.constant 5.000000e-01 : f32
    %160 = vector.broadcast %cst_60 : f32 to vector<8x128xf32>
    %161 = arith.mulf %160, %159 : vector<8x128xf32>
    %162 = vector.extract_strided_slice %145 {offsets = [0, 256], sizes = [8, 128], strides = [1, 1]} : vector<8x512xf32> to vector<8x128xf32>
    %163 = math.tanh %162 : vector<8x128xf32>
    %164 = vector.extract_strided_slice %145 {offsets = [0, 384], sizes = [8, 128], strides = [1, 1]} : vector<8x512xf32> to vector<8x128xf32>
    %cst_61 = arith.constant 5.000000e-01 : f32
    %165 = vector.broadcast %cst_61 : f32 to vector<8x128xf32>
    %166 = arith.mulf %165, %164 : vector<8x128xf32>
    %167 = math.tanh %166 : vector<8x128xf32>
    %cst_62 = arith.constant 1.000000e+00 : f32
    %168 = vector.broadcast %cst_62 : f32 to vector<8x128xf32>
    %169 = arith.addf %167, %168 : vector<8x128xf32>
    %cst_63 = arith.constant 5.000000e-01 : f32
    %170 = vector.broadcast %cst_63 : f32 to vector<8x128xf32>
    %171 = arith.mulf %170, %169 : vector<8x128xf32>
    %172 = arith.mulf %161, %130 : vector<8x128xf32>
    %173 = arith.mulf %153, %163 : vector<8x128xf32>
    %174 = arith.addf %172, %173 : vector<8x128xf32>
    %175 = math.tanh %174 : vector<8x128xf32>
    %176 = arith.mulf %171, %175 : vector<8x128xf32>
    %177 = arith.truncf %176 : vector<8x128xf32> to vector<8x128xbf16>
    %178 = arith.index_cast %139 : i32 to index
    %c0_64 = arith.constant 0 : index
    %c0_65 = arith.constant 0 : index
    %179 = vector.load %arg4[%178, %c0_64, %c0_65] : memref<8x8x128xbf16, #tpu.memory_space<vmem>>, vector<1x8x128xbf16>
    %180 = vector.shape_cast %179 : vector<1x8x128xbf16> to vector<8x128xbf16>
    %181 = vector.shape_cast %177 : vector<8x128xbf16> to vector<1x8x128xbf16>
    tpu.vector_store %arg4[%178, %c0_64, %c0_65], %181 {strides = array<i32>} : memref<8x8x128xbf16, #tpu.memory_space<vmem>>, vector<1x8x128xbf16>,
    %182 = arith.addf %138, %176 : vector<8x128xf32>
    %c4_i32 = arith.constant 4 : i32
    %c7_i32_66 = arith.constant 7 : i32
    %183 = arith.subi %c7_i32_66, %c4_i32 : i32
    %184 = arith.index_cast %183 : i32 to index
    %c0_67 = arith.constant 0 : index
    %c0_68 = arith.constant 0 : index
    %185 = vector.load %arg2[%184, %c0_67, %c0_68] : memref<8x8x512xf32, #tpu.memory_space<vmem>>, vector<1x8x512xf32>
    %186 = vector.shape_cast %185 : vector<1x8x512xf32> to vector<8x512xf32>
    %187 = arith.truncf %176 : vector<8x128xf32> to vector<8x128xbf16>
    %cst_69 = arith.constant dense<0.000000e+00> : vector<8x512xf32>
    %188 = tpu.matmul %187, %3, %cst_69 {dimension_numbers = #tpu.dot_dimension_numbers<[1], [0], [0], [1], [0, 0, 1, 1], [], []>} : vector<8x128xbf16>, vector<128x512xbf16>, vector<8x512xf32> -> vector<8x512xf32>
    %189 = arith.addf %186, %188 : vector<8x512xf32>
    %190 = vector.extract_strided_slice %189 {offsets = [0, 0], sizes = [8, 128], strides = [1, 1]} : vector<8x512xf32> to vector<8x128xf32>
    %cst_70 = arith.constant 5.000000e-01 : f32
    %191 = vector.broadcast %cst_70 : f32 to vector<8x128xf32>
    %192 = arith.mulf %191, %190 : vector<8x128xf32>
    %193 = math.tanh %192 : vector<8x128xf32>
    %cst_71 = arith.constant 1.000000e+00 : f32
    %194 = vector.broadcast %cst_71 : f32 to vector<8x128xf32>
    %195 = arith.addf %193, %194 : vector<8x128xf32>
    %cst_72 = arith.constant 5.000000e-01 : f32
    %196 = vector.broadcast %cst_72 : f32 to vector<8x128xf32>
    %197 = arith.mulf %196, %195 : vector<8x128xf32>
    %198 = vector.extract_strided_slice %189 {offsets = [0, 128], sizes = [8, 128], strides = [1, 1]} : vector<8x512xf32> to vector<8x128xf32>
    %cst_73 = arith.constant 5.000000e-01 : f32
    %199 = vector.broadcast %cst_73 : f32 to vector<8x128xf32>
    %200 = arith.mulf %199, %198 : vector<8x128xf32>
    %201 = math.tanh %200 : vector<8x128xf32>
    %cst_74 = arith.constant 1.000000e+00 : f32
    %202 = vector.broadcast %cst_74 : f32 to vector<8x128xf32>
    %203 = arith.addf %201, %202 : vector<8x128xf32>
    %cst_75 = arith.constant 5.000000e-01 : f32
    %204 = vector.broadcast %cst_75 : f32 to vector<8x128xf32>
    %205 = arith.mulf %204, %203 : vector<8x128xf32>
    %206 = vector.extract_strided_slice %189 {offsets = [0, 256], sizes = [8, 128], strides = [1, 1]} : vector<8x512xf32> to vector<8x128xf32>
    %207 = math.tanh %206 : vector<8x128xf32>
    %208 = vector.extract_strided_slice %189 {offsets = [0, 384], sizes = [8, 128], strides = [1, 1]} : vector<8x512xf32> to vector<8x128xf32>
    %cst_76 = arith.constant 5.000000e-01 : f32
    %209 = vector.broadcast %cst_76 : f32 to vector<8x128xf32>
    %210 = arith.mulf %209, %208 : vector<8x128xf32>
    %211 = math.tanh %210 : vector<8x128xf32>
    %cst_77 = arith.constant 1.000000e+00 : f32
    %212 = vector.broadcast %cst_77 : f32 to vector<8x128xf32>
    %213 = arith.addf %211, %212 : vector<8x128xf32>
    %cst_78 = arith.constant 5.000000e-01 : f32
    %214 = vector.broadcast %cst_78 : f32 to vector<8x128xf32>
    %215 = arith.mulf %214, %213 : vector<8x128xf32>
    %216 = arith.mulf %205, %174 : vector<8x128xf32>
    %217 = arith.mulf %197, %207 : vector<8x128xf32>
    %218 = arith.addf %216, %217 : vector<8x128xf32>
    %219 = math.tanh %218 : vector<8x128xf32>
    %220 = arith.mulf %215, %219 : vector<8x128xf32>
    %221 = arith.truncf %220 : vector<8x128xf32> to vector<8x128xbf16>
    %222 = arith.index_cast %183 : i32 to index
    %c0_79 = arith.constant 0 : index
    %c0_80 = arith.constant 0 : index
    %223 = vector.load %arg4[%222, %c0_79, %c0_80] : memref<8x8x128xbf16, #tpu.memory_space<vmem>>, vector<1x8x128xbf16>
    %224 = vector.shape_cast %223 : vector<1x8x128xbf16> to vector<8x128xbf16>
    %225 = vector.shape_cast %221 : vector<8x128xbf16> to vector<1x8x128xbf16>
    tpu.vector_store %arg4[%222, %c0_79, %c0_80], %225 {strides = array<i32>} : memref<8x8x128xbf16, #tpu.memory_space<vmem>>, vector<1x8x128xbf16>,
    %226 = arith.addf %182, %220 : vector<8x128xf32>
    %c5_i32 = arith.constant 5 : i32
    %c7_i32_81 = arith.constant 7 : i32
    %227 = arith.subi %c7_i32_81, %c5_i32 : i32
    %228 = arith.index_cast %227 : i32 to index
    %c0_82 = arith.constant 0 : index
    %c0_83 = arith.constant 0 : index
    %229 = vector.load %arg2[%228, %c0_82, %c0_83] : memref<8x8x512xf32, #tpu.memory_space<vmem>>, vector<1x8x512xf32>
    %230 = vector.shape_cast %229 : vector<1x8x512xf32> to vector<8x512xf32>
    %231 = arith.truncf %220 : vector<8x128xf32> to vector<8x128xbf16>
    %cst_84 = arith.constant dense<0.000000e+00> : vector<8x512xf32>
    %232 = tpu.matmul %231, %3, %cst_84 {dimension_numbers = #tpu.dot_dimension_numbers<[1], [0], [0], [1], [0, 0, 1, 1], [], []>} : vector<8x128xbf16>, vector<128x512xbf16>, vector<8x512xf32> -> vector<8x512xf32>
    %233 = arith.addf %230, %232 : vector<8x512xf32>
    %234 = vector.extract_strided_slice %233 {offsets = [0, 0], sizes = [8, 128], strides = [1, 1]} : vector<8x512xf32> to vector<8x128xf32>
    %cst_85 = arith.constant 5.000000e-01 : f32
    %235 = vector.broadcast %cst_85 : f32 to vector<8x128xf32>
    %236 = arith.mulf %235, %234 : vector<8x128xf32>
    %237 = math.tanh %236 : vector<8x128xf32>
    %cst_86 = arith.constant 1.000000e+00 : f32
    %238 = vector.broadcast %cst_86 : f32 to vector<8x128xf32>
    %239 = arith.addf %237, %238 : vector<8x128xf32>
    %cst_87 = arith.constant 5.000000e-01 : f32
    %240 = vector.broadcast %cst_87 : f32 to vector<8x128xf32>
    %241 = arith.mulf %240, %239 : vector<8x128xf32>
    %242 = vector.extract_strided_slice %233 {offsets = [0, 128], sizes = [8, 128], strides = [1, 1]} : vector<8x512xf32> to vector<8x128xf32>
    %cst_88 = arith.constant 5.000000e-01 : f32
    %243 = vector.broadcast %cst_88 : f32 to vector<8x128xf32>
    %244 = arith.mulf %243, %242 : vector<8x128xf32>
    %245 = math.tanh %244 : vector<8x128xf32>
    %cst_89 = arith.constant 1.000000e+00 : f32
    %246 = vector.broadcast %cst_89 : f32 to vector<8x128xf32>
    %247 = arith.addf %245, %246 : vector<8x128xf32>
    %cst_90 = arith.constant 5.000000e-01 : f32
    %248 = vector.broadcast %cst_90 : f32 to vector<8x128xf32>
    %249 = arith.mulf %248, %247 : vector<8x128xf32>
    %250 = vector.extract_strided_slice %233 {offsets = [0, 256], sizes = [8, 128], strides = [1, 1]} : vector<8x512xf32> to vector<8x128xf32>
    %251 = math.tanh %250 : vector<8x128xf32>
    %252 = vector.extract_strided_slice %233 {offsets = [0, 384], sizes = [8, 128], strides = [1, 1]} : vector<8x512xf32> to vector<8x128xf32>
    %cst_91 = arith.constant 5.000000e-01 : f32
    %253 = vector.broadcast %cst_91 : f32 to vector<8x128xf32>
    %254 = arith.mulf %253, %252 : vector<8x128xf32>
    %255 = math.tanh %254 : vector<8x128xf32>
    %cst_92 = arith.constant 1.000000e+00 : f32
    %256 = vector.broadcast %cst_92 : f32 to vector<8x128xf32>
    %257 = arith.addf %255, %256 : vector<8x128xf32>
    %cst_93 = arith.constant 5.000000e-01 : f32
    %258 = vector.broadcast %cst_93 : f32 to vector<8x128xf32>
    %259 = arith.mulf %258, %257 : vector<8x128xf32>
    %260 = arith.mulf %249, %218 : vector<8x128xf32>
    %261 = arith.mulf %241, %251 : vector<8x128xf32>
    %262 = arith.addf %260, %261 : vector<8x128xf32>
    %263 = math.tanh %262 : vector<8x128xf32>
    %264 = arith.mulf %259, %263 : vector<8x128xf32>
    %265 = arith.truncf %264 : vector<8x128xf32> to vector<8x128xbf16>
    %266 = arith.index_cast %227 : i32 to index
    %c0_94 = arith.constant 0 : index
    %c0_95 = arith.constant 0 : index
    %267 = vector.load %arg4[%266, %c0_94, %c0_95] : memref<8x8x128xbf16, #tpu.memory_space<vmem>>, vector<1x8x128xbf16>
    %268 = vector.shape_cast %267 : vector<1x8x128xbf16> to vector<8x128xbf16>
    %269 = vector.shape_cast %265 : vector<8x128xbf16> to vector<1x8x128xbf16>
    tpu.vector_store %arg4[%266, %c0_94, %c0_95], %269 {strides = array<i32>} : memref<8x8x128xbf16, #tpu.memory_space<vmem>>, vector<1x8x128xbf16>,
    %270 = arith.addf %226, %264 : vector<8x128xf32>
    %c6_i32 = arith.constant 6 : i32
    %c7_i32_96 = arith.constant 7 : i32
    %271 = arith.subi %c7_i32_96, %c6_i32 : i32
    %272 = arith.index_cast %271 : i32 to index
    %c0_97 = arith.constant 0 : index
    %c0_98 = arith.constant 0 : index
    %273 = vector.load %arg2[%272, %c0_97, %c0_98] : memref<8x8x512xf32, #tpu.memory_space<vmem>>, vector<1x8x512xf32>
    %274 = vector.shape_cast %273 : vector<1x8x512xf32> to vector<8x512xf32>
    %275 = arith.truncf %264 : vector<8x128xf32> to vector<8x128xbf16>
    %cst_99 = arith.constant dense<0.000000e+00> : vector<8x512xf32>
    %276 = tpu.matmul %275, %3, %cst_99 {dimension_numbers = #tpu.dot_dimension_numbers<[1], [0], [0], [1], [0, 0, 1, 1], [], []>} : vector<8x128xbf16>, vector<128x512xbf16>, vector<8x512xf32> -> vector<8x512xf32>
    %277 = arith.addf %274, %276 : vector<8x512xf32>
    %278 = vector.extract_strided_slice %277 {offsets = [0, 0], sizes = [8, 128], strides = [1, 1]} : vector<8x512xf32> to vector<8x128xf32>
    %cst_100 = arith.constant 5.000000e-01 : f32
    %279 = vector.broadcast %cst_100 : f32 to vector<8x128xf32>
    %280 = arith.mulf %279, %278 : vector<8x128xf32>
    %281 = math.tanh %280 : vector<8x128xf32>
    %cst_101 = arith.constant 1.000000e+00 : f32
    %282 = vector.broadcast %cst_101 : f32 to vector<8x128xf32>
    %283 = arith.addf %281, %282 : vector<8x128xf32>
    %cst_102 = arith.constant 5.000000e-01 : f32
    %284 = vector.broadcast %cst_102 : f32 to vector<8x128xf32>
    %285 = arith.mulf %284, %283 : vector<8x128xf32>
    %286 = vector.extract_strided_slice %277 {offsets = [0, 128], sizes = [8, 128], strides = [1, 1]} : vector<8x512xf32> to vector<8x128xf32>
    %cst_103 = arith.constant 5.000000e-01 : f32
    %287 = vector.broadcast %cst_103 : f32 to vector<8x128xf32>
    %288 = arith.mulf %287, %286 : vector<8x128xf32>
    %289 = math.tanh %288 : vector<8x128xf32>
    %cst_104 = arith.constant 1.000000e+00 : f32
    %290 = vector.broadcast %cst_104 : f32 to vector<8x128xf32>
    %291 = arith.addf %289, %290 : vector<8x128xf32>
    %cst_105 = arith.constant 5.000000e-01 : f32
    %292 = vector.broadcast %cst_105 : f32 to vector<8x128xf32>
    %293 = arith.mulf %292, %291 : vector<8x128xf32>
    %294 = vector.extract_strided_slice %277 {offsets = [0, 256], sizes = [8, 128], strides = [1, 1]} : vector<8x512xf32> to vector<8x128xf32>
    %295 = math.tanh %294 : vector<8x128xf32>
    %296 = vector.extract_strided_slice %277 {offsets = [0, 384], sizes = [8, 128], strides = [1, 1]} : vector<8x512xf32> to vector<8x128xf32>
    %cst_106 = arith.constant 5.000000e-01 : f32
    %297 = vector.broadcast %cst_106 : f32 to vector<8x128xf32>
    %298 = arith.mulf %297, %296 : vector<8x128xf32>
    %299 = math.tanh %298 : vector<8x128xf32>
    %cst_107 = arith.constant 1.000000e+00 : f32
    %300 = vector.broadcast %cst_107 : f32 to vector<8x128xf32>
    %301 = arith.addf %299, %300 : vector<8x128xf32>
    %cst_108 = arith.constant 5.000000e-01 : f32
    %302 = vector.broadcast %cst_108 : f32 to vector<8x128xf32>
    %303 = arith.mulf %302, %301 : vector<8x128xf32>
    %304 = arith.mulf %293, %262 : vector<8x128xf32>
    %305 = arith.mulf %285, %295 : vector<8x128xf32>
    %306 = arith.addf %304, %305 : vector<8x128xf32>
    %307 = math.tanh %306 : vector<8x128xf32>
    %308 = arith.mulf %303, %307 : vector<8x128xf32>
    %309 = arith.truncf %308 : vector<8x128xf32> to vector<8x128xbf16>
    %310 = arith.index_cast %271 : i32 to index
    %c0_109 = arith.constant 0 : index
    %c0_110 = arith.constant 0 : index
    %311 = vector.load %arg4[%310, %c0_109, %c0_110] : memref<8x8x128xbf16, #tpu.memory_space<vmem>>, vector<1x8x128xbf16>
    %312 = vector.shape_cast %311 : vector<1x8x128xbf16> to vector<8x128xbf16>
    %313 = vector.shape_cast %309 : vector<8x128xbf16> to vector<1x8x128xbf16>
    tpu.vector_store %arg4[%310, %c0_109, %c0_110], %313 {strides = array<i32>} : memref<8x8x128xbf16, #tpu.memory_space<vmem>>, vector<1x8x128xbf16>,
    %314 = arith.addf %270, %308 : vector<8x128xf32>
    %c7_i32_111 = arith.constant 7 : i32
    %c7_i32_112 = arith.constant 7 : i32
    %315 = arith.subi %c7_i32_112, %c7_i32_111 : i32
    %316 = arith.index_cast %315 : i32 to index
    %c0_113 = arith.constant 0 : index
    %c0_114 = arith.constant 0 : index
    %317 = vector.load %arg2[%316, %c0_113, %c0_114] : memref<8x8x512xf32, #tpu.memory_space<vmem>>, vector<1x8x512xf32>
    %318 = vector.shape_cast %317 : vector<1x8x512xf32> to vector<8x512xf32>
    %319 = arith.truncf %308 : vector<8x128xf32> to vector<8x128xbf16>
    %cst_115 = arith.constant dense<0.000000e+00> : vector<8x512xf32>
    %320 = tpu.matmul %319, %3, %cst_115 {dimension_numbers = #tpu.dot_dimension_numbers<[1], [0], [0], [1], [0, 0, 1, 1], [], []>} : vector<8x128xbf16>, vector<128x512xbf16>, vector<8x512xf32> -> vector<8x512xf32>
    %321 = arith.addf %318, %320 : vector<8x512xf32>
    %322 = vector.extract_strided_slice %321 {offsets = [0, 0], sizes = [8, 128], strides = [1, 1]} : vector<8x512xf32> to vector<8x128xf32>
    %cst_116 = arith.constant 5.000000e-01 : f32
    %323 = vector.broadcast %cst_116 : f32 to vector<8x128xf32>
    %324 = arith.mulf %323, %322 : vector<8x128xf32>
    %325 = math.tanh %324 : vector<8x128xf32>
    %cst_117 = arith.constant 1.000000e+00 : f32
    %326 = vector.broadcast %cst_117 : f32 to vector<8x128xf32>
    %327 = arith.addf %325, %326 : vector<8x128xf32>
    %cst_118 = arith.constant 5.000000e-01 : f32
    %328 = vector.broadcast %cst_118 : f32 to vector<8x128xf32>
    %329 = arith.mulf %328, %327 : vector<8x128xf32>
    %330 = vector.extract_strided_slice %321 {offsets = [0, 128], sizes = [8, 128], strides = [1, 1]} : vector<8x512xf32> to vector<8x128xf32>
    %cst_119 = arith.constant 5.000000e-01 : f32
    %331 = vector.broadcast %cst_119 : f32 to vector<8x128xf32>
    %332 = arith.mulf %331, %330 : vector<8x128xf32>
    %333 = math.tanh %332 : vector<8x128xf32>
    %cst_120 = arith.constant 1.000000e+00 : f32
    %334 = vector.broadcast %cst_120 : f32 to vector<8x128xf32>
    %335 = arith.addf %333, %334 : vector<8x128xf32>
    %cst_121 = arith.constant 5.000000e-01 : f32
    %336 = vector.broadcast %cst_121 : f32 to vector<8x128xf32>
    %337 = arith.mulf %336, %335 : vector<8x128xf32>
    %338 = vector.extract_strided_slice %321 {offsets = [0, 256], sizes = [8, 128], strides = [1, 1]} : vector<8x512xf32> to vector<8x128xf32>
    %339 = math.tanh %338 : vector<8x128xf32>
    %340 = vector.extract_strided_slice %321 {offsets = [0, 384], sizes = [8, 128], strides = [1, 1]} : vector<8x512xf32> to vector<8x128xf32>
    %cst_122 = arith.constant 5.000000e-01 : f32
    %341 = vector.broadcast %cst_122 : f32 to vector<8x128xf32>
    %342 = arith.mulf %341, %340 : vector<8x128xf32>
    %343 = math.tanh %342 : vector<8x128xf32>
    %cst_123 = arith.constant 1.000000e+00 : f32
    %344 = vector.broadcast %cst_123 : f32 to vector<8x128xf32>
    %345 = arith.addf %343, %344 : vector<8x128xf32>
    %cst_124 = arith.constant 5.000000e-01 : f32
    %346 = vector.broadcast %cst_124 : f32 to vector<8x128xf32>
    %347 = arith.mulf %346, %345 : vector<8x128xf32>
    %348 = arith.mulf %337, %306 : vector<8x128xf32>
    %349 = arith.mulf %329, %339 : vector<8x128xf32>
    %350 = arith.addf %348, %349 : vector<8x128xf32>
    %351 = math.tanh %350 : vector<8x128xf32>
    %352 = arith.mulf %347, %351 : vector<8x128xf32>
    %353 = arith.truncf %352 : vector<8x128xf32> to vector<8x128xbf16>
    %354 = arith.index_cast %315 : i32 to index
    %c0_125 = arith.constant 0 : index
    %c0_126 = arith.constant 0 : index
    %355 = vector.load %arg4[%354, %c0_125, %c0_126] : memref<8x8x128xbf16, #tpu.memory_space<vmem>>, vector<1x8x128xbf16>
    %356 = vector.shape_cast %355 : vector<1x8x128xbf16> to vector<8x128xbf16>
    %357 = vector.shape_cast %353 : vector<8x128xbf16> to vector<1x8x128xbf16>
    tpu.vector_store %arg4[%354, %c0_125, %c0_126], %357 {strides = array<i32>} : memref<8x8x128xbf16, #tpu.memory_space<vmem>>, vector<1x8x128xbf16>,
    %358 = arith.addf %314, %352 : vector<8x128xf32>
    %c8_i32 = arith.constant 8 : i32
    %c0_127 = arith.constant 0 : index
    %c0_128 = arith.constant 0 : index
    %359 = vector.load %arg6[%c0_127, %c0_128] : memref<8x128xf32, #tpu.memory_space<vmem>>, vector<8x128xf32>
    tpu.vector_store %arg6[%c0_127, %c0_128], %352 {strides = array<i32>} : memref<8x128xf32, #tpu.memory_space<vmem>>, vector<8x128xf32>,
    %c0_129 = arith.constant 0 : index
    %c0_130 = arith.constant 0 : index
    %360 = vector.load %arg7[%c0_129, %c0_130] : memref<8x128xf32, #tpu.memory_space<vmem>>, vector<8x128xf32>
    tpu.vector_store %arg7[%c0_129, %c0_130], %350 {strides = array<i32>} : memref<8x128xf32, #tpu.memory_space<vmem>>, vector<8x128xf32>,
    %c0_131 = arith.constant 0 : index
    %c0_132 = arith.constant 0 : index
    %361 = vector.load %arg5[%c0_131, %c0_132] : memref<8x128xf32, #tpu.memory_space<vmem>>, vector<8x128xf32>
    %cst_133 = arith.constant 6.250000e-02 : f32
    %362 = vector.broadcast %cst_133 : f32 to vector<8x128xf32>
    %363 = arith.mulf %358, %362 : vector<8x128xf32>
    %364 = arith.addf %361, %363 : vector<8x128xf32>
    %c0_134 = arith.constant 0 : index
    %c0_135 = arith.constant 0 : index
    %365 = vector.load %arg5[%c0_134, %c0_135] : memref<8x128xf32, #tpu.memory_space<vmem>>, vector<8x128xf32>
    tpu.vector_store %arg5[%c0_134, %c0_135], %364 {strides = array<i32>} : memref<8x128xf32, #tpu.memory_space<vmem>>, vector<8x128xf32>,
    return
  }
  func.func @transform_0(%arg0: i32, %arg1: i32) -> (i32, i32, i32) {
    %c1_i32 = arith.constant 1 : i32
    %0 = arith.subi %c1_i32, %arg1 : i32
    %c0_i32 = arith.constant 0 : i32
    %c0_i32_0 = arith.constant 0 : i32
    return %0, %arg0, %c0_i32 : i32, i32, i32
  }
  func.func @transform_1(%arg0: i32, %arg1: i32) -> (i32, i32) {
    %c0_i32 = arith.constant 0 : i32
    %c0_i32_0 = arith.constant 0 : i32
    %c0_i32_1 = arith.constant 0 : i32
    return %c0_i32, %c0_i32_0 : i32, i32
  }
  func.func @transform_2(%arg0: i32, %arg1: i32) -> (i32, i32, i32) {
    %c1_i32 = arith.constant 1 : i32
    %0 = arith.subi %c1_i32, %arg1 : i32
    %c0_i32 = arith.constant 0 : i32
    %c0_i32_0 = arith.constant 0 : i32
    return %0, %arg0, %c0_i32 : i32, i32, i32
  }
  func.func @transform_3(%arg0: i32, %arg1: i32) -> (i32, i32) {
    %c0_i32 = arith.constant 0 : i32
    %c0_i32_0 = arith.constant 0 : i32
    return %arg0, %c0_i32 : i32, i32
  }
}

module attributes {stable_mosaic.version = 11 : i64} {
  func.func @_lstm_dir_kernel(%arg0: i32, %arg1: i32, %arg2: memref<8x8x512xf32, #tpu.memory_space<vmem>>, %arg3: memref<128x512xbf16, #tpu.memory_space<vmem>>, %arg4: memref<8x128xf32, #tpu.memory_space<vmem>>, %arg5: memref<8x128xf32, #tpu.memory_space<vmem>>, %arg6: memref<8x128xf32, #tpu.memory_space<vmem>>) attributes {dimension_semantics = [#tpu.dimension_semantics<parallel>, #tpu.dimension_semantics<arbitrary>], iteration_bounds = array<i64: 1, 2>, scalar_prefetch = 0 : i64, scratch_operands = 2 : i64, tpu.core_type = #tpu.core_type<tc>, window_params = [{transform_indices = @transform_0, window_bounds = array<i64: 8, 8, 512>}, {pipeline_mode = #tpu.pipeline_mode<synchronous>, transform_indices = @transform_1, window_bounds = array<i64: 128, 512>}, {transform_indices = @transform_2, window_bounds = array<i64: 8, 128>}]} {
    %c0_i32 = arith.constant 0 : i32
    %0 = arith.cmpi eq, %arg1, %c0_i32 : i32
    %1 = arith.extui %0 : i1 to i32
    %c0_i32_0 = arith.constant 0 : i32
    %2 = arith.cmpi ne, %1, %c0_i32_0 : i32
    scf.if %2 {
      %cst_112 = arith.constant 0.000000e+00 : f32
      %318 = vector.broadcast %cst_112 : f32 to vector<8x128xf32>
      %c0_113 = arith.constant 0 : index
      %c0_114 = arith.constant 0 : index
      %319 = vector.load %arg5[%c0_113, %c0_114] : memref<8x128xf32, #tpu.memory_space<vmem>>, vector<8x128xf32>
      tpu.vector_store %arg5[%c0_113, %c0_114], %318 {strides = array<i32>} : memref<8x128xf32, #tpu.memory_space<vmem>>, vector<8x128xf32>,
      %cst_115 = arith.constant 0.000000e+00 : f32
      %320 = vector.broadcast %cst_115 : f32 to vector<8x128xf32>
      %c0_116 = arith.constant 0 : index
      %c0_117 = arith.constant 0 : index
      %321 = vector.load %arg6[%c0_116, %c0_117] : memref<8x128xf32, #tpu.memory_space<vmem>>, vector<8x128xf32>
      tpu.vector_store %arg6[%c0_116, %c0_117], %320 {strides = array<i32>} : memref<8x128xf32, #tpu.memory_space<vmem>>, vector<8x128xf32>,
      %cst_118 = arith.constant 0.000000e+00 : f32
      %322 = vector.broadcast %cst_118 : f32 to vector<8x128xf32>
      %c0_119 = arith.constant 0 : index
      %c0_120 = arith.constant 0 : index
      %323 = vector.load %arg4[%c0_119, %c0_120] : memref<8x128xf32, #tpu.memory_space<vmem>>, vector<8x128xf32>
      tpu.vector_store %arg4[%c0_119, %c0_120], %322 {strides = array<i32>} : memref<8x128xf32, #tpu.memory_space<vmem>>, vector<8x128xf32>,
    } else {
    }
    %c0 = arith.constant 0 : index
    %c0_1 = arith.constant 0 : index
    %3 = vector.load %arg3[%c0, %c0_1] : memref<128x512xbf16, #tpu.memory_space<vmem>>, vector<128x512xbf16>
    %c0_2 = arith.constant 0 : index
    %c0_3 = arith.constant 0 : index
    %4 = vector.load %arg5[%c0_2, %c0_3] : memref<8x128xf32, #tpu.memory_space<vmem>>, vector<8x128xf32>
    %c0_4 = arith.constant 0 : index
    %c0_5 = arith.constant 0 : index
    %5 = vector.load %arg6[%c0_4, %c0_5] : memref<8x128xf32, #tpu.memory_space<vmem>>, vector<8x128xf32>
    %cst = arith.constant 0.000000e+00 : f32
    %6 = vector.broadcast %cst : f32 to vector<8x128xf32>
    %c0_i32_6 = arith.constant 0 : i32
    %7 = arith.index_cast %c0_i32_6 : i32 to index
    %c0_7 = arith.constant 0 : index
    %c0_8 = arith.constant 0 : index
    %8 = vector.load %arg2[%7, %c0_7, %c0_8] : memref<8x8x512xf32, #tpu.memory_space<vmem>>, vector<1x8x512xf32>
    %9 = vector.shape_cast %8 : vector<1x8x512xf32> to vector<8x512xf32>
    %10 = arith.truncf %4 : vector<8x128xf32> to vector<8x128xbf16>
    %cst_9 = arith.constant dense<0.000000e+00> : vector<8x512xf32>
    %11 = tpu.matmul %10, %3, %cst_9 {dimension_numbers = #tpu.dot_dimension_numbers<[1], [0], [0], [1], [0, 0, 1, 1], [], []>} : vector<8x128xbf16>, vector<128x512xbf16>, vector<8x512xf32> -> vector<8x512xf32>
    %12 = arith.addf %9, %11 : vector<8x512xf32>
    %13 = vector.extract_strided_slice %12 {offsets = [0, 0], sizes = [8, 128], strides = [1, 1]} : vector<8x512xf32> to vector<8x128xf32>
    %cst_10 = arith.constant 5.000000e-01 : f32
    %14 = vector.broadcast %cst_10 : f32 to vector<8x128xf32>
    %15 = arith.mulf %14, %13 : vector<8x128xf32>
    %16 = math.tanh %15 : vector<8x128xf32>
    %cst_11 = arith.constant 1.000000e+00 : f32
    %17 = vector.broadcast %cst_11 : f32 to vector<8x128xf32>
    %18 = arith.addf %16, %17 : vector<8x128xf32>
    %cst_12 = arith.constant 5.000000e-01 : f32
    %19 = vector.broadcast %cst_12 : f32 to vector<8x128xf32>
    %20 = arith.mulf %19, %18 : vector<8x128xf32>
    %21 = vector.extract_strided_slice %12 {offsets = [0, 128], sizes = [8, 128], strides = [1, 1]} : vector<8x512xf32> to vector<8x128xf32>
    %cst_13 = arith.constant 5.000000e-01 : f32
    %22 = vector.broadcast %cst_13 : f32 to vector<8x128xf32>
    %23 = arith.mulf %22, %21 : vector<8x128xf32>
    %24 = math.tanh %23 : vector<8x128xf32>
    %cst_14 = arith.constant 1.000000e+00 : f32
    %25 = vector.broadcast %cst_14 : f32 to vector<8x128xf32>
    %26 = arith.addf %24, %25 : vector<8x128xf32>
    %cst_15 = arith.constant 5.000000e-01 : f32
    %27 = vector.broadcast %cst_15 : f32 to vector<8x128xf32>
    %28 = arith.mulf %27, %26 : vector<8x128xf32>
    %29 = vector.extract_strided_slice %12 {offsets = [0, 256], sizes = [8, 128], strides = [1, 1]} : vector<8x512xf32> to vector<8x128xf32>
    %30 = math.tanh %29 : vector<8x128xf32>
    %31 = vector.extract_strided_slice %12 {offsets = [0, 384], sizes = [8, 128], strides = [1, 1]} : vector<8x512xf32> to vector<8x128xf32>
    %cst_16 = arith.constant 5.000000e-01 : f32
    %32 = vector.broadcast %cst_16 : f32 to vector<8x128xf32>
    %33 = arith.mulf %32, %31 : vector<8x128xf32>
    %34 = math.tanh %33 : vector<8x128xf32>
    %cst_17 = arith.constant 1.000000e+00 : f32
    %35 = vector.broadcast %cst_17 : f32 to vector<8x128xf32>
    %36 = arith.addf %34, %35 : vector<8x128xf32>
    %cst_18 = arith.constant 5.000000e-01 : f32
    %37 = vector.broadcast %cst_18 : f32 to vector<8x128xf32>
    %38 = arith.mulf %37, %36 : vector<8x128xf32>
    %39 = arith.mulf %28, %5 : vector<8x128xf32>
    %40 = arith.mulf %20, %30 : vector<8x128xf32>
    %41 = arith.addf %39, %40 : vector<8x128xf32>
    %42 = math.tanh %41 : vector<8x128xf32>
    %43 = arith.mulf %38, %42 : vector<8x128xf32>
    %44 = arith.addf %6, %43 : vector<8x128xf32>
    %c1_i32 = arith.constant 1 : i32
    %45 = arith.index_cast %c1_i32 : i32 to index
    %c0_19 = arith.constant 0 : index
    %c0_20 = arith.constant 0 : index
    %46 = vector.load %arg2[%45, %c0_19, %c0_20] : memref<8x8x512xf32, #tpu.memory_space<vmem>>, vector<1x8x512xf32>
    %47 = vector.shape_cast %46 : vector<1x8x512xf32> to vector<8x512xf32>
    %48 = arith.truncf %43 : vector<8x128xf32> to vector<8x128xbf16>
    %cst_21 = arith.constant dense<0.000000e+00> : vector<8x512xf32>
    %49 = tpu.matmul %48, %3, %cst_21 {dimension_numbers = #tpu.dot_dimension_numbers<[1], [0], [0], [1], [0, 0, 1, 1], [], []>} : vector<8x128xbf16>, vector<128x512xbf16>, vector<8x512xf32> -> vector<8x512xf32>
    %50 = arith.addf %47, %49 : vector<8x512xf32>
    %51 = vector.extract_strided_slice %50 {offsets = [0, 0], sizes = [8, 128], strides = [1, 1]} : vector<8x512xf32> to vector<8x128xf32>
    %cst_22 = arith.constant 5.000000e-01 : f32
    %52 = vector.broadcast %cst_22 : f32 to vector<8x128xf32>
    %53 = arith.mulf %52, %51 : vector<8x128xf32>
    %54 = math.tanh %53 : vector<8x128xf32>
    %cst_23 = arith.constant 1.000000e+00 : f32
    %55 = vector.broadcast %cst_23 : f32 to vector<8x128xf32>
    %56 = arith.addf %54, %55 : vector<8x128xf32>
    %cst_24 = arith.constant 5.000000e-01 : f32
    %57 = vector.broadcast %cst_24 : f32 to vector<8x128xf32>
    %58 = arith.mulf %57, %56 : vector<8x128xf32>
    %59 = vector.extract_strided_slice %50 {offsets = [0, 128], sizes = [8, 128], strides = [1, 1]} : vector<8x512xf32> to vector<8x128xf32>
    %cst_25 = arith.constant 5.000000e-01 : f32
    %60 = vector.broadcast %cst_25 : f32 to vector<8x128xf32>
    %61 = arith.mulf %60, %59 : vector<8x128xf32>
    %62 = math.tanh %61 : vector<8x128xf32>
    %cst_26 = arith.constant 1.000000e+00 : f32
    %63 = vector.broadcast %cst_26 : f32 to vector<8x128xf32>
    %64 = arith.addf %62, %63 : vector<8x128xf32>
    %cst_27 = arith.constant 5.000000e-01 : f32
    %65 = vector.broadcast %cst_27 : f32 to vector<8x128xf32>
    %66 = arith.mulf %65, %64 : vector<8x128xf32>
    %67 = vector.extract_strided_slice %50 {offsets = [0, 256], sizes = [8, 128], strides = [1, 1]} : vector<8x512xf32> to vector<8x128xf32>
    %68 = math.tanh %67 : vector<8x128xf32>
    %69 = vector.extract_strided_slice %50 {offsets = [0, 384], sizes = [8, 128], strides = [1, 1]} : vector<8x512xf32> to vector<8x128xf32>
    %cst_28 = arith.constant 5.000000e-01 : f32
    %70 = vector.broadcast %cst_28 : f32 to vector<8x128xf32>
    %71 = arith.mulf %70, %69 : vector<8x128xf32>
    %72 = math.tanh %71 : vector<8x128xf32>
    %cst_29 = arith.constant 1.000000e+00 : f32
    %73 = vector.broadcast %cst_29 : f32 to vector<8x128xf32>
    %74 = arith.addf %72, %73 : vector<8x128xf32>
    %cst_30 = arith.constant 5.000000e-01 : f32
    %75 = vector.broadcast %cst_30 : f32 to vector<8x128xf32>
    %76 = arith.mulf %75, %74 : vector<8x128xf32>
    %77 = arith.mulf %66, %41 : vector<8x128xf32>
    %78 = arith.mulf %58, %68 : vector<8x128xf32>
    %79 = arith.addf %77, %78 : vector<8x128xf32>
    %80 = math.tanh %79 : vector<8x128xf32>
    %81 = arith.mulf %76, %80 : vector<8x128xf32>
    %82 = arith.addf %44, %81 : vector<8x128xf32>
    %c2_i32 = arith.constant 2 : i32
    %83 = arith.index_cast %c2_i32 : i32 to index
    %c0_31 = arith.constant 0 : index
    %c0_32 = arith.constant 0 : index
    %84 = vector.load %arg2[%83, %c0_31, %c0_32] : memref<8x8x512xf32, #tpu.memory_space<vmem>>, vector<1x8x512xf32>
    %85 = vector.shape_cast %84 : vector<1x8x512xf32> to vector<8x512xf32>
    %86 = arith.truncf %81 : vector<8x128xf32> to vector<8x128xbf16>
    %cst_33 = arith.constant dense<0.000000e+00> : vector<8x512xf32>
    %87 = tpu.matmul %86, %3, %cst_33 {dimension_numbers = #tpu.dot_dimension_numbers<[1], [0], [0], [1], [0, 0, 1, 1], [], []>} : vector<8x128xbf16>, vector<128x512xbf16>, vector<8x512xf32> -> vector<8x512xf32>
    %88 = arith.addf %85, %87 : vector<8x512xf32>
    %89 = vector.extract_strided_slice %88 {offsets = [0, 0], sizes = [8, 128], strides = [1, 1]} : vector<8x512xf32> to vector<8x128xf32>
    %cst_34 = arith.constant 5.000000e-01 : f32
    %90 = vector.broadcast %cst_34 : f32 to vector<8x128xf32>
    %91 = arith.mulf %90, %89 : vector<8x128xf32>
    %92 = math.tanh %91 : vector<8x128xf32>
    %cst_35 = arith.constant 1.000000e+00 : f32
    %93 = vector.broadcast %cst_35 : f32 to vector<8x128xf32>
    %94 = arith.addf %92, %93 : vector<8x128xf32>
    %cst_36 = arith.constant 5.000000e-01 : f32
    %95 = vector.broadcast %cst_36 : f32 to vector<8x128xf32>
    %96 = arith.mulf %95, %94 : vector<8x128xf32>
    %97 = vector.extract_strided_slice %88 {offsets = [0, 128], sizes = [8, 128], strides = [1, 1]} : vector<8x512xf32> to vector<8x128xf32>
    %cst_37 = arith.constant 5.000000e-01 : f32
    %98 = vector.broadcast %cst_37 : f32 to vector<8x128xf32>
    %99 = arith.mulf %98, %97 : vector<8x128xf32>
    %100 = math.tanh %99 : vector<8x128xf32>
    %cst_38 = arith.constant 1.000000e+00 : f32
    %101 = vector.broadcast %cst_38 : f32 to vector<8x128xf32>
    %102 = arith.addf %100, %101 : vector<8x128xf32>
    %cst_39 = arith.constant 5.000000e-01 : f32
    %103 = vector.broadcast %cst_39 : f32 to vector<8x128xf32>
    %104 = arith.mulf %103, %102 : vector<8x128xf32>
    %105 = vector.extract_strided_slice %88 {offsets = [0, 256], sizes = [8, 128], strides = [1, 1]} : vector<8x512xf32> to vector<8x128xf32>
    %106 = math.tanh %105 : vector<8x128xf32>
    %107 = vector.extract_strided_slice %88 {offsets = [0, 384], sizes = [8, 128], strides = [1, 1]} : vector<8x512xf32> to vector<8x128xf32>
    %cst_40 = arith.constant 5.000000e-01 : f32
    %108 = vector.broadcast %cst_40 : f32 to vector<8x128xf32>
    %109 = arith.mulf %108, %107 : vector<8x128xf32>
    %110 = math.tanh %109 : vector<8x128xf32>
    %cst_41 = arith.constant 1.000000e+00 : f32
    %111 = vector.broadcast %cst_41 : f32 to vector<8x128xf32>
    %112 = arith.addf %110, %111 : vector<8x128xf32>
    %cst_42 = arith.constant 5.000000e-01 : f32
    %113 = vector.broadcast %cst_42 : f32 to vector<8x128xf32>
    %114 = arith.mulf %113, %112 : vector<8x128xf32>
    %115 = arith.mulf %104, %79 : vector<8x128xf32>
    %116 = arith.mulf %96, %106 : vector<8x128xf32>
    %117 = arith.addf %115, %116 : vector<8x128xf32>
    %118 = math.tanh %117 : vector<8x128xf32>
    %119 = arith.mulf %114, %118 : vector<8x128xf32>
    %120 = arith.addf %82, %119 : vector<8x128xf32>
    %c3_i32 = arith.constant 3 : i32
    %121 = arith.index_cast %c3_i32 : i32 to index
    %c0_43 = arith.constant 0 : index
    %c0_44 = arith.constant 0 : index
    %122 = vector.load %arg2[%121, %c0_43, %c0_44] : memref<8x8x512xf32, #tpu.memory_space<vmem>>, vector<1x8x512xf32>
    %123 = vector.shape_cast %122 : vector<1x8x512xf32> to vector<8x512xf32>
    %124 = arith.truncf %119 : vector<8x128xf32> to vector<8x128xbf16>
    %cst_45 = arith.constant dense<0.000000e+00> : vector<8x512xf32>
    %125 = tpu.matmul %124, %3, %cst_45 {dimension_numbers = #tpu.dot_dimension_numbers<[1], [0], [0], [1], [0, 0, 1, 1], [], []>} : vector<8x128xbf16>, vector<128x512xbf16>, vector<8x512xf32> -> vector<8x512xf32>
    %126 = arith.addf %123, %125 : vector<8x512xf32>
    %127 = vector.extract_strided_slice %126 {offsets = [0, 0], sizes = [8, 128], strides = [1, 1]} : vector<8x512xf32> to vector<8x128xf32>
    %cst_46 = arith.constant 5.000000e-01 : f32
    %128 = vector.broadcast %cst_46 : f32 to vector<8x128xf32>
    %129 = arith.mulf %128, %127 : vector<8x128xf32>
    %130 = math.tanh %129 : vector<8x128xf32>
    %cst_47 = arith.constant 1.000000e+00 : f32
    %131 = vector.broadcast %cst_47 : f32 to vector<8x128xf32>
    %132 = arith.addf %130, %131 : vector<8x128xf32>
    %cst_48 = arith.constant 5.000000e-01 : f32
    %133 = vector.broadcast %cst_48 : f32 to vector<8x128xf32>
    %134 = arith.mulf %133, %132 : vector<8x128xf32>
    %135 = vector.extract_strided_slice %126 {offsets = [0, 128], sizes = [8, 128], strides = [1, 1]} : vector<8x512xf32> to vector<8x128xf32>
    %cst_49 = arith.constant 5.000000e-01 : f32
    %136 = vector.broadcast %cst_49 : f32 to vector<8x128xf32>
    %137 = arith.mulf %136, %135 : vector<8x128xf32>
    %138 = math.tanh %137 : vector<8x128xf32>
    %cst_50 = arith.constant 1.000000e+00 : f32
    %139 = vector.broadcast %cst_50 : f32 to vector<8x128xf32>
    %140 = arith.addf %138, %139 : vector<8x128xf32>
    %cst_51 = arith.constant 5.000000e-01 : f32
    %141 = vector.broadcast %cst_51 : f32 to vector<8x128xf32>
    %142 = arith.mulf %141, %140 : vector<8x128xf32>
    %143 = vector.extract_strided_slice %126 {offsets = [0, 256], sizes = [8, 128], strides = [1, 1]} : vector<8x512xf32> to vector<8x128xf32>
    %144 = math.tanh %143 : vector<8x128xf32>
    %145 = vector.extract_strided_slice %126 {offsets = [0, 384], sizes = [8, 128], strides = [1, 1]} : vector<8x512xf32> to vector<8x128xf32>
    %cst_52 = arith.constant 5.000000e-01 : f32
    %146 = vector.broadcast %cst_52 : f32 to vector<8x128xf32>
    %147 = arith.mulf %146, %145 : vector<8x128xf32>
    %148 = math.tanh %147 : vector<8x128xf32>
    %cst_53 = arith.constant 1.000000e+00 : f32
    %149 = vector.broadcast %cst_53 : f32 to vector<8x128xf32>
    %150 = arith.addf %148, %149 : vector<8x128xf32>
    %cst_54 = arith.constant 5.000000e-01 : f32
    %151 = vector.broadcast %cst_54 : f32 to vector<8x128xf32>
    %152 = arith.mulf %151, %150 : vector<8x128xf32>
    %153 = arith.mulf %142, %117 : vector<8x128xf32>
    %154 = arith.mulf %134, %144 : vector<8x128xf32>
    %155 = arith.addf %153, %154 : vector<8x128xf32>
    %156 = math.tanh %155 : vector<8x128xf32>
    %157 = arith.mulf %152, %156 : vector<8x128xf32>
    %158 = arith.addf %120, %157 : vector<8x128xf32>
    %c4_i32 = arith.constant 4 : i32
    %159 = arith.index_cast %c4_i32 : i32 to index
    %c0_55 = arith.constant 0 : index
    %c0_56 = arith.constant 0 : index
    %160 = vector.load %arg2[%159, %c0_55, %c0_56] : memref<8x8x512xf32, #tpu.memory_space<vmem>>, vector<1x8x512xf32>
    %161 = vector.shape_cast %160 : vector<1x8x512xf32> to vector<8x512xf32>
    %162 = arith.truncf %157 : vector<8x128xf32> to vector<8x128xbf16>
    %cst_57 = arith.constant dense<0.000000e+00> : vector<8x512xf32>
    %163 = tpu.matmul %162, %3, %cst_57 {dimension_numbers = #tpu.dot_dimension_numbers<[1], [0], [0], [1], [0, 0, 1, 1], [], []>} : vector<8x128xbf16>, vector<128x512xbf16>, vector<8x512xf32> -> vector<8x512xf32>
    %164 = arith.addf %161, %163 : vector<8x512xf32>
    %165 = vector.extract_strided_slice %164 {offsets = [0, 0], sizes = [8, 128], strides = [1, 1]} : vector<8x512xf32> to vector<8x128xf32>
    %cst_58 = arith.constant 5.000000e-01 : f32
    %166 = vector.broadcast %cst_58 : f32 to vector<8x128xf32>
    %167 = arith.mulf %166, %165 : vector<8x128xf32>
    %168 = math.tanh %167 : vector<8x128xf32>
    %cst_59 = arith.constant 1.000000e+00 : f32
    %169 = vector.broadcast %cst_59 : f32 to vector<8x128xf32>
    %170 = arith.addf %168, %169 : vector<8x128xf32>
    %cst_60 = arith.constant 5.000000e-01 : f32
    %171 = vector.broadcast %cst_60 : f32 to vector<8x128xf32>
    %172 = arith.mulf %171, %170 : vector<8x128xf32>
    %173 = vector.extract_strided_slice %164 {offsets = [0, 128], sizes = [8, 128], strides = [1, 1]} : vector<8x512xf32> to vector<8x128xf32>
    %cst_61 = arith.constant 5.000000e-01 : f32
    %174 = vector.broadcast %cst_61 : f32 to vector<8x128xf32>
    %175 = arith.mulf %174, %173 : vector<8x128xf32>
    %176 = math.tanh %175 : vector<8x128xf32>
    %cst_62 = arith.constant 1.000000e+00 : f32
    %177 = vector.broadcast %cst_62 : f32 to vector<8x128xf32>
    %178 = arith.addf %176, %177 : vector<8x128xf32>
    %cst_63 = arith.constant 5.000000e-01 : f32
    %179 = vector.broadcast %cst_63 : f32 to vector<8x128xf32>
    %180 = arith.mulf %179, %178 : vector<8x128xf32>
    %181 = vector.extract_strided_slice %164 {offsets = [0, 256], sizes = [8, 128], strides = [1, 1]} : vector<8x512xf32> to vector<8x128xf32>
    %182 = math.tanh %181 : vector<8x128xf32>
    %183 = vector.extract_strided_slice %164 {offsets = [0, 384], sizes = [8, 128], strides = [1, 1]} : vector<8x512xf32> to vector<8x128xf32>
    %cst_64 = arith.constant 5.000000e-01 : f32
    %184 = vector.broadcast %cst_64 : f32 to vector<8x128xf32>
    %185 = arith.mulf %184, %183 : vector<8x128xf32>
    %186 = math.tanh %185 : vector<8x128xf32>
    %cst_65 = arith.constant 1.000000e+00 : f32
    %187 = vector.broadcast %cst_65 : f32 to vector<8x128xf32>
    %188 = arith.addf %186, %187 : vector<8x128xf32>
    %cst_66 = arith.constant 5.000000e-01 : f32
    %189 = vector.broadcast %cst_66 : f32 to vector<8x128xf32>
    %190 = arith.mulf %189, %188 : vector<8x128xf32>
    %191 = arith.mulf %180, %155 : vector<8x128xf32>
    %192 = arith.mulf %172, %182 : vector<8x128xf32>
    %193 = arith.addf %191, %192 : vector<8x128xf32>
    %194 = math.tanh %193 : vector<8x128xf32>
    %195 = arith.mulf %190, %194 : vector<8x128xf32>
    %196 = arith.addf %158, %195 : vector<8x128xf32>
    %c5_i32 = arith.constant 5 : i32
    %197 = arith.index_cast %c5_i32 : i32 to index
    %c0_67 = arith.constant 0 : index
    %c0_68 = arith.constant 0 : index
    %198 = vector.load %arg2[%197, %c0_67, %c0_68] : memref<8x8x512xf32, #tpu.memory_space<vmem>>, vector<1x8x512xf32>
    %199 = vector.shape_cast %198 : vector<1x8x512xf32> to vector<8x512xf32>
    %200 = arith.truncf %195 : vector<8x128xf32> to vector<8x128xbf16>
    %cst_69 = arith.constant dense<0.000000e+00> : vector<8x512xf32>
    %201 = tpu.matmul %200, %3, %cst_69 {dimension_numbers = #tpu.dot_dimension_numbers<[1], [0], [0], [1], [0, 0, 1, 1], [], []>} : vector<8x128xbf16>, vector<128x512xbf16>, vector<8x512xf32> -> vector<8x512xf32>
    %202 = arith.addf %199, %201 : vector<8x512xf32>
    %203 = vector.extract_strided_slice %202 {offsets = [0, 0], sizes = [8, 128], strides = [1, 1]} : vector<8x512xf32> to vector<8x128xf32>
    %cst_70 = arith.constant 5.000000e-01 : f32
    %204 = vector.broadcast %cst_70 : f32 to vector<8x128xf32>
    %205 = arith.mulf %204, %203 : vector<8x128xf32>
    %206 = math.tanh %205 : vector<8x128xf32>
    %cst_71 = arith.constant 1.000000e+00 : f32
    %207 = vector.broadcast %cst_71 : f32 to vector<8x128xf32>
    %208 = arith.addf %206, %207 : vector<8x128xf32>
    %cst_72 = arith.constant 5.000000e-01 : f32
    %209 = vector.broadcast %cst_72 : f32 to vector<8x128xf32>
    %210 = arith.mulf %209, %208 : vector<8x128xf32>
    %211 = vector.extract_strided_slice %202 {offsets = [0, 128], sizes = [8, 128], strides = [1, 1]} : vector<8x512xf32> to vector<8x128xf32>
    %cst_73 = arith.constant 5.000000e-01 : f32
    %212 = vector.broadcast %cst_73 : f32 to vector<8x128xf32>
    %213 = arith.mulf %212, %211 : vector<8x128xf32>
    %214 = math.tanh %213 : vector<8x128xf32>
    %cst_74 = arith.constant 1.000000e+00 : f32
    %215 = vector.broadcast %cst_74 : f32 to vector<8x128xf32>
    %216 = arith.addf %214, %215 : vector<8x128xf32>
    %cst_75 = arith.constant 5.000000e-01 : f32
    %217 = vector.broadcast %cst_75 : f32 to vector<8x128xf32>
    %218 = arith.mulf %217, %216 : vector<8x128xf32>
    %219 = vector.extract_strided_slice %202 {offsets = [0, 256], sizes = [8, 128], strides = [1, 1]} : vector<8x512xf32> to vector<8x128xf32>
    %220 = math.tanh %219 : vector<8x128xf32>
    %221 = vector.extract_strided_slice %202 {offsets = [0, 384], sizes = [8, 128], strides = [1, 1]} : vector<8x512xf32> to vector<8x128xf32>
    %cst_76 = arith.constant 5.000000e-01 : f32
    %222 = vector.broadcast %cst_76 : f32 to vector<8x128xf32>
    %223 = arith.mulf %222, %221 : vector<8x128xf32>
    %224 = math.tanh %223 : vector<8x128xf32>
    %cst_77 = arith.constant 1.000000e+00 : f32
    %225 = vector.broadcast %cst_77 : f32 to vector<8x128xf32>
    %226 = arith.addf %224, %225 : vector<8x128xf32>
    %cst_78 = arith.constant 5.000000e-01 : f32
    %227 = vector.broadcast %cst_78 : f32 to vector<8x128xf32>
    %228 = arith.mulf %227, %226 : vector<8x128xf32>
    %229 = arith.mulf %218, %193 : vector<8x128xf32>
    %230 = arith.mulf %210, %220 : vector<8x128xf32>
    %231 = arith.addf %229, %230 : vector<8x128xf32>
    %232 = math.tanh %231 : vector<8x128xf32>
    %233 = arith.mulf %228, %232 : vector<8x128xf32>
    %234 = arith.addf %196, %233 : vector<8x128xf32>
    %c6_i32 = arith.constant 6 : i32
    %235 = arith.index_cast %c6_i32 : i32 to index
    %c0_79 = arith.constant 0 : index
    %c0_80 = arith.constant 0 : index
    %236 = vector.load %arg2[%235, %c0_79, %c0_80] : memref<8x8x512xf32, #tpu.memory_space<vmem>>, vector<1x8x512xf32>
    %237 = vector.shape_cast %236 : vector<1x8x512xf32> to vector<8x512xf32>
    %238 = arith.truncf %233 : vector<8x128xf32> to vector<8x128xbf16>
    %cst_81 = arith.constant dense<0.000000e+00> : vector<8x512xf32>
    %239 = tpu.matmul %238, %3, %cst_81 {dimension_numbers = #tpu.dot_dimension_numbers<[1], [0], [0], [1], [0, 0, 1, 1], [], []>} : vector<8x128xbf16>, vector<128x512xbf16>, vector<8x512xf32> -> vector<8x512xf32>
    %240 = arith.addf %237, %239 : vector<8x512xf32>
    %241 = vector.extract_strided_slice %240 {offsets = [0, 0], sizes = [8, 128], strides = [1, 1]} : vector<8x512xf32> to vector<8x128xf32>
    %cst_82 = arith.constant 5.000000e-01 : f32
    %242 = vector.broadcast %cst_82 : f32 to vector<8x128xf32>
    %243 = arith.mulf %242, %241 : vector<8x128xf32>
    %244 = math.tanh %243 : vector<8x128xf32>
    %cst_83 = arith.constant 1.000000e+00 : f32
    %245 = vector.broadcast %cst_83 : f32 to vector<8x128xf32>
    %246 = arith.addf %244, %245 : vector<8x128xf32>
    %cst_84 = arith.constant 5.000000e-01 : f32
    %247 = vector.broadcast %cst_84 : f32 to vector<8x128xf32>
    %248 = arith.mulf %247, %246 : vector<8x128xf32>
    %249 = vector.extract_strided_slice %240 {offsets = [0, 128], sizes = [8, 128], strides = [1, 1]} : vector<8x512xf32> to vector<8x128xf32>
    %cst_85 = arith.constant 5.000000e-01 : f32
    %250 = vector.broadcast %cst_85 : f32 to vector<8x128xf32>
    %251 = arith.mulf %250, %249 : vector<8x128xf32>
    %252 = math.tanh %251 : vector<8x128xf32>
    %cst_86 = arith.constant 1.000000e+00 : f32
    %253 = vector.broadcast %cst_86 : f32 to vector<8x128xf32>
    %254 = arith.addf %252, %253 : vector<8x128xf32>
    %cst_87 = arith.constant 5.000000e-01 : f32
    %255 = vector.broadcast %cst_87 : f32 to vector<8x128xf32>
    %256 = arith.mulf %255, %254 : vector<8x128xf32>
    %257 = vector.extract_strided_slice %240 {offsets = [0, 256], sizes = [8, 128], strides = [1, 1]} : vector<8x512xf32> to vector<8x128xf32>
    %258 = math.tanh %257 : vector<8x128xf32>
    %259 = vector.extract_strided_slice %240 {offsets = [0, 384], sizes = [8, 128], strides = [1, 1]} : vector<8x512xf32> to vector<8x128xf32>
    %cst_88 = arith.constant 5.000000e-01 : f32
    %260 = vector.broadcast %cst_88 : f32 to vector<8x128xf32>
    %261 = arith.mulf %260, %259 : vector<8x128xf32>
    %262 = math.tanh %261 : vector<8x128xf32>
    %cst_89 = arith.constant 1.000000e+00 : f32
    %263 = vector.broadcast %cst_89 : f32 to vector<8x128xf32>
    %264 = arith.addf %262, %263 : vector<8x128xf32>
    %cst_90 = arith.constant 5.000000e-01 : f32
    %265 = vector.broadcast %cst_90 : f32 to vector<8x128xf32>
    %266 = arith.mulf %265, %264 : vector<8x128xf32>
    %267 = arith.mulf %256, %231 : vector<8x128xf32>
    %268 = arith.mulf %248, %258 : vector<8x128xf32>
    %269 = arith.addf %267, %268 : vector<8x128xf32>
    %270 = math.tanh %269 : vector<8x128xf32>
    %271 = arith.mulf %266, %270 : vector<8x128xf32>
    %272 = arith.addf %234, %271 : vector<8x128xf32>
    %c7_i32 = arith.constant 7 : i32
    %273 = arith.index_cast %c7_i32 : i32 to index
    %c0_91 = arith.constant 0 : index
    %c0_92 = arith.constant 0 : index
    %274 = vector.load %arg2[%273, %c0_91, %c0_92] : memref<8x8x512xf32, #tpu.memory_space<vmem>>, vector<1x8x512xf32>
    %275 = vector.shape_cast %274 : vector<1x8x512xf32> to vector<8x512xf32>
    %276 = arith.truncf %271 : vector<8x128xf32> to vector<8x128xbf16>
    %cst_93 = arith.constant dense<0.000000e+00> : vector<8x512xf32>
    %277 = tpu.matmul %276, %3, %cst_93 {dimension_numbers = #tpu.dot_dimension_numbers<[1], [0], [0], [1], [0, 0, 1, 1], [], []>} : vector<8x128xbf16>, vector<128x512xbf16>, vector<8x512xf32> -> vector<8x512xf32>
    %278 = arith.addf %275, %277 : vector<8x512xf32>
    %279 = vector.extract_strided_slice %278 {offsets = [0, 0], sizes = [8, 128], strides = [1, 1]} : vector<8x512xf32> to vector<8x128xf32>
    %cst_94 = arith.constant 5.000000e-01 : f32
    %280 = vector.broadcast %cst_94 : f32 to vector<8x128xf32>
    %281 = arith.mulf %280, %279 : vector<8x128xf32>
    %282 = math.tanh %281 : vector<8x128xf32>
    %cst_95 = arith.constant 1.000000e+00 : f32
    %283 = vector.broadcast %cst_95 : f32 to vector<8x128xf32>
    %284 = arith.addf %282, %283 : vector<8x128xf32>
    %cst_96 = arith.constant 5.000000e-01 : f32
    %285 = vector.broadcast %cst_96 : f32 to vector<8x128xf32>
    %286 = arith.mulf %285, %284 : vector<8x128xf32>
    %287 = vector.extract_strided_slice %278 {offsets = [0, 128], sizes = [8, 128], strides = [1, 1]} : vector<8x512xf32> to vector<8x128xf32>
    %cst_97 = arith.constant 5.000000e-01 : f32
    %288 = vector.broadcast %cst_97 : f32 to vector<8x128xf32>
    %289 = arith.mulf %288, %287 : vector<8x128xf32>
    %290 = math.tanh %289 : vector<8x128xf32>
    %cst_98 = arith.constant 1.000000e+00 : f32
    %291 = vector.broadcast %cst_98 : f32 to vector<8x128xf32>
    %292 = arith.addf %290, %291 : vector<8x128xf32>
    %cst_99 = arith.constant 5.000000e-01 : f32
    %293 = vector.broadcast %cst_99 : f32 to vector<8x128xf32>
    %294 = arith.mulf %293, %292 : vector<8x128xf32>
    %295 = vector.extract_strided_slice %278 {offsets = [0, 256], sizes = [8, 128], strides = [1, 1]} : vector<8x512xf32> to vector<8x128xf32>
    %296 = math.tanh %295 : vector<8x128xf32>
    %297 = vector.extract_strided_slice %278 {offsets = [0, 384], sizes = [8, 128], strides = [1, 1]} : vector<8x512xf32> to vector<8x128xf32>
    %cst_100 = arith.constant 5.000000e-01 : f32
    %298 = vector.broadcast %cst_100 : f32 to vector<8x128xf32>
    %299 = arith.mulf %298, %297 : vector<8x128xf32>
    %300 = math.tanh %299 : vector<8x128xf32>
    %cst_101 = arith.constant 1.000000e+00 : f32
    %301 = vector.broadcast %cst_101 : f32 to vector<8x128xf32>
    %302 = arith.addf %300, %301 : vector<8x128xf32>
    %cst_102 = arith.constant 5.000000e-01 : f32
    %303 = vector.broadcast %cst_102 : f32 to vector<8x128xf32>
    %304 = arith.mulf %303, %302 : vector<8x128xf32>
    %305 = arith.mulf %294, %269 : vector<8x128xf32>
    %306 = arith.mulf %286, %296 : vector<8x128xf32>
    %307 = arith.addf %305, %306 : vector<8x128xf32>
    %308 = math.tanh %307 : vector<8x128xf32>
    %309 = arith.mulf %304, %308 : vector<8x128xf32>
    %310 = arith.addf %272, %309 : vector<8x128xf32>
    %c8_i32 = arith.constant 8 : i32
    %c0_103 = arith.constant 0 : index
    %c0_104 = arith.constant 0 : index
    %311 = vector.load %arg5[%c0_103, %c0_104] : memref<8x128xf32, #tpu.memory_space<vmem>>, vector<8x128xf32>
    tpu.vector_store %arg5[%c0_103, %c0_104], %309 {strides = array<i32>} : memref<8x128xf32, #tpu.memory_space<vmem>>, vector<8x128xf32>,
    %c0_105 = arith.constant 0 : index
    %c0_106 = arith.constant 0 : index
    %312 = vector.load %arg6[%c0_105, %c0_106] : memref<8x128xf32, #tpu.memory_space<vmem>>, vector<8x128xf32>
    tpu.vector_store %arg6[%c0_105, %c0_106], %307 {strides = array<i32>} : memref<8x128xf32, #tpu.memory_space<vmem>>, vector<8x128xf32>,
    %c0_107 = arith.constant 0 : index
    %c0_108 = arith.constant 0 : index
    %313 = vector.load %arg4[%c0_107, %c0_108] : memref<8x128xf32, #tpu.memory_space<vmem>>, vector<8x128xf32>
    %cst_109 = arith.constant 6.250000e-02 : f32
    %314 = vector.broadcast %cst_109 : f32 to vector<8x128xf32>
    %315 = arith.mulf %310, %314 : vector<8x128xf32>
    %316 = arith.addf %313, %315 : vector<8x128xf32>
    %c0_110 = arith.constant 0 : index
    %c0_111 = arith.constant 0 : index
    %317 = vector.load %arg4[%c0_110, %c0_111] : memref<8x128xf32, #tpu.memory_space<vmem>>, vector<8x128xf32>
    tpu.vector_store %arg4[%c0_110, %c0_111], %316 {strides = array<i32>} : memref<8x128xf32, #tpu.memory_space<vmem>>, vector<8x128xf32>,
    return
  }
  func.func @transform_0(%arg0: i32, %arg1: i32) -> (i32, i32, i32) {
    %c0_i32 = arith.constant 0 : i32
    %c0_i32_0 = arith.constant 0 : i32
    return %arg1, %arg0, %c0_i32 : i32, i32, i32
  }
  func.func @transform_1(%arg0: i32, %arg1: i32) -> (i32, i32) {
    %c0_i32 = arith.constant 0 : i32
    %c0_i32_0 = arith.constant 0 : i32
    %c0_i32_1 = arith.constant 0 : i32
    return %c0_i32, %c0_i32_0 : i32, i32
  }
  func.func @transform_2(%arg0: i32, %arg1: i32) -> (i32, i32) {
    %c0_i32 = arith.constant 0 : i32
    %c0_i32_0 = arith.constant 0 : i32
    return %arg0, %c0_i32 : i32, i32
  }
}

module attributes {stable_mosaic.version = 11 : i64} {
  func.func @_lstm_dir_kernel(%arg0: i32, %arg1: i32, %arg2: memref<8x8x512xf32, #tpu.memory_space<vmem>>, %arg3: memref<128x512xbf16, #tpu.memory_space<vmem>>, %arg4: memref<8x128xf32, #tpu.memory_space<vmem>>, %arg5: memref<8x128xf32, #tpu.memory_space<vmem>>, %arg6: memref<8x128xf32, #tpu.memory_space<vmem>>) attributes {dimension_semantics = [#tpu.dimension_semantics<parallel>, #tpu.dimension_semantics<arbitrary>], iteration_bounds = array<i64: 1, 2>, scalar_prefetch = 0 : i64, scratch_operands = 2 : i64, tpu.core_type = #tpu.core_type<tc>, window_params = [{transform_indices = @transform_0, window_bounds = array<i64: 8, 8, 512>}, {pipeline_mode = #tpu.pipeline_mode<synchronous>, transform_indices = @transform_1, window_bounds = array<i64: 128, 512>}, {transform_indices = @transform_2, window_bounds = array<i64: 8, 128>}]} {
    %c0_i32 = arith.constant 0 : i32
    %0 = arith.cmpi eq, %arg1, %c0_i32 : i32
    %1 = arith.extui %0 : i1 to i32
    %c0_i32_0 = arith.constant 0 : i32
    %2 = arith.cmpi ne, %1, %c0_i32_0 : i32
    scf.if %2 {
      %cst_120 = arith.constant 0.000000e+00 : f32
      %326 = vector.broadcast %cst_120 : f32 to vector<8x128xf32>
      %c0_121 = arith.constant 0 : index
      %c0_122 = arith.constant 0 : index
      %327 = vector.load %arg5[%c0_121, %c0_122] : memref<8x128xf32, #tpu.memory_space<vmem>>, vector<8x128xf32>
      tpu.vector_store %arg5[%c0_121, %c0_122], %326 {strides = array<i32>} : memref<8x128xf32, #tpu.memory_space<vmem>>, vector<8x128xf32>,
      %cst_123 = arith.constant 0.000000e+00 : f32
      %328 = vector.broadcast %cst_123 : f32 to vector<8x128xf32>
      %c0_124 = arith.constant 0 : index
      %c0_125 = arith.constant 0 : index
      %329 = vector.load %arg6[%c0_124, %c0_125] : memref<8x128xf32, #tpu.memory_space<vmem>>, vector<8x128xf32>
      tpu.vector_store %arg6[%c0_124, %c0_125], %328 {strides = array<i32>} : memref<8x128xf32, #tpu.memory_space<vmem>>, vector<8x128xf32>,
      %cst_126 = arith.constant 0.000000e+00 : f32
      %330 = vector.broadcast %cst_126 : f32 to vector<8x128xf32>
      %c0_127 = arith.constant 0 : index
      %c0_128 = arith.constant 0 : index
      %331 = vector.load %arg4[%c0_127, %c0_128] : memref<8x128xf32, #tpu.memory_space<vmem>>, vector<8x128xf32>
      tpu.vector_store %arg4[%c0_127, %c0_128], %330 {strides = array<i32>} : memref<8x128xf32, #tpu.memory_space<vmem>>, vector<8x128xf32>,
    } else {
    }
    %c0 = arith.constant 0 : index
    %c0_1 = arith.constant 0 : index
    %3 = vector.load %arg3[%c0, %c0_1] : memref<128x512xbf16, #tpu.memory_space<vmem>>, vector<128x512xbf16>
    %c0_2 = arith.constant 0 : index
    %c0_3 = arith.constant 0 : index
    %4 = vector.load %arg5[%c0_2, %c0_3] : memref<8x128xf32, #tpu.memory_space<vmem>>, vector<8x128xf32>
    %c0_4 = arith.constant 0 : index
    %c0_5 = arith.constant 0 : index
    %5 = vector.load %arg6[%c0_4, %c0_5] : memref<8x128xf32, #tpu.memory_space<vmem>>, vector<8x128xf32>
    %cst = arith.constant 0.000000e+00 : f32
    %6 = vector.broadcast %cst : f32 to vector<8x128xf32>
    %c0_i32_6 = arith.constant 0 : i32
    %c7_i32 = arith.constant 7 : i32
    %7 = arith.subi %c7_i32, %c0_i32_6 : i32
    %8 = arith.index_cast %7 : i32 to index
    %c0_7 = arith.constant 0 : index
    %c0_8 = arith.constant 0 : index
    %9 = vector.load %arg2[%8, %c0_7, %c0_8] : memref<8x8x512xf32, #tpu.memory_space<vmem>>, vector<1x8x512xf32>
    %10 = vector.shape_cast %9 : vector<1x8x512xf32> to vector<8x512xf32>
    %11 = arith.truncf %4 : vector<8x128xf32> to vector<8x128xbf16>
    %cst_9 = arith.constant dense<0.000000e+00> : vector<8x512xf32>
    %12 = tpu.matmul %11, %3, %cst_9 {dimension_numbers = #tpu.dot_dimension_numbers<[1], [0], [0], [1], [0, 0, 1, 1], [], []>} : vector<8x128xbf16>, vector<128x512xbf16>, vector<8x512xf32> -> vector<8x512xf32>
    %13 = arith.addf %10, %12 : vector<8x512xf32>
    %14 = vector.extract_strided_slice %13 {offsets = [0, 0], sizes = [8, 128], strides = [1, 1]} : vector<8x512xf32> to vector<8x128xf32>
    %cst_10 = arith.constant 5.000000e-01 : f32
    %15 = vector.broadcast %cst_10 : f32 to vector<8x128xf32>
    %16 = arith.mulf %15, %14 : vector<8x128xf32>
    %17 = math.tanh %16 : vector<8x128xf32>
    %cst_11 = arith.constant 1.000000e+00 : f32
    %18 = vector.broadcast %cst_11 : f32 to vector<8x128xf32>
    %19 = arith.addf %17, %18 : vector<8x128xf32>
    %cst_12 = arith.constant 5.000000e-01 : f32
    %20 = vector.broadcast %cst_12 : f32 to vector<8x128xf32>
    %21 = arith.mulf %20, %19 : vector<8x128xf32>
    %22 = vector.extract_strided_slice %13 {offsets = [0, 128], sizes = [8, 128], strides = [1, 1]} : vector<8x512xf32> to vector<8x128xf32>
    %cst_13 = arith.constant 5.000000e-01 : f32
    %23 = vector.broadcast %cst_13 : f32 to vector<8x128xf32>
    %24 = arith.mulf %23, %22 : vector<8x128xf32>
    %25 = math.tanh %24 : vector<8x128xf32>
    %cst_14 = arith.constant 1.000000e+00 : f32
    %26 = vector.broadcast %cst_14 : f32 to vector<8x128xf32>
    %27 = arith.addf %25, %26 : vector<8x128xf32>
    %cst_15 = arith.constant 5.000000e-01 : f32
    %28 = vector.broadcast %cst_15 : f32 to vector<8x128xf32>
    %29 = arith.mulf %28, %27 : vector<8x128xf32>
    %30 = vector.extract_strided_slice %13 {offsets = [0, 256], sizes = [8, 128], strides = [1, 1]} : vector<8x512xf32> to vector<8x128xf32>
    %31 = math.tanh %30 : vector<8x128xf32>
    %32 = vector.extract_strided_slice %13 {offsets = [0, 384], sizes = [8, 128], strides = [1, 1]} : vector<8x512xf32> to vector<8x128xf32>
    %cst_16 = arith.constant 5.000000e-01 : f32
    %33 = vector.broadcast %cst_16 : f32 to vector<8x128xf32>
    %34 = arith.mulf %33, %32 : vector<8x128xf32>
    %35 = math.tanh %34 : vector<8x128xf32>
    %cst_17 = arith.constant 1.000000e+00 : f32
    %36 = vector.broadcast %cst_17 : f32 to vector<8x128xf32>
    %37 = arith.addf %35, %36 : vector<8x128xf32>
    %cst_18 = arith.constant 5.000000e-01 : f32
    %38 = vector.broadcast %cst_18 : f32 to vector<8x128xf32>
    %39 = arith.mulf %38, %37 : vector<8x128xf32>
    %40 = arith.mulf %29, %5 : vector<8x128xf32>
    %41 = arith.mulf %21, %31 : vector<8x128xf32>
    %42 = arith.addf %40, %41 : vector<8x128xf32>
    %43 = math.tanh %42 : vector<8x128xf32>
    %44 = arith.mulf %39, %43 : vector<8x128xf32>
    %45 = arith.addf %6, %44 : vector<8x128xf32>
    %c1_i32 = arith.constant 1 : i32
    %c7_i32_19 = arith.constant 7 : i32
    %46 = arith.subi %c7_i32_19, %c1_i32 : i32
    %47 = arith.index_cast %46 : i32 to index
    %c0_20 = arith.constant 0 : index
    %c0_21 = arith.constant 0 : index
    %48 = vector.load %arg2[%47, %c0_20, %c0_21] : memref<8x8x512xf32, #tpu.memory_space<vmem>>, vector<1x8x512xf32>
    %49 = vector.shape_cast %48 : vector<1x8x512xf32> to vector<8x512xf32>
    %50 = arith.truncf %44 : vector<8x128xf32> to vector<8x128xbf16>
    %cst_22 = arith.constant dense<0.000000e+00> : vector<8x512xf32>
    %51 = tpu.matmul %50, %3, %cst_22 {dimension_numbers = #tpu.dot_dimension_numbers<[1], [0], [0], [1], [0, 0, 1, 1], [], []>} : vector<8x128xbf16>, vector<128x512xbf16>, vector<8x512xf32> -> vector<8x512xf32>
    %52 = arith.addf %49, %51 : vector<8x512xf32>
    %53 = vector.extract_strided_slice %52 {offsets = [0, 0], sizes = [8, 128], strides = [1, 1]} : vector<8x512xf32> to vector<8x128xf32>
    %cst_23 = arith.constant 5.000000e-01 : f32
    %54 = vector.broadcast %cst_23 : f32 to vector<8x128xf32>
    %55 = arith.mulf %54, %53 : vector<8x128xf32>
    %56 = math.tanh %55 : vector<8x128xf32>
    %cst_24 = arith.constant 1.000000e+00 : f32
    %57 = vector.broadcast %cst_24 : f32 to vector<8x128xf32>
    %58 = arith.addf %56, %57 : vector<8x128xf32>
    %cst_25 = arith.constant 5.000000e-01 : f32
    %59 = vector.broadcast %cst_25 : f32 to vector<8x128xf32>
    %60 = arith.mulf %59, %58 : vector<8x128xf32>
    %61 = vector.extract_strided_slice %52 {offsets = [0, 128], sizes = [8, 128], strides = [1, 1]} : vector<8x512xf32> to vector<8x128xf32>
    %cst_26 = arith.constant 5.000000e-01 : f32
    %62 = vector.broadcast %cst_26 : f32 to vector<8x128xf32>
    %63 = arith.mulf %62, %61 : vector<8x128xf32>
    %64 = math.tanh %63 : vector<8x128xf32>
    %cst_27 = arith.constant 1.000000e+00 : f32
    %65 = vector.broadcast %cst_27 : f32 to vector<8x128xf32>
    %66 = arith.addf %64, %65 : vector<8x128xf32>
    %cst_28 = arith.constant 5.000000e-01 : f32
    %67 = vector.broadcast %cst_28 : f32 to vector<8x128xf32>
    %68 = arith.mulf %67, %66 : vector<8x128xf32>
    %69 = vector.extract_strided_slice %52 {offsets = [0, 256], sizes = [8, 128], strides = [1, 1]} : vector<8x512xf32> to vector<8x128xf32>
    %70 = math.tanh %69 : vector<8x128xf32>
    %71 = vector.extract_strided_slice %52 {offsets = [0, 384], sizes = [8, 128], strides = [1, 1]} : vector<8x512xf32> to vector<8x128xf32>
    %cst_29 = arith.constant 5.000000e-01 : f32
    %72 = vector.broadcast %cst_29 : f32 to vector<8x128xf32>
    %73 = arith.mulf %72, %71 : vector<8x128xf32>
    %74 = math.tanh %73 : vector<8x128xf32>
    %cst_30 = arith.constant 1.000000e+00 : f32
    %75 = vector.broadcast %cst_30 : f32 to vector<8x128xf32>
    %76 = arith.addf %74, %75 : vector<8x128xf32>
    %cst_31 = arith.constant 5.000000e-01 : f32
    %77 = vector.broadcast %cst_31 : f32 to vector<8x128xf32>
    %78 = arith.mulf %77, %76 : vector<8x128xf32>
    %79 = arith.mulf %68, %42 : vector<8x128xf32>
    %80 = arith.mulf %60, %70 : vector<8x128xf32>
    %81 = arith.addf %79, %80 : vector<8x128xf32>
    %82 = math.tanh %81 : vector<8x128xf32>
    %83 = arith.mulf %78, %82 : vector<8x128xf32>
    %84 = arith.addf %45, %83 : vector<8x128xf32>
    %c2_i32 = arith.constant 2 : i32
    %c7_i32_32 = arith.constant 7 : i32
    %85 = arith.subi %c7_i32_32, %c2_i32 : i32
    %86 = arith.index_cast %85 : i32 to index
    %c0_33 = arith.constant 0 : index
    %c0_34 = arith.constant 0 : index
    %87 = vector.load %arg2[%86, %c0_33, %c0_34] : memref<8x8x512xf32, #tpu.memory_space<vmem>>, vector<1x8x512xf32>
    %88 = vector.shape_cast %87 : vector<1x8x512xf32> to vector<8x512xf32>
    %89 = arith.truncf %83 : vector<8x128xf32> to vector<8x128xbf16>
    %cst_35 = arith.constant dense<0.000000e+00> : vector<8x512xf32>
    %90 = tpu.matmul %89, %3, %cst_35 {dimension_numbers = #tpu.dot_dimension_numbers<[1], [0], [0], [1], [0, 0, 1, 1], [], []>} : vector<8x128xbf16>, vector<128x512xbf16>, vector<8x512xf32> -> vector<8x512xf32>
    %91 = arith.addf %88, %90 : vector<8x512xf32>
    %92 = vector.extract_strided_slice %91 {offsets = [0, 0], sizes = [8, 128], strides = [1, 1]} : vector<8x512xf32> to vector<8x128xf32>
    %cst_36 = arith.constant 5.000000e-01 : f32
    %93 = vector.broadcast %cst_36 : f32 to vector<8x128xf32>
    %94 = arith.mulf %93, %92 : vector<8x128xf32>
    %95 = math.tanh %94 : vector<8x128xf32>
    %cst_37 = arith.constant 1.000000e+00 : f32
    %96 = vector.broadcast %cst_37 : f32 to vector<8x128xf32>
    %97 = arith.addf %95, %96 : vector<8x128xf32>
    %cst_38 = arith.constant 5.000000e-01 : f32
    %98 = vector.broadcast %cst_38 : f32 to vector<8x128xf32>
    %99 = arith.mulf %98, %97 : vector<8x128xf32>
    %100 = vector.extract_strided_slice %91 {offsets = [0, 128], sizes = [8, 128], strides = [1, 1]} : vector<8x512xf32> to vector<8x128xf32>
    %cst_39 = arith.constant 5.000000e-01 : f32
    %101 = vector.broadcast %cst_39 : f32 to vector<8x128xf32>
    %102 = arith.mulf %101, %100 : vector<8x128xf32>
    %103 = math.tanh %102 : vector<8x128xf32>
    %cst_40 = arith.constant 1.000000e+00 : f32
    %104 = vector.broadcast %cst_40 : f32 to vector<8x128xf32>
    %105 = arith.addf %103, %104 : vector<8x128xf32>
    %cst_41 = arith.constant 5.000000e-01 : f32
    %106 = vector.broadcast %cst_41 : f32 to vector<8x128xf32>
    %107 = arith.mulf %106, %105 : vector<8x128xf32>
    %108 = vector.extract_strided_slice %91 {offsets = [0, 256], sizes = [8, 128], strides = [1, 1]} : vector<8x512xf32> to vector<8x128xf32>
    %109 = math.tanh %108 : vector<8x128xf32>
    %110 = vector.extract_strided_slice %91 {offsets = [0, 384], sizes = [8, 128], strides = [1, 1]} : vector<8x512xf32> to vector<8x128xf32>
    %cst_42 = arith.constant 5.000000e-01 : f32
    %111 = vector.broadcast %cst_42 : f32 to vector<8x128xf32>
    %112 = arith.mulf %111, %110 : vector<8x128xf32>
    %113 = math.tanh %112 : vector<8x128xf32>
    %cst_43 = arith.constant 1.000000e+00 : f32
    %114 = vector.broadcast %cst_43 : f32 to vector<8x128xf32>
    %115 = arith.addf %113, %114 : vector<8x128xf32>
    %cst_44 = arith.constant 5.000000e-01 : f32
    %116 = vector.broadcast %cst_44 : f32 to vector<8x128xf32>
    %117 = arith.mulf %116, %115 : vector<8x128xf32>
    %118 = arith.mulf %107, %81 : vector<8x128xf32>
    %119 = arith.mulf %99, %109 : vector<8x128xf32>
    %120 = arith.addf %118, %119 : vector<8x128xf32>
    %121 = math.tanh %120 : vector<8x128xf32>
    %122 = arith.mulf %117, %121 : vector<8x128xf32>
    %123 = arith.addf %84, %122 : vector<8x128xf32>
    %c3_i32 = arith.constant 3 : i32
    %c7_i32_45 = arith.constant 7 : i32
    %124 = arith.subi %c7_i32_45, %c3_i32 : i32
    %125 = arith.index_cast %124 : i32 to index
    %c0_46 = arith.constant 0 : index
    %c0_47 = arith.constant 0 : index
    %126 = vector.load %arg2[%125, %c0_46, %c0_47] : memref<8x8x512xf32, #tpu.memory_space<vmem>>, vector<1x8x512xf32>
    %127 = vector.shape_cast %126 : vector<1x8x512xf32> to vector<8x512xf32>
    %128 = arith.truncf %122 : vector<8x128xf32> to vector<8x128xbf16>
    %cst_48 = arith.constant dense<0.000000e+00> : vector<8x512xf32>
    %129 = tpu.matmul %128, %3, %cst_48 {dimension_numbers = #tpu.dot_dimension_numbers<[1], [0], [0], [1], [0, 0, 1, 1], [], []>} : vector<8x128xbf16>, vector<128x512xbf16>, vector<8x512xf32> -> vector<8x512xf32>
    %130 = arith.addf %127, %129 : vector<8x512xf32>
    %131 = vector.extract_strided_slice %130 {offsets = [0, 0], sizes = [8, 128], strides = [1, 1]} : vector<8x512xf32> to vector<8x128xf32>
    %cst_49 = arith.constant 5.000000e-01 : f32
    %132 = vector.broadcast %cst_49 : f32 to vector<8x128xf32>
    %133 = arith.mulf %132, %131 : vector<8x128xf32>
    %134 = math.tanh %133 : vector<8x128xf32>
    %cst_50 = arith.constant 1.000000e+00 : f32
    %135 = vector.broadcast %cst_50 : f32 to vector<8x128xf32>
    %136 = arith.addf %134, %135 : vector<8x128xf32>
    %cst_51 = arith.constant 5.000000e-01 : f32
    %137 = vector.broadcast %cst_51 : f32 to vector<8x128xf32>
    %138 = arith.mulf %137, %136 : vector<8x128xf32>
    %139 = vector.extract_strided_slice %130 {offsets = [0, 128], sizes = [8, 128], strides = [1, 1]} : vector<8x512xf32> to vector<8x128xf32>
    %cst_52 = arith.constant 5.000000e-01 : f32
    %140 = vector.broadcast %cst_52 : f32 to vector<8x128xf32>
    %141 = arith.mulf %140, %139 : vector<8x128xf32>
    %142 = math.tanh %141 : vector<8x128xf32>
    %cst_53 = arith.constant 1.000000e+00 : f32
    %143 = vector.broadcast %cst_53 : f32 to vector<8x128xf32>
    %144 = arith.addf %142, %143 : vector<8x128xf32>
    %cst_54 = arith.constant 5.000000e-01 : f32
    %145 = vector.broadcast %cst_54 : f32 to vector<8x128xf32>
    %146 = arith.mulf %145, %144 : vector<8x128xf32>
    %147 = vector.extract_strided_slice %130 {offsets = [0, 256], sizes = [8, 128], strides = [1, 1]} : vector<8x512xf32> to vector<8x128xf32>
    %148 = math.tanh %147 : vector<8x128xf32>
    %149 = vector.extract_strided_slice %130 {offsets = [0, 384], sizes = [8, 128], strides = [1, 1]} : vector<8x512xf32> to vector<8x128xf32>
    %cst_55 = arith.constant 5.000000e-01 : f32
    %150 = vector.broadcast %cst_55 : f32 to vector<8x128xf32>
    %151 = arith.mulf %150, %149 : vector<8x128xf32>
    %152 = math.tanh %151 : vector<8x128xf32>
    %cst_56 = arith.constant 1.000000e+00 : f32
    %153 = vector.broadcast %cst_56 : f32 to vector<8x128xf32>
    %154 = arith.addf %152, %153 : vector<8x128xf32>
    %cst_57 = arith.constant 5.000000e-01 : f32
    %155 = vector.broadcast %cst_57 : f32 to vector<8x128xf32>
    %156 = arith.mulf %155, %154 : vector<8x128xf32>
    %157 = arith.mulf %146, %120 : vector<8x128xf32>
    %158 = arith.mulf %138, %148 : vector<8x128xf32>
    %159 = arith.addf %157, %158 : vector<8x128xf32>
    %160 = math.tanh %159 : vector<8x128xf32>
    %161 = arith.mulf %156, %160 : vector<8x128xf32>
    %162 = arith.addf %123, %161 : vector<8x128xf32>
    %c4_i32 = arith.constant 4 : i32
    %c7_i32_58 = arith.constant 7 : i32
    %163 = arith.subi %c7_i32_58, %c4_i32 : i32
    %164 = arith.index_cast %163 : i32 to index
    %c0_59 = arith.constant 0 : index
    %c0_60 = arith.constant 0 : index
    %165 = vector.load %arg2[%164, %c0_59, %c0_60] : memref<8x8x512xf32, #tpu.memory_space<vmem>>, vector<1x8x512xf32>
    %166 = vector.shape_cast %165 : vector<1x8x512xf32> to vector<8x512xf32>
    %167 = arith.truncf %161 : vector<8x128xf32> to vector<8x128xbf16>
    %cst_61 = arith.constant dense<0.000000e+00> : vector<8x512xf32>
    %168 = tpu.matmul %167, %3, %cst_61 {dimension_numbers = #tpu.dot_dimension_numbers<[1], [0], [0], [1], [0, 0, 1, 1], [], []>} : vector<8x128xbf16>, vector<128x512xbf16>, vector<8x512xf32> -> vector<8x512xf32>
    %169 = arith.addf %166, %168 : vector<8x512xf32>
    %170 = vector.extract_strided_slice %169 {offsets = [0, 0], sizes = [8, 128], strides = [1, 1]} : vector<8x512xf32> to vector<8x128xf32>
    %cst_62 = arith.constant 5.000000e-01 : f32
    %171 = vector.broadcast %cst_62 : f32 to vector<8x128xf32>
    %172 = arith.mulf %171, %170 : vector<8x128xf32>
    %173 = math.tanh %172 : vector<8x128xf32>
    %cst_63 = arith.constant 1.000000e+00 : f32
    %174 = vector.broadcast %cst_63 : f32 to vector<8x128xf32>
    %175 = arith.addf %173, %174 : vector<8x128xf32>
    %cst_64 = arith.constant 5.000000e-01 : f32
    %176 = vector.broadcast %cst_64 : f32 to vector<8x128xf32>
    %177 = arith.mulf %176, %175 : vector<8x128xf32>
    %178 = vector.extract_strided_slice %169 {offsets = [0, 128], sizes = [8, 128], strides = [1, 1]} : vector<8x512xf32> to vector<8x128xf32>
    %cst_65 = arith.constant 5.000000e-01 : f32
    %179 = vector.broadcast %cst_65 : f32 to vector<8x128xf32>
    %180 = arith.mulf %179, %178 : vector<8x128xf32>
    %181 = math.tanh %180 : vector<8x128xf32>
    %cst_66 = arith.constant 1.000000e+00 : f32
    %182 = vector.broadcast %cst_66 : f32 to vector<8x128xf32>
    %183 = arith.addf %181, %182 : vector<8x128xf32>
    %cst_67 = arith.constant 5.000000e-01 : f32
    %184 = vector.broadcast %cst_67 : f32 to vector<8x128xf32>
    %185 = arith.mulf %184, %183 : vector<8x128xf32>
    %186 = vector.extract_strided_slice %169 {offsets = [0, 256], sizes = [8, 128], strides = [1, 1]} : vector<8x512xf32> to vector<8x128xf32>
    %187 = math.tanh %186 : vector<8x128xf32>
    %188 = vector.extract_strided_slice %169 {offsets = [0, 384], sizes = [8, 128], strides = [1, 1]} : vector<8x512xf32> to vector<8x128xf32>
    %cst_68 = arith.constant 5.000000e-01 : f32
    %189 = vector.broadcast %cst_68 : f32 to vector<8x128xf32>
    %190 = arith.mulf %189, %188 : vector<8x128xf32>
    %191 = math.tanh %190 : vector<8x128xf32>
    %cst_69 = arith.constant 1.000000e+00 : f32
    %192 = vector.broadcast %cst_69 : f32 to vector<8x128xf32>
    %193 = arith.addf %191, %192 : vector<8x128xf32>
    %cst_70 = arith.constant 5.000000e-01 : f32
    %194 = vector.broadcast %cst_70 : f32 to vector<8x128xf32>
    %195 = arith.mulf %194, %193 : vector<8x128xf32>
    %196 = arith.mulf %185, %159 : vector<8x128xf32>
    %197 = arith.mulf %177, %187 : vector<8x128xf32>
    %198 = arith.addf %196, %197 : vector<8x128xf32>
    %199 = math.tanh %198 : vector<8x128xf32>
    %200 = arith.mulf %195, %199 : vector<8x128xf32>
    %201 = arith.addf %162, %200 : vector<8x128xf32>
    %c5_i32 = arith.constant 5 : i32
    %c7_i32_71 = arith.constant 7 : i32
    %202 = arith.subi %c7_i32_71, %c5_i32 : i32
    %203 = arith.index_cast %202 : i32 to index
    %c0_72 = arith.constant 0 : index
    %c0_73 = arith.constant 0 : index
    %204 = vector.load %arg2[%203, %c0_72, %c0_73] : memref<8x8x512xf32, #tpu.memory_space<vmem>>, vector<1x8x512xf32>
    %205 = vector.shape_cast %204 : vector<1x8x512xf32> to vector<8x512xf32>
    %206 = arith.truncf %200 : vector<8x128xf32> to vector<8x128xbf16>
    %cst_74 = arith.constant dense<0.000000e+00> : vector<8x512xf32>
    %207 = tpu.matmul %206, %3, %cst_74 {dimension_numbers = #tpu.dot_dimension_numbers<[1], [0], [0], [1], [0, 0, 1, 1], [], []>} : vector<8x128xbf16>, vector<128x512xbf16>, vector<8x512xf32> -> vector<8x512xf32>
    %208 = arith.addf %205, %207 : vector<8x512xf32>
    %209 = vector.extract_strided_slice %208 {offsets = [0, 0], sizes = [8, 128], strides = [1, 1]} : vector<8x512xf32> to vector<8x128xf32>
    %cst_75 = arith.constant 5.000000e-01 : f32
    %210 = vector.broadcast %cst_75 : f32 to vector<8x128xf32>
    %211 = arith.mulf %210, %209 : vector<8x128xf32>
    %212 = math.tanh %211 : vector<8x128xf32>
    %cst_76 = arith.constant 1.000000e+00 : f32
    %213 = vector.broadcast %cst_76 : f32 to vector<8x128xf32>
    %214 = arith.addf %212, %213 : vector<8x128xf32>
    %cst_77 = arith.constant 5.000000e-01 : f32
    %215 = vector.broadcast %cst_77 : f32 to vector<8x128xf32>
    %216 = arith.mulf %215, %214 : vector<8x128xf32>
    %217 = vector.extract_strided_slice %208 {offsets = [0, 128], sizes = [8, 128], strides = [1, 1]} : vector<8x512xf32> to vector<8x128xf32>
    %cst_78 = arith.constant 5.000000e-01 : f32
    %218 = vector.broadcast %cst_78 : f32 to vector<8x128xf32>
    %219 = arith.mulf %218, %217 : vector<8x128xf32>
    %220 = math.tanh %219 : vector<8x128xf32>
    %cst_79 = arith.constant 1.000000e+00 : f32
    %221 = vector.broadcast %cst_79 : f32 to vector<8x128xf32>
    %222 = arith.addf %220, %221 : vector<8x128xf32>
    %cst_80 = arith.constant 5.000000e-01 : f32
    %223 = vector.broadcast %cst_80 : f32 to vector<8x128xf32>
    %224 = arith.mulf %223, %222 : vector<8x128xf32>
    %225 = vector.extract_strided_slice %208 {offsets = [0, 256], sizes = [8, 128], strides = [1, 1]} : vector<8x512xf32> to vector<8x128xf32>
    %226 = math.tanh %225 : vector<8x128xf32>
    %227 = vector.extract_strided_slice %208 {offsets = [0, 384], sizes = [8, 128], strides = [1, 1]} : vector<8x512xf32> to vector<8x128xf32>
    %cst_81 = arith.constant 5.000000e-01 : f32
    %228 = vector.broadcast %cst_81 : f32 to vector<8x128xf32>
    %229 = arith.mulf %228, %227 : vector<8x128xf32>
    %230 = math.tanh %229 : vector<8x128xf32>
    %cst_82 = arith.constant 1.000000e+00 : f32
    %231 = vector.broadcast %cst_82 : f32 to vector<8x128xf32>
    %232 = arith.addf %230, %231 : vector<8x128xf32>
    %cst_83 = arith.constant 5.000000e-01 : f32
    %233 = vector.broadcast %cst_83 : f32 to vector<8x128xf32>
    %234 = arith.mulf %233, %232 : vector<8x128xf32>
    %235 = arith.mulf %224, %198 : vector<8x128xf32>
    %236 = arith.mulf %216, %226 : vector<8x128xf32>
    %237 = arith.addf %235, %236 : vector<8x128xf32>
    %238 = math.tanh %237 : vector<8x128xf32>
    %239 = arith.mulf %234, %238 : vector<8x128xf32>
    %240 = arith.addf %201, %239 : vector<8x128xf32>
    %c6_i32 = arith.constant 6 : i32
    %c7_i32_84 = arith.constant 7 : i32
    %241 = arith.subi %c7_i32_84, %c6_i32 : i32
    %242 = arith.index_cast %241 : i32 to index
    %c0_85 = arith.constant 0 : index
    %c0_86 = arith.constant 0 : index
    %243 = vector.load %arg2[%242, %c0_85, %c0_86] : memref<8x8x512xf32, #tpu.memory_space<vmem>>, vector<1x8x512xf32>
    %244 = vector.shape_cast %243 : vector<1x8x512xf32> to vector<8x512xf32>
    %245 = arith.truncf %239 : vector<8x128xf32> to vector<8x128xbf16>
    %cst_87 = arith.constant dense<0.000000e+00> : vector<8x512xf32>
    %246 = tpu.matmul %245, %3, %cst_87 {dimension_numbers = #tpu.dot_dimension_numbers<[1], [0], [0], [1], [0, 0, 1, 1], [], []>} : vector<8x128xbf16>, vector<128x512xbf16>, vector<8x512xf32> -> vector<8x512xf32>
    %247 = arith.addf %244, %246 : vector<8x512xf32>
    %248 = vector.extract_strided_slice %247 {offsets = [0, 0], sizes = [8, 128], strides = [1, 1]} : vector<8x512xf32> to vector<8x128xf32>
    %cst_88 = arith.constant 5.000000e-01 : f32
    %249 = vector.broadcast %cst_88 : f32 to vector<8x128xf32>
    %250 = arith.mulf %249, %248 : vector<8x128xf32>
    %251 = math.tanh %250 : vector<8x128xf32>
    %cst_89 = arith.constant 1.000000e+00 : f32
    %252 = vector.broadcast %cst_89 : f32 to vector<8x128xf32>
    %253 = arith.addf %251, %252 : vector<8x128xf32>
    %cst_90 = arith.constant 5.000000e-01 : f32
    %254 = vector.broadcast %cst_90 : f32 to vector<8x128xf32>
    %255 = arith.mulf %254, %253 : vector<8x128xf32>
    %256 = vector.extract_strided_slice %247 {offsets = [0, 128], sizes = [8, 128], strides = [1, 1]} : vector<8x512xf32> to vector<8x128xf32>
    %cst_91 = arith.constant 5.000000e-01 : f32
    %257 = vector.broadcast %cst_91 : f32 to vector<8x128xf32>
    %258 = arith.mulf %257, %256 : vector<8x128xf32>
    %259 = math.tanh %258 : vector<8x128xf32>
    %cst_92 = arith.constant 1.000000e+00 : f32
    %260 = vector.broadcast %cst_92 : f32 to vector<8x128xf32>
    %261 = arith.addf %259, %260 : vector<8x128xf32>
    %cst_93 = arith.constant 5.000000e-01 : f32
    %262 = vector.broadcast %cst_93 : f32 to vector<8x128xf32>
    %263 = arith.mulf %262, %261 : vector<8x128xf32>
    %264 = vector.extract_strided_slice %247 {offsets = [0, 256], sizes = [8, 128], strides = [1, 1]} : vector<8x512xf32> to vector<8x128xf32>
    %265 = math.tanh %264 : vector<8x128xf32>
    %266 = vector.extract_strided_slice %247 {offsets = [0, 384], sizes = [8, 128], strides = [1, 1]} : vector<8x512xf32> to vector<8x128xf32>
    %cst_94 = arith.constant 5.000000e-01 : f32
    %267 = vector.broadcast %cst_94 : f32 to vector<8x128xf32>
    %268 = arith.mulf %267, %266 : vector<8x128xf32>
    %269 = math.tanh %268 : vector<8x128xf32>
    %cst_95 = arith.constant 1.000000e+00 : f32
    %270 = vector.broadcast %cst_95 : f32 to vector<8x128xf32>
    %271 = arith.addf %269, %270 : vector<8x128xf32>
    %cst_96 = arith.constant 5.000000e-01 : f32
    %272 = vector.broadcast %cst_96 : f32 to vector<8x128xf32>
    %273 = arith.mulf %272, %271 : vector<8x128xf32>
    %274 = arith.mulf %263, %237 : vector<8x128xf32>
    %275 = arith.mulf %255, %265 : vector<8x128xf32>
    %276 = arith.addf %274, %275 : vector<8x128xf32>
    %277 = math.tanh %276 : vector<8x128xf32>
    %278 = arith.mulf %273, %277 : vector<8x128xf32>
    %279 = arith.addf %240, %278 : vector<8x128xf32>
    %c7_i32_97 = arith.constant 7 : i32
    %c7_i32_98 = arith.constant 7 : i32
    %280 = arith.subi %c7_i32_98, %c7_i32_97 : i32
    %281 = arith.index_cast %280 : i32 to index
    %c0_99 = arith.constant 0 : index
    %c0_100 = arith.constant 0 : index
    %282 = vector.load %arg2[%281, %c0_99, %c0_100] : memref<8x8x512xf32, #tpu.memory_space<vmem>>, vector<1x8x512xf32>
    %283 = vector.shape_cast %282 : vector<1x8x512xf32> to vector<8x512xf32>
    %284 = arith.truncf %278 : vector<8x128xf32> to vector<8x128xbf16>
    %cst_101 = arith.constant dense<0.000000e+00> : vector<8x512xf32>
    %285 = tpu.matmul %284, %3, %cst_101 {dimension_numbers = #tpu.dot_dimension_numbers<[1], [0], [0], [1], [0, 0, 1, 1], [], []>} : vector<8x128xbf16>, vector<128x512xbf16>, vector<8x512xf32> -> vector<8x512xf32>
    %286 = arith.addf %283, %285 : vector<8x512xf32>
    %287 = vector.extract_strided_slice %286 {offsets = [0, 0], sizes = [8, 128], strides = [1, 1]} : vector<8x512xf32> to vector<8x128xf32>
    %cst_102 = arith.constant 5.000000e-01 : f32
    %288 = vector.broadcast %cst_102 : f32 to vector<8x128xf32>
    %289 = arith.mulf %288, %287 : vector<8x128xf32>
    %290 = math.tanh %289 : vector<8x128xf32>
    %cst_103 = arith.constant 1.000000e+00 : f32
    %291 = vector.broadcast %cst_103 : f32 to vector<8x128xf32>
    %292 = arith.addf %290, %291 : vector<8x128xf32>
    %cst_104 = arith.constant 5.000000e-01 : f32
    %293 = vector.broadcast %cst_104 : f32 to vector<8x128xf32>
    %294 = arith.mulf %293, %292 : vector<8x128xf32>
    %295 = vector.extract_strided_slice %286 {offsets = [0, 128], sizes = [8, 128], strides = [1, 1]} : vector<8x512xf32> to vector<8x128xf32>
    %cst_105 = arith.constant 5.000000e-01 : f32
    %296 = vector.broadcast %cst_105 : f32 to vector<8x128xf32>
    %297 = arith.mulf %296, %295 : vector<8x128xf32>
    %298 = math.tanh %297 : vector<8x128xf32>
    %cst_106 = arith.constant 1.000000e+00 : f32
    %299 = vector.broadcast %cst_106 : f32 to vector<8x128xf32>
    %300 = arith.addf %298, %299 : vector<8x128xf32>
    %cst_107 = arith.constant 5.000000e-01 : f32
    %301 = vector.broadcast %cst_107 : f32 to vector<8x128xf32>
    %302 = arith.mulf %301, %300 : vector<8x128xf32>
    %303 = vector.extract_strided_slice %286 {offsets = [0, 256], sizes = [8, 128], strides = [1, 1]} : vector<8x512xf32> to vector<8x128xf32>
    %304 = math.tanh %303 : vector<8x128xf32>
    %305 = vector.extract_strided_slice %286 {offsets = [0, 384], sizes = [8, 128], strides = [1, 1]} : vector<8x512xf32> to vector<8x128xf32>
    %cst_108 = arith.constant 5.000000e-01 : f32
    %306 = vector.broadcast %cst_108 : f32 to vector<8x128xf32>
    %307 = arith.mulf %306, %305 : vector<8x128xf32>
    %308 = math.tanh %307 : vector<8x128xf32>
    %cst_109 = arith.constant 1.000000e+00 : f32
    %309 = vector.broadcast %cst_109 : f32 to vector<8x128xf32>
    %310 = arith.addf %308, %309 : vector<8x128xf32>
    %cst_110 = arith.constant 5.000000e-01 : f32
    %311 = vector.broadcast %cst_110 : f32 to vector<8x128xf32>
    %312 = arith.mulf %311, %310 : vector<8x128xf32>
    %313 = arith.mulf %302, %276 : vector<8x128xf32>
    %314 = arith.mulf %294, %304 : vector<8x128xf32>
    %315 = arith.addf %313, %314 : vector<8x128xf32>
    %316 = math.tanh %315 : vector<8x128xf32>
    %317 = arith.mulf %312, %316 : vector<8x128xf32>
    %318 = arith.addf %279, %317 : vector<8x128xf32>
    %c8_i32 = arith.constant 8 : i32
    %c0_111 = arith.constant 0 : index
    %c0_112 = arith.constant 0 : index
    %319 = vector.load %arg5[%c0_111, %c0_112] : memref<8x128xf32, #tpu.memory_space<vmem>>, vector<8x128xf32>
    tpu.vector_store %arg5[%c0_111, %c0_112], %317 {strides = array<i32>} : memref<8x128xf32, #tpu.memory_space<vmem>>, vector<8x128xf32>,
    %c0_113 = arith.constant 0 : index
    %c0_114 = arith.constant 0 : index
    %320 = vector.load %arg6[%c0_113, %c0_114] : memref<8x128xf32, #tpu.memory_space<vmem>>, vector<8x128xf32>
    tpu.vector_store %arg6[%c0_113, %c0_114], %315 {strides = array<i32>} : memref<8x128xf32, #tpu.memory_space<vmem>>, vector<8x128xf32>,
    %c0_115 = arith.constant 0 : index
    %c0_116 = arith.constant 0 : index
    %321 = vector.load %arg4[%c0_115, %c0_116] : memref<8x128xf32, #tpu.memory_space<vmem>>, vector<8x128xf32>
    %cst_117 = arith.constant 6.250000e-02 : f32
    %322 = vector.broadcast %cst_117 : f32 to vector<8x128xf32>
    %323 = arith.mulf %318, %322 : vector<8x128xf32>
    %324 = arith.addf %321, %323 : vector<8x128xf32>
    %c0_118 = arith.constant 0 : index
    %c0_119 = arith.constant 0 : index
    %325 = vector.load %arg4[%c0_118, %c0_119] : memref<8x128xf32, #tpu.memory_space<vmem>>, vector<8x128xf32>
    tpu.vector_store %arg4[%c0_118, %c0_119], %324 {strides = array<i32>} : memref<8x128xf32, #tpu.memory_space<vmem>>, vector<8x128xf32>,
    return
  }
  func.func @transform_0(%arg0: i32, %arg1: i32) -> (i32, i32, i32) {
    %c1_i32 = arith.constant 1 : i32
    %0 = arith.subi %c1_i32, %arg1 : i32
    %c0_i32 = arith.constant 0 : i32
    %c0_i32_0 = arith.constant 0 : i32
    return %0, %arg0, %c0_i32 : i32, i32, i32
  }
  func.func @transform_1(%arg0: i32, %arg1: i32) -> (i32, i32) {
    %c0_i32 = arith.constant 0 : i32
    %c0_i32_0 = arith.constant 0 : i32
    %c0_i32_1 = arith.constant 0 : i32
    return %c0_i32, %c0_i32_0 : i32, i32
  }
  func.func @transform_2(%arg0: i32, %arg1: i32) -> (i32, i32) {
    %c0_i32 = arith.constant 0 : i32
    %c0_i32_0 = arith.constant 0 : i32
    return %arg0, %c0_i32 : i32, i32
  }
}

module attributes {stable_mosaic.version = 11 : i64} {
  func.func @_head_kernel(%arg0: memref<8x256xf32, #tpu.memory_space<vmem>>, %arg1: memref<256x64xbf16, #tpu.memory_space<vmem>>, %arg2: memref<1x64xf32, #tpu.memory_space<vmem>>, %arg3: memref<64x10xbf16, #tpu.memory_space<vmem>>, %arg4: memref<1x10xf32, #tpu.memory_space<vmem>>, %arg5: memref<8x10xf32, #tpu.memory_space<vmem>>) attributes {dimension_semantics = [], scalar_prefetch = 0 : i64, scratch_operands = 0 : i64, tpu.core_type = #tpu.core_type<tc>} {
    %c0 = arith.constant 0 : index
    %c0_0 = arith.constant 0 : index
    %0 = vector.load %arg0[%c0, %c0_0] : memref<8x256xf32, #tpu.memory_space<vmem>>, vector<8x256xf32>
    %1 = arith.truncf %0 : vector<8x256xf32> to vector<8x256xbf16>
    %c0_1 = arith.constant 0 : index
    %c0_2 = arith.constant 0 : index
    %2 = vector.load %arg1[%c0_1, %c0_2] : memref<256x64xbf16, #tpu.memory_space<vmem>>, vector<256x64xbf16>
    %cst = arith.constant dense<0.000000e+00> : vector<8x64xf32>
    %3 = tpu.matmul %1, %2, %cst {dimension_numbers = #tpu.dot_dimension_numbers<[1], [0], [0], [1], [0, 0, 1, 1], [], []>} : vector<8x256xbf16>, vector<256x64xbf16>, vector<8x64xf32> -> vector<8x64xf32>
    %c0_3 = arith.constant 0 : index
    %c0_4 = arith.constant 0 : index
    %4 = vector.load %arg2[%c0_3, %c0_4] : memref<1x64xf32, #tpu.memory_space<vmem>>, vector<1x64xf32>
    %5 = vector.broadcast %4 : vector<1x64xf32> to vector<8x64xf32>
    %6 = arith.addf %3, %5 : vector<8x64xf32>
    %cst_5 = arith.constant 0.000000e+00 : f32
    %7 = vector.broadcast %cst_5 : f32 to vector<8x64xf32>
    %8 = arith.maximumf %6, %7 : vector<8x64xf32>
    %9 = arith.truncf %8 : vector<8x64xf32> to vector<8x64xbf16>
    %c0_6 = arith.constant 0 : index
    %c0_7 = arith.constant 0 : index
    %10 = vector.load %arg3[%c0_6, %c0_7] : memref<64x10xbf16, #tpu.memory_space<vmem>>, vector<64x10xbf16>
    %cst_8 = arith.constant dense<0.000000e+00> : vector<8x10xf32>
    %11 = tpu.matmul %9, %10, %cst_8 {dimension_numbers = #tpu.dot_dimension_numbers<[1], [0], [0], [1], [0, 0, 1, 1], [], []>} : vector<8x64xbf16>, vector<64x10xbf16>, vector<8x10xf32> -> vector<8x10xf32>
    %c0_9 = arith.constant 0 : index
    %c0_10 = arith.constant 0 : index
    %12 = vector.load %arg4[%c0_9, %c0_10] : memref<1x10xf32, #tpu.memory_space<vmem>>, vector<1x10xf32>
    %13 = vector.broadcast %12 : vector<1x10xf32> to vector<8x10xf32>
    %14 = arith.addf %11, %13 : vector<8x10xf32>
    %c0_11 = arith.constant 0 : index
    %c0_12 = arith.constant 0 : index
    %15 = vector.load %arg5[%c0_11, %c0_12] : memref<8x10xf32, #tpu.memory_space<vmem>>, vector<8x10xf32>
    tpu.vector_store %arg5[%c0_11, %c0_12], %14 {strides = array<i32>} : memref<8x10xf32, #tpu.memory_space<vmem>>, vector<8x10xf32>,
    return
  }
}

</mosaic_0001>

<bundles_post_ra>
// kernel: blstm_relu_forward.9
= control target key start
LH: loop header
LB: loop body
LE: loop exit
PB: predicated region body
PF: predicated region fallthrough
CT: control target
= control target key end

     0   :  { %v479_v1 = vmov 0   ;;  %vm117_vm0 = vcmask 130048   ;;  %v37_v13 = vlaneseq  ;;  %s819_s1 = inlined_call_operand.vmem [shape: bf16[16,512], index: 1, kind: input, shape index: {}]   ;;  %s820_s0 = inlined_call_operand.vmem [shape: bf16[128,16], index: 0, kind: input, shape index: {}]   ;;  %s821_s2 = inlined_call_operand.vmem [shape: f32[1,512], index: 2, kind: input, shape index: {}]   ;;  %s822_s3 = inlined_call_operand.vmem [shape: f32[128,512], index: 3, kind: output, shape index: {}]  }
   0x1   :  { %v465_v0 = vld [vmem:[%s819_s1 + $0x4] ss:$16 sps:$4 sm:$0xff]   ;;  %174 = vmatprep.mubr.bf16.mxu0 %v479_v1  ;;  %287 = vmatprep.mubr.bf16.mxu1 %v479_v1  ;;  %v467_v2 = vld [vmem:[%s819_s1 + $0xc] ss:$16 sps:$4 sm:$0xff]   ;;  %v469_v3 = vld [vmem:[%s819_s1] ss:$16 sps:$4 sm:$0xff]  }
   0x2   :  { %142 = vmatprep.subr.bf16.mxu0 %v465_v0  ;;  %v470_v4 = vld [vmem:[%s819_s1 + $0x8] ss:$16 sps:$4 sm:$0xff]   ;;  %255 = vmatprep.subr.bf16.mxu1 %v467_v2  ;;  %v471_v5 = vld [vmem:[%s820_s0] sm:$0xff]   ;;  %v473_v7 = vld [vmem:[%s820_s0 + $0x10] sm:$0xff]   ;;  %v38_v14 = vshrl.u32 %v37_v13, 7 }
   0x3   :  { %143 = vmatpush1.bf16.msra.mxu0 %v469_v3  ;;  %256 = vmatpush1.bf16.msra.mxu1 %v470_v4  ;;  %v472_v6 = vld [vmem:[%s820_s0 + $0x8] sm:$0xff]   ;;  %v474_v8 = vld [vmem:[%s820_s0 + $0x18] sm:$0xff]   ;;  %v475_v9 = vld [vmem:[%s820_s0 + $0x20] sm:$0xff]  }
   0x4   :  { %v476_v10 = vld [vmem:[%s820_s0 + $0x28] sm:$0xff]   ;;  %v477_v11 = vld [vmem:[%s820_s0 + $0x30] sm:$0xff]   ;;  %v478_v12 = vld [vmem:[%s820_s0 + $0x38] sm:$0xff]   ;;  %v39_v15 = vsub.s32 0, %v38_v14  ;;  %v47_v16 = vsub.s32 2, %v38_v14  ;;  %v43_v18 = vsub.s32 1, %v38_v14 }
   0x5   :  { %v35_v17 = vld [vmem:[%s821_s2] sm:$0xf]  ;;  %v51_v19 = vsub.s32 3, %v38_v14 }
   0x6   :  { %448 = vmatmul.mubr.msk.bf16.vlgmr.msra.gmra.mrb[0].mxu0 %vm117_vm0, %v471_v5  ;;  %456 = vmatmul.mubr.msk.bf16.vlgmr.msra.gmra.mrb[0].mxu1 %vm117_vm0, %v471_v5  ;;  %v555_v20 = vrot.slane %v35_v17, %v39_v15  ;;  %v557_v21 = vrot.slane %v35_v17, %v47_v16  ;;  %v559_v22 = vrot.slane %v35_v17, %v43_v18 }
   0x7   :  { %184 = vmatprep.mubr.bf16.mxu0 %v479_v1  ;;  %297 = vmatprep.mubr.bf16.mxu1 %v479_v1  ;;  %v561_v23 = vrot.slane %v35_v17, %v51_v19 }
   0xe   :  { %449 = vmatmul.mubr.msk.bf16.gmra.mrb[4].mxu0 %vm117_vm0, %v472_v6  ;;  %457 = vmatmul.mubr.msk.bf16.gmra.mrb[4].mxu1 %vm117_vm0, %v472_v6 }
   0xf   :  { %194 = vmatprep.mubr.bf16.mxu0 %v479_v1  ;;  %307 = vmatprep.mubr.bf16.mxu1 %v479_v1 }
  0x16   :  { %450 = vmatmul.mubr.msk.bf16.gmra.mrb[8].mxu0 %vm117_vm0, %v473_v7  ;;  %458 = vmatmul.mubr.msk.bf16.gmra.mrb[8].mxu1 %vm117_vm0, %v473_v7 }
  0x17   :  { %204 = vmatprep.mubr.bf16.mxu0 %v479_v1  ;;  %317 = vmatprep.mubr.bf16.mxu1 %v479_v1 }
  0x1e   :  { %451 = vmatmul.mubr.msk.bf16.gmra.mrb[12].mxu0 %vm117_vm0, %v474_v8  ;;  %459 = vmatmul.mubr.msk.bf16.gmra.mrb[12].mxu1 %vm117_vm0, %v474_v8 }
  0x1f   :  { %214 = vmatprep.mubr.bf16.mxu0 %v479_v1  ;;  %327 = vmatprep.mubr.bf16.mxu1 %v479_v1 }
  0x26   :  { %452 = vmatmul.mubr.msk.bf16.gmra.mrb[16].mxu0 %vm117_vm0, %v475_v9  ;;  %460 = vmatmul.mubr.msk.bf16.gmra.mrb[16].mxu1 %vm117_vm0, %v475_v9 }
  0x27   :  { %224 = vmatprep.mubr.bf16.mxu0 %v479_v1  ;;  %337 = vmatprep.mubr.bf16.mxu1 %v479_v1 }
  0x2e   :  { %453 = vmatmul.mubr.msk.bf16.gmra.mrb[20].mxu0 %vm117_vm0, %v476_v10  ;;  %461 = vmatmul.mubr.msk.bf16.gmra.mrb[20].mxu1 %vm117_vm0, %v476_v10 }
  0x2f   :  { %234 = vmatprep.mubr.bf16.mxu0 %v479_v1  ;;  %347 = vmatprep.mubr.bf16.mxu1 %v479_v1 }
  0x36   :  { %454 = vmatmul.mubr.msk.bf16.gmra.mrb[24].mxu0 %vm117_vm0, %v477_v11  ;;  %462 = vmatmul.mubr.msk.bf16.gmra.mrb[24].mxu1 %vm117_vm0, %v477_v11 }
  0x37   :  { %244 = vmatprep.mubr.bf16.mxu0 %v479_v1  ;;  %357 = vmatprep.mubr.bf16.mxu1 %v479_v1 }
  0x3e   :  { %455 = vmatmul.mubr.msk.bf16.gmra.mrb[28].mxu0 %vm117_vm0, %v478_v12  ;;  %463 = vmatmul.mubr.msk.bf16.gmra.mrb[28].mxu1 %vm117_vm0, %v478_v12 }
  0xd9   :  { %v176_v24 = vpop.f32.mrb[0].mxu0  ;;  %v289_v25 = vpop.f32.mrb[0].mxu1 }
  0xda   :  { %v177_v26 = vadd.f32 %v176_v24, %v555_v20  ;;  %v290_v27 = vadd.f32 %v289_v25, %v557_v21  ;;  %v178_v28 = vpop.f32.mrb[1].mxu0  ;;  %v291_v29 = vpop.f32.mrb[1].mxu1 }
  0xdb   :  { %v179_v30 = vadd.f32 %v178_v28, %v559_v22  ;;  %v292_v31 = vadd.f32 %v291_v29, %v561_v23  ;;  %v180_v32 = vpop.f32.mrb[2].mxu0  ;;  %v293_v33 = vpop.f32.mrb[2].mxu1 }
  0xdc   :  { %368 = vst [vmem:[%s822_s3] sm:$0xff] %v177_v26  ;;  %370 = vst [vmem:[%s822_s3 + $0x10] sm:$0xff] %v290_v27  ;;  %v181_v34 = vadd.f32 %v180_v32, %v555_v20  ;;  %v294_v35 = vadd.f32 %v293_v33, %v557_v21  ;;  %v182_v36 = vpop.f32.mrb[3].mxu0  ;;  %v295_v37 = vpop.f32.mrb[3].mxu1 }
  0xdd   :  { %369 = vst [vmem:[%s822_s3 + $0x8] sm:$0xff] %v179_v30  ;;  %371 = vst [vmem:[%s822_s3 + $0x18] sm:$0xff] %v292_v31  ;;  %v183_v38 = vadd.f32 %v182_v36, %v559_v22  ;;  %v296_v39 = vadd.f32 %v295_v37, %v561_v23 }
  0xde   :  { %372 = vst [vmem:[%s822_s3 + $0x20] sm:$0xff] %v181_v34  ;;  %374 = vst [vmem:[%s822_s3 + $0x30] sm:$0xff] %v294_v35 }
  0xdf   :  { %373 = vst [vmem:[%s822_s3 + $0x28] sm:$0xff] %v183_v38  ;;  %375 = vst [vmem:[%s822_s3 + $0x38] sm:$0xff] %v296_v39 }
  0xe1   :  { %v186_v40 = vpop.f32.mrb[4].mxu0  ;;  %v299_v41 = vpop.f32.mrb[4].mxu1 }
  0xe2   :  { %v187_v42 = vadd.f32 %v186_v40, %v555_v20  ;;  %v300_v43 = vadd.f32 %v299_v41, %v557_v21  ;;  %v188_v44 = vpop.f32.mrb[5].mxu0  ;;  %v301_v45 = vpop.f32.mrb[5].mxu1 }
  0xe3   :  { %v189_v46 = vadd.f32 %v188_v44, %v559_v22  ;;  %v302_v47 = vadd.f32 %v301_v45, %v561_v23  ;;  %v190_v48 = vpop.f32.mrb[6].mxu0  ;;  %v303_v49 = vpop.f32.mrb[6].mxu1 }
  0xe4   :  { %376 = vst [vmem:[%s822_s3 + $0x40] sm:$0xff] %v187_v42  ;;  %378 = vst [vmem:[%s822_s3 + $0x50] sm:$0xff] %v300_v43  ;;  %v191_v50 = vadd.f32 %v190_v48, %v555_v20  ;;  %v304_v51 = vadd.f32 %v303_v49, %v557_v21  ;;  %v192_v52 = vpop.f32.mrb[7].mxu0  ;;  %v305_v53 = vpop.f32.mrb[7].mxu1 }
  0xe5   :  { %377 = vst [vmem:[%s822_s3 + $0x48] sm:$0xff] %v189_v46  ;;  %379 = vst [vmem:[%s822_s3 + $0x58] sm:$0xff] %v302_v47  ;;  %v193_v54 = vadd.f32 %v192_v52, %v559_v22  ;;  %v306_v55 = vadd.f32 %v305_v53, %v561_v23 }
  0xe6   :  { %380 = vst [vmem:[%s822_s3 + $0x60] sm:$0xff] %v191_v50  ;;  %382 = vst [vmem:[%s822_s3 + $0x70] sm:$0xff] %v304_v51 }
  0xe7   :  { %381 = vst [vmem:[%s822_s3 + $0x68] sm:$0xff] %v193_v54  ;;  %383 = vst [vmem:[%s822_s3 + $0x78] sm:$0xff] %v306_v55 }
  0xe9   :  { %v196_v56 = vpop.f32.mrb[8].mxu0  ;;  %v309_v57 = vpop.f32.mrb[8].mxu1 }
  0xea   :  { %v197_v58 = vadd.f32 %v196_v56, %v555_v20  ;;  %v310_v59 = vadd.f32 %v309_v57, %v557_v21  ;;  %v198_v60 = vpop.f32.mrb[9].mxu0  ;;  %v311_v61 = vpop.f32.mrb[9].mxu1 }
  0xeb   :  { %v199_v62 = vadd.f32 %v198_v60, %v559_v22  ;;  %v312_v63 = vadd.f32 %v311_v61, %v561_v23  ;;  %v200_v0 = vpop.f32.mrb[10].mxu0  ;;  %v313_v1 = vpop.f32.mrb[10].mxu1 }
  0xec   :  { %384 = vst [vmem:[%s822_s3 + $0x80] sm:$0xff] %v197_v58  ;;  %386 = vst [vmem:[%s822_s3 + $0x90] sm:$0xff] %v310_v59  ;;  %v201_v2 = vadd.f32 %v200_v0, %v555_v20  ;;  %v314_v3 = vadd.f32 %v313_v1, %v557_v21  ;;  %v202_v4 = vpop.f32.mrb[11].mxu0  ;;  %v315_v5 = vpop.f32.mrb[11].mxu1 }
  0xed   :  { %385 = vst [vmem:[%s822_s3 + $0x88] sm:$0xff] %v199_v62  ;;  %387 = vst [vmem:[%s822_s3 + $0x98] sm:$0xff] %v312_v63  ;;  %v203_v6 = vadd.f32 %v202_v4, %v559_v22  ;;  %v316_v7 = vadd.f32 %v315_v5, %v561_v23 }
  0xee   :  { %388 = vst [vmem:[%s822_s3 + $0xa0] sm:$0xff] %v201_v2  ;;  %390 = vst [vmem:[%s822_s3 + $0xb0] sm:$0xff] %v314_v3 }
  0xef   :  { %389 = vst [vmem:[%s822_s3 + $0xa8] sm:$0xff] %v203_v6  ;;  %391 = vst [vmem:[%s822_s3 + $0xb8] sm:$0xff] %v316_v7 }
  0xf1   :  { %v206_v8 = vpop.f32.mrb[12].mxu0  ;;  %v319_v9 = vpop.f32.mrb[12].mxu1 }
  0xf2   :  { %v207_v10 = vadd.f32 %v206_v8, %v555_v20  ;;  %v320_v11 = vadd.f32 %v319_v9, %v557_v21  ;;  %v208_v12 = vpop.f32.mrb[13].mxu0  ;;  %v321_v13 = vpop.f32.mrb[13].mxu1 }
  0xf3   :  { %v209_v14 = vadd.f32 %v208_v12, %v559_v22  ;;  %v322_v15 = vadd.f32 %v321_v13, %v561_v23  ;;  %v210_v16 = vpop.f32.mrb[14].mxu0  ;;  %v323_v17 = vpop.f32.mrb[14].mxu1 }
  0xf4   :  { %392 = vst [vmem:[%s822_s3 + $0xc0] sm:$0xff] %v207_v10  ;;  %394 = vst [vmem:[%s822_s3 + $0xd0] sm:$0xff] %v320_v11  ;;  %v211_v18 = vadd.f32 %v210_v16, %v555_v20  ;;  %v324_v19 = vadd.f32 %v323_v17, %v557_v21  ;;  %v212_v24 = vpop.f32.mrb[15].mxu0  ;;  %v325_v25 = vpop.f32.mrb[15].mxu1 }
  0xf5   :  { %393 = vst [vmem:[%s822_s3 + $0xc8] sm:$0xff] %v209_v14  ;;  %395 = vst [vmem:[%s822_s3 + $0xd8] sm:$0xff] %v322_v15  ;;  %v213_v26 = vadd.f32 %v212_v24, %v559_v22  ;;  %v326_v27 = vadd.f32 %v325_v25, %v561_v23 }
  0xf6   :  { %396 = vst [vmem:[%s822_s3 + $0xe0] sm:$0xff] %v211_v18  ;;  %398 = vst [vmem:[%s822_s3 + $0xf0] sm:$0xff] %v324_v19 }
  0xf7   :  { %397 = vst [vmem:[%s822_s3 + $0xe8] sm:$0xff] %v213_v26  ;;  %399 = vst [vmem:[%s822_s3 + $0xf8] sm:$0xff] %v326_v27 }
  0xf9   :  { %v216_v28 = vpop.f32.mrb[16].mxu0  ;;  %v329_v29 = vpop.f32.mrb[16].mxu1 }
  0xfa   :  { %v217_v30 = vadd.f32 %v216_v28, %v555_v20  ;;  %v330_v31 = vadd.f32 %v329_v29, %v557_v21  ;;  %v218_v32 = vpop.f32.mrb[17].mxu0  ;;  %v331_v33 = vpop.f32.mrb[17].mxu1 }
  0xfb   :  { %v219_v34 = vadd.f32 %v218_v32, %v559_v22  ;;  %v332_v35 = vadd.f32 %v331_v33, %v561_v23  ;;  %v220_v36 = vpop.f32.mrb[18].mxu0  ;;  %v333_v37 = vpop.f32.mrb[18].mxu1 }
  0xfc   :  { %400 = vst [vmem:[%s822_s3 + $0x100] sm:$0xff] %v217_v30  ;;  %402 = vst [vmem:[%s822_s3 + $0x110] sm:$0xff] %v330_v31  ;;  %v221_v38 = vadd.f32 %v220_v36, %v555_v20  ;;  %v334_v39 = vadd.f32 %v333_v37, %v557_v21  ;;  %v222_v40 = vpop.f32.mrb[19].mxu0  ;;  %v335_v41 = vpop.f32.mrb[19].mxu1 }
  0xfd   :  { %401 = vst [vmem:[%s822_s3 + $0x108] sm:$0xff] %v219_v34  ;;  %403 = vst [vmem:[%s822_s3 + $0x118] sm:$0xff] %v332_v35  ;;  %v223_v42 = vadd.f32 %v222_v40, %v559_v22  ;;  %v336_v43 = vadd.f32 %v335_v41, %v561_v23 }
  0xfe   :  { %404 = vst [vmem:[%s822_s3 + $0x120] sm:$0xff] %v221_v38  ;;  %406 = vst [vmem:[%s822_s3 + $0x130] sm:$0xff] %v334_v39 }
  0xff   :  { %405 = vst [vmem:[%s822_s3 + $0x128] sm:$0xff] %v223_v42  ;;  %407 = vst [vmem:[%s822_s3 + $0x138] sm:$0xff] %v336_v43 }
 0x101   :  { %v226_v44 = vpop.f32.mrb[20].mxu0  ;;  %v339_v45 = vpop.f32.mrb[20].mxu1 }
 0x102   :  { %v227_v46 = vadd.f32 %v226_v44, %v555_v20  ;;  %v340_v47 = vadd.f32 %v339_v45, %v557_v21  ;;  %v228_v48 = vpop.f32.mrb[21].mxu0  ;;  %v341_v49 = vpop.f32.mrb[21].mxu1 }
 0x103   :  { %v229_v50 = vadd.f32 %v228_v48, %v559_v22  ;;  %v342_v51 = vadd.f32 %v341_v49, %v561_v23  ;;  %v230_v52 = vpop.f32.mrb[22].mxu0  ;;  %v343_v53 = vpop.f32.mrb[22].mxu1 }
 0x104   :  { %408 = vst [vmem:[%s822_s3 + $0x140] sm:$0xff] %v227_v46  ;;  %410 = vst [vmem:[%s822_s3 + $0x150] sm:$0xff] %v340_v47  ;;  %v231_v54 = vadd.f32 %v230_v52, %v555_v20  ;;  %v344_v55 = vadd.f32 %v343_v53, %v557_v21  ;;  %v232_v56 = vpop.f32.mrb[23].mxu0  ;;  %v345_v57 = vpop.f32.mrb[23].mxu1 }
 0x105   :  { %409 = vst [vmem:[%s822_s3 + $0x148] sm:$0xff] %v229_v50  ;;  %411 = vst [vmem:[%s822_s3 + $0x158] sm:$0xff] %v342_v51  ;;  %v233_v58 = vadd.f32 %v232_v56, %v559_v22  ;;  %v346_v59 = vadd.f32 %v345_v57, %v561_v23 }
 0x106   :  { %412 = vst [vmem:[%s822_s3 + $0x160] sm:$0xff] %v231_v54  ;;  %414 = vst [vmem:[%s822_s3 + $0x170] sm:$0xff] %v344_v55 }
 0x107   :  { %413 = vst [vmem:[%s822_s3 + $0x168] sm:$0xff] %v233_v58  ;;  %415 = vst [vmem:[%s822_s3 + $0x178] sm:$0xff] %v346_v59 }
 0x109   :  { %v236_v60 = vpop.f32.mrb[24].mxu0  ;;  %v349_v61 = vpop.f32.mrb[24].mxu1 }
 0x10a   :  { %v237_v62 = vadd.f32 %v236_v60, %v555_v20  ;;  %v350_v63 = vadd.f32 %v349_v61, %v557_v21  ;;  %v238_v0 = vpop.f32.mrb[25].mxu0  ;;  %v351_v1 = vpop.f32.mrb[25].mxu1 }
 0x10b   :  { %v239_v2 = vadd.f32 %v238_v0, %v559_v22  ;;  %v352_v3 = vadd.f32 %v351_v1, %v561_v23  ;;  %v240_v4 = vpop.f32.mrb[26].mxu0  ;;  %v353_v5 = vpop.f32.mrb[26].mxu1 }
 0x10c   :  { %416 = vst [vmem:[%s822_s3 + $0x180] sm:$0xff] %v237_v62  ;;  %418 = vst [vmem:[%s822_s3 + $0x190] sm:$0xff] %v350_v63  ;;  %v241_v6 = vadd.f32 %v240_v4, %v555_v20  ;;  %v354_v7 = vadd.f32 %v353_v5, %v557_v21  ;;  %v242_v8 = vpop.f32.mrb[27].mxu0  ;;  %v355_v9 = vpop.f32.mrb[27].mxu1 }
 0x10d   :  { %417 = vst [vmem:[%s822_s3 + $0x188] sm:$0xff] %v239_v2  ;;  %419 = vst [vmem:[%s822_s3 + $0x198] sm:$0xff] %v352_v3  ;;  %v243_v10 = vadd.f32 %v242_v8, %v559_v22  ;;  %v356_v11 = vadd.f32 %v355_v9, %v561_v23 }
 0x10e   :  { %420 = vst [vmem:[%s822_s3 + $0x1a0] sm:$0xff] %v241_v6  ;;  %422 = vst [vmem:[%s822_s3 + $0x1b0] sm:$0xff] %v354_v7 }
 0x10f   :  { %421 = vst [vmem:[%s822_s3 + $0x1a8] sm:$0xff] %v243_v10  ;;  %423 = vst [vmem:[%s822_s3 + $0x1b8] sm:$0xff] %v356_v11 }
 0x111   :  { %v246_v12 = vpop.f32.mrb[28].mxu0  ;;  %v359_v13 = vpop.f32.mrb[28].mxu1 }
 0x112   :  { %v247_v14 = vadd.f32 %v246_v12, %v555_v20  ;;  %v360_v15 = vadd.f32 %v359_v13, %v557_v21  ;;  %v248_v16 = vpop.f32.mrb[29].mxu0  ;;  %v361_v17 = vpop.f32.mrb[29].mxu1 }
 0x113   :  { %v249_v18 = vadd.f32 %v248_v16, %v559_v22  ;;  %v362_v19 = vadd.f32 %v361_v17, %v561_v23  ;;  %v250_v24 = vpop.f32.mrb[30].mxu0  ;;  %v363_v25 = vpop.f32.mrb[30].mxu1 }
 0x114   :  { %424 = vst [vmem:[%s822_s3 + $0x1c0] sm:$0xff] %v247_v14  ;;  %426 = vst [vmem:[%s822_s3 + $0x1d0] sm:$0xff] %v360_v15  ;;  %v251_v26 = vadd.f32 %v250_v24, %v555_v20  ;;  %v364_v27 = vadd.f32 %v363_v25, %v557_v21  ;;  %v252_v28 = vpop.f32.mrb[31].mxu0  ;;  %v365_v29 = vpop.f32.mrb[31].mxu1 }
 0x115   :  { %425 = vst [vmem:[%s822_s3 + $0x1c8] sm:$0xff] %v249_v18  ;;  %427 = vst [vmem:[%s822_s3 + $0x1d8] sm:$0xff] %v362_v19  ;;  %v253_v30 = vadd.f32 %v252_v28, %v559_v22  ;;  %v366_v31 = vadd.f32 %v365_v29, %v561_v23 }
 0x116   :  { %428 = vst [vmem:[%s822_s3 + $0x1e0] sm:$0xff] %v251_v26  ;;  %430 = vst [vmem:[%s822_s3 + $0x1f0] sm:$0xff] %v364_v27 }
 0x117   :  { %429 = vst [vmem:[%s822_s3 + $0x1e8] sm:$0xff] %v253_v30  ;;  %431 = vst [vmem:[%s822_s3 + $0x1f8] sm:$0xff] %v366_v31 }

// kernel: blstm_relu_forward.10
= control target key start
LH: loop header
LB: loop body
LE: loop exit
PB: predicated region body
PF: predicated region fallthrough
CT: control target
= control target key end

     0   :  { %9 = vsyncpa [#allocation5], 0  ;;  %s1789_s12 = smov 0   ;;  %s1791_s13 = smov 0   ;;  %s2433_s0 = inlined_call_operand.vmem [shape: f32[16,8,512], index: 0, kind: input, shape index: {}]   ;;  %s2434_s1 = inlined_call_operand.vmem [shape: bf16[128,512], index: 1, kind: input, shape index: {}]   ;;  %s2435_s2 = inlined_call_operand.vmem [shape: bf16[16,8,128], index: 2, kind: output, shape index: {0}]   ;;  %s2436_s3 = inlined_call_operand.hbm [shape: f32[8,128], index: 3, kind: output, shape index: {1}]  }
   0x1   :  { %s1793_s14 = smov 0  }
   0x2 LB: > { %s1438_s15 = sadd.s32 4294967295, %s1764_s14   ;;  %s24_s16 = sadd.s32 1, %s1760_s13  ;;  %s1764_s14 = sphi %s1793_s14, %s15_s14   ;;  %s1760_s13 = sphi %s1791_s13, %s2439_s13   ;;  %s1756_s12 = sphi %s1789_s12, %s2438_s12  }
   0x3   : > { %p25_p0 = scmp.ge.s32.totalorder %s24_s16, 2  ;;  %p1442_p1 = scmp.ge.s32.totalorder %s1764_s14, 1 }
   0x4   : > { %p163_p2 = scmp.lt.s32.totalorder %s1764_s14, 3 }
   0x5   : > { %s2441_s16 = smov (%p25_p0, %s24_s16), 0 }
   0x6   : > { %p164_p3 = pnand %p1442_p1, %p163_p2 }
   0x7   : > { %s1443_s17 = sshll.u32 (!%p164_p3), %s1756_s12, 3  ;;  %p1448_p5 = scmp.ne.s32.totalorder (!%p164_p3), %s1756_s12, 0 }
   0x8   : > { %167 = sbr.rel (%p164_p3) target bundleno = 2083 (0x823), region = 28  ;;  %p196_p4 = scmp.lt.s32.totalorder (!%p164_p3), %s1443_s17, 15 }
   0xf   : > { %s2443_s17 = smov (!%p196_p4, %s1443_s17), 15  ;;  %219 = sbr.rel (%p1448_p5) target bundleno = 22 (0x16), region = 32 }
  0x10   : > { %s1520_s18 = sshll.u32 %s2443_s17, 5  ;;  %s1447_s19 = sshll.u32 %s2443_s17, 2  ;;  %v1766_v0 = vmov (!%p1448_p5), 0.0  }
  0x11   : > { %s1811_s22 = scalar_lea.vmem %s2433_s0, %s1520_s18  ;;  %s1816_s25 = scalar_lea.vmem %s2435_s2, %s1447_s19  ;;  %220 = vst [vmem:[#allocation2] sm:$0xff] (!%p1448_p5), %v1766_v0  ;;  %221 = vst [vmem:[#allocation3] sm:$0xff] (!%p1448_p5), %v1766_v0 }
  0x12   : > { %222 = vst [vmem:[#allocation4] sm:$0xff] (!%p1448_p5), %v1766_v0 }
  0x16 PF: > { %v1821_v1 = vld [vmem:[%s2434_s1 + $0x4] ss:$16 sps:$4 sm:$0xff]   ;;  %v1826_v2 = vld [vmem:[%s2434_s1] ss:$16 sps:$4 sm:$0xff]   ;;  %v1767_v3 = vmov 0   ;;  %v258_v37 = vld [vmem:[%s1811_s22 + $0x8] sm:$0xff] }
  0x17   : > { %454 = vmatprep.mubr.bf16.mxu0 %v1767_v3  ;;  %495 = vmatprep.mubr.bf16.mxu1 %v1767_v3  ;;  %v1834_v4 = vld [vmem:[%s2434_s1 + $0x24] ss:$16 sps:$4 sm:$0xff]   ;;  %v1840_v5 = vld [vmem:[%s2434_s1 + $0xc] ss:$16 sps:$4 sm:$0xff]   ;;  %v1845_v6 = vld [vmem:[%s2434_s1 + $0x20] ss:$16 sps:$4 sm:$0xff]  }
  0x18   : > { %422 = vmatprep.subr.bf16.mxu0 %v1821_v1  ;;  %v1850_v7 = vld [vmem:[%s2434_s1 + $0x8] ss:$16 sps:$4 sm:$0xff]   ;;  %v1856_v8 = vld [vmem:[%s2434_s1 + $0x44] ss:$16 sps:$4 sm:$0xff]   ;;  %463 = vmatprep.subr.bf16.mxu1 %v1840_v5  ;;  %v1862_v9 = vld [vmem:[%s2434_s1 + $0x2c] ss:$16 sps:$4 sm:$0xff]  }
  0x19   : > { %423 = vmatpush1.bf16.msra.mxu0 %v1826_v2  ;;  %464 = vmatpush1.bf16.msra.mxu1 %v1850_v7  ;;  %v1868_v10 = vld [vmem:[%s2434_s1 + $0x28] ss:$16 sps:$4 sm:$0xff]   ;;  %v1875_v11 = vld [vmem:[%s2434_s1 + $0x40] ss:$16 sps:$4 sm:$0xff]   ;;  %v1881_v12 = vld [vmem:[%s2434_s1 + $0x64] ss:$16 sps:$4 sm:$0xff]  }
  0x1a   : > { %424 = vmatprep.subr.bf16.mxu0 %v1834_v4  ;;  %465 = vmatprep.subr.bf16.mxu1 %v1862_v9  ;;  %v1886_v13 = vld [vmem:[%s2434_s1 + $0x4c] ss:$16 sps:$4 sm:$0xff]   ;;  %v1892_v14 = vld [vmem:[%s2434_s1 + $0x48] ss:$16 sps:$4 sm:$0xff]   ;;  %v1899_v15 = vld [vmem:[%s2434_s1 + $0x60] ss:$16 sps:$4 sm:$0xff]  }
  0x1b   : > { %v1904_v16 = vld [vmem:[%s2434_s1 + $0x6c] ss:$16 sps:$4 sm:$0xff]   ;;  %v1910_v17 = vld [vmem:[%s2434_s1 + $0x84] ss:$16 sps:$4 sm:$0xff]   ;;  %v1916_v18 = vld [vmem:[%s2434_s1 + $0x80] ss:$16 sps:$4 sm:$0xff]  }
  0x1c   : > { %v1921_v19 = vld [vmem:[%s2434_s1 + $0x68] ss:$16 sps:$4 sm:$0xff]   ;;  %v1928_v20 = vld [vmem:[%s2434_s1 + $0x8c] ss:$16 sps:$4 sm:$0xff]   ;;  %v1934_v21 = vld [vmem:[%s2434_s1 + $0xa4] ss:$16 sps:$4 sm:$0xff]  }
  0x1d   : > { %425 = vmatpush1.bf16.msra.mxu0 %v1845_v6  ;;  %466 = vmatpush1.bf16.msra.mxu1 %v1868_v10  ;;  %v1940_v22 = vld [vmem:[%s2434_s1 + $0x88] ss:$16 sps:$4 sm:$0xff]   ;;  %v1947_v23 = vld [vmem:[%s2434_s1 + $0xa0] ss:$16 sps:$4 sm:$0xff]   ;;  %v1952_v24 = vld [vmem:[%s2434_s1 + $0xac] ss:$16 sps:$4 sm:$0xff]  }
  0x1e   : > { %426 = vmatprep.subr.bf16.mxu0 %v1856_v8  ;;  %467 = vmatprep.subr.bf16.mxu1 %v1886_v13  ;;  %v1958_v25 = vld [vmem:[%s2434_s1 + $0xc4] ss:$16 sps:$4 sm:$0xff]   ;;  %v1964_v26 = vld [vmem:[%s2434_s1 + $0xa8] ss:$16 sps:$4 sm:$0xff]   ;;  %v1971_v27 = vld [vmem:[%s2434_s1 + $0xc0] ss:$16 sps:$4 sm:$0xff]  }
  0x1f   : > { %v1976_v28 = vld [vmem:[%s2434_s1 + $0xcc] ss:$16 sps:$4 sm:$0xff]   ;;  %v1982_v29 = vld [vmem:[%s2434_s1 + $0xe4] ss:$16 sps:$4 sm:$0xff]   ;;  %v1988_v30 = vld [vmem:[%s2434_s1 + $0xc8] ss:$16 sps:$4 sm:$0xff]  }
  0x20   : > { %v1995_v31 = vld [vmem:[%s2434_s1 + $0xe0] ss:$16 sps:$4 sm:$0xff]   ;;  %v2000_v33 = vld [vmem:[%s2434_s1 + $0xec] ss:$16 sps:$4 sm:$0xff]   ;;  %v2007_v35 = vld [vmem:[%s2434_s1 + $0xe8] ss:$16 sps:$4 sm:$0xff]  }
  0x21   : > { %427 = vmatpush1.bf16.msra.mxu0 %v1875_v11  ;;  %468 = vmatpush1.bf16.msra.mxu1 %v1892_v14  ;;  %v255_v32 = vld [vmem:[#allocation2] sm:$0xff]  ;;  %v259_v41 = vld [vmem:[%s1811_s22 + $0x10] sm:$0xff]  ;;  %v260_v51 = vld [vmem:[%s1811_s22 + $0x18] sm:$0xff]  ;;  %p2398_p6 = scmp.eq.s32.totalorder %s1438_s15, 1 }
  0x22   : > { %428 = vmatprep.subr.bf16.mxu0 %v1881_v12  ;;  %469 = vmatprep.subr.bf16.mxu1 %v1904_v16  ;;  %v261_v34 = vpack.c.bf16 %v255_v32, %v255_v32  ;;  %v257_v36 = vld [vmem:[%s1811_s22] sm:$0xff]  ;;  %v256_v61 = vld [vmem:[#allocation3] sm:$0xff] }
  0x25   : > { %429 = vmatpush1.bf16.msra.mxu0 %v1899_v15  ;;  %470 = vmatpush1.bf16.msra.mxu1 %v1921_v19 }
  0x26   : > { %430 = vmatprep.subr.bf16.mxu0 %v1910_v17  ;;  %471 = vmatprep.subr.bf16.mxu1 %v1928_v20 }
  0x29   : > { %431 = vmatpush1.bf16.msra.mxu0 %v1916_v18  ;;  %472 = vmatpush1.bf16.msra.mxu1 %v1940_v22 }
  0x2a   : > { %432 = vmatprep.subr.bf16.mxu0 %v1934_v21  ;;  %473 = vmatprep.subr.bf16.mxu1 %v1952_v24 }
  0x2d   : > { %433 = vmatpush1.bf16.msra.mxu0 %v1947_v23  ;;  %474 = vmatpush1.bf16.msra.mxu1 %v1964_v26 }
  0x2e   : > { %434 = vmatprep.subr.bf16.mxu0 %v1958_v25  ;;  %475 = vmatprep.subr.bf16.mxu1 %v1976_v28 }
  0x31   : > { %435 = vmatpush1.bf16.msra.mxu0 %v1971_v27  ;;  %476 = vmatpush1.bf16.msra.mxu1 %v1988_v30 }
  0x32   : > { %436 = vmatprep.subr.bf16.mxu0 %v1982_v29  ;;  %477 = vmatprep.subr.bf16.mxu1 %v2000_v33 }
  0x35   : > { %437 = vmatpush1.bf16.msra.mxu0 %v1995_v31  ;;  %478 = vmatpush1.bf16.msra.mxu1 %v2007_v35 }
  0x36   : > { %534 = vmatprep.subr.bf16.mxu0 %v1821_v1  ;;  %575 = vmatprep.subr.bf16.mxu1 %v1840_v5 }
  0x38   : > { %455 = vmatmul.mubr.bf16.vlgmr.msra.gmra.mrb[0].mxu0 %v261_v34  ;;  %496 = vmatmul.mubr.bf16.vlgmr.msra.gmra.mrb[0].mxu1 %v261_v34 }
  0x39   : > { %535 = vmatpush1.bf16.msra.mxu0 %v1826_v2  ;;  %566 = vmatprep.mubr.bf16.mxu0 %v1767_v3 }
  0x3a   : > { %536 = vmatprep.subr.bf16.mxu0 %v1834_v4  ;;  %576 = vmatpush1.bf16.msra.mxu1 %v1850_v7 }
  0x3b   : > { %607 = vmatprep.mubr.bf16.mxu1 %v1767_v3  ;;  %577 = vmatprep.subr.bf16.mxu1 %v1862_v9 }
  0x3d   : > { %537 = vmatpush1.bf16.msra.mxu0 %v1845_v6 }
  0x3e   : > { %538 = vmatprep.subr.bf16.mxu0 %v1856_v8  ;;  %578 = vmatpush1.bf16.msra.mxu1 %v1868_v10 }
  0x3f   : > { %579 = vmatprep.subr.bf16.mxu1 %v1886_v13 }
  0x41   : > { %539 = vmatpush1.bf16.msra.mxu0 %v1875_v11 }
  0x42   : > { %540 = vmatprep.subr.bf16.mxu0 %v1881_v12  ;;  %580 = vmatpush1.bf16.msra.mxu1 %v1892_v14 }
  0x43   : > { %581 = vmatprep.subr.bf16.mxu1 %v1904_v16 }
  0x45   : > { %541 = vmatpush1.bf16.msra.mxu0 %v1899_v15 }
  0x46   : > { %542 = vmatprep.subr.bf16.mxu0 %v1910_v17  ;;  %582 = vmatpush1.bf16.msra.mxu1 %v1921_v19 }
  0x47   : > { %583 = vmatprep.subr.bf16.mxu1 %v1928_v20 }
  0x49   : > { %543 = vmatpush1.bf16.msra.mxu0 %v1916_v18 }
  0x4a   : > { %544 = vmatprep.subr.bf16.mxu0 %v1934_v21  ;;  %584 = vmatpush1.bf16.msra.mxu1 %v1940_v22 }
  0x4b   : > { %585 = vmatprep.subr.bf16.mxu1 %v1952_v24 }
  0x4d   : > { %545 = vmatpush1.bf16.msra.mxu0 %v1947_v23 }
  0x4e   : > { %546 = vmatprep.subr.bf16.mxu0 %v1958_v25  ;;  %586 = vmatpush1.bf16.msra.mxu1 %v1964_v26 }
  0x4f   : > { %587 = vmatprep.subr.bf16.mxu1 %v1976_v28 }
  0x51   : > { %547 = vmatpush1.bf16.msra.mxu0 %v1971_v27 }
  0x52   : > { %548 = vmatprep.subr.bf16.mxu0 %v1982_v29  ;;  %588 = vmatpush1.bf16.msra.mxu1 %v1988_v30 }
  0x53   : > { %589 = vmatprep.subr.bf16.mxu1 %v2000_v33 }
  0x55   : > { %549 = vmatpush1.bf16.msra.mxu0 %v1995_v31 }
  0x56   : > { %647 = vmatprep.subr.bf16.mxu0 %v1821_v1  ;;  %590 = vmatpush1.bf16.msra.mxu1 %v2007_v35 }
  0x57   : > { %688 = vmatprep.subr.bf16.mxu1 %v1840_v5 }
 0x10b   : > { %v456_v38 = vpop.f32.mrb[0].mxu0  ;;  %v497_v46 = vpop.f32.mrb[0].mxu1 }
 0x10c   : > { %v504_v39 = vadd.f32 %v456_v38, %v257_v36  ;;  %v458_v40 = vpop.f32.mrb[1].mxu0  ;;  %v506_v48 = vadd.f32 %v497_v46, %v259_v41  ;;  %v499_v49 = vpop.f32.mrb[1].mxu1  ;;  %v1481_v41 = vld [vmem:[%s1811_s22 + $0x20] sm:$0xff] }
 0x10d   : > { %v505_v42 = vadd.f32 %v458_v40, %v258_v37  ;;  %v460_v43 = vpop.f32.mrb[2].mxu0  ;;  %v501_v50 = vpop.f32.mrb[2].mxu1  ;;  %v507_v53 = vadd.f32 %v499_v49, %v260_v51 }
 0x10e   : > { %v508_v44 = vmul.f32 0.5, %v504_v39  ;;  %v461_v45 = vpop.f32.mrb[3].mxu0  ;;  %v502_v52 = vpop.f32.mrb[3].mxu1 }
 0x10f   : > { %v512_v47 = vmul.f32 0.5, %v505_v42  ;;  %v517_v54 = vmul.f32 0.5, %v507_v53  ;;  %v1482_v42 = vld [vmem:[%s1811_s22 + $0x28] sm:$0xff] }
 0x110   : > { %1602 = vtanh.f32 %v508_v44 }
 0x111   : > { %1604 = vtanh.f32 %v512_v47 }
 0x112   : > { %1606 = vtanh.f32 %v506_v48  ;;  %v1483_v48 = vld [vmem:[%s1811_s22 + $0x30] sm:$0xff] }
 0x113   : > { %1608 = vtanh.f32 %v517_v54 }
 0x11a   : > { %v1603_v55 = vpop.eup %1602 }
 0x11b   : > { %v1605_v56 = vpop.eup %1604  ;;  %v510_v57 = vadd.f32 1.0, %v1603_v55 }
 0x11c   : > { %v1607_v58 = vpop.eup %1606  ;;  %v514_v59 = vadd.f32 1.0, %v1605_v56 }
 0x11d   : > { %v511_v60 = vmul.f32 0.5, %v510_v57  ;;  %v1609_v34 = vpop.eup %1608  ;;  %v1484_v57 = vld [vmem:[%s1811_s22 + $0x38] sm:$0xff] }
 0x11e   : > { %v515_v62 = vmul.f32 0.5, %v514_v59  ;;  %v519_v36 = vadd.f32 1.0, %v1609_v34 }
 0x11f   : > { %v522_v63 = vmul.f32 %v1607_v58, %v511_v60 }
 0x120   : > { %v521_v0 = vmul.f32 %v515_v62, %v256_v61  ;;  %v520_v37 = vmul.f32 0.5, %v519_v36 }
 0x122   : > { %v2052_v32 = vadd.f32 %v522_v63, %v521_v0 }
 0x124   : > { %1610 = vtanh.f32 %v2052_v32 }
 0x12e   : > { %v1611_v38 = vpop.eup %1610 }
 0x12f   : > { %v2055_v39 = vmul.f32 %v1611_v38, %v520_v37 }
 0x131   : > { %v526_v40 = vpack.c.bf16 %v2055_v39, %v2055_v39 }
 0x133   : > { %527 = vst [vmem:[%s1816_s25] sm:$0xf] %v526_v40  ;;  %567 = vmatmul.mubr.bf16.vlgmr.msra.gmra.mrb[4].mxu0 %v526_v40  ;;  %608 = vmatmul.mubr.bf16.vlgmr.msra.gmra.mrb[4].mxu1 %v526_v40 }
 0x134   : > { %648 = vmatpush1.bf16.msra.mxu0 %v1826_v2  ;;  %689 = vmatpush1.bf16.msra.mxu1 %v1850_v7 }
 0x135   : > { %649 = vmatprep.subr.bf16.mxu0 %v1834_v4  ;;  %690 = vmatprep.subr.bf16.mxu1 %v1862_v9 }
 0x136   : > { %679 = vmatprep.mubr.bf16.mxu0 %v1767_v3  ;;  %720 = vmatprep.mubr.bf16.mxu1 %v1767_v3 }
 0x138   : > { %650 = vmatpush1.bf16.msra.mxu0 %v1845_v6  ;;  %691 = vmatpush1.bf16.msra.mxu1 %v1868_v10 }
 0x139   : > { %651 = vmatprep.subr.bf16.mxu0 %v1856_v8  ;;  %692 = vmatprep.subr.bf16.mxu1 %v1886_v13 }
 0x13c   : > { %652 = vmatpush1.bf16.msra.mxu0 %v1875_v11  ;;  %693 = vmatpush1.bf16.msra.mxu1 %v1892_v14 }
 0x13d   : > { %653 = vmatprep.subr.bf16.mxu0 %v1881_v12  ;;  %694 = vmatprep.subr.bf16.mxu1 %v1904_v16 }
 0x140   : > { %654 = vmatpush1.bf16.msra.mxu0 %v1899_v15  ;;  %695 = vmatpush1.bf16.msra.mxu1 %v1921_v19 }
 0x141   : > { %655 = vmatprep.subr.bf16.mxu0 %v1910_v17  ;;  %696 = vmatprep.subr.bf16.mxu1 %v1928_v20 }
 0x144   : > { %656 = vmatpush1.bf16.msra.mxu0 %v1916_v18  ;;  %697 = vmatpush1.bf16.msra.mxu1 %v1940_v22 }
 0x145   : > { %657 = vmatprep.subr.bf16.mxu0 %v1934_v21  ;;  %698 = vmatprep.subr.bf16.mxu1 %v1952_v24 }
 0x148   : > { %658 = vmatpush1.bf16.msra.mxu0 %v1947_v23  ;;  %699 = vmatpush1.bf16.msra.mxu1 %v1964_v26 }
 0x149   : > { %659 = vmatprep.subr.bf16.mxu0 %v1958_v25  ;;  %700 = vmatprep.subr.bf16.mxu1 %v1976_v28 }
 0x14c   : > { %660 = vmatpush1.bf16.msra.mxu0 %v1971_v27  ;;  %701 = vmatpush1.bf16.msra.mxu1 %v1988_v30 }
 0x14d   : > { %661 = vmatprep.subr.bf16.mxu0 %v1982_v29  ;;  %702 = vmatprep.subr.bf16.mxu1 %v2000_v33 }
 0x150   : > { %662 = vmatpush1.bf16.msra.mxu0 %v1995_v31  ;;  %703 = vmatpush1.bf16.msra.mxu1 %v2007_v35 }
 0x151   : > { %760 = vmatprep.subr.bf16.mxu0 %v1821_v1  ;;  %801 = vmatprep.subr.bf16.mxu1 %v1840_v5 }
 0x206   : > { %v568_v43 = vpop.f32.mrb[4].mxu0  ;;  %v609_v44 = vpop.f32.mrb[4].mxu1 }
 0x207   : > { %v616_v45 = vadd.f32 %v1481_v41, %v568_v43  ;;  %v570_v46 = vpop.f32.mrb[5].mxu0  ;;  %v611_v47 = vpop.f32.mrb[5].mxu1  ;;  %v618_v56 = vadd.f32 %v1483_v48, %v609_v44 }
 0x208   : > { %v617_v49 = vadd.f32 %v1482_v42, %v570_v46  ;;  %v572_v50 = vpop.f32.mrb[6].mxu0  ;;  %v613_v51 = vpop.f32.mrb[6].mxu1  ;;  %v619_v58 = vadd.f32 %v1484_v57, %v611_v47  ;;  %v1487_v47 = vld [vmem:[%s1811_s22 + $0x48] sm:$0xff] }
 0x209   : > { %v620_v52 = vmul.f32 0.5, %v616_v45  ;;  %v573_v53 = vpop.f32.mrb[7].mxu0  ;;  %v614_v54 = vpop.f32.mrb[7].mxu1 }
 0x20a   : > { %v624_v55 = vmul.f32 0.5, %v617_v49  ;;  %v629_v59 = vmul.f32 0.5, %v619_v58  ;;  %v1488_v53 = vld [vmem:[%s1811_s22 + $0x50] sm:$0xff] }
 0x20b   : > { %1612 = vtanh.f32 %v620_v52 }
 0x20c   : > { %1614 = vtanh.f32 %v624_v55 }
 0x20d   : > { %1616 = vtanh.f32 %v618_v56 }
 0x20e   : > { %1618 = vtanh.f32 %v629_v59 }
 0x215   : > { %v1613_v60 = vpop.eup %1612 }
 0x216   : > { %v1615_v61 = vpop.eup %1614  ;;  %v622_v62 = vadd.f32 1.0, %v1613_v60 }
 0x217   : > { %v626_v63 = vadd.f32 1.0, %v1615_v61  ;;  %v1617_v34 = vpop.eup %1616 }
 0x218   : > { %v623_v0 = vmul.f32 0.5, %v622_v62  ;;  %v1619_v41 = vpop.eup %1618  ;;  %v1489_v62 = vld [vmem:[%s1811_s22 + $0x58] sm:$0xff] }
 0x219   : > { %v627_v36 = vmul.f32 0.5, %v626_v63  ;;  %v631_v42 = vadd.f32 1.0, %v1619_v41 }
 0x21a   : > { %v634_v37 = vmul.f32 %v1617_v34, %v623_v0 }
 0x21b   : > { %v633_v38 = vmul.f32 %v627_v36, %v2052_v32  ;;  %v632_v43 = vmul.f32 0.5, %v631_v42  ;;  %v1486_v32 = vld [vmem:[%s1811_s22 + $0x40] sm:$0xff] }
 0x21d   : > { %v2099_v40 = vadd.f32 %v634_v37, %v633_v38 }
 0x21f   : > { %1620 = vtanh.f32 %v2099_v40 }
 0x229   : > { %v1621_v44 = vpop.eup %1620 }
 0x22a   : > { %v2102_v45 = vmul.f32 %v1621_v44, %v632_v43 }
 0x22c   : > { %v638_v46 = vpack.c.bf16 %v2102_v45, %v2102_v45 }
 0x22e   : > { %1485 = vst [vmem:[%s1816_s25 + $0x4] sm:$0xf] %v638_v46  ;;  %680 = vmatmul.mubr.bf16.vlgmr.msra.gmra.mrb[8].mxu0 %v638_v46  ;;  %721 = vmatmul.mubr.bf16.vlgmr.msra.gmra.mrb[8].mxu1 %v638_v46 }
 0x22f   : > { %761 = vmatpush1.bf16.msra.mxu0 %v1826_v2  ;;  %802 = vmatpush1.bf16.msra.mxu1 %v1850_v7 }
 0x230   : > { %762 = vmatprep.subr.bf16.mxu0 %v1834_v4  ;;  %803 = vmatprep.subr.bf16.mxu1 %v1862_v9 }
 0x231   : > { %792 = vmatprep.mubr.bf16.mxu0 %v1767_v3  ;;  %833 = vmatprep.mubr.bf16.mxu1 %v1767_v3 }
 0x233   : > { %763 = vmatpush1.bf16.msra.mxu0 %v1845_v6  ;;  %804 = vmatpush1.bf16.msra.mxu1 %v1868_v10 }
 0x234   : > { %764 = vmatprep.subr.bf16.mxu0 %v1856_v8  ;;  %805 = vmatprep.subr.bf16.mxu1 %v1886_v13 }
 0x237   : > { %765 = vmatpush1.bf16.msra.mxu0 %v1875_v11  ;;  %806 = vmatpush1.bf16.msra.mxu1 %v1892_v14 }
 0x238   : > { %766 = vmatprep.subr.bf16.mxu0 %v1881_v12  ;;  %807 = vmatprep.subr.bf16.mxu1 %v1904_v16 }
 0x23b   : > { %767 = vmatpush1.bf16.msra.mxu0 %v1899_v15  ;;  %808 = vmatpush1.bf16.msra.mxu1 %v1921_v19 }
 0x23c   : > { %768 = vmatprep.subr.bf16.mxu0 %v1910_v17  ;;  %809 = vmatprep.subr.bf16.mxu1 %v1928_v20 }
 0x23f   : > { %769 = vmatpush1.bf16.msra.mxu0 %v1916_v18  ;;  %810 = vmatpush1.bf16.msra.mxu1 %v1940_v22 }
 0x240   : > { %770 = vmatprep.subr.bf16.mxu0 %v1934_v21  ;;  %811 = vmatprep.subr.bf16.mxu1 %v1952_v24 }
 0x243   : > { %771 = vmatpush1.bf16.msra.mxu0 %v1947_v23  ;;  %812 = vmatpush1.bf16.msra.mxu1 %v1964_v26 }
 0x244   : > { %772 = vmatprep.subr.bf16.mxu0 %v1958_v25  ;;  %813 = vmatprep.subr.bf16.mxu1 %v1976_v28 }
 0x247   : > { %773 = vmatpush1.bf16.msra.mxu0 %v1971_v27  ;;  %814 = vmatpush1.bf16.msra.mxu1 %v1988_v30 }
 0x248   : > { %774 = vmatprep.subr.bf16.mxu0 %v1982_v29  ;;  %815 = vmatprep.subr.bf16.mxu1 %v2000_v33 }
 0x24b   : > { %775 = vmatpush1.bf16.msra.mxu0 %v1995_v31  ;;  %816 = vmatpush1.bf16.msra.mxu1 %v2007_v35 }
 0x24c   : > { %873 = vmatprep.subr.bf16.mxu0 %v1821_v1  ;;  %914 = vmatprep.subr.bf16.mxu1 %v1840_v5 }
 0x301   : > { %v681_v48 = vpop.f32.mrb[8].mxu0  ;;  %v722_v49 = vpop.f32.mrb[8].mxu1 }
 0x302   : > { %v729_v50 = vadd.f32 %v1486_v32, %v681_v48  ;;  %v683_v51 = vpop.f32.mrb[9].mxu0  ;;  %v724_v52 = vpop.f32.mrb[9].mxu1  ;;  %v731_v61 = vadd.f32 %v1488_v53, %v722_v49 }
 0x303   : > { %v730_v54 = vadd.f32 %v1487_v47, %v683_v51  ;;  %v685_v55 = vpop.f32.mrb[10].mxu0  ;;  %v726_v56 = vpop.f32.mrb[10].mxu1  ;;  %v732_v63 = vadd.f32 %v1489_v62, %v724_v52  ;;  %v641_v51 = vadd.f32 %v2102_v45, %v2055_v39  ;;  %v1491_v39 = vld [vmem:[%s1811_s22 + $0x60] sm:$0xff] }
 0x304   : > { %v733_v57 = vmul.f32 0.5, %v729_v50  ;;  %v686_v58 = vpop.f32.mrb[11].mxu0  ;;  %v727_v59 = vpop.f32.mrb[11].mxu1 }
 0x305   : > { %v737_v60 = vmul.f32 0.5, %v730_v54  ;;  %v742_v0 = vmul.f32 0.5, %v732_v63  ;;  %v1493_v59 = vld [vmem:[%s1811_s22 + $0x70] sm:$0xff] }
 0x306   : > { %1622 = vtanh.f32 %v733_v57 }
 0x307   : > { %1624 = vtanh.f32 %v737_v60 }
 0x308   : > { %1626 = vtanh.f32 %v731_v61 }
 0x309   : > { %1628 = vtanh.f32 %v742_v0 }
 0x310   : > { %v1623_v34 = vpop.eup %1622 }
 0x311   : > { %v1625_v36 = vpop.eup %1624  ;;  %v735_v37 = vadd.f32 1.0, %v1623_v34 }
 0x312   : > { %v739_v38 = vadd.f32 1.0, %v1625_v36  ;;  %v1627_v42 = vpop.eup %1626 }
 0x313   : > { %v736_v41 = vmul.f32 0.5, %v735_v37  ;;  %v1629_v47 = vpop.eup %1628 }
 0x314   : > { %v740_v43 = vmul.f32 0.5, %v739_v38  ;;  %v744_v48 = vadd.f32 1.0, %v1629_v47  ;;  %v1494_v38 = vld [vmem:[%s1811_s22 + $0x78] sm:$0xff] }
 0x315   : > { %v747_v44 = vmul.f32 %v1627_v42, %v736_v41 }
 0x316   : > { %v746_v46 = vmul.f32 %v740_v43, %v2099_v40  ;;  %v745_v49 = vmul.f32 0.5, %v744_v48  ;;  %v1492_v40 = vld [vmem:[%s1811_s22 + $0x68] sm:$0xff] }
 0x318   : > { %v2146_v32 = vadd.f32 %v747_v44, %v746_v46 }
 0x31a   : > { %1630 = vtanh.f32 %v2146_v32 }
 0x324   : > { %v1631_v50 = vpop.eup %1630 }
 0x325   : > { %v750_v52 = vmul.f32 %v1631_v50, %v745_v49 }
 0x327   : > { %v2151_v53 = vadd.f32 %v750_v52, %v641_v51  ;;  %v751_v54 = vpack.c.bf16 %v750_v52, %v750_v52 }
 0x329   : > { %1490 = vst [vmem:[%s1816_s25 + $0x8] sm:$0xf] %v751_v54  ;;  %793 = vmatmul.mubr.bf16.vlgmr.msra.gmra.mrb[12].mxu0 %v751_v54  ;;  %834 = vmatmul.mubr.bf16.vlgmr.msra.gmra.mrb[12].mxu1 %v751_v54 }
 0x32a   : > { %874 = vmatpush1.bf16.msra.mxu0 %v1826_v2  ;;  %915 = vmatpush1.bf16.msra.mxu1 %v1850_v7 }
 0x32b   : > { %875 = vmatprep.subr.bf16.mxu0 %v1834_v4  ;;  %916 = vmatprep.subr.bf16.mxu1 %v1862_v9 }
 0x32c   : > { %905 = vmatprep.mubr.bf16.mxu0 %v1767_v3  ;;  %946 = vmatprep.mubr.bf16.mxu1 %v1767_v3 }
 0x32e   : > { %876 = vmatpush1.bf16.msra.mxu0 %v1845_v6  ;;  %917 = vmatpush1.bf16.msra.mxu1 %v1868_v10 }
 0x32f   : > { %877 = vmatprep.subr.bf16.mxu0 %v1856_v8  ;;  %918 = vmatprep.subr.bf16.mxu1 %v1886_v13 }
 0x332   : > { %878 = vmatpush1.bf16.msra.mxu0 %v1875_v11  ;;  %919 = vmatpush1.bf16.msra.mxu1 %v1892_v14 }
 0x333   : > { %879 = vmatprep.subr.bf16.mxu0 %v1881_v12  ;;  %920 = vmatprep.subr.bf16.mxu1 %v1904_v16 }
 0x336   : > { %880 = vmatpush1.bf16.msra.mxu0 %v1899_v15  ;;  %921 = vmatpush1.bf16.msra.mxu1 %v1921_v19 }
 0x337   : > { %881 = vmatprep.subr.bf16.mxu0 %v1910_v17  ;;  %922 = vmatprep.subr.bf16.mxu1 %v1928_v20 }
 0x33a   : > { %882 = vmatpush1.bf16.msra.mxu0 %v1916_v18  ;;  %923 = vmatpush1.bf16.msra.mxu1 %v1940_v22 }
 0x33b   : > { %883 = vmatprep.subr.bf16.mxu0 %v1934_v21  ;;  %924 = vmatprep.subr.bf16.mxu1 %v1952_v24 }
 0x33e   : > { %884 = vmatpush1.bf16.msra.mxu0 %v1947_v23  ;;  %925 = vmatpush1.bf16.msra.mxu1 %v1964_v26 }
 0x33f   : > { %885 = vmatprep.subr.bf16.mxu0 %v1958_v25  ;;  %926 = vmatprep.subr.bf16.mxu1 %v1976_v28 }
 0x342   : > { %886 = vmatpush1.bf16.msra.mxu0 %v1971_v27  ;;  %927 = vmatpush1.bf16.msra.mxu1 %v1988_v30 }
 0x343   : > { %887 = vmatprep.subr.bf16.mxu0 %v1982_v29  ;;  %928 = vmatprep.subr.bf16.mxu1 %v2000_v33 }
 0x346   : > { %888 = vmatpush1.bf16.msra.mxu0 %v1995_v31  ;;  %929 = vmatpush1.bf16.msra.mxu1 %v2007_v35 }
 0x347   : > { %986 = vmatprep.subr.bf16.mxu0 %v1821_v1  ;;  %1027 = vmatprep.subr.bf16.mxu1 %v1840_v5 }
 0x3fc   : > { %v794_v45 = vpop.f32.mrb[12].mxu0  ;;  %v835_v55 = vpop.f32.mrb[12].mxu1 }
 0x3fd   : > { %v842_v56 = vadd.f32 %v1491_v39, %v794_v45  ;;  %v796_v57 = vpop.f32.mrb[13].mxu0  ;;  %v837_v58 = vpop.f32.mrb[13].mxu1  ;;  %v844_v37 = vadd.f32 %v1493_v59, %v835_v55 }
 0x3fe   : > { %v843_v60 = vadd.f32 %v1492_v40, %v796_v57  ;;  %v798_v61 = vpop.f32.mrb[14].mxu0  ;;  %v839_v62 = vpop.f32.mrb[14].mxu1  ;;  %v845_v41 = vadd.f32 %v1494_v38, %v837_v58 }
 0x3ff   : > { %v846_v63 = vmul.f32 0.5, %v842_v56  ;;  %v799_v0 = vpop.f32.mrb[15].mxu0  ;;  %v840_v34 = vpop.f32.mrb[15].mxu1 }
 0x400   : > { %v850_v36 = vmul.f32 0.5, %v843_v60  ;;  %v855_v42 = vmul.f32 0.5, %v845_v41  ;;  %v1498_v0 = vld [vmem:[%s1811_s22 + $0x90] sm:$0xff] }
 0x401   : > { %1632 = vtanh.f32 %v846_v63 }
 0x402   : > { %1634 = vtanh.f32 %v850_v36 }
 0x403   : > { %1636 = vtanh.f32 %v844_v37 }
 0x404   : > { %1638 = vtanh.f32 %v855_v42 }
 0x40b   : > { %v1633_v43 = vpop.eup %1632 }
 0x40c   : > { %v1635_v44 = vpop.eup %1634  ;;  %v848_v46 = vadd.f32 1.0, %v1633_v43 }
 0x40d   : > { %v852_v47 = vadd.f32 1.0, %v1635_v44  ;;  %v1637_v49 = vpop.eup %1636 }
 0x40e   : > { %v849_v48 = vmul.f32 0.5, %v848_v46  ;;  %v1639_v39 = vpop.eup %1638 }
 0x40f   : > { %v853_v50 = vmul.f32 0.5, %v852_v47  ;;  %v857_v40 = vadd.f32 1.0, %v1639_v39 }
 0x410   : > { %v860_v51 = vmul.f32 %v1637_v49, %v849_v48 }
 0x411   : > { %v859_v52 = vmul.f32 %v853_v50, %v2146_v32  ;;  %v858_v45 = vmul.f32 0.5, %v857_v40  ;;  %v1496_v32 = vld [vmem:[%s1811_s22 + $0x80] sm:$0xff] }
 0x413   : > { %v2193_v54 = vadd.f32 %v860_v51, %v859_v52 }
 0x415   : > { %1640 = vtanh.f32 %v2193_v54 }
 0x41f   : > { %v1641_v55 = vpop.eup %1640 }
 0x420   : > { %v863_v56 = vmul.f32 %v1641_v55, %v858_v45 }
 0x422   : > { %v2197_v57 = vadd.f32 %v863_v56, %v2151_v53  ;;  %v864_v58 = vpack.c.bf16 %v863_v56, %v863_v56  ;;  %v1497_v53 = vld [vmem:[%s1811_s22 + $0x88] sm:$0xff] }
 0x424   : > { %1495 = vst [vmem:[%s1816_s25 + $0xc] sm:$0xf] %v864_v58  ;;  %906 = vmatmul.mubr.bf16.vlgmr.msra.gmra.mrb[16].mxu0 %v864_v58  ;;  %947 = vmatmul.mubr.bf16.vlgmr.msra.gmra.mrb[16].mxu1 %v864_v58 }
 0x425   : > { %987 = vmatpush1.bf16.msra.mxu0 %v1826_v2  ;;  %1028 = vmatpush1.bf16.msra.mxu1 %v1850_v7 }
 0x426   : > { %988 = vmatprep.subr.bf16.mxu0 %v1834_v4  ;;  %1029 = vmatprep.subr.bf16.mxu1 %v1862_v9 }
 0x427   : > { %1018 = vmatprep.mubr.bf16.mxu0 %v1767_v3  ;;  %1059 = vmatprep.mubr.bf16.mxu1 %v1767_v3 }
 0x429   : > { %989 = vmatpush1.bf16.msra.mxu0 %v1845_v6  ;;  %1030 = vmatpush1.bf16.msra.mxu1 %v1868_v10 }
 0x42a   : > { %990 = vmatprep.subr.bf16.mxu0 %v1856_v8  ;;  %1031 = vmatprep.subr.bf16.mxu1 %v1886_v13 }
 0x42d   : > { %991 = vmatpush1.bf16.msra.mxu0 %v1875_v11  ;;  %1032 = vmatpush1.bf16.msra.mxu1 %v1892_v14 }
 0x42e   : > { %992 = vmatprep.subr.bf16.mxu0 %v1881_v12  ;;  %1033 = vmatprep.subr.bf16.mxu1 %v1904_v16 }
 0x431   : > { %993 = vmatpush1.bf16.msra.mxu0 %v1899_v15  ;;  %1034 = vmatpush1.bf16.msra.mxu1 %v1921_v19 }
 0x432   : > { %994 = vmatprep.subr.bf16.mxu0 %v1910_v17  ;;  %1035 = vmatprep.subr.bf16.mxu1 %v1928_v20 }
 0x435   : > { %995 = vmatpush1.bf16.msra.mxu0 %v1916_v18  ;;  %1036 = vmatpush1.bf16.msra.mxu1 %v1940_v22 }
 0x436   : > { %996 = vmatprep.subr.bf16.mxu0 %v1934_v21  ;;  %1037 = vmatprep.subr.bf16.mxu1 %v1952_v24 }
 0x439   : > { %997 = vmatpush1.bf16.msra.mxu0 %v1947_v23  ;;  %1038 = vmatpush1.bf16.msra.mxu1 %v1964_v26 }
 0x43a   : > { %998 = vmatprep.subr.bf16.mxu0 %v1958_v25  ;;  %1039 = vmatprep.subr.bf16.mxu1 %v1976_v28 }
 0x43d   : > { %999 = vmatpush1.bf16.msra.mxu0 %v1971_v27  ;;  %1040 = vmatpush1.bf16.msra.mxu1 %v1988_v30 }
 0x43e   : > { %1000 = vmatprep.subr.bf16.mxu0 %v1982_v29  ;;  %1041 = vmatprep.subr.bf16.mxu1 %v2000_v33 }
 0x441   : > { %1001 = vmatpush1.bf16.msra.mxu0 %v1995_v31  ;;  %1042 = vmatpush1.bf16.msra.mxu1 %v2007_v35 }
 0x442   : > { %1099 = vmatprep.subr.bf16.mxu0 %v1821_v1  ;;  %1140 = vmatprep.subr.bf16.mxu1 %v1840_v5  ;;  %v1499_v5 = vld [vmem:[%s1811_s22 + $0x98] sm:$0xff] }
 0x4f7   : > { %v907_v59 = vpop.f32.mrb[16].mxu0  ;;  %v948_v60 = vpop.f32.mrb[16].mxu1 }
 0x4f8   : > { %v955_v61 = vadd.f32 %v1496_v32, %v907_v59  ;;  %v909_v62 = vpop.f32.mrb[17].mxu0  ;;  %v950_v63 = vpop.f32.mrb[17].mxu1  ;;  %v957_v1 = vadd.f32 %v1498_v0, %v948_v60 }
 0x4f9   : > { %v956_v34 = vadd.f32 %v1497_v53, %v909_v62  ;;  %v911_v36 = vpop.f32.mrb[18].mxu0  ;;  %v952_v37 = vpop.f32.mrb[18].mxu1  ;;  %v958_v44 = vadd.f32 %v1499_v5, %v950_v63  ;;  %v1687_v5 = vld [vmem:[%s2434_s1 + $0x2c] ss:$16 sps:$4 sm:$0xff]  }
 0x4fa   : > { %v959_v38 = vmul.f32 0.5, %v955_v61  ;;  %v912_v41 = vpop.f32.mrb[19].mxu0  ;;  %v953_v42 = vpop.f32.mrb[19].mxu1 }
 0x4fb   : > { %v963_v43 = vmul.f32 0.5, %v956_v34  ;;  %v968_v46 = vmul.f32 0.5, %v958_v44  ;;  %v1684_v42 = vld [vmem:[%s2434_s1] ss:$16 sps:$4 sm:$0xff]  }
 0x4fc   : > { %1642 = vtanh.f32 %v959_v38  ;;  %v1688_v44 = vld [vmem:[%s2434_s1 + $0x20] ss:$16 sps:$4 sm:$0xff]  }
 0x4fd   : > { %1644 = vtanh.f32 %v963_v43  ;;  %v1685_v43 = vld [vmem:[%s2434_s1 + $0x8] ss:$16 sps:$4 sm:$0xff]  }
 0x4fe   : > { %1646 = vtanh.f32 %v957_v1  ;;  %v1686_v1 = vld [vmem:[%s2434_s1 + $0x24] ss:$16 sps:$4 sm:$0xff]  }
 0x4ff   : > { %1648 = vtanh.f32 %v968_v46  ;;  %v1689_v46 = vld [vmem:[%s2434_s1 + $0x28] ss:$16 sps:$4 sm:$0xff]  }
 0x506   : > { %v1643_v47 = vpop.eup %1642 }
 0x507   : > { %v1645_v48 = vpop.eup %1644  ;;  %v961_v49 = vadd.f32 1.0, %v1643_v47  ;;  %v1690_v47 = vld [vmem:[%s2434_s1 + $0x44] ss:$16 sps:$4 sm:$0xff]  }
 0x508   : > { %v965_v50 = vadd.f32 1.0, %v1645_v48  ;;  %v1647_v52 = vpop.eup %1646  ;;  %v1691_v48 = vld [vmem:[%s2434_s1 + $0x4c] ss:$16 sps:$4 sm:$0xff]  }
 0x509   : > { %v962_v51 = vmul.f32 0.5, %v961_v49  ;;  %v1649_v56 = vpop.eup %1648  ;;  %v1693_v49 = vld [vmem:[%s2434_s1 + $0x48] ss:$16 sps:$4 sm:$0xff]  }
 0x50a   : > { %v966_v39 = vmul.f32 0.5, %v965_v50  ;;  %v970_v58 = vadd.f32 1.0, %v1649_v56  ;;  %v1694_v50 = vld [vmem:[%s2434_s1 + $0x64] ss:$16 sps:$4 sm:$0xff]   ;;  %v1701_v56 = vld [vmem:[%s2434_s1 + $0x88] ss:$16 sps:$4 sm:$0xff]  }
 0x50b   : > { %v973_v40 = vmul.f32 %v1647_v52, %v962_v51  ;;  %v1695_v51 = vld [vmem:[%s2434_s1 + $0x6c] ss:$16 sps:$4 sm:$0xff]   ;;  %v1696_v52 = vld [vmem:[%s2434_s1 + $0x60] ss:$16 sps:$4 sm:$0xff]  }
 0x50c   : > { %v972_v45 = vmul.f32 %v966_v39, %v2193_v54  ;;  %v971_v32 = vmul.f32 0.5, %v970_v58  ;;  %v1697_v39 = vld [vmem:[%s2434_s1 + $0x68] ss:$16 sps:$4 sm:$0xff]   ;;  %v1702_v58 = vld [vmem:[%s2434_s1 + $0xa4] ss:$16 sps:$4 sm:$0xff]  }
 0x50e   : > { %v2239_v55 = vadd.f32 %v973_v40, %v972_v45  ;;  %v1698_v40 = vld [vmem:[%s2434_s1 + $0x84] ss:$16 sps:$4 sm:$0xff]   ;;  %v1699_v45 = vld [vmem:[%s2434_s1 + $0x8c] ss:$16 sps:$4 sm:$0xff]  }
 0x510   : > { %1650 = vtanh.f32 %v2239_v55 }
 0x51a   : > { %v1651_v53 = vpop.eup %1650 }
 0x51b   : > { %v976_v59 = vmul.f32 %v1651_v53, %v971_v32  ;;  %v1703_v32 = vld [vmem:[%s2434_s1 + $0xac] ss:$16 sps:$4 sm:$0xff]   ;;  %v1704_v53 = vld [vmem:[%s2434_s1 + $0xa0] ss:$16 sps:$4 sm:$0xff]  }
 0x51d   : > { %v2243_v60 = vadd.f32 %v976_v59, %v2197_v57  ;;  %v977_v61 = vpack.c.bf16 %v976_v59, %v976_v59  ;;  %v1705_v59 = vld [vmem:[%s2434_s1 + $0xa8] ss:$16 sps:$4 sm:$0xff]  }
 0x51f   : > { %1500 = vst [vmem:[%s1816_s25 + $0x10] sm:$0xf] %v977_v61  ;;  %1019 = vmatmul.mubr.bf16.vlgmr.msra.gmra.mrb[20].mxu0 %v977_v61  ;;  %1060 = vmatmul.mubr.bf16.vlgmr.msra.gmra.mrb[20].mxu1 %v977_v61  ;;  %v1707_v61 = vld [vmem:[%s2434_s1 + $0xcc] ss:$16 sps:$4 sm:$0xff]  }
 0x520   : > { %1100 = vmatpush1.bf16.msra.mxu0 %v1826_v2  ;;  %1141 = vmatpush1.bf16.msra.mxu1 %v1850_v7  ;;  %v1682_v2 = vld [vmem:[%s2434_s1 + $0x4] ss:$16 sps:$4 sm:$0xff]   ;;  %v1502_v7 = vld [vmem:[%s1811_s22 + $0xa8] sm:$0xff] }
 0x521   : > { %1101 = vmatprep.subr.bf16.mxu0 %v1834_v4  ;;  %1142 = vmatprep.subr.bf16.mxu1 %v1862_v9  ;;  %v1683_v4 = vld [vmem:[%s2434_s1 + $0xc] ss:$16 sps:$4 sm:$0xff]  }
 0x522   : > { %1131 = vmatprep.mubr.bf16.mxu0 %v1767_v3  ;;  %1172 = vmatprep.mubr.bf16.mxu1 %v1767_v3 }
 0x524   : > { %1102 = vmatpush1.bf16.msra.mxu0 %v1845_v6  ;;  %1143 = vmatpush1.bf16.msra.mxu1 %v1868_v10  ;;  %v1501_v6 = vld [vmem:[%s1811_s22 + $0xa0] sm:$0xff] }
 0x525   : > { %1103 = vmatprep.subr.bf16.mxu0 %v1856_v8  ;;  %1144 = vmatprep.subr.bf16.mxu1 %v1886_v13  ;;  %v1503_v13 = vld [vmem:[%s1811_s22 + $0xb0] sm:$0xff] }
 0x528   : > { %1104 = vmatpush1.bf16.msra.mxu0 %v1875_v11  ;;  %1145 = vmatpush1.bf16.msra.mxu1 %v1892_v14 }
 0x529   : > { %1105 = vmatprep.subr.bf16.mxu0 %v1881_v12  ;;  %1146 = vmatprep.subr.bf16.mxu1 %v1904_v16 }
 0x52c   : > { %1106 = vmatpush1.bf16.msra.mxu0 %v1899_v15  ;;  %1147 = vmatpush1.bf16.msra.mxu1 %v1921_v19 }
 0x52d   : > { %1107 = vmatprep.subr.bf16.mxu0 %v1910_v17  ;;  %1148 = vmatprep.subr.bf16.mxu1 %v1928_v20 }
 0x530   : > { %1108 = vmatpush1.bf16.msra.mxu0 %v1916_v18  ;;  %1149 = vmatpush1.bf16.msra.mxu1 %v1940_v22  ;;  %v1504_v22 = vld [vmem:[%s1811_s22 + $0xb8] sm:$0xff] }
 0x531   : > { %1109 = vmatprep.subr.bf16.mxu0 %v1934_v21  ;;  %1150 = vmatprep.subr.bf16.mxu1 %v1952_v24 }
 0x534   : > { %1110 = vmatpush1.bf16.msra.mxu0 %v1947_v23  ;;  %1151 = vmatpush1.bf16.msra.mxu1 %v1964_v26 }
 0x535   : > { %1111 = vmatprep.subr.bf16.mxu0 %v1958_v25  ;;  %1152 = vmatprep.subr.bf16.mxu1 %v1976_v28 }
 0x538   : > { %1112 = vmatpush1.bf16.msra.mxu0 %v1971_v27  ;;  %1153 = vmatpush1.bf16.msra.mxu1 %v1988_v30 }
 0x539   : > { %1113 = vmatprep.subr.bf16.mxu0 %v1982_v29  ;;  %1154 = vmatprep.subr.bf16.mxu1 %v2000_v33 }
 0x53c   : > { %1114 = vmatpush1.bf16.msra.mxu0 %v1995_v31  ;;  %1155 = vmatpush1.bf16.msra.mxu1 %v2007_v35 }
 0x53d   : > { %1212 = vmatprep.subr.bf16.mxu0 %v1682_v2  ;;  %1253 = vmatprep.subr.bf16.mxu1 %v1683_v4  ;;  %v1708_v2 = vld [vmem:[%s2434_s1 + $0xc0] ss:$16 sps:$4 sm:$0xff]   ;;  %v1709_v4 = vld [vmem:[%s2434_s1 + $0xc8] ss:$16 sps:$4 sm:$0xff]  }
 0x5f2   : > { %v1020_v8 = vpop.f32.mrb[20].mxu0  ;;  %v1061_v9 = vpop.f32.mrb[20].mxu1 }
 0x5f3   : > { %v1068_v10 = vadd.f32 %v1501_v6, %v1020_v8  ;;  %v1022_v11 = vpop.f32.mrb[21].mxu0  ;;  %v1063_v12 = vpop.f32.mrb[21].mxu1  ;;  %v1070_v21 = vadd.f32 %v1503_v13, %v1061_v9  ;;  %v1710_v6 = vld [vmem:[%s2434_s1 + $0xe4] ss:$16 sps:$4 sm:$0xff]   ;;  %v1507_v9 = vld [vmem:[%s1811_s22 + $0xc8] sm:$0xff] }
 0x5f4   : > { %v1069_v14 = vadd.f32 %v1502_v7, %v1022_v11  ;;  %v1024_v15 = vpop.f32.mrb[22].mxu0  ;;  %v1065_v16 = vpop.f32.mrb[22].mxu1  ;;  %v1071_v23 = vadd.f32 %v1504_v22, %v1063_v12  ;;  %v1711_v7 = vld [vmem:[%s2434_s1 + $0xe0] ss:$16 sps:$4 sm:$0xff]  }
 0x5f5   : > { %v1072_v17 = vmul.f32 0.5, %v1068_v10  ;;  %v1025_v18 = vpop.f32.mrb[23].mxu0  ;;  %v1066_v19 = vpop.f32.mrb[23].mxu1  ;;  %v1506_v8 = vld [vmem:[%s1811_s22 + $0xc0] sm:$0xff]  ;;  %v1508_v15 = vld [vmem:[%s1811_s22 + $0xd0] sm:$0xff] }
 0x5f6   : > { %v1076_v20 = vmul.f32 0.5, %v1069_v14  ;;  %v1081_v24 = vmul.f32 0.5, %v1071_v23 }
 0x5f7   : > { %1652 = vtanh.f32 %v1072_v17 }
 0x5f8   : > { %1654 = vtanh.f32 %v1076_v20 }
 0x5f9   : > { %1656 = vtanh.f32 %v1070_v21 }
 0x5fa   : > { %1658 = vtanh.f32 %v1081_v24 }
 0x601   : > { %v1653_v25 = vpop.eup %1652 }
 0x602   : > { %v1655_v26 = vpop.eup %1654  ;;  %v1074_v27 = vadd.f32 1.0, %v1653_v25 }
 0x603   : > { %v1078_v28 = vadd.f32 1.0, %v1655_v26  ;;  %v1657_v30 = vpop.eup %1656 }
 0x604   : > { %v1075_v29 = vmul.f32 0.5, %v1074_v27  ;;  %v1659_v63 = vpop.eup %1658 }
 0x605   : > { %v1079_v31 = vmul.f32 0.5, %v1078_v28  ;;  %v1083_v0 = vadd.f32 1.0, %v1659_v63 }
 0x606   : > { %v1086_v54 = vmul.f32 %v1657_v30, %v1075_v29 }
 0x607   : > { %v1085_v57 = vmul.f32 %v1079_v31, %v2239_v55  ;;  %v1084_v34 = vmul.f32 0.5, %v1083_v0  ;;  %v1700_v55 = vld [vmem:[%s2434_s1 + $0x80] ss:$16 sps:$4 sm:$0xff]  }
 0x609   : > { %v2289_v62 = vadd.f32 %v1086_v54, %v1085_v57 }
 0x60b   : > { %1660 = vtanh.f32 %v2289_v62 }
 0x615   : > { %v1661_v36 = vpop.eup %1660 }
 0x616   : > { %v1089_v37 = vmul.f32 %v1661_v36, %v1084_v34 }
 0x618   : > { %v2293_v38 = vadd.f32 %v1089_v37, %v2243_v60  ;;  %v1090_v41 = vpack.c.bf16 %v1089_v37, %v1089_v37  ;;  %v1706_v60 = vld [vmem:[%s2434_s1 + $0xc4] ss:$16 sps:$4 sm:$0xff]  }
 0x61a   : > { %1505 = vst [vmem:[%s1816_s25 + $0x14] sm:$0xf] %v1090_v41  ;;  %1132 = vmatmul.mubr.bf16.vlgmr.msra.gmra.mrb[24].mxu0 %v1090_v41  ;;  %1173 = vmatmul.mubr.bf16.vlgmr.msra.gmra.mrb[24].mxu1 %v1090_v41 }
 0x61b   : > { %1213 = vmatpush1.bf16.msra.mxu0 %v1684_v42  ;;  %1254 = vmatpush1.bf16.msra.mxu1 %v1685_v43 }
 0x61c   : > { %1214 = vmatprep.subr.bf16.mxu0 %v1686_v1  ;;  %1255 = vmatprep.subr.bf16.mxu1 %v1687_v5  ;;  %v1511_v1 = vld [vmem:[%s1811_s22 + $0xe0] sm:$0xff]  ;;  %v1512_v5 = vld [vmem:[%s1811_s22 + $0xe8] sm:$0xff] }
 0x61d   : > { %1244 = vmatprep.mubr.bf16.mxu0 %v1767_v3  ;;  %1285 = vmatprep.mubr.bf16.mxu1 %v1767_v3  ;;  %v1692_v3 = vld [vmem:[%s2434_s1 + $0x40] ss:$16 sps:$4 sm:$0xff]  }
 0x61f   : > { %1215 = vmatpush1.bf16.msra.mxu0 %v1688_v44  ;;  %1256 = vmatpush1.bf16.msra.mxu1 %v1689_v46 }
 0x620   : > { %1216 = vmatprep.subr.bf16.mxu0 %v1690_v47  ;;  %1257 = vmatprep.subr.bf16.mxu1 %v1691_v48 }
 0x623   : > { %1217 = vmatpush1.bf16.msra.mxu0 %v1692_v3  ;;  %1258 = vmatpush1.bf16.msra.mxu1 %v1693_v49  ;;  %v1513_v3 = vld [vmem:[%s1811_s22 + $0xf0] sm:$0xff] }
 0x624   : > { %1218 = vmatprep.subr.bf16.mxu0 %v1694_v50  ;;  %1259 = vmatprep.subr.bf16.mxu1 %v1695_v51 }
 0x627   : > { %1219 = vmatpush1.bf16.msra.mxu0 %v1696_v52  ;;  %1260 = vmatpush1.bf16.msra.mxu1 %v1697_v39 }
 0x628   : > { %1220 = vmatprep.subr.bf16.mxu0 %v1698_v40  ;;  %1261 = vmatprep.subr.bf16.mxu1 %v1699_v45 }
 0x62b   : > { %1221 = vmatpush1.bf16.msra.mxu0 %v1700_v55  ;;  %1262 = vmatpush1.bf16.msra.mxu1 %v1701_v56  ;;  %v1514_v55 = vld [vmem:[%s1811_s22 + $0xf8] sm:$0xff] }
 0x62c   : > { %1222 = vmatprep.subr.bf16.mxu0 %v1702_v58  ;;  %1263 = vmatprep.subr.bf16.mxu1 %v1703_v32 }
 0x62f   : > { %1223 = vmatpush1.bf16.msra.mxu0 %v1704_v53  ;;  %1264 = vmatpush1.bf16.msra.mxu1 %v1705_v59 }
 0x630   : > { %1224 = vmatprep.subr.bf16.mxu0 %v1706_v60  ;;  %1265 = vmatprep.subr.bf16.mxu1 %v1707_v61 }
 0x633   : > { %1225 = vmatpush1.bf16.msra.mxu0 %v1708_v2  ;;  %1266 = vmatpush1.bf16.msra.mxu1 %v1709_v4 }
 0x634   : > { %1226 = vmatprep.subr.bf16.mxu0 %v1710_v6  ;;  %1267 = vmatprep.subr.bf16.mxu1 %v2000_v33 }
 0x637   : > { %1227 = vmatpush1.bf16.msra.mxu0 %v1711_v7  ;;  %1268 = vmatpush1.bf16.msra.mxu1 %v2007_v35  ;;  %v1509_v35 = vld [vmem:[%s1811_s22 + $0xd8] sm:$0xff]  ;;  %s1768_s22 = smov [#allocation4]  }
 0x638   : > { %s1347_s23 = sshll.u32 %s1768_s22, 4  ;;  %s1348_s23 = int_to_ptr.vmem [resolvable:$true] %s1347_s23 }
 0x639   : > { %s1712_s26 = scalar_lea.vmem %s1348_s23, 128  ;;  %p1719_p10 = scmp.lt.s32.totalorder %s1348_s23, %s1348_s23 }
 0x63a   : > { %p1713_p7 = scmp.ne.s32.totalorder %s1348_s23, %s1712_s26  ;;  %p1720_p11 = scmp.lt.s32.totalorder %s1712_s26, %s1712_s26 }
 0x63c   : > { %p1714_p8 = pnand %p1713_p7, %p2398_p6  ;;  %p1721_p12 = por %p1720_p11, %p1719_p10 }
 0x63e   : > { %p1715_p9 = pneg %p1714_p8 }
 0x640   : > { %p1722_p13 = pnand %p1721_p12, %p1715_p9 }
 0x6ed   : > { %v1133_v10 = vpop.f32.mrb[24].mxu0  ;;  %v1174_v11 = vpop.f32.mrb[24].mxu1 }
 0x6ee   : > { %v1181_v12 = vadd.f32 %v1506_v8, %v1133_v10  ;;  %v1135_v13 = vpop.f32.mrb[25].mxu0  ;;  %v1176_v14 = vpop.f32.mrb[25].mxu1  ;;  %v1183_v22 = vadd.f32 %v1508_v15, %v1174_v11 }
 0x6ef   : > { %v1182_v16 = vadd.f32 %v1507_v9, %v1135_v13  ;;  %v1137_v17 = vpop.f32.mrb[26].mxu0  ;;  %v1178_v18 = vpop.f32.mrb[26].mxu1  ;;  %v1184_v23 = vadd.f32 %v1509_v35, %v1176_v14 }
 0x6f0   : > { %v1185_v33 = vmul.f32 0.5, %v1181_v12  ;;  %v1138_v19 = vpop.f32.mrb[27].mxu0  ;;  %v1179_v20 = vpop.f32.mrb[27].mxu1 }
 0x6f1   : > { %v1189_v21 = vmul.f32 0.5, %v1182_v16  ;;  %v1194_v24 = vmul.f32 0.5, %v1184_v23  ;;  %v1322_v16 = vld [vmem:[#allocation4] sm:$0xff] }
 0x6f2   : > { %1662 = vtanh.f32 %v1185_v33 }
 0x6f3   : > { %1664 = vtanh.f32 %v1189_v21 }
 0x6f4   : > { %1666 = vtanh.f32 %v1183_v22 }
 0x6f5   : > { %1668 = vtanh.f32 %v1194_v24 }
 0x6fc   : > { %v1663_v25 = vpop.eup %1662 }
 0x6fd   : > { %v1665_v26 = vpop.eup %1664  ;;  %v1187_v27 = vadd.f32 1.0, %v1663_v25 }
 0x6fe   : > { %v1191_v28 = vadd.f32 1.0, %v1665_v26  ;;  %v1667_v30 = vpop.eup %1666 }
 0x6ff   : > { %v1188_v29 = vmul.f32 0.5, %v1187_v27  ;;  %v1669_v0 = vpop.eup %1668 }
 0x700   : > { %v1192_v31 = vmul.f32 0.5, %v1191_v28  ;;  %v1196_v34 = vadd.f32 1.0, %v1669_v0 }
 0x701   : > { %v1199_v54 = vmul.f32 %v1667_v30, %v1188_v29 }
 0x702   : > { %v1198_v57 = vmul.f32 %v1192_v31, %v2289_v62  ;;  %v1197_v36 = vmul.f32 0.5, %v1196_v34 }
 0x704   : > { %v1200_v63 = vadd.f32 %v1199_v54, %v1198_v57 }
 0x706   : > { %1670 = vtanh.f32 %v1200_v63 }
 0x710   : > { %v1671_v37 = vpop.eup %1670 }
 0x711   : > { %v1202_v41 = vmul.f32 %v1671_v37, %v1197_v36 }
 0x713   : > { %v1203_v42 = vpack.c.bf16 %v1202_v41, %v1202_v41  ;;  %v1206_v43 = vadd.f32 %v1202_v41, %v2293_v38 }
 0x715   : > { %1510 = vst [vmem:[%s1816_s25 + $0x18] sm:$0xf] %v1203_v42  ;;  %1245 = vmatmul.mubr.bf16.vlgmr.msra.gmra.mrb[28].mxu0 %v1203_v42  ;;  %1286 = vmatmul.mubr.bf16.vlgmr.msra.gmra.mrb[28].mxu1 %v1203_v42 }
 0x7e8   : > { %v1246_v44 = vpop.f32.mrb[28].mxu0  ;;  %v1287_v46 = vpop.f32.mrb[28].mxu1 }
 0x7e9   : > { %v1294_v62 = vadd.f32 %v1511_v1, %v1246_v44  ;;  %v1248_v47 = vpop.f32.mrb[29].mxu0  ;;  %v1289_v48 = vpop.f32.mrb[29].mxu1  ;;  %v1296_v38 = vadd.f32 %v1513_v3, %v1287_v46 }
 0x7ea   : > { %v1295_v49 = vadd.f32 %v1512_v5, %v1248_v47  ;;  %v1250_v50 = vpop.f32.mrb[30].mxu0  ;;  %v1291_v51 = vpop.f32.mrb[30].mxu1  ;;  %v1297_v56 = vadd.f32 %v1514_v55, %v1289_v48 }
 0x7eb   : > { %v1298_v52 = vmul.f32 0.5, %v1294_v62  ;;  %v1251_v39 = vpop.f32.mrb[31].mxu0  ;;  %v1292_v40 = vpop.f32.mrb[31].mxu1 }
 0x7ec   : > { %v1302_v45 = vmul.f32 0.5, %v1295_v49  ;;  %v1307_v58 = vmul.f32 0.5, %v1297_v56 }
 0x7ed   : > { %1672 = vtanh.f32 %v1298_v52 }
 0x7ee   : > { %1674 = vtanh.f32 %v1302_v45 }
 0x7ef   : > { %1676 = vtanh.f32 %v1296_v38 }
 0x7f0   : > { %1678 = vtanh.f32 %v1307_v58 }
 0x7f7   : > { %v1673_v32 = vpop.eup %1672 }
 0x7f8   : > { %v1675_v53 = vpop.eup %1674  ;;  %v1300_v59 = vadd.f32 1.0, %v1673_v32 }
 0x7f9   : > { %v1304_v60 = vadd.f32 1.0, %v1675_v53  ;;  %v1677_v2 = vpop.eup %1676 }
 0x7fa   : > { %v1301_v61 = vmul.f32 0.5, %v1300_v59  ;;  %v1679_v9 = vpop.eup %1678 }
 0x7fb   : > { %v1305_v4 = vmul.f32 0.5, %v1304_v60  ;;  %v1309_v10 = vadd.f32 1.0, %v1679_v9 }
 0x7fc   : > { %v1312_v6 = vmul.f32 %v1677_v2, %v1301_v61 }
 0x7fd   : > { %v1311_v7 = vmul.f32 %v1305_v4, %v1200_v63  ;;  %v1310_v11 = vmul.f32 0.5, %v1309_v10 }
 0x7ff   : > { %v1313_v8 = vadd.f32 %v1312_v6, %v1311_v7 }
 0x801   : > { %1680 = vtanh.f32 %v1313_v8  ;;  %1321 = vst [vmem:[#allocation3] sm:$0xff] %v1313_v8 }
 0x80b   : > { %v1681_v12 = vpop.eup %1680 }
 0x80c   : > { %v1315_v13 = vmul.f32 %v1681_v12, %v1310_v11 }
 0x80e   : > { %v1316_v14 = vpack.c.bf16 %v1315_v13, %v1315_v13  ;;  %1320 = vst [vmem:[#allocation2] sm:$0xff] %v1315_v13  ;;  %v1319_v15 = vadd.f32 %v1315_v13, %v1206_v43 }
 0x810   : > { %1515 = vst [vmem:[%s1816_s25 + $0x1c] sm:$0xf] %v1316_v14  ;;  %v1323_v17 = vmul.f32 0.0625, %v1319_v15 }
 0x812   : > { %v1324_v18 = vadd.f32 %v1323_v17, %v1322_v16 }
 0x814   : > { %1325 = vst [vmem:[#allocation4] sm:$0xff] %v1324_v18 }
 0x815   : > { %1725 = shalt.err (!%p1722_p13)
}
 0x816   : > { %s1726_s15 = scalar_lea.hbm %s2436_s3, 128 }
 0x817   : > { %p1727_p0 = scmp.ne.s32.totalorder %s2436_s3, %s1726_s15  ;;  %p1732_p3 = scmp.lt.u32.totalorder %s1726_s15, %s2436_s3 }
 0x819   : > { %p1728_p1 = pnand %p1727_p0, %p2398_p6 }
 0x81b   : > { %p1729_p2 = pneg %p1728_p1 }
 0x81d   : > { %p1734_p4 = pnand %p1732_p3, %p1729_p2 }
 0x81f   : > { %1737 = shalt.err (!%p1734_p4)
}
 0x820   : > { %1522 = dma.vmem_to_hbm [thread:$0]  (%p2398_p6), %s1348_s23, 128, %s2436_s3, [#allocation5]  }
 0x821   : > { %1751 = dma.done.wait (%p2398_p6), [#allocation5], 128  }
 0x822   : > { %1753 = vsyncadd (%p2398_p6), [#allocation5], 4294967168 }
 0x823 PF: > { %s15_s14 = sadd.s32 1, %s1764_s14   ;;  %s2438_s12 = smov %s1760_s13 }
 0x824   : > { %p12_p5 = scmp.ge.s32.totalorder %s15_s14, 4   ;;  %s2439_s13 = smov %s2441_s16 }
 0x826   :  { %14 = sbr.rel (!%p12_p5) target bundleno = 2 (0x2), region = 86 }
 0x82d   :  { %1371 = vsyncpa [#allocation5], 1 }
 0x82e   :  { %1373 = vsyncpa [#allocation5 + $0x1], 1 }

// kernel: blstm_relu_forward.13
= control target key start
LH: loop header
LB: loop body
LE: loop exit
PB: predicated region body
PF: predicated region fallthrough
CT: control target
= control target key end

     0   :  { %s1537_s1 = inlined_call_operand.vmem [shape: bf16[256,512], index: 1, kind: input, shape index: {}]   ;;  %s1538_s0 = inlined_call_operand.vmem [shape: bf16[128,256], index: 0, kind: input, shape index: {}]   ;;  %s1539_s2 = inlined_call_operand.vmem [shape: f32[1,512], index: 2, kind: input, shape index: {}]   ;;  %s1540_s3 = inlined_call_operand.vmem [shape: f32[128,512], index: 3, kind: output, shape index: {}]  }
   0x1   :  { %v890_v0 = vld [vmem:[%s1537_s1 + $0x4] ss:$16 sps:$4 sm:$0xff]   ;;  %v892_v1 = vld [vmem:[%s1537_s1 + $0xc] ss:$16 sps:$4 sm:$0xff]   ;;  %v894_v2 = vld [vmem:[%s1537_s1] ss:$16 sps:$4 sm:$0xff]  }
   0x2   :  { %516 = vmatprep.subr.bf16.mxu0 %v890_v0  ;;  %v895_v3 = vld [vmem:[%s1537_s1 + $0x8] ss:$16 sps:$4 sm:$0xff]   ;;  %629 = vmatprep.subr.bf16.mxu1 %v892_v1  ;;  %v896_v4 = vld [vmem:[%s1537_s1 + $0x24] ss:$16 sps:$4 sm:$0xff]   ;;  %v898_v5 = vld [vmem:[%s1537_s1 + $0x2c] ss:$16 sps:$4 sm:$0xff]  }
   0x3   :  { %517 = vmatpush1.bf16.msra.mxu0 %v894_v2  ;;  %630 = vmatpush1.bf16.msra.mxu1 %v895_v3  ;;  %v900_v6 = vld [vmem:[%s1537_s1 + $0x20] ss:$16 sps:$4 sm:$0xff]   ;;  %v901_v7 = vld [vmem:[%s1537_s1 + $0x28] ss:$16 sps:$4 sm:$0xff]   ;;  %v902_v8 = vld [vmem:[%s1537_s1 + $0x44] ss:$16 sps:$4 sm:$0xff]  }
   0x4   :  { %518 = vmatprep.subr.bf16.mxu0 %v896_v4  ;;  %631 = vmatprep.subr.bf16.mxu1 %v898_v5  ;;  %v904_v9 = vld [vmem:[%s1537_s1 + $0x4c] ss:$16 sps:$4 sm:$0xff]   ;;  %v906_v10 = vld [vmem:[%s1537_s1 + $0x40] ss:$16 sps:$4 sm:$0xff]   ;;  %v907_v11 = vld [vmem:[%s1537_s1 + $0x48] ss:$16 sps:$4 sm:$0xff]  }
   0x5   :  { %v908_v12 = vld [vmem:[%s1537_s1 + $0x64] ss:$16 sps:$4 sm:$0xff]   ;;  %v910_v13 = vld [vmem:[%s1537_s1 + $0x6c] ss:$16 sps:$4 sm:$0xff]   ;;  %v912_v14 = vld [vmem:[%s1537_s1 + $0x60] ss:$16 sps:$4 sm:$0xff]  }
   0x6   :  { %v913_v15 = vld [vmem:[%s1537_s1 + $0x68] ss:$16 sps:$4 sm:$0xff]   ;;  %v914_v16 = vld [vmem:[%s1537_s1 + $0x84] ss:$16 sps:$4 sm:$0xff]   ;;  %v916_v17 = vld [vmem:[%s1537_s1 + $0x8c] ss:$16 sps:$4 sm:$0xff]  }
   0x7   :  { %519 = vmatpush1.bf16.msra.mxu0 %v900_v6  ;;  %632 = vmatpush1.bf16.msra.mxu1 %v901_v7  ;;  %v918_v18 = vld [vmem:[%s1537_s1 + $0x80] ss:$16 sps:$4 sm:$0xff]   ;;  %v919_v19 = vld [vmem:[%s1537_s1 + $0x88] ss:$16 sps:$4 sm:$0xff]   ;;  %v920_v20 = vld [vmem:[%s1537_s1 + $0xa4] ss:$16 sps:$4 sm:$0xff]  }
   0x8   :  { %520 = vmatprep.subr.bf16.mxu0 %v902_v8  ;;  %633 = vmatprep.subr.bf16.mxu1 %v904_v9  ;;  %v922_v21 = vld [vmem:[%s1537_s1 + $0xac] ss:$16 sps:$4 sm:$0xff]   ;;  %v924_v22 = vld [vmem:[%s1537_s1 + $0xa0] ss:$16 sps:$4 sm:$0xff]   ;;  %v925_v23 = vld [vmem:[%s1537_s1 + $0xa8] ss:$16 sps:$4 sm:$0xff]  }
   0x9   :  { %v926_v24 = vld [vmem:[%s1537_s1 + $0xc4] ss:$16 sps:$4 sm:$0xff]   ;;  %v928_v25 = vld [vmem:[%s1537_s1 + $0xcc] ss:$16 sps:$4 sm:$0xff]   ;;  %v930_v26 = vld [vmem:[%s1537_s1 + $0xc0] ss:$16 sps:$4 sm:$0xff]  }
   0xa   :  { %v931_v27 = vld [vmem:[%s1537_s1 + $0xc8] ss:$16 sps:$4 sm:$0xff]   ;;  %v932_v28 = vld [vmem:[%s1537_s1 + $0xe4] ss:$16 sps:$4 sm:$0xff]   ;;  %v934_v29 = vld [vmem:[%s1537_s1 + $0xec] ss:$16 sps:$4 sm:$0xff]  }
   0xb   :  { %521 = vmatpush1.bf16.msra.mxu0 %v906_v10  ;;  %634 = vmatpush1.bf16.msra.mxu1 %v907_v11  ;;  %v936_v30 = vld [vmem:[%s1537_s1 + $0xe0] ss:$16 sps:$4 sm:$0xff]   ;;  %v937_v31 = vld [vmem:[%s1537_s1 + $0xe8] ss:$16 sps:$4 sm:$0xff]   ;;  %v938_v32 = vld [vmem:[%s1537_s1 + $0x104] ss:$16 sps:$4 sm:$0xff]  }
   0xc   :  { %522 = vmatprep.subr.bf16.mxu0 %v908_v12  ;;  %635 = vmatprep.subr.bf16.mxu1 %v910_v13  ;;  %v940_v33 = vld [vmem:[%s1537_s1 + $0x10c] ss:$16 sps:$4 sm:$0xff]   ;;  %v942_v34 = vld [vmem:[%s1537_s1 + $0x100] ss:$16 sps:$4 sm:$0xff]   ;;  %v943_v35 = vld [vmem:[%s1537_s1 + $0x108] ss:$16 sps:$4 sm:$0xff]  }
   0xd   :  { %v944_v36 = vld [vmem:[%s1537_s1 + $0x124] ss:$16 sps:$4 sm:$0xff]   ;;  %v946_v37 = vld [vmem:[%s1537_s1 + $0x12c] ss:$16 sps:$4 sm:$0xff]   ;;  %v948_v38 = vld [vmem:[%s1537_s1 + $0x120] ss:$16 sps:$4 sm:$0xff]  }
   0xe   :  { %v949_v39 = vld [vmem:[%s1537_s1 + $0x128] ss:$16 sps:$4 sm:$0xff]   ;;  %v950_v40 = vld [vmem:[%s1537_s1 + $0x144] ss:$16 sps:$4 sm:$0xff]   ;;  %v952_v41 = vld [vmem:[%s1537_s1 + $0x14c] ss:$16 sps:$4 sm:$0xff]  }
   0xf   :  { %523 = vmatpush1.bf16.msra.mxu0 %v912_v14  ;;  %636 = vmatpush1.bf16.msra.mxu1 %v913_v15  ;;  %v954_v42 = vld [vmem:[%s1537_s1 + $0x140] ss:$16 sps:$4 sm:$0xff]   ;;  %v955_v43 = vld [vmem:[%s1537_s1 + $0x148] ss:$16 sps:$4 sm:$0xff]   ;;  %v956_v44 = vld [vmem:[%s1537_s1 + $0x164] ss:$16 sps:$4 sm:$0xff]  }
  0x10   :  { %524 = vmatprep.subr.bf16.mxu0 %v914_v16  ;;  %637 = vmatprep.subr.bf16.mxu1 %v916_v17  ;;  %v958_v45 = vld [vmem:[%s1537_s1 + $0x16c] ss:$16 sps:$4 sm:$0xff]   ;;  %v960_v46 = vld [vmem:[%s1537_s1 + $0x160] ss:$16 sps:$4 sm:$0xff]   ;;  %v961_v47 = vld [vmem:[%s1537_s1 + $0x168] ss:$16 sps:$4 sm:$0xff]   ;;  %v96_v16 = vlaneseq }
  0x11   :  { %v988_v48 = vld [vmem:[%s1538_s0 + $0x4] ss:$8 sps:$4 sm:$0xff]   ;;  %v966_v51 = vld [vmem:[%s1537_s1 + $0x180] ss:$16 sps:$4 sm:$0xff]   ;;  %v967_v52 = vld [vmem:[%s1537_s1 + $0x188] ss:$16 sps:$4 sm:$0xff]  }
  0x12   :  { %v962_v49 = vld [vmem:[%s1537_s1 + $0x184] ss:$16 sps:$4 sm:$0xff]   ;;  %v964_v50 = vld [vmem:[%s1537_s1 + $0x18c] ss:$16 sps:$4 sm:$0xff]   ;;  %548 = vmatprep.mubr.bf16.mxu0 %v988_v48  ;;  %661 = vmatprep.mubr.bf16.mxu1 %v988_v48  ;;  %v972_v55 = vld [vmem:[%s1537_s1 + $0x1a0] ss:$16 sps:$4 sm:$0xff]  }
  0x13   :  { %525 = vmatpush1.bf16.msra.mxu0 %v918_v18  ;;  %638 = vmatpush1.bf16.msra.mxu1 %v919_v19  ;;  %v968_v53 = vld [vmem:[%s1537_s1 + $0x1a4] ss:$16 sps:$4 sm:$0xff]   ;;  %v970_v54 = vld [vmem:[%s1537_s1 + $0x1ac] ss:$16 sps:$4 sm:$0xff]   ;;  %v973_v56 = vld [vmem:[%s1537_s1 + $0x1a8] ss:$16 sps:$4 sm:$0xff]  }
  0x14   :  { %526 = vmatprep.subr.bf16.mxu0 %v920_v20  ;;  %639 = vmatprep.subr.bf16.mxu1 %v922_v21  ;;  %v974_v57 = vld [vmem:[%s1537_s1 + $0x1c4] ss:$16 sps:$4 sm:$0xff]   ;;  %v976_v58 = vld [vmem:[%s1537_s1 + $0x1cc] ss:$16 sps:$4 sm:$0xff]   ;;  %v978_v59 = vld [vmem:[%s1537_s1 + $0x1c0] ss:$16 sps:$4 sm:$0xff]  }
  0x15   :  { %v979_v60 = vld [vmem:[%s1537_s1 + $0x1c8] ss:$16 sps:$4 sm:$0xff]   ;;  %v980_v61 = vld [vmem:[%s1537_s1 + $0x1e4] ss:$16 sps:$4 sm:$0xff]   ;;  %v982_v62 = vld [vmem:[%s1537_s1 + $0x1ec] ss:$16 sps:$4 sm:$0xff]  }
  0x16   :  { %v984_v63 = vld [vmem:[%s1537_s1 + $0x1e0] ss:$16 sps:$4 sm:$0xff]   ;;  %v985_v0 = vld [vmem:[%s1537_s1 + $0x1e8] ss:$16 sps:$4 sm:$0xff]   ;;  %v989_v2 = vld [vmem:[%s1538_s0 + $0x14] ss:$8 sps:$4 sm:$0xff]  }
  0x17   :  { %527 = vmatpush1.bf16.msra.mxu0 %v924_v22  ;;  %640 = vmatpush1.bf16.msra.mxu1 %v925_v23  ;;  %v986_v1 = vld [vmem:[%s1538_s0] ss:$8 sps:$4 sm:$0xff]   ;;  %v991_v3 = vld [vmem:[%s1538_s0 + $0x10] ss:$8 sps:$4 sm:$0xff]   ;;  %v992_v4 = vld [vmem:[%s1538_s0 + $0x24] ss:$8 sps:$4 sm:$0xff]  }
  0x18   :  { %528 = vmatprep.subr.bf16.mxu0 %v926_v24  ;;  %641 = vmatprep.subr.bf16.mxu1 %v928_v25  ;;  %v994_v5 = vld [vmem:[%s1538_s0 + $0x20] ss:$8 sps:$4 sm:$0xff]   ;;  %v995_v6 = vld [vmem:[%s1538_s0 + $0x34] ss:$8 sps:$4 sm:$0xff]   ;;  %v997_v7 = vld [vmem:[%s1538_s0 + $0x30] ss:$8 sps:$4 sm:$0xff]  }
  0x19   :  { %v998_v8 = vld [vmem:[%s1538_s0 + $0x44] ss:$8 sps:$4 sm:$0xff]   ;;  %v1000_v9 = vld [vmem:[%s1538_s0 + $0x40] ss:$8 sps:$4 sm:$0xff]   ;;  %v1001_v10 = vld [vmem:[%s1538_s0 + $0x54] ss:$8 sps:$4 sm:$0xff]  }
  0x1a   :  { %v1003_v11 = vld [vmem:[%s1538_s0 + $0x50] ss:$8 sps:$4 sm:$0xff]   ;;  %v1004_v12 = vld [vmem:[%s1538_s0 + $0x64] ss:$8 sps:$4 sm:$0xff]   ;;  %v1006_v13 = vld [vmem:[%s1538_s0 + $0x60] ss:$8 sps:$4 sm:$0xff]  }
  0x1b   :  { %529 = vmatpush1.bf16.msra.mxu0 %v930_v26  ;;  %642 = vmatpush1.bf16.msra.mxu1 %v931_v27  ;;  %v1007_v14 = vld [vmem:[%s1538_s0 + $0x74] ss:$8 sps:$4 sm:$0xff]   ;;  %v1009_v15 = vld [vmem:[%s1538_s0 + $0x70] ss:$8 sps:$4 sm:$0xff]   ;;  %v97_v17 = vshrl.u32 %v96_v16, 7 }
  0x1c   :  { %530 = vmatprep.subr.bf16.mxu0 %v932_v28  ;;  %643 = vmatprep.subr.bf16.mxu1 %v934_v29  ;;  %v94_v20 = vld [vmem:[%s1539_s2] sm:$0xf] }
  0x1d   :  { %v98_v18 = vsub.s32 0, %v97_v17  ;;  %v106_v19 = vsub.s32 2, %v97_v17  ;;  %v102_v21 = vsub.s32 1, %v97_v17  ;;  %v110_v22 = vsub.s32 3, %v97_v17 }
  0x1f   :  { %531 = vmatpush1.bf16.msra.mxu0 %v936_v30  ;;  %644 = vmatpush1.bf16.msra.mxu1 %v937_v31  ;;  %v1273_v23 = vrot.slane %v94_v20, %v98_v18  ;;  %v1275_v24 = vrot.slane %v94_v20, %v106_v19  ;;  %v1277_v25 = vrot.slane %v94_v20, %v102_v21 }
  0x20   :  { %532 = vmatprep.subr.bf16.mxu0 %v938_v32  ;;  %645 = vmatprep.subr.bf16.mxu1 %v940_v33  ;;  %v1279_v26 = vrot.slane %v94_v20, %v110_v22 }
  0x23   :  { %533 = vmatpush1.bf16.msra.mxu0 %v942_v34  ;;  %646 = vmatpush1.bf16.msra.mxu1 %v943_v35 }
  0x24   :  { %534 = vmatprep.subr.bf16.mxu0 %v944_v36  ;;  %647 = vmatprep.subr.bf16.mxu1 %v946_v37 }
  0x27   :  { %535 = vmatpush1.bf16.msra.mxu0 %v948_v38  ;;  %648 = vmatpush1.bf16.msra.mxu1 %v949_v39 }
  0x28   :  { %536 = vmatprep.subr.bf16.mxu0 %v950_v40  ;;  %649 = vmatprep.subr.bf16.mxu1 %v952_v41 }
  0x2b   :  { %537 = vmatpush1.bf16.msra.mxu0 %v954_v42  ;;  %650 = vmatpush1.bf16.msra.mxu1 %v955_v43 }
  0x2c   :  { %538 = vmatprep.subr.bf16.mxu0 %v956_v44  ;;  %651 = vmatprep.subr.bf16.mxu1 %v958_v45 }
  0x2f   :  { %539 = vmatpush1.bf16.msra.mxu0 %v960_v46  ;;  %652 = vmatpush1.bf16.msra.mxu1 %v961_v47 }
  0x30   :  { %540 = vmatprep.subr.bf16.mxu0 %v962_v49  ;;  %653 = vmatprep.subr.bf16.mxu1 %v964_v50 }
  0x33   :  { %541 = vmatpush1.bf16.msra.mxu0 %v966_v51  ;;  %654 = vmatpush1.bf16.msra.mxu1 %v967_v52 }
  0x34   :  { %542 = vmatprep.subr.bf16.mxu0 %v968_v53  ;;  %655 = vmatprep.subr.bf16.mxu1 %v970_v54 }
  0x37   :  { %543 = vmatpush1.bf16.msra.mxu0 %v972_v55  ;;  %656 = vmatpush1.bf16.msra.mxu1 %v973_v56 }
  0x38   :  { %544 = vmatprep.subr.bf16.mxu0 %v974_v57  ;;  %657 = vmatprep.subr.bf16.mxu1 %v976_v58 }
  0x3b   :  { %545 = vmatpush1.bf16.msra.mxu0 %v978_v59  ;;  %658 = vmatpush1.bf16.msra.mxu1 %v979_v60 }
  0x3c   :  { %546 = vmatprep.subr.bf16.mxu0 %v980_v61  ;;  %659 = vmatprep.subr.bf16.mxu1 %v982_v62 }
  0x3f   :  { %547 = vmatpush1.bf16.msra.mxu0 %v984_v63  ;;  %660 = vmatpush1.bf16.msra.mxu1 %v985_v0 }
  0x42   :  { %549 = vmatmul.mubr.bf16.vlgmr.msra.gmra.mrb[0].mxu0 %v986_v1  ;;  %662 = vmatmul.mubr.bf16.vlgmr.msra.gmra.mrb[0].mxu1 %v986_v1 }
  0x43   :  { %558 = vmatprep.mubr.bf16.mxu0 %v989_v2  ;;  %671 = vmatprep.mubr.bf16.mxu1 %v989_v2 }
  0x4a   :  { %559 = vmatmul.mubr.bf16.gmra.mrb[4].mxu0 %v991_v3  ;;  %672 = vmatmul.mubr.bf16.gmra.mrb[4].mxu1 %v991_v3 }
  0x4b   :  { %568 = vmatprep.mubr.bf16.mxu0 %v992_v4  ;;  %681 = vmatprep.mubr.bf16.mxu1 %v992_v4 }
  0x52   :  { %569 = vmatmul.mubr.bf16.gmra.mrb[8].mxu0 %v994_v5  ;;  %682 = vmatmul.mubr.bf16.gmra.mrb[8].mxu1 %v994_v5 }
  0x53   :  { %578 = vmatprep.mubr.bf16.mxu0 %v995_v6  ;;  %691 = vmatprep.mubr.bf16.mxu1 %v995_v6 }
  0x5a   :  { %579 = vmatmul.mubr.bf16.gmra.mrb[12].mxu0 %v997_v7  ;;  %692 = vmatmul.mubr.bf16.gmra.mrb[12].mxu1 %v997_v7 }
  0x5b   :  { %588 = vmatprep.mubr.bf16.mxu0 %v998_v8  ;;  %701 = vmatprep.mubr.bf16.mxu1 %v998_v8 }
  0x62   :  { %589 = vmatmul.mubr.bf16.gmra.mrb[16].mxu0 %v1000_v9  ;;  %702 = vmatmul.mubr.bf16.gmra.mrb[16].mxu1 %v1000_v9 }
  0x63   :  { %598 = vmatprep.mubr.bf16.mxu0 %v1001_v10  ;;  %711 = vmatprep.mubr.bf16.mxu1 %v1001_v10 }
  0x6a   :  { %599 = vmatmul.mubr.bf16.gmra.mrb[20].mxu0 %v1003_v11  ;;  %712 = vmatmul.mubr.bf16.gmra.mrb[20].mxu1 %v1003_v11 }
  0x6b   :  { %608 = vmatprep.mubr.bf16.mxu0 %v1004_v12  ;;  %721 = vmatprep.mubr.bf16.mxu1 %v1004_v12 }
  0x72   :  { %609 = vmatmul.mubr.bf16.gmra.mrb[24].mxu0 %v1006_v13  ;;  %722 = vmatmul.mubr.bf16.gmra.mrb[24].mxu1 %v1006_v13 }
  0x73   :  { %618 = vmatprep.mubr.bf16.mxu0 %v1007_v14  ;;  %731 = vmatprep.mubr.bf16.mxu1 %v1007_v14 }
  0x7a   :  { %619 = vmatmul.mubr.bf16.gmra.mrb[28].mxu0 %v1009_v15  ;;  %732 = vmatmul.mubr.bf16.gmra.mrb[28].mxu1 %v1009_v15 }
 0x115   :  { %v550_v27 = vpop.f32.mrb[0].mxu0  ;;  %v663_v28 = vpop.f32.mrb[0].mxu1 }
 0x116   :  { %v551_v29 = vadd.f32 %v550_v27, %v1273_v23  ;;  %v664_v30 = vadd.f32 %v663_v28, %v1275_v24  ;;  %v552_v31 = vpop.f32.mrb[1].mxu0  ;;  %v665_v32 = vpop.f32.mrb[1].mxu1 }
 0x117   :  { %v553_v33 = vadd.f32 %v552_v31, %v1277_v25  ;;  %v666_v34 = vadd.f32 %v665_v32, %v1279_v26  ;;  %v554_v35 = vpop.f32.mrb[2].mxu0  ;;  %v667_v36 = vpop.f32.mrb[2].mxu1 }
 0x118   :  { %742 = vst [vmem:[%s1540_s3] sm:$0xff] %v551_v29  ;;  %744 = vst [vmem:[%s1540_s3 + $0x10] sm:$0xff] %v664_v30  ;;  %v555_v37 = vadd.f32 %v554_v35, %v1273_v23  ;;  %v668_v38 = vadd.f32 %v667_v36, %v1275_v24  ;;  %v556_v39 = vpop.f32.mrb[3].mxu0  ;;  %v669_v40 = vpop.f32.mrb[3].mxu1 }
 0x119   :  { %743 = vst [vmem:[%s1540_s3 + $0x8] sm:$0xff] %v553_v33  ;;  %745 = vst [vmem:[%s1540_s3 + $0x18] sm:$0xff] %v666_v34  ;;  %v557_v41 = vadd.f32 %v556_v39, %v1277_v25  ;;  %v670_v42 = vadd.f32 %v669_v40, %v1279_v26 }
 0x11a   :  { %746 = vst [vmem:[%s1540_s3 + $0x20] sm:$0xff] %v555_v37  ;;  %748 = vst [vmem:[%s1540_s3 + $0x30] sm:$0xff] %v668_v38 }
 0x11b   :  { %747 = vst [vmem:[%s1540_s3 + $0x28] sm:$0xff] %v557_v41  ;;  %749 = vst [vmem:[%s1540_s3 + $0x38] sm:$0xff] %v670_v42 }
 0x11d   :  { %v560_v43 = vpop.f32.mrb[4].mxu0  ;;  %v673_v44 = vpop.f32.mrb[4].mxu1 }
 0x11e   :  { %v561_v45 = vadd.f32 %v560_v43, %v1273_v23  ;;  %v674_v46 = vadd.f32 %v673_v44, %v1275_v24  ;;  %v562_v47 = vpop.f32.mrb[5].mxu0  ;;  %v675_v48 = vpop.f32.mrb[5].mxu1 }
 0x11f   :  { %v563_v49 = vadd.f32 %v562_v47, %v1277_v25  ;;  %v676_v50 = vadd.f32 %v675_v48, %v1279_v26  ;;  %v564_v51 = vpop.f32.mrb[6].mxu0  ;;  %v677_v52 = vpop.f32.mrb[6].mxu1 }
 0x120   :  { %750 = vst [vmem:[%s1540_s3 + $0x40] sm:$0xff] %v561_v45  ;;  %752 = vst [vmem:[%s1540_s3 + $0x50] sm:$0xff] %v674_v46  ;;  %v565_v53 = vadd.f32 %v564_v51, %v1273_v23  ;;  %v678_v54 = vadd.f32 %v677_v52, %v1275_v24  ;;  %v566_v55 = vpop.f32.mrb[7].mxu0  ;;  %v679_v56 = vpop.f32.mrb[7].mxu1 }
 0x121   :  { %751 = vst [vmem:[%s1540_s3 + $0x48] sm:$0xff] %v563_v49  ;;  %753 = vst [vmem:[%s1540_s3 + $0x58] sm:$0xff] %v676_v50  ;;  %v567_v57 = vadd.f32 %v566_v55, %v1277_v25  ;;  %v680_v58 = vadd.f32 %v679_v56, %v1279_v26 }
 0x122   :  { %754 = vst [vmem:[%s1540_s3 + $0x60] sm:$0xff] %v565_v53  ;;  %756 = vst [vmem:[%s1540_s3 + $0x70] sm:$0xff] %v678_v54 }
 0x123   :  { %755 = vst [vmem:[%s1540_s3 + $0x68] sm:$0xff] %v567_v57  ;;  %757 = vst [vmem:[%s1540_s3 + $0x78] sm:$0xff] %v680_v58 }
 0x125   :  { %v570_v59 = vpop.f32.mrb[8].mxu0  ;;  %v683_v60 = vpop.f32.mrb[8].mxu1 }
 0x126   :  { %v571_v61 = vadd.f32 %v570_v59, %v1273_v23  ;;  %v684_v62 = vadd.f32 %v683_v60, %v1275_v24  ;;  %v572_v63 = vpop.f32.mrb[9].mxu0  ;;  %v685_v0 = vpop.f32.mrb[9].mxu1 }
 0x127   :  { %v573_v1 = vadd.f32 %v572_v63, %v1277_v25  ;;  %v686_v2 = vadd.f32 %v685_v0, %v1279_v26  ;;  %v574_v3 = vpop.f32.mrb[10].mxu0  ;;  %v687_v4 = vpop.f32.mrb[10].mxu1 }
 0x128   :  { %758 = vst [vmem:[%s1540_s3 + $0x80] sm:$0xff] %v571_v61  ;;  %760 = vst [vmem:[%s1540_s3 + $0x90] sm:$0xff] %v684_v62  ;;  %v575_v5 = vadd.f32 %v574_v3, %v1273_v23  ;;  %v688_v6 = vadd.f32 %v687_v4, %v1275_v24  ;;  %v576_v7 = vpop.f32.mrb[11].mxu0  ;;  %v689_v8 = vpop.f32.mrb[11].mxu1 }
 0x129   :  { %759 = vst [vmem:[%s1540_s3 + $0x88] sm:$0xff] %v573_v1  ;;  %761 = vst [vmem:[%s1540_s3 + $0x98] sm:$0xff] %v686_v2  ;;  %v577_v9 = vadd.f32 %v576_v7, %v1277_v25  ;;  %v690_v10 = vadd.f32 %v689_v8, %v1279_v26 }
 0x12a   :  { %762 = vst [vmem:[%s1540_s3 + $0xa0] sm:$0xff] %v575_v5  ;;  %764 = vst [vmem:[%s1540_s3 + $0xb0] sm:$0xff] %v688_v6 }
 0x12b   :  { %763 = vst [vmem:[%s1540_s3 + $0xa8] sm:$0xff] %v577_v9  ;;  %765 = vst [vmem:[%s1540_s3 + $0xb8] sm:$0xff] %v690_v10 }
 0x12d   :  { %v580_v11 = vpop.f32.mrb[12].mxu0  ;;  %v693_v12 = vpop.f32.mrb[12].mxu1 }
 0x12e   :  { %v581_v13 = vadd.f32 %v580_v11, %v1273_v23  ;;  %v694_v14 = vadd.f32 %v693_v12, %v1275_v24  ;;  %v582_v15 = vpop.f32.mrb[13].mxu0  ;;  %v695_v16 = vpop.f32.mrb[13].mxu1 }
 0x12f   :  { %v583_v17 = vadd.f32 %v582_v15, %v1277_v25  ;;  %v696_v18 = vadd.f32 %v695_v16, %v1279_v26  ;;  %v584_v19 = vpop.f32.mrb[14].mxu0  ;;  %v697_v20 = vpop.f32.mrb[14].mxu1 }
 0x130   :  { %766 = vst [vmem:[%s1540_s3 + $0xc0] sm:$0xff] %v581_v13  ;;  %768 = vst [vmem:[%s1540_s3 + $0xd0] sm:$0xff] %v694_v14  ;;  %v585_v21 = vadd.f32 %v584_v19, %v1273_v23  ;;  %v698_v22 = vadd.f32 %v697_v20, %v1275_v24  ;;  %v586_v27 = vpop.f32.mrb[15].mxu0  ;;  %v699_v28 = vpop.f32.mrb[15].mxu1 }
 0x131   :  { %767 = vst [vmem:[%s1540_s3 + $0xc8] sm:$0xff] %v583_v17  ;;  %769 = vst [vmem:[%s1540_s3 + $0xd8] sm:$0xff] %v696_v18  ;;  %v587_v29 = vadd.f32 %v586_v27, %v1277_v25  ;;  %v700_v30 = vadd.f32 %v699_v28, %v1279_v26 }
 0x132   :  { %770 = vst [vmem:[%s1540_s3 + $0xe0] sm:$0xff] %v585_v21  ;;  %772 = vst [vmem:[%s1540_s3 + $0xf0] sm:$0xff] %v698_v22 }
 0x133   :  { %771 = vst [vmem:[%s1540_s3 + $0xe8] sm:$0xff] %v587_v29  ;;  %773 = vst [vmem:[%s1540_s3 + $0xf8] sm:$0xff] %v700_v30 }
 0x135   :  { %v590_v31 = vpop.f32.mrb[16].mxu0  ;;  %v703_v32 = vpop.f32.mrb[16].mxu1 }
 0x136   :  { %v591_v33 = vadd.f32 %v590_v31, %v1273_v23  ;;  %v704_v34 = vadd.f32 %v703_v32, %v1275_v24  ;;  %v592_v35 = vpop.f32.mrb[17].mxu0  ;;  %v705_v36 = vpop.f32.mrb[17].mxu1 }
 0x137   :  { %v593_v37 = vadd.f32 %v592_v35, %v1277_v25  ;;  %v706_v38 = vadd.f32 %v705_v36, %v1279_v26  ;;  %v594_v39 = vpop.f32.mrb[18].mxu0  ;;  %v707_v40 = vpop.f32.mrb[18].mxu1 }
 0x138   :  { %774 = vst [vmem:[%s1540_s3 + $0x100] sm:$0xff] %v591_v33  ;;  %776 = vst [vmem:[%s1540_s3 + $0x110] sm:$0xff] %v704_v34  ;;  %v595_v41 = vadd.f32 %v594_v39, %v1273_v23  ;;  %v708_v42 = vadd.f32 %v707_v40, %v1275_v24  ;;  %v596_v43 = vpop.f32.mrb[19].mxu0  ;;  %v709_v44 = vpop.f32.mrb[19].mxu1 }
 0x139   :  { %775 = vst [vmem:[%s1540_s3 + $0x108] sm:$0xff] %v593_v37  ;;  %777 = vst [vmem:[%s1540_s3 + $0x118] sm:$0xff] %v706_v38  ;;  %v597_v45 = vadd.f32 %v596_v43, %v1277_v25  ;;  %v710_v46 = vadd.f32 %v709_v44, %v1279_v26 }
 0x13a   :  { %778 = vst [vmem:[%s1540_s3 + $0x120] sm:$0xff] %v595_v41  ;;  %780 = vst [vmem:[%s1540_s3 + $0x130] sm:$0xff] %v708_v42 }
 0x13b   :  { %779 = vst [vmem:[%s1540_s3 + $0x128] sm:$0xff] %v597_v45  ;;  %781 = vst [vmem:[%s1540_s3 + $0x138] sm:$0xff] %v710_v46 }
 0x13d   :  { %v600_v47 = vpop.f32.mrb[20].mxu0  ;;  %v713_v48 = vpop.f32.mrb[20].mxu1 }
 0x13e   :  { %v601_v49 = vadd.f32 %v600_v47, %v1273_v23  ;;  %v714_v50 = vadd.f32 %v713_v48, %v1275_v24  ;;  %v602_v51 = vpop.f32.mrb[21].mxu0  ;;  %v715_v52 = vpop.f32.mrb[21].mxu1 }
 0x13f   :  { %v603_v53 = vadd.f32 %v602_v51, %v1277_v25  ;;  %v716_v54 = vadd.f32 %v715_v52, %v1279_v26  ;;  %v604_v55 = vpop.f32.mrb[22].mxu0  ;;  %v717_v56 = vpop.f32.mrb[22].mxu1 }
 0x140   :  { %782 = vst [vmem:[%s1540_s3 + $0x140] sm:$0xff] %v601_v49  ;;  %784 = vst [vmem:[%s1540_s3 + $0x150] sm:$0xff] %v714_v50  ;;  %v605_v57 = vadd.f32 %v604_v55, %v1273_v23  ;;  %v718_v58 = vadd.f32 %v717_v56, %v1275_v24  ;;  %v606_v59 = vpop.f32.mrb[23].mxu0  ;;  %v719_v60 = vpop.f32.mrb[23].mxu1 }
 0x141   :  { %783 = vst [vmem:[%s1540_s3 + $0x148] sm:$0xff] %v603_v53  ;;  %785 = vst [vmem:[%s1540_s3 + $0x158] sm:$0xff] %v716_v54  ;;  %v607_v61 = vadd.f32 %v606_v59, %v1277_v25  ;;  %v720_v62 = vadd.f32 %v719_v60, %v1279_v26 }
 0x142   :  { %786 = vst [vmem:[%s1540_s3 + $0x160] sm:$0xff] %v605_v57  ;;  %788 = vst [vmem:[%s1540_s3 + $0x170] sm:$0xff] %v718_v58 }
 0x143   :  { %787 = vst [vmem:[%s1540_s3 + $0x168] sm:$0xff] %v607_v61  ;;  %789 = vst [vmem:[%s1540_s3 + $0x178] sm:$0xff] %v720_v62 }
 0x145   :  { %v610_v63 = vpop.f32.mrb[24].mxu0  ;;  %v723_v0 = vpop.f32.mrb[24].mxu1 }
 0x146   :  { %v611_v1 = vadd.f32 %v610_v63, %v1273_v23  ;;  %v724_v2 = vadd.f32 %v723_v0, %v1275_v24  ;;  %v612_v3 = vpop.f32.mrb[25].mxu0  ;;  %v725_v4 = vpop.f32.mrb[25].mxu1 }
 0x147   :  { %v613_v5 = vadd.f32 %v612_v3, %v1277_v25  ;;  %v726_v6 = vadd.f32 %v725_v4, %v1279_v26  ;;  %v614_v7 = vpop.f32.mrb[26].mxu0  ;;  %v727_v8 = vpop.f32.mrb[26].mxu1 }
 0x148   :  { %790 = vst [vmem:[%s1540_s3 + $0x180] sm:$0xff] %v611_v1  ;;  %792 = vst [vmem:[%s1540_s3 + $0x190] sm:$0xff] %v724_v2  ;;  %v615_v9 = vadd.f32 %v614_v7, %v1273_v23  ;;  %v728_v10 = vadd.f32 %v727_v8, %v1275_v24  ;;  %v616_v11 = vpop.f32.mrb[27].mxu0  ;;  %v729_v12 = vpop.f32.mrb[27].mxu1 }
 0x149   :  { %791 = vst [vmem:[%s1540_s3 + $0x188] sm:$0xff] %v613_v5  ;;  %793 = vst [vmem:[%s1540_s3 + $0x198] sm:$0xff] %v726_v6  ;;  %v617_v13 = vadd.f32 %v616_v11, %v1277_v25  ;;  %v730_v14 = vadd.f32 %v729_v12, %v1279_v26 }
 0x14a   :  { %794 = vst [vmem:[%s1540_s3 + $0x1a0] sm:$0xff] %v615_v9  ;;  %796 = vst [vmem:[%s1540_s3 + $0x1b0] sm:$0xff] %v728_v10 }
 0x14b   :  { %795 = vst [vmem:[%s1540_s3 + $0x1a8] sm:$0xff] %v617_v13  ;;  %797 = vst [vmem:[%s1540_s3 + $0x1b8] sm:$0xff] %v730_v14 }
 0x14d   :  { %v620_v15 = vpop.f32.mrb[28].mxu0  ;;  %v733_v16 = vpop.f32.mrb[28].mxu1 }
 0x14e   :  { %v621_v17 = vadd.f32 %v620_v15, %v1273_v23  ;;  %v734_v18 = vadd.f32 %v733_v16, %v1275_v24  ;;  %v622_v19 = vpop.f32.mrb[29].mxu0  ;;  %v735_v20 = vpop.f32.mrb[29].mxu1 }
 0x14f   :  { %v623_v21 = vadd.f32 %v622_v19, %v1277_v25  ;;  %v736_v22 = vadd.f32 %v735_v20, %v1279_v26  ;;  %v624_v27 = vpop.f32.mrb[30].mxu0  ;;  %v737_v28 = vpop.f32.mrb[30].mxu1 }
 0x150   :  { %798 = vst [vmem:[%s1540_s3 + $0x1c0] sm:$0xff] %v621_v17  ;;  %800 = vst [vmem:[%s1540_s3 + $0x1d0] sm:$0xff] %v734_v18  ;;  %v625_v29 = vadd.f32 %v624_v27, %v1273_v23  ;;  %v738_v30 = vadd.f32 %v737_v28, %v1275_v24  ;;  %v626_v31 = vpop.f32.mrb[31].mxu0  ;;  %v739_v32 = vpop.f32.mrb[31].mxu1 }
 0x151   :  { %799 = vst [vmem:[%s1540_s3 + $0x1c8] sm:$0xff] %v623_v21  ;;  %801 = vst [vmem:[%s1540_s3 + $0x1d8] sm:$0xff] %v736_v22  ;;  %v627_v33 = vadd.f32 %v626_v31, %v1277_v25  ;;  %v740_v34 = vadd.f32 %v739_v32, %v1279_v26 }
 0x152   :  { %802 = vst [vmem:[%s1540_s3 + $0x1e0] sm:$0xff] %v625_v29  ;;  %804 = vst [vmem:[%s1540_s3 + $0x1f0] sm:$0xff] %v738_v30 }
 0x153   :  { %803 = vst [vmem:[%s1540_s3 + $0x1e8] sm:$0xff] %v627_v33  ;;  %805 = vst [vmem:[%s1540_s3 + $0x1f8] sm:$0xff] %v740_v34 }

// kernel: blstm_relu_forward.12
= control target key start
LH: loop header
LB: loop body
LE: loop exit
PB: predicated region body
PF: predicated region fallthrough
CT: control target
= control target key end

     0   :  { %9 = vsyncpa [#allocation5], 0  ;;  %s1804_s12 = smov 0   ;;  %s1806_s13 = smov 0   ;;  %s2448_s0 = inlined_call_operand.vmem [shape: f32[16,8,512], index: 0, kind: input, shape index: {}]   ;;  %s2449_s1 = inlined_call_operand.vmem [shape: bf16[128,512], index: 1, kind: input, shape index: {}]   ;;  %s2450_s2 = inlined_call_operand.vmem [shape: bf16[16,8,128], index: 2, kind: output, shape index: {0}]   ;;  %s2451_s3 = inlined_call_operand.hbm [shape: f32[8,128], index: 3, kind: output, shape index: {1}]  }
   0x1   :  { %s1808_s14 = smov 0  }
   0x2 LB: > { %s1453_s15 = sadd.s32 4294967295, %s1779_s14   ;;  %s24_s16 = sadd.s32 1, %s1775_s13  ;;  %s1779_s14 = sphi %s1808_s14, %s15_s14   ;;  %s1775_s13 = sphi %s1806_s13, %s2454_s13   ;;  %s1771_s12 = sphi %s1804_s12, %s2453_s12  }
   0x3   : > { %p25_p0 = scmp.ge.s32.totalorder %s24_s16, 2  ;;  %p1457_p1 = scmp.ge.s32.totalorder %s1779_s14, 1 }
   0x4   : > { %p169_p2 = scmp.lt.s32.totalorder %s1779_s14, 3 }
   0x5   : > { %s2456_s16 = smov (%p25_p0, %s24_s16), 0 }
   0x6   : > { %p170_p3 = pnand %p1457_p1, %p169_p2 }
   0x7   : > { %s203_s17 = ssub.s32 (!%p170_p3), 1, %s1771_s12  ;;  %p1463_p5 = scmp.ne.s32.totalorder (!%p170_p3), %s1771_s12, 0 }
   0x8   : > { %173 = sbr.rel (%p170_p3) target bundleno = 2083 (0x823), region = 28  ;;  %s1458_s18 = sshll.u32 (!%p170_p3), %s203_s17, 3 }
   0x9   : > { %p205_p4 = scmp.lt.s32.totalorder (!%p170_p3), %s1458_s18, 15 }
   0xf   : > { %s2458_s18 = smov (!%p205_p4, %s1458_s18), 15  ;;  %231 = sbr.rel (%p1463_p5) target bundleno = 22 (0x16), region = 32 }
  0x10   : > { %s1535_s19 = sshll.u32 %s2458_s18, 5  ;;  %s1462_s20 = sshll.u32 %s2458_s18, 2  ;;  %v1781_v0 = vmov (!%p1463_p5), 0.0  }
  0x11   : > { %s1826_s23 = scalar_lea.vmem %s2448_s0, %s1535_s19  ;;  %s1831_s26 = scalar_lea.vmem %s2450_s2, %s1462_s20  ;;  %232 = vst [vmem:[#allocation2] sm:$0xff] (!%p1463_p5), %v1781_v0  ;;  %233 = vst [vmem:[#allocation3] sm:$0xff] (!%p1463_p5), %v1781_v0 }
  0x12   : > { %234 = vst [vmem:[#allocation4] sm:$0xff] (!%p1463_p5), %v1781_v0 }
  0x16 PF: > { %v1836_v1 = vld [vmem:[%s2449_s1 + $0x4] ss:$16 sps:$4 sm:$0xff]   ;;  %v1841_v2 = vld [vmem:[%s2449_s1] ss:$16 sps:$4 sm:$0xff]   ;;  %v1782_v3 = vmov 0   ;;  %v1465_v37 = vld [vmem:[%s1826_s23 + $0xe8] sm:$0xff] }
  0x17   : > { %467 = vmatprep.mubr.bf16.mxu0 %v1782_v3  ;;  %508 = vmatprep.mubr.bf16.mxu1 %v1782_v3  ;;  %v1849_v4 = vld [vmem:[%s2449_s1 + $0x24] ss:$16 sps:$4 sm:$0xff]   ;;  %v1855_v5 = vld [vmem:[%s2449_s1 + $0xc] ss:$16 sps:$4 sm:$0xff]   ;;  %v1860_v6 = vld [vmem:[%s2449_s1 + $0x20] ss:$16 sps:$4 sm:$0xff]  }
  0x18   : > { %435 = vmatprep.subr.bf16.mxu0 %v1836_v1  ;;  %v1865_v7 = vld [vmem:[%s2449_s1 + $0x8] ss:$16 sps:$4 sm:$0xff]   ;;  %v1871_v8 = vld [vmem:[%s2449_s1 + $0x44] ss:$16 sps:$4 sm:$0xff]   ;;  %476 = vmatprep.subr.bf16.mxu1 %v1855_v5  ;;  %v1877_v9 = vld [vmem:[%s2449_s1 + $0x2c] ss:$16 sps:$4 sm:$0xff]  }
  0x19   : > { %436 = vmatpush1.bf16.msra.mxu0 %v1841_v2  ;;  %477 = vmatpush1.bf16.msra.mxu1 %v1865_v7  ;;  %v1883_v10 = vld [vmem:[%s2449_s1 + $0x28] ss:$16 sps:$4 sm:$0xff]   ;;  %v1890_v11 = vld [vmem:[%s2449_s1 + $0x40] ss:$16 sps:$4 sm:$0xff]   ;;  %v1896_v12 = vld [vmem:[%s2449_s1 + $0x64] ss:$16 sps:$4 sm:$0xff]  }
  0x1a   : > { %437 = vmatprep.subr.bf16.mxu0 %v1849_v4  ;;  %478 = vmatprep.subr.bf16.mxu1 %v1877_v9  ;;  %v1901_v13 = vld [vmem:[%s2449_s1 + $0x4c] ss:$16 sps:$4 sm:$0xff]   ;;  %v1907_v14 = vld [vmem:[%s2449_s1 + $0x48] ss:$16 sps:$4 sm:$0xff]   ;;  %v1914_v15 = vld [vmem:[%s2449_s1 + $0x60] ss:$16 sps:$4 sm:$0xff]  }
  0x1b   : > { %v1919_v16 = vld [vmem:[%s2449_s1 + $0x6c] ss:$16 sps:$4 sm:$0xff]   ;;  %v1925_v17 = vld [vmem:[%s2449_s1 + $0x84] ss:$16 sps:$4 sm:$0xff]   ;;  %v1931_v18 = vld [vmem:[%s2449_s1 + $0x80] ss:$16 sps:$4 sm:$0xff]  }
  0x1c   : > { %v1936_v19 = vld [vmem:[%s2449_s1 + $0x68] ss:$16 sps:$4 sm:$0xff]   ;;  %v1943_v20 = vld [vmem:[%s2449_s1 + $0x8c] ss:$16 sps:$4 sm:$0xff]   ;;  %v1949_v21 = vld [vmem:[%s2449_s1 + $0xa4] ss:$16 sps:$4 sm:$0xff]  }
  0x1d   : > { %438 = vmatpush1.bf16.msra.mxu0 %v1860_v6  ;;  %479 = vmatpush1.bf16.msra.mxu1 %v1883_v10  ;;  %v1955_v22 = vld [vmem:[%s2449_s1 + $0x88] ss:$16 sps:$4 sm:$0xff]   ;;  %v1962_v23 = vld [vmem:[%s2449_s1 + $0xa0] ss:$16 sps:$4 sm:$0xff]   ;;  %v1967_v24 = vld [vmem:[%s2449_s1 + $0xac] ss:$16 sps:$4 sm:$0xff]  }
  0x1e   : > { %439 = vmatprep.subr.bf16.mxu0 %v1871_v8  ;;  %480 = vmatprep.subr.bf16.mxu1 %v1901_v13  ;;  %v1973_v25 = vld [vmem:[%s2449_s1 + $0xc4] ss:$16 sps:$4 sm:$0xff]   ;;  %v1979_v26 = vld [vmem:[%s2449_s1 + $0xa8] ss:$16 sps:$4 sm:$0xff]   ;;  %v1986_v27 = vld [vmem:[%s2449_s1 + $0xc0] ss:$16 sps:$4 sm:$0xff]  }
  0x1f   : > { %v1991_v28 = vld [vmem:[%s2449_s1 + $0xcc] ss:$16 sps:$4 sm:$0xff]   ;;  %v1997_v29 = vld [vmem:[%s2449_s1 + $0xe4] ss:$16 sps:$4 sm:$0xff]   ;;  %v2003_v30 = vld [vmem:[%s2449_s1 + $0xc8] ss:$16 sps:$4 sm:$0xff]  }
  0x20   : > { %v2010_v31 = vld [vmem:[%s2449_s1 + $0xe0] ss:$16 sps:$4 sm:$0xff]   ;;  %v2015_v33 = vld [vmem:[%s2449_s1 + $0xec] ss:$16 sps:$4 sm:$0xff]   ;;  %v2022_v35 = vld [vmem:[%s2449_s1 + $0xe8] ss:$16 sps:$4 sm:$0xff]  }
  0x21   : > { %440 = vmatpush1.bf16.msra.mxu0 %v1890_v11  ;;  %481 = vmatpush1.bf16.msra.mxu1 %v1907_v14  ;;  %v267_v32 = vld [vmem:[#allocation2] sm:$0xff]  ;;  %v1466_v41 = vld [vmem:[%s1826_s23 + $0xf0] sm:$0xff]  ;;  %v1467_v51 = vld [vmem:[%s1826_s23 + $0xf8] sm:$0xff]  ;;  %p2413_p6 = scmp.eq.s32.totalorder %s1453_s15, 1 }
  0x22   : > { %441 = vmatprep.subr.bf16.mxu0 %v1896_v12  ;;  %482 = vmatprep.subr.bf16.mxu1 %v1919_v16  ;;  %v274_v34 = vpack.c.bf16 %v267_v32, %v267_v32  ;;  %v1464_v36 = vld [vmem:[%s1826_s23 + $0xe0] sm:$0xff]  ;;  %v268_v61 = vld [vmem:[#allocation3] sm:$0xff] }
  0x25   : > { %442 = vmatpush1.bf16.msra.mxu0 %v1914_v15  ;;  %483 = vmatpush1.bf16.msra.mxu1 %v1936_v19 }
  0x26   : > { %443 = vmatprep.subr.bf16.mxu0 %v1925_v17  ;;  %484 = vmatprep.subr.bf16.mxu1 %v1943_v20 }
  0x29   : > { %444 = vmatpush1.bf16.msra.mxu0 %v1931_v18  ;;  %485 = vmatpush1.bf16.msra.mxu1 %v1955_v22 }
  0x2a   : > { %445 = vmatprep.subr.bf16.mxu0 %v1949_v21  ;;  %486 = vmatprep.subr.bf16.mxu1 %v1967_v24 }
  0x2d   : > { %446 = vmatpush1.bf16.msra.mxu0 %v1962_v23  ;;  %487 = vmatpush1.bf16.msra.mxu1 %v1979_v26 }
  0x2e   : > { %447 = vmatprep.subr.bf16.mxu0 %v1973_v25  ;;  %488 = vmatprep.subr.bf16.mxu1 %v1991_v28 }
  0x31   : > { %448 = vmatpush1.bf16.msra.mxu0 %v1986_v27  ;;  %489 = vmatpush1.bf16.msra.mxu1 %v2003_v30 }
  0x32   : > { %449 = vmatprep.subr.bf16.mxu0 %v1997_v29  ;;  %490 = vmatprep.subr.bf16.mxu1 %v2015_v33 }
  0x35   : > { %450 = vmatpush1.bf16.msra.mxu0 %v2010_v31  ;;  %491 = vmatpush1.bf16.msra.mxu1 %v2022_v35 }
  0x36   : > { %548 = vmatprep.subr.bf16.mxu0 %v1836_v1  ;;  %589 = vmatprep.subr.bf16.mxu1 %v1855_v5 }
  0x38   : > { %468 = vmatmul.mubr.bf16.vlgmr.msra.gmra.mrb[0].mxu0 %v274_v34  ;;  %509 = vmatmul.mubr.bf16.vlgmr.msra.gmra.mrb[0].mxu1 %v274_v34 }
  0x39   : > { %549 = vmatpush1.bf16.msra.mxu0 %v1841_v2  ;;  %580 = vmatprep.mubr.bf16.mxu0 %v1782_v3 }
  0x3a   : > { %550 = vmatprep.subr.bf16.mxu0 %v1849_v4  ;;  %590 = vmatpush1.bf16.msra.mxu1 %v1865_v7 }
  0x3b   : > { %621 = vmatprep.mubr.bf16.mxu1 %v1782_v3  ;;  %591 = vmatprep.subr.bf16.mxu1 %v1877_v9 }
  0x3d   : > { %551 = vmatpush1.bf16.msra.mxu0 %v1860_v6 }
  0x3e   : > { %552 = vmatprep.subr.bf16.mxu0 %v1871_v8  ;;  %592 = vmatpush1.bf16.msra.mxu1 %v1883_v10 }
  0x3f   : > { %593 = vmatprep.subr.bf16.mxu1 %v1901_v13 }
  0x41   : > { %553 = vmatpush1.bf16.msra.mxu0 %v1890_v11 }
  0x42   : > { %554 = vmatprep.subr.bf16.mxu0 %v1896_v12  ;;  %594 = vmatpush1.bf16.msra.mxu1 %v1907_v14 }
  0x43   : > { %595 = vmatprep.subr.bf16.mxu1 %v1919_v16 }
  0x45   : > { %555 = vmatpush1.bf16.msra.mxu0 %v1914_v15 }
  0x46   : > { %556 = vmatprep.subr.bf16.mxu0 %v1925_v17  ;;  %596 = vmatpush1.bf16.msra.mxu1 %v1936_v19 }
  0x47   : > { %597 = vmatprep.subr.bf16.mxu1 %v1943_v20 }
  0x49   : > { %557 = vmatpush1.bf16.msra.mxu0 %v1931_v18 }
  0x4a   : > { %558 = vmatprep.subr.bf16.mxu0 %v1949_v21  ;;  %598 = vmatpush1.bf16.msra.mxu1 %v1955_v22 }
  0x4b   : > { %599 = vmatprep.subr.bf16.mxu1 %v1967_v24 }
  0x4d   : > { %559 = vmatpush1.bf16.msra.mxu0 %v1962_v23 }
  0x4e   : > { %560 = vmatprep.subr.bf16.mxu0 %v1973_v25  ;;  %600 = vmatpush1.bf16.msra.mxu1 %v1979_v26 }
  0x4f   : > { %601 = vmatprep.subr.bf16.mxu1 %v1991_v28 }
  0x51   : > { %561 = vmatpush1.bf16.msra.mxu0 %v1986_v27 }
  0x52   : > { %562 = vmatprep.subr.bf16.mxu0 %v1997_v29  ;;  %602 = vmatpush1.bf16.msra.mxu1 %v2003_v30 }
  0x53   : > { %603 = vmatprep.subr.bf16.mxu1 %v2015_v33 }
  0x55   : > { %563 = vmatpush1.bf16.msra.mxu0 %v2010_v31 }
  0x56   : > { %661 = vmatprep.subr.bf16.mxu0 %v1836_v1  ;;  %604 = vmatpush1.bf16.msra.mxu1 %v2022_v35 }
  0x57   : > { %702 = vmatprep.subr.bf16.mxu1 %v1855_v5 }
 0x10b   : > { %v469_v38 = vpop.f32.mrb[0].mxu0  ;;  %v510_v46 = vpop.f32.mrb[0].mxu1 }
 0x10c   : > { %v517_v39 = vadd.f32 %v1464_v36, %v469_v38  ;;  %v471_v40 = vpop.f32.mrb[1].mxu0  ;;  %v519_v48 = vadd.f32 %v1466_v41, %v510_v46  ;;  %v512_v49 = vpop.f32.mrb[1].mxu1  ;;  %v1501_v41 = vld [vmem:[%s1826_s23 + $0xc0] sm:$0xff] }
 0x10d   : > { %v518_v42 = vadd.f32 %v1465_v37, %v471_v40  ;;  %v473_v43 = vpop.f32.mrb[2].mxu0  ;;  %v514_v50 = vpop.f32.mrb[2].mxu1  ;;  %v520_v53 = vadd.f32 %v1467_v51, %v512_v49 }
 0x10e   : > { %v521_v44 = vmul.f32 0.5, %v517_v39  ;;  %v474_v45 = vpop.f32.mrb[3].mxu0  ;;  %v515_v52 = vpop.f32.mrb[3].mxu1 }
 0x10f   : > { %v525_v47 = vmul.f32 0.5, %v518_v42  ;;  %v530_v54 = vmul.f32 0.5, %v520_v53  ;;  %v1502_v42 = vld [vmem:[%s1826_s23 + $0xc8] sm:$0xff] }
 0x110   : > { %1617 = vtanh.f32 %v521_v44 }
 0x111   : > { %1619 = vtanh.f32 %v525_v47 }
 0x112   : > { %1621 = vtanh.f32 %v519_v48  ;;  %v1503_v48 = vld [vmem:[%s1826_s23 + $0xd0] sm:$0xff] }
 0x113   : > { %1623 = vtanh.f32 %v530_v54 }
 0x11a   : > { %v1618_v55 = vpop.eup %1617 }
 0x11b   : > { %v1620_v56 = vpop.eup %1619  ;;  %v523_v57 = vadd.f32 1.0, %v1618_v55 }
 0x11c   : > { %v1622_v58 = vpop.eup %1621  ;;  %v527_v59 = vadd.f32 1.0, %v1620_v56 }
 0x11d   : > { %v524_v60 = vmul.f32 0.5, %v523_v57  ;;  %v1624_v34 = vpop.eup %1623  ;;  %v1504_v57 = vld [vmem:[%s1826_s23 + $0xd8] sm:$0xff] }
 0x11e   : > { %v528_v62 = vmul.f32 0.5, %v527_v59  ;;  %v532_v36 = vadd.f32 1.0, %v1624_v34 }
 0x11f   : > { %v535_v63 = vmul.f32 %v1622_v58, %v524_v60 }
 0x120   : > { %v534_v0 = vmul.f32 %v528_v62, %v268_v61  ;;  %v533_v37 = vmul.f32 0.5, %v532_v36 }
 0x122   : > { %v2067_v32 = vadd.f32 %v535_v63, %v534_v0 }
 0x124   : > { %1625 = vtanh.f32 %v2067_v32 }
 0x12e   : > { %v1626_v38 = vpop.eup %1625 }
 0x12f   : > { %v2070_v39 = vmul.f32 %v1626_v38, %v533_v37 }
 0x131   : > { %v539_v40 = vpack.c.bf16 %v2070_v39, %v2070_v39 }
 0x133   : > { %1500 = vst [vmem:[%s1831_s26 + $0x1c] sm:$0xf] %v539_v40  ;;  %581 = vmatmul.mubr.bf16.vlgmr.msra.gmra.mrb[4].mxu0 %v539_v40  ;;  %622 = vmatmul.mubr.bf16.vlgmr.msra.gmra.mrb[4].mxu1 %v539_v40 }
 0x134   : > { %662 = vmatpush1.bf16.msra.mxu0 %v1841_v2  ;;  %703 = vmatpush1.bf16.msra.mxu1 %v1865_v7 }
 0x135   : > { %663 = vmatprep.subr.bf16.mxu0 %v1849_v4  ;;  %704 = vmatprep.subr.bf16.mxu1 %v1877_v9 }
 0x136   : > { %693 = vmatprep.mubr.bf16.mxu0 %v1782_v3  ;;  %734 = vmatprep.mubr.bf16.mxu1 %v1782_v3 }
 0x138   : > { %664 = vmatpush1.bf16.msra.mxu0 %v1860_v6  ;;  %705 = vmatpush1.bf16.msra.mxu1 %v1883_v10 }
 0x139   : > { %665 = vmatprep.subr.bf16.mxu0 %v1871_v8  ;;  %706 = vmatprep.subr.bf16.mxu1 %v1901_v13 }
 0x13c   : > { %666 = vmatpush1.bf16.msra.mxu0 %v1890_v11  ;;  %707 = vmatpush1.bf16.msra.mxu1 %v1907_v14 }
 0x13d   : > { %667 = vmatprep.subr.bf16.mxu0 %v1896_v12  ;;  %708 = vmatprep.subr.bf16.mxu1 %v1919_v16 }
 0x140   : > { %668 = vmatpush1.bf16.msra.mxu0 %v1914_v15  ;;  %709 = vmatpush1.bf16.msra.mxu1 %v1936_v19 }
 0x141   : > { %669 = vmatprep.subr.bf16.mxu0 %v1925_v17  ;;  %710 = vmatprep.subr.bf16.mxu1 %v1943_v20 }
 0x144   : > { %670 = vmatpush1.bf16.msra.mxu0 %v1931_v18  ;;  %711 = vmatpush1.bf16.msra.mxu1 %v1955_v22 }
 0x145   : > { %671 = vmatprep.subr.bf16.mxu0 %v1949_v21  ;;  %712 = vmatprep.subr.bf16.mxu1 %v1967_v24 }
 0x148   : > { %672 = vmatpush1.bf16.msra.mxu0 %v1962_v23  ;;  %713 = vmatpush1.bf16.msra.mxu1 %v1979_v26 }
 0x149   : > { %673 = vmatprep.subr.bf16.mxu0 %v1973_v25  ;;  %714 = vmatprep.subr.bf16.mxu1 %v1991_v28 }
 0x14c   : > { %674 = vmatpush1.bf16.msra.mxu0 %v1986_v27  ;;  %715 = vmatpush1.bf16.msra.mxu1 %v2003_v30 }
 0x14d   : > { %675 = vmatprep.subr.bf16.mxu0 %v1997_v29  ;;  %716 = vmatprep.subr.bf16.mxu1 %v2015_v33 }
 0x150   : > { %676 = vmatpush1.bf16.msra.mxu0 %v2010_v31  ;;  %717 = vmatpush1.bf16.msra.mxu1 %v2022_v35 }
 0x151   : > { %774 = vmatprep.subr.bf16.mxu0 %v1836_v1  ;;  %815 = vmatprep.subr.bf16.mxu1 %v1855_v5 }
 0x206   : > { %v582_v43 = vpop.f32.mrb[4].mxu0  ;;  %v623_v44 = vpop.f32.mrb[4].mxu1 }
 0x207   : > { %v630_v45 = vadd.f32 %v1501_v41, %v582_v43  ;;  %v584_v46 = vpop.f32.mrb[5].mxu0  ;;  %v625_v47 = vpop.f32.mrb[5].mxu1  ;;  %v632_v56 = vadd.f32 %v1503_v48, %v623_v44 }
 0x208   : > { %v631_v49 = vadd.f32 %v1502_v42, %v584_v46  ;;  %v586_v50 = vpop.f32.mrb[6].mxu0  ;;  %v627_v51 = vpop.f32.mrb[6].mxu1  ;;  %v633_v58 = vadd.f32 %v1504_v57, %v625_v47  ;;  %v1507_v47 = vld [vmem:[%s1826_s23 + $0xa8] sm:$0xff] }
 0x209   : > { %v634_v52 = vmul.f32 0.5, %v630_v45  ;;  %v587_v53 = vpop.f32.mrb[7].mxu0  ;;  %v628_v54 = vpop.f32.mrb[7].mxu1 }
 0x20a   : > { %v638_v55 = vmul.f32 0.5, %v631_v49  ;;  %v643_v59 = vmul.f32 0.5, %v633_v58  ;;  %v1508_v53 = vld [vmem:[%s1826_s23 + $0xb0] sm:$0xff] }
 0x20b   : > { %1627 = vtanh.f32 %v634_v52 }
 0x20c   : > { %1629 = vtanh.f32 %v638_v55 }
 0x20d   : > { %1631 = vtanh.f32 %v632_v56 }
 0x20e   : > { %1633 = vtanh.f32 %v643_v59 }
 0x215   : > { %v1628_v60 = vpop.eup %1627 }
 0x216   : > { %v1630_v61 = vpop.eup %1629  ;;  %v636_v62 = vadd.f32 1.0, %v1628_v60 }
 0x217   : > { %v640_v63 = vadd.f32 1.0, %v1630_v61  ;;  %v1632_v34 = vpop.eup %1631 }
 0x218   : > { %v637_v0 = vmul.f32 0.5, %v636_v62  ;;  %v1634_v41 = vpop.eup %1633  ;;  %v1509_v62 = vld [vmem:[%s1826_s23 + $0xb8] sm:$0xff] }
 0x219   : > { %v641_v36 = vmul.f32 0.5, %v640_v63  ;;  %v645_v42 = vadd.f32 1.0, %v1634_v41 }
 0x21a   : > { %v648_v37 = vmul.f32 %v1632_v34, %v637_v0 }
 0x21b   : > { %v647_v38 = vmul.f32 %v641_v36, %v2067_v32  ;;  %v646_v43 = vmul.f32 0.5, %v645_v42  ;;  %v1506_v32 = vld [vmem:[%s1826_s23 + $0xa0] sm:$0xff] }
 0x21d   : > { %v2114_v40 = vadd.f32 %v648_v37, %v647_v38 }
 0x21f   : > { %1635 = vtanh.f32 %v2114_v40 }
 0x229   : > { %v1636_v44 = vpop.eup %1635 }
 0x22a   : > { %v2117_v45 = vmul.f32 %v1636_v44, %v646_v43 }
 0x22c   : > { %v652_v46 = vpack.c.bf16 %v2117_v45, %v2117_v45 }
 0x22e   : > { %1505 = vst [vmem:[%s1831_s26 + $0x18] sm:$0xf] %v652_v46  ;;  %694 = vmatmul.mubr.bf16.vlgmr.msra.gmra.mrb[8].mxu0 %v652_v46  ;;  %735 = vmatmul.mubr.bf16.vlgmr.msra.gmra.mrb[8].mxu1 %v652_v46 }
 0x22f   : > { %775 = vmatpush1.bf16.msra.mxu0 %v1841_v2  ;;  %816 = vmatpush1.bf16.msra.mxu1 %v1865_v7 }
 0x230   : > { %776 = vmatprep.subr.bf16.mxu0 %v1849_v4  ;;  %817 = vmatprep.subr.bf16.mxu1 %v1877_v9 }
 0x231   : > { %806 = vmatprep.mubr.bf16.mxu0 %v1782_v3  ;;  %847 = vmatprep.mubr.bf16.mxu1 %v1782_v3 }
 0x233   : > { %777 = vmatpush1.bf16.msra.mxu0 %v1860_v6  ;;  %818 = vmatpush1.bf16.msra.mxu1 %v1883_v10 }
 0x234   : > { %778 = vmatprep.subr.bf16.mxu0 %v1871_v8  ;;  %819 = vmatprep.subr.bf16.mxu1 %v1901_v13 }
 0x237   : > { %779 = vmatpush1.bf16.msra.mxu0 %v1890_v11  ;;  %820 = vmatpush1.bf16.msra.mxu1 %v1907_v14 }
 0x238   : > { %780 = vmatprep.subr.bf16.mxu0 %v1896_v12  ;;  %821 = vmatprep.subr.bf16.mxu1 %v1919_v16 }
 0x23b   : > { %781 = vmatpush1.bf16.msra.mxu0 %v1914_v15  ;;  %822 = vmatpush1.bf16.msra.mxu1 %v1936_v19 }
 0x23c   : > { %782 = vmatprep.subr.bf16.mxu0 %v1925_v17  ;;  %823 = vmatprep.subr.bf16.mxu1 %v1943_v20 }
 0x23f   : > { %783 = vmatpush1.bf16.msra.mxu0 %v1931_v18  ;;  %824 = vmatpush1.bf16.msra.mxu1 %v1955_v22 }
 0x240   : > { %784 = vmatprep.subr.bf16.mxu0 %v1949_v21  ;;  %825 = vmatprep.subr.bf16.mxu1 %v1967_v24 }
 0x243   : > { %785 = vmatpush1.bf16.msra.mxu0 %v1962_v23  ;;  %826 = vmatpush1.bf16.msra.mxu1 %v1979_v26 }
 0x244   : > { %786 = vmatprep.subr.bf16.mxu0 %v1973_v25  ;;  %827 = vmatprep.subr.bf16.mxu1 %v1991_v28 }
 0x247   : > { %787 = vmatpush1.bf16.msra.mxu0 %v1986_v27  ;;  %828 = vmatpush1.bf16.msra.mxu1 %v2003_v30 }
 0x248   : > { %788 = vmatprep.subr.bf16.mxu0 %v1997_v29  ;;  %829 = vmatprep.subr.bf16.mxu1 %v2015_v33 }
 0x24b   : > { %789 = vmatpush1.bf16.msra.mxu0 %v2010_v31  ;;  %830 = vmatpush1.bf16.msra.mxu1 %v2022_v35 }
 0x24c   : > { %887 = vmatprep.subr.bf16.mxu0 %v1836_v1  ;;  %928 = vmatprep.subr.bf16.mxu1 %v1855_v5 }
 0x301   : > { %v695_v48 = vpop.f32.mrb[8].mxu0  ;;  %v736_v49 = vpop.f32.mrb[8].mxu1 }
 0x302   : > { %v743_v50 = vadd.f32 %v1506_v32, %v695_v48  ;;  %v697_v51 = vpop.f32.mrb[9].mxu0  ;;  %v738_v52 = vpop.f32.mrb[9].mxu1  ;;  %v745_v61 = vadd.f32 %v1508_v53, %v736_v49 }
 0x303   : > { %v744_v54 = vadd.f32 %v1507_v47, %v697_v51  ;;  %v699_v55 = vpop.f32.mrb[10].mxu0  ;;  %v740_v56 = vpop.f32.mrb[10].mxu1  ;;  %v746_v63 = vadd.f32 %v1509_v62, %v738_v52  ;;  %v655_v51 = vadd.f32 %v2117_v45, %v2070_v39  ;;  %v1511_v39 = vld [vmem:[%s1826_s23 + $0x80] sm:$0xff] }
 0x304   : > { %v747_v57 = vmul.f32 0.5, %v743_v50  ;;  %v700_v58 = vpop.f32.mrb[11].mxu0  ;;  %v741_v59 = vpop.f32.mrb[11].mxu1 }
 0x305   : > { %v751_v60 = vmul.f32 0.5, %v744_v54  ;;  %v756_v0 = vmul.f32 0.5, %v746_v63  ;;  %v1513_v59 = vld [vmem:[%s1826_s23 + $0x90] sm:$0xff] }
 0x306   : > { %1637 = vtanh.f32 %v747_v57 }
 0x307   : > { %1639 = vtanh.f32 %v751_v60 }
 0x308   : > { %1641 = vtanh.f32 %v745_v61 }
 0x309   : > { %1643 = vtanh.f32 %v756_v0 }
 0x310   : > { %v1638_v34 = vpop.eup %1637 }
 0x311   : > { %v1640_v36 = vpop.eup %1639  ;;  %v749_v37 = vadd.f32 1.0, %v1638_v34 }
 0x312   : > { %v753_v38 = vadd.f32 1.0, %v1640_v36  ;;  %v1642_v42 = vpop.eup %1641 }
 0x313   : > { %v750_v41 = vmul.f32 0.5, %v749_v37  ;;  %v1644_v47 = vpop.eup %1643 }
 0x314   : > { %v754_v43 = vmul.f32 0.5, %v753_v38  ;;  %v758_v48 = vadd.f32 1.0, %v1644_v47  ;;  %v1514_v38 = vld [vmem:[%s1826_s23 + $0x98] sm:$0xff] }
 0x315   : > { %v761_v44 = vmul.f32 %v1642_v42, %v750_v41 }
 0x316   : > { %v760_v46 = vmul.f32 %v754_v43, %v2114_v40  ;;  %v759_v49 = vmul.f32 0.5, %v758_v48  ;;  %v1512_v40 = vld [vmem:[%s1826_s23 + $0x88] sm:$0xff] }
 0x318   : > { %v2161_v32 = vadd.f32 %v761_v44, %v760_v46 }
 0x31a   : > { %1645 = vtanh.f32 %v2161_v32 }
 0x324   : > { %v1646_v50 = vpop.eup %1645 }
 0x325   : > { %v764_v52 = vmul.f32 %v1646_v50, %v759_v49 }
 0x327   : > { %v2166_v53 = vadd.f32 %v764_v52, %v655_v51  ;;  %v765_v54 = vpack.c.bf16 %v764_v52, %v764_v52 }
 0x329   : > { %1510 = vst [vmem:[%s1831_s26 + $0x14] sm:$0xf] %v765_v54  ;;  %807 = vmatmul.mubr.bf16.vlgmr.msra.gmra.mrb[12].mxu0 %v765_v54  ;;  %848 = vmatmul.mubr.bf16.vlgmr.msra.gmra.mrb[12].mxu1 %v765_v54 }
 0x32a   : > { %888 = vmatpush1.bf16.msra.mxu0 %v1841_v2  ;;  %929 = vmatpush1.bf16.msra.mxu1 %v1865_v7 }
 0x32b   : > { %889 = vmatprep.subr.bf16.mxu0 %v1849_v4  ;;  %930 = vmatprep.subr.bf16.mxu1 %v1877_v9 }
 0x32c   : > { %919 = vmatprep.mubr.bf16.mxu0 %v1782_v3  ;;  %960 = vmatprep.mubr.bf16.mxu1 %v1782_v3 }
 0x32e   : > { %890 = vmatpush1.bf16.msra.mxu0 %v1860_v6  ;;  %931 = vmatpush1.bf16.msra.mxu1 %v1883_v10 }
 0x32f   : > { %891 = vmatprep.subr.bf16.mxu0 %v1871_v8  ;;  %932 = vmatprep.subr.bf16.mxu1 %v1901_v13 }
 0x332   : > { %892 = vmatpush1.bf16.msra.mxu0 %v1890_v11  ;;  %933 = vmatpush1.bf16.msra.mxu1 %v1907_v14 }
 0x333   : > { %893 = vmatprep.subr.bf16.mxu0 %v1896_v12  ;;  %934 = vmatprep.subr.bf16.mxu1 %v1919_v16 }
 0x336   : > { %894 = vmatpush1.bf16.msra.mxu0 %v1914_v15  ;;  %935 = vmatpush1.bf16.msra.mxu1 %v1936_v19 }
 0x337   : > { %895 = vmatprep.subr.bf16.mxu0 %v1925_v17  ;;  %936 = vmatprep.subr.bf16.mxu1 %v1943_v20 }
 0x33a   : > { %896 = vmatpush1.bf16.msra.mxu0 %v1931_v18  ;;  %937 = vmatpush1.bf16.msra.mxu1 %v1955_v22 }
 0x33b   : > { %897 = vmatprep.subr.bf16.mxu0 %v1949_v21  ;;  %938 = vmatprep.subr.bf16.mxu1 %v1967_v24 }
 0x33e   : > { %898 = vmatpush1.bf16.msra.mxu0 %v1962_v23  ;;  %939 = vmatpush1.bf16.msra.mxu1 %v1979_v26 }
 0x33f   : > { %899 = vmatprep.subr.bf16.mxu0 %v1973_v25  ;;  %940 = vmatprep.subr.bf16.mxu1 %v1991_v28 }
 0x342   : > { %900 = vmatpush1.bf16.msra.mxu0 %v1986_v27  ;;  %941 = vmatpush1.bf16.msra.mxu1 %v2003_v30 }
 0x343   : > { %901 = vmatprep.subr.bf16.mxu0 %v1997_v29  ;;  %942 = vmatprep.subr.bf16.mxu1 %v2015_v33 }
 0x346   : > { %902 = vmatpush1.bf16.msra.mxu0 %v2010_v31  ;;  %943 = vmatpush1.bf16.msra.mxu1 %v2022_v35 }
 0x347   : > { %1000 = vmatprep.subr.bf16.mxu0 %v1836_v1  ;;  %1041 = vmatprep.subr.bf16.mxu1 %v1855_v5 }
 0x3fc   : > { %v808_v45 = vpop.f32.mrb[12].mxu0  ;;  %v849_v55 = vpop.f32.mrb[12].mxu1 }
 0x3fd   : > { %v856_v56 = vadd.f32 %v1511_v39, %v808_v45  ;;  %v810_v57 = vpop.f32.mrb[13].mxu0  ;;  %v851_v58 = vpop.f32.mrb[13].mxu1  ;;  %v858_v37 = vadd.f32 %v1513_v59, %v849_v55 }
 0x3fe   : > { %v857_v60 = vadd.f32 %v1512_v40, %v810_v57  ;;  %v812_v61 = vpop.f32.mrb[14].mxu0  ;;  %v853_v62 = vpop.f32.mrb[14].mxu1  ;;  %v859_v41 = vadd.f32 %v1514_v38, %v851_v58 }
 0x3ff   : > { %v860_v63 = vmul.f32 0.5, %v856_v56  ;;  %v813_v0 = vpop.f32.mrb[15].mxu0  ;;  %v854_v34 = vpop.f32.mrb[15].mxu1 }
 0x400   : > { %v864_v36 = vmul.f32 0.5, %v857_v60  ;;  %v869_v42 = vmul.f32 0.5, %v859_v41  ;;  %v1518_v0 = vld [vmem:[%s1826_s23 + $0x70] sm:$0xff] }
 0x401   : > { %1647 = vtanh.f32 %v860_v63 }
 0x402   : > { %1649 = vtanh.f32 %v864_v36 }
 0x403   : > { %1651 = vtanh.f32 %v858_v37 }
 0x404   : > { %1653 = vtanh.f32 %v869_v42 }
 0x40b   : > { %v1648_v43 = vpop.eup %1647 }
 0x40c   : > { %v1650_v44 = vpop.eup %1649  ;;  %v862_v46 = vadd.f32 1.0, %v1648_v43 }
 0x40d   : > { %v866_v47 = vadd.f32 1.0, %v1650_v44  ;;  %v1652_v49 = vpop.eup %1651 }
 0x40e   : > { %v863_v48 = vmul.f32 0.5, %v862_v46  ;;  %v1654_v39 = vpop.eup %1653 }
 0x40f   : > { %v867_v50 = vmul.f32 0.5, %v866_v47  ;;  %v871_v40 = vadd.f32 1.0, %v1654_v39 }
 0x410   : > { %v874_v51 = vmul.f32 %v1652_v49, %v863_v48 }
 0x411   : > { %v873_v52 = vmul.f32 %v867_v50, %v2161_v32  ;;  %v872_v45 = vmul.f32 0.5, %v871_v40  ;;  %v1516_v32 = vld [vmem:[%s1826_s23 + $0x60] sm:$0xff] }
 0x413   : > { %v2208_v54 = vadd.f32 %v874_v51, %v873_v52 }
 0x415   : > { %1655 = vtanh.f32 %v2208_v54 }
 0x41f   : > { %v1656_v55 = vpop.eup %1655 }
 0x420   : > { %v877_v56 = vmul.f32 %v1656_v55, %v872_v45 }
 0x422   : > { %v2212_v57 = vadd.f32 %v877_v56, %v2166_v53  ;;  %v878_v58 = vpack.c.bf16 %v877_v56, %v877_v56  ;;  %v1517_v53 = vld [vmem:[%s1826_s23 + $0x68] sm:$0xff] }
 0x424   : > { %1515 = vst [vmem:[%s1831_s26 + $0x10] sm:$0xf] %v878_v58  ;;  %920 = vmatmul.mubr.bf16.vlgmr.msra.gmra.mrb[16].mxu0 %v878_v58  ;;  %961 = vmatmul.mubr.bf16.vlgmr.msra.gmra.mrb[16].mxu1 %v878_v58 }
 0x425   : > { %1001 = vmatpush1.bf16.msra.mxu0 %v1841_v2  ;;  %1042 = vmatpush1.bf16.msra.mxu1 %v1865_v7 }
 0x426   : > { %1002 = vmatprep.subr.bf16.mxu0 %v1849_v4  ;;  %1043 = vmatprep.subr.bf16.mxu1 %v1877_v9 }
 0x427   : > { %1032 = vmatprep.mubr.bf16.mxu0 %v1782_v3  ;;  %1073 = vmatprep.mubr.bf16.mxu1 %v1782_v3 }
 0x429   : > { %1003 = vmatpush1.bf16.msra.mxu0 %v1860_v6  ;;  %1044 = vmatpush1.bf16.msra.mxu1 %v1883_v10 }
 0x42a   : > { %1004 = vmatprep.subr.bf16.mxu0 %v1871_v8  ;;  %1045 = vmatprep.subr.bf16.mxu1 %v1901_v13 }
 0x42d   : > { %1005 = vmatpush1.bf16.msra.mxu0 %v1890_v11  ;;  %1046 = vmatpush1.bf16.msra.mxu1 %v1907_v14 }
 0x42e   : > { %1006 = vmatprep.subr.bf16.mxu0 %v1896_v12  ;;  %1047 = vmatprep.subr.bf16.mxu1 %v1919_v16 }
 0x431   : > { %1007 = vmatpush1.bf16.msra.mxu0 %v1914_v15  ;;  %1048 = vmatpush1.bf16.msra.mxu1 %v1936_v19 }
 0x432   : > { %1008 = vmatprep.subr.bf16.mxu0 %v1925_v17  ;;  %1049 = vmatprep.subr.bf16.mxu1 %v1943_v20 }
 0x435   : > { %1009 = vmatpush1.bf16.msra.mxu0 %v1931_v18  ;;  %1050 = vmatpush1.bf16.msra.mxu1 %v1955_v22 }
 0x436   : > { %1010 = vmatprep.subr.bf16.mxu0 %v1949_v21  ;;  %1051 = vmatprep.subr.bf16.mxu1 %v1967_v24 }
 0x439   : > { %1011 = vmatpush1.bf16.msra.mxu0 %v1962_v23  ;;  %1052 = vmatpush1.bf16.msra.mxu1 %v1979_v26 }
 0x43a   : > { %1012 = vmatprep.subr.bf16.mxu0 %v1973_v25  ;;  %1053 = vmatprep.subr.bf16.mxu1 %v1991_v28 }
 0x43d   : > { %1013 = vmatpush1.bf16.msra.mxu0 %v1986_v27  ;;  %1054 = vmatpush1.bf16.msra.mxu1 %v2003_v30 }
 0x43e   : > { %1014 = vmatprep.subr.bf16.mxu0 %v1997_v29  ;;  %1055 = vmatprep.subr.bf16.mxu1 %v2015_v33 }
 0x441   : > { %1015 = vmatpush1.bf16.msra.mxu0 %v2010_v31  ;;  %1056 = vmatpush1.bf16.msra.mxu1 %v2022_v35 }
 0x442   : > { %1113 = vmatprep.subr.bf16.mxu0 %v1836_v1  ;;  %1154 = vmatprep.subr.bf16.mxu1 %v1855_v5  ;;  %v1519_v5 = vld [vmem:[%s1826_s23 + $0x78] sm:$0xff] }
 0x4f7   : > { %v921_v59 = vpop.f32.mrb[16].mxu0  ;;  %v962_v60 = vpop.f32.mrb[16].mxu1 }
 0x4f8   : > { %v969_v61 = vadd.f32 %v1516_v32, %v921_v59  ;;  %v923_v62 = vpop.f32.mrb[17].mxu0  ;;  %v964_v63 = vpop.f32.mrb[17].mxu1  ;;  %v971_v1 = vadd.f32 %v1518_v0, %v962_v60 }
 0x4f9   : > { %v970_v34 = vadd.f32 %v1517_v53, %v923_v62  ;;  %v925_v36 = vpop.f32.mrb[18].mxu0  ;;  %v966_v37 = vpop.f32.mrb[18].mxu1  ;;  %v972_v44 = vadd.f32 %v1519_v5, %v964_v63  ;;  %v1702_v5 = vld [vmem:[%s2449_s1 + $0x2c] ss:$16 sps:$4 sm:$0xff]  }
 0x4fa   : > { %v973_v38 = vmul.f32 0.5, %v969_v61  ;;  %v926_v41 = vpop.f32.mrb[19].mxu0  ;;  %v967_v42 = vpop.f32.mrb[19].mxu1 }
 0x4fb   : > { %v977_v43 = vmul.f32 0.5, %v970_v34  ;;  %v982_v46 = vmul.f32 0.5, %v972_v44  ;;  %v1699_v42 = vld [vmem:[%s2449_s1] ss:$16 sps:$4 sm:$0xff]  }
 0x4fc   : > { %1657 = vtanh.f32 %v973_v38  ;;  %v1703_v44 = vld [vmem:[%s2449_s1 + $0x20] ss:$16 sps:$4 sm:$0xff]  }
 0x4fd   : > { %1659 = vtanh.f32 %v977_v43  ;;  %v1700_v43 = vld [vmem:[%s2449_s1 + $0x8] ss:$16 sps:$4 sm:$0xff]  }
 0x4fe   : > { %1661 = vtanh.f32 %v971_v1  ;;  %v1701_v1 = vld [vmem:[%s2449_s1 + $0x24] ss:$16 sps:$4 sm:$0xff]  }
 0x4ff   : > { %1663 = vtanh.f32 %v982_v46  ;;  %v1704_v46 = vld [vmem:[%s2449_s1 + $0x28] ss:$16 sps:$4 sm:$0xff]  }
 0x506   : > { %v1658_v47 = vpop.eup %1657 }
 0x507   : > { %v1660_v48 = vpop.eup %1659  ;;  %v975_v49 = vadd.f32 1.0, %v1658_v47  ;;  %v1705_v47 = vld [vmem:[%s2449_s1 + $0x44] ss:$16 sps:$4 sm:$0xff]  }
 0x508   : > { %v979_v50 = vadd.f32 1.0, %v1660_v48  ;;  %v1662_v52 = vpop.eup %1661  ;;  %v1706_v48 = vld [vmem:[%s2449_s1 + $0x4c] ss:$16 sps:$4 sm:$0xff]  }
 0x509   : > { %v976_v51 = vmul.f32 0.5, %v975_v49  ;;  %v1664_v56 = vpop.eup %1663  ;;  %v1708_v49 = vld [vmem:[%s2449_s1 + $0x48] ss:$16 sps:$4 sm:$0xff]  }
 0x50a   : > { %v980_v39 = vmul.f32 0.5, %v979_v50  ;;  %v984_v58 = vadd.f32 1.0, %v1664_v56  ;;  %v1709_v50 = vld [vmem:[%s2449_s1 + $0x64] ss:$16 sps:$4 sm:$0xff]   ;;  %v1716_v56 = vld [vmem:[%s2449_s1 + $0x88] ss:$16 sps:$4 sm:$0xff]  }
 0x50b   : > { %v987_v40 = vmul.f32 %v1662_v52, %v976_v51  ;;  %v1710_v51 = vld [vmem:[%s2449_s1 + $0x6c] ss:$16 sps:$4 sm:$0xff]   ;;  %v1711_v52 = vld [vmem:[%s2449_s1 + $0x60] ss:$16 sps:$4 sm:$0xff]  }
 0x50c   : > { %v986_v45 = vmul.f32 %v980_v39, %v2208_v54  ;;  %v985_v32 = vmul.f32 0.5, %v984_v58  ;;  %v1712_v39 = vld [vmem:[%s2449_s1 + $0x68] ss:$16 sps:$4 sm:$0xff]   ;;  %v1717_v58 = vld [vmem:[%s2449_s1 + $0xa4] ss:$16 sps:$4 sm:$0xff]  }
 0x50e   : > { %v2254_v55 = vadd.f32 %v987_v40, %v986_v45  ;;  %v1713_v40 = vld [vmem:[%s2449_s1 + $0x84] ss:$16 sps:$4 sm:$0xff]   ;;  %v1714_v45 = vld [vmem:[%s2449_s1 + $0x8c] ss:$16 sps:$4 sm:$0xff]  }
 0x510   : > { %1665 = vtanh.f32 %v2254_v55 }
 0x51a   : > { %v1666_v53 = vpop.eup %1665 }
 0x51b   : > { %v990_v59 = vmul.f32 %v1666_v53, %v985_v32  ;;  %v1718_v32 = vld [vmem:[%s2449_s1 + $0xac] ss:$16 sps:$4 sm:$0xff]   ;;  %v1719_v53 = vld [vmem:[%s2449_s1 + $0xa0] ss:$16 sps:$4 sm:$0xff]  }
 0x51d   : > { %v2258_v60 = vadd.f32 %v990_v59, %v2212_v57  ;;  %v991_v61 = vpack.c.bf16 %v990_v59, %v990_v59  ;;  %v1720_v59 = vld [vmem:[%s2449_s1 + $0xa8] ss:$16 sps:$4 sm:$0xff]  }
 0x51f   : > { %1520 = vst [vmem:[%s1831_s26 + $0xc] sm:$0xf] %v991_v61  ;;  %1033 = vmatmul.mubr.bf16.vlgmr.msra.gmra.mrb[20].mxu0 %v991_v61  ;;  %1074 = vmatmul.mubr.bf16.vlgmr.msra.gmra.mrb[20].mxu1 %v991_v61  ;;  %v1722_v61 = vld [vmem:[%s2449_s1 + $0xcc] ss:$16 sps:$4 sm:$0xff]  }
 0x520   : > { %1114 = vmatpush1.bf16.msra.mxu0 %v1841_v2  ;;  %1155 = vmatpush1.bf16.msra.mxu1 %v1865_v7  ;;  %v1697_v2 = vld [vmem:[%s2449_s1 + $0x4] ss:$16 sps:$4 sm:$0xff]   ;;  %v1522_v7 = vld [vmem:[%s1826_s23 + $0x48] sm:$0xff] }
 0x521   : > { %1115 = vmatprep.subr.bf16.mxu0 %v1849_v4  ;;  %1156 = vmatprep.subr.bf16.mxu1 %v1877_v9  ;;  %v1698_v4 = vld [vmem:[%s2449_s1 + $0xc] ss:$16 sps:$4 sm:$0xff]  }
 0x522   : > { %1145 = vmatprep.mubr.bf16.mxu0 %v1782_v3  ;;  %1186 = vmatprep.mubr.bf16.mxu1 %v1782_v3 }
 0x524   : > { %1116 = vmatpush1.bf16.msra.mxu0 %v1860_v6  ;;  %1157 = vmatpush1.bf16.msra.mxu1 %v1883_v10  ;;  %v1521_v6 = vld [vmem:[%s1826_s23 + $0x40] sm:$0xff] }
 0x525   : > { %1117 = vmatprep.subr.bf16.mxu0 %v1871_v8  ;;  %1158 = vmatprep.subr.bf16.mxu1 %v1901_v13  ;;  %v1523_v13 = vld [vmem:[%s1826_s23 + $0x50] sm:$0xff] }
 0x528   : > { %1118 = vmatpush1.bf16.msra.mxu0 %v1890_v11  ;;  %1159 = vmatpush1.bf16.msra.mxu1 %v1907_v14 }
 0x529   : > { %1119 = vmatprep.subr.bf16.mxu0 %v1896_v12  ;;  %1160 = vmatprep.subr.bf16.mxu1 %v1919_v16 }
 0x52c   : > { %1120 = vmatpush1.bf16.msra.mxu0 %v1914_v15  ;;  %1161 = vmatpush1.bf16.msra.mxu1 %v1936_v19 }
 0x52d   : > { %1121 = vmatprep.subr.bf16.mxu0 %v1925_v17  ;;  %1162 = vmatprep.subr.bf16.mxu1 %v1943_v20 }
 0x530   : > { %1122 = vmatpush1.bf16.msra.mxu0 %v1931_v18  ;;  %1163 = vmatpush1.bf16.msra.mxu1 %v1955_v22  ;;  %v1524_v22 = vld [vmem:[%s1826_s23 + $0x58] sm:$0xff] }
 0x531   : > { %1123 = vmatprep.subr.bf16.mxu0 %v1949_v21  ;;  %1164 = vmatprep.subr.bf16.mxu1 %v1967_v24 }
 0x534   : > { %1124 = vmatpush1.bf16.msra.mxu0 %v1962_v23  ;;  %1165 = vmatpush1.bf16.msra.mxu1 %v1979_v26 }
 0x535   : > { %1125 = vmatprep.subr.bf16.mxu0 %v1973_v25  ;;  %1166 = vmatprep.subr.bf16.mxu1 %v1991_v28 }
 0x538   : > { %1126 = vmatpush1.bf16.msra.mxu0 %v1986_v27  ;;  %1167 = vmatpush1.bf16.msra.mxu1 %v2003_v30 }
 0x539   : > { %1127 = vmatprep.subr.bf16.mxu0 %v1997_v29  ;;  %1168 = vmatprep.subr.bf16.mxu1 %v2015_v33 }
 0x53c   : > { %1128 = vmatpush1.bf16.msra.mxu0 %v2010_v31  ;;  %1169 = vmatpush1.bf16.msra.mxu1 %v2022_v35 }
 0x53d   : > { %1225 = vmatprep.subr.bf16.mxu0 %v1697_v2  ;;  %1266 = vmatprep.subr.bf16.mxu1 %v1698_v4  ;;  %v1723_v2 = vld [vmem:[%s2449_s1 + $0xc0] ss:$16 sps:$4 sm:$0xff]   ;;  %v1724_v4 = vld [vmem:[%s2449_s1 + $0xc8] ss:$16 sps:$4 sm:$0xff]  }
 0x5f2   : > { %v1034_v8 = vpop.f32.mrb[20].mxu0  ;;  %v1075_v9 = vpop.f32.mrb[20].mxu1 }
 0x5f3   : > { %v1082_v10 = vadd.f32 %v1521_v6, %v1034_v8  ;;  %v1036_v11 = vpop.f32.mrb[21].mxu0  ;;  %v1077_v12 = vpop.f32.mrb[21].mxu1  ;;  %v1084_v21 = vadd.f32 %v1523_v13, %v1075_v9  ;;  %v1725_v6 = vld [vmem:[%s2449_s1 + $0xe4] ss:$16 sps:$4 sm:$0xff]   ;;  %v1527_v9 = vld [vmem:[%s1826_s23 + $0x28] sm:$0xff] }
 0x5f4   : > { %v1083_v14 = vadd.f32 %v1522_v7, %v1036_v11  ;;  %v1038_v15 = vpop.f32.mrb[22].mxu0  ;;  %v1079_v16 = vpop.f32.mrb[22].mxu1  ;;  %v1085_v23 = vadd.f32 %v1524_v22, %v1077_v12  ;;  %v1726_v7 = vld [vmem:[%s2449_s1 + $0xe0] ss:$16 sps:$4 sm:$0xff]  }
 0x5f5   : > { %v1086_v17 = vmul.f32 0.5, %v1082_v10  ;;  %v1039_v18 = vpop.f32.mrb[23].mxu0  ;;  %v1080_v19 = vpop.f32.mrb[23].mxu1  ;;  %v1526_v8 = vld [vmem:[%s1826_s23 + $0x20] sm:$0xff]  ;;  %v1528_v15 = vld [vmem:[%s1826_s23 + $0x30] sm:$0xff] }
 0x5f6   : > { %v1090_v20 = vmul.f32 0.5, %v1083_v14  ;;  %v1095_v24 = vmul.f32 0.5, %v1085_v23 }
 0x5f7   : > { %1667 = vtanh.f32 %v1086_v17 }
 0x5f8   : > { %1669 = vtanh.f32 %v1090_v20 }
 0x5f9   : > { %1671 = vtanh.f32 %v1084_v21 }
 0x5fa   : > { %1673 = vtanh.f32 %v1095_v24 }
 0x601   : > { %v1668_v25 = vpop.eup %1667 }
 0x602   : > { %v1670_v26 = vpop.eup %1669  ;;  %v1088_v27 = vadd.f32 1.0, %v1668_v25 }
 0x603   : > { %v1092_v28 = vadd.f32 1.0, %v1670_v26  ;;  %v1672_v30 = vpop.eup %1671 }
 0x604   : > { %v1089_v29 = vmul.f32 0.5, %v1088_v27  ;;  %v1674_v63 = vpop.eup %1673 }
 0x605   : > { %v1093_v31 = vmul.f32 0.5, %v1092_v28  ;;  %v1097_v0 = vadd.f32 1.0, %v1674_v63 }
 0x606   : > { %v1100_v54 = vmul.f32 %v1672_v30, %v1089_v29 }
 0x607   : > { %v1099_v57 = vmul.f32 %v1093_v31, %v2254_v55  ;;  %v1098_v34 = vmul.f32 0.5, %v1097_v0  ;;  %v1715_v55 = vld [vmem:[%s2449_s1 + $0x80] ss:$16 sps:$4 sm:$0xff]  }
 0x609   : > { %v2304_v62 = vadd.f32 %v1100_v54, %v1099_v57 }
 0x60b   : > { %1675 = vtanh.f32 %v2304_v62 }
 0x615   : > { %v1676_v36 = vpop.eup %1675 }
 0x616   : > { %v1103_v37 = vmul.f32 %v1676_v36, %v1098_v34 }
 0x618   : > { %v2308_v38 = vadd.f32 %v1103_v37, %v2258_v60  ;;  %v1104_v41 = vpack.c.bf16 %v1103_v37, %v1103_v37  ;;  %v1721_v60 = vld [vmem:[%s2449_s1 + $0xc4] ss:$16 sps:$4 sm:$0xff]  }
 0x61a   : > { %1525 = vst [vmem:[%s1831_s26 + $0x8] sm:$0xf] %v1104_v41  ;;  %1146 = vmatmul.mubr.bf16.vlgmr.msra.gmra.mrb[24].mxu0 %v1104_v41  ;;  %1187 = vmatmul.mubr.bf16.vlgmr.msra.gmra.mrb[24].mxu1 %v1104_v41 }
 0x61b   : > { %1226 = vmatpush1.bf16.msra.mxu0 %v1699_v42  ;;  %1267 = vmatpush1.bf16.msra.mxu1 %v1700_v43 }
 0x61c   : > { %1227 = vmatprep.subr.bf16.mxu0 %v1701_v1  ;;  %1268 = vmatprep.subr.bf16.mxu1 %v1702_v5  ;;  %v1221_v1 = vld [vmem:[%s1826_s23] sm:$0xff]  ;;  %v1222_v5 = vld [vmem:[%s1826_s23 + $0x8] sm:$0xff] }
 0x61d   : > { %1257 = vmatprep.mubr.bf16.mxu0 %v1782_v3  ;;  %1298 = vmatprep.mubr.bf16.mxu1 %v1782_v3  ;;  %v1707_v3 = vld [vmem:[%s2449_s1 + $0x40] ss:$16 sps:$4 sm:$0xff]  }
 0x61f   : > { %1228 = vmatpush1.bf16.msra.mxu0 %v1703_v44  ;;  %1269 = vmatpush1.bf16.msra.mxu1 %v1704_v46 }
 0x620   : > { %1229 = vmatprep.subr.bf16.mxu0 %v1705_v47  ;;  %1270 = vmatprep.subr.bf16.mxu1 %v1706_v48 }
 0x623   : > { %1230 = vmatpush1.bf16.msra.mxu0 %v1707_v3  ;;  %1271 = vmatpush1.bf16.msra.mxu1 %v1708_v49  ;;  %v1223_v3 = vld [vmem:[%s1826_s23 + $0x10] sm:$0xff] }
 0x624   : > { %1231 = vmatprep.subr.bf16.mxu0 %v1709_v50  ;;  %1272 = vmatprep.subr.bf16.mxu1 %v1710_v51 }
 0x627   : > { %1232 = vmatpush1.bf16.msra.mxu0 %v1711_v52  ;;  %1273 = vmatpush1.bf16.msra.mxu1 %v1712_v39 }
 0x628   : > { %1233 = vmatprep.subr.bf16.mxu0 %v1713_v40  ;;  %1274 = vmatprep.subr.bf16.mxu1 %v1714_v45 }
 0x62b   : > { %1234 = vmatpush1.bf16.msra.mxu0 %v1715_v55  ;;  %1275 = vmatpush1.bf16.msra.mxu1 %v1716_v56  ;;  %v1224_v55 = vld [vmem:[%s1826_s23 + $0x18] sm:$0xff] }
 0x62c   : > { %1235 = vmatprep.subr.bf16.mxu0 %v1717_v58  ;;  %1276 = vmatprep.subr.bf16.mxu1 %v1718_v32 }
 0x62f   : > { %1236 = vmatpush1.bf16.msra.mxu0 %v1719_v53  ;;  %1277 = vmatpush1.bf16.msra.mxu1 %v1720_v59 }
 0x630   : > { %1237 = vmatprep.subr.bf16.mxu0 %v1721_v60  ;;  %1278 = vmatprep.subr.bf16.mxu1 %v1722_v61 }
 0x633   : > { %1238 = vmatpush1.bf16.msra.mxu0 %v1723_v2  ;;  %1279 = vmatpush1.bf16.msra.mxu1 %v1724_v4 }
 0x634   : > { %1239 = vmatprep.subr.bf16.mxu0 %v1725_v6  ;;  %1280 = vmatprep.subr.bf16.mxu1 %v2015_v33 }
 0x637   : > { %1240 = vmatpush1.bf16.msra.mxu0 %v1726_v7  ;;  %1281 = vmatpush1.bf16.msra.mxu1 %v2022_v35  ;;  %v1529_v35 = vld [vmem:[%s1826_s23 + $0x38] sm:$0xff]  ;;  %s1783_s23 = smov [#allocation4]  }
 0x638   : > { %s1361_s24 = sshll.u32 %s1783_s23, 4  ;;  %s1362_s24 = int_to_ptr.vmem [resolvable:$true] %s1361_s24 }
 0x639   : > { %s1727_s27 = scalar_lea.vmem %s1362_s24, 128  ;;  %p1734_p10 = scmp.lt.s32.totalorder %s1362_s24, %s1362_s24 }
 0x63a   : > { %p1728_p7 = scmp.ne.s32.totalorder %s1362_s24, %s1727_s27  ;;  %p1735_p11 = scmp.lt.s32.totalorder %s1727_s27, %s1727_s27 }
 0x63c   : > { %p1729_p8 = pnand %p1728_p7, %p2413_p6  ;;  %p1736_p12 = por %p1735_p11, %p1734_p10 }
 0x63e   : > { %p1730_p9 = pneg %p1729_p8 }
 0x640   : > { %p1737_p13 = pnand %p1736_p12, %p1730_p9 }
 0x6ed   : > { %v1147_v10 = vpop.f32.mrb[24].mxu0  ;;  %v1188_v11 = vpop.f32.mrb[24].mxu1 }
 0x6ee   : > { %v1195_v12 = vadd.f32 %v1526_v8, %v1147_v10  ;;  %v1149_v13 = vpop.f32.mrb[25].mxu0  ;;  %v1190_v14 = vpop.f32.mrb[25].mxu1  ;;  %v1197_v22 = vadd.f32 %v1528_v15, %v1188_v11 }
 0x6ef   : > { %v1196_v16 = vadd.f32 %v1527_v9, %v1149_v13  ;;  %v1151_v17 = vpop.f32.mrb[26].mxu0  ;;  %v1192_v18 = vpop.f32.mrb[26].mxu1  ;;  %v1198_v23 = vadd.f32 %v1529_v35, %v1190_v14 }
 0x6f0   : > { %v1199_v33 = vmul.f32 0.5, %v1195_v12  ;;  %v1152_v19 = vpop.f32.mrb[27].mxu0  ;;  %v1193_v20 = vpop.f32.mrb[27].mxu1 }
 0x6f1   : > { %v1203_v21 = vmul.f32 0.5, %v1196_v16  ;;  %v1208_v24 = vmul.f32 0.5, %v1198_v23  ;;  %v1334_v16 = vld [vmem:[#allocation4] sm:$0xff] }
 0x6f2   : > { %1677 = vtanh.f32 %v1199_v33 }
 0x6f3   : > { %1679 = vtanh.f32 %v1203_v21 }
 0x6f4   : > { %1681 = vtanh.f32 %v1197_v22 }
 0x6f5   : > { %1683 = vtanh.f32 %v1208_v24 }
 0x6fc   : > { %v1678_v25 = vpop.eup %1677 }
 0x6fd   : > { %v1680_v26 = vpop.eup %1679  ;;  %v1201_v27 = vadd.f32 1.0, %v1678_v25 }
 0x6fe   : > { %v1205_v28 = vadd.f32 1.0, %v1680_v26  ;;  %v1682_v30 = vpop.eup %1681 }
 0x6ff   : > { %v1202_v29 = vmul.f32 0.5, %v1201_v27  ;;  %v1684_v0 = vpop.eup %1683 }
 0x700   : > { %v1206_v31 = vmul.f32 0.5, %v1205_v28  ;;  %v1210_v34 = vadd.f32 1.0, %v1684_v0 }
 0x701   : > { %v1213_v54 = vmul.f32 %v1682_v30, %v1202_v29 }
 0x702   : > { %v1212_v57 = vmul.f32 %v1206_v31, %v2304_v62  ;;  %v1211_v36 = vmul.f32 0.5, %v1210_v34 }
 0x704   : > { %v1214_v63 = vadd.f32 %v1213_v54, %v1212_v57 }
 0x706   : > { %1685 = vtanh.f32 %v1214_v63 }
 0x710   : > { %v1686_v37 = vpop.eup %1685 }
 0x711   : > { %v1216_v41 = vmul.f32 %v1686_v37, %v1211_v36 }
 0x713   : > { %v1217_v42 = vpack.c.bf16 %v1216_v41, %v1216_v41  ;;  %v1220_v43 = vadd.f32 %v1216_v41, %v2308_v38 }
 0x715   : > { %1530 = vst [vmem:[%s1831_s26 + $0x4] sm:$0xf] %v1217_v42  ;;  %1258 = vmatmul.mubr.bf16.vlgmr.msra.gmra.mrb[28].mxu0 %v1217_v42  ;;  %1299 = vmatmul.mubr.bf16.vlgmr.msra.gmra.mrb[28].mxu1 %v1217_v42 }
 0x7e8   : > { %v1259_v44 = vpop.f32.mrb[28].mxu0  ;;  %v1300_v46 = vpop.f32.mrb[28].mxu1 }
 0x7e9   : > { %v1307_v62 = vadd.f32 %v1259_v44, %v1221_v1  ;;  %v1261_v47 = vpop.f32.mrb[29].mxu0  ;;  %v1302_v48 = vpop.f32.mrb[29].mxu1  ;;  %v1309_v38 = vadd.f32 %v1300_v46, %v1223_v3 }
 0x7ea   : > { %v1308_v49 = vadd.f32 %v1261_v47, %v1222_v5  ;;  %v1263_v50 = vpop.f32.mrb[30].mxu0  ;;  %v1304_v51 = vpop.f32.mrb[30].mxu1  ;;  %v1310_v56 = vadd.f32 %v1302_v48, %v1224_v55 }
 0x7eb   : > { %v1311_v52 = vmul.f32 0.5, %v1307_v62  ;;  %v1264_v39 = vpop.f32.mrb[31].mxu0  ;;  %v1305_v40 = vpop.f32.mrb[31].mxu1 }
 0x7ec   : > { %v1315_v45 = vmul.f32 0.5, %v1308_v49  ;;  %v1320_v58 = vmul.f32 0.5, %v1310_v56 }
 0x7ed   : > { %1687 = vtanh.f32 %v1311_v52 }
 0x7ee   : > { %1689 = vtanh.f32 %v1315_v45 }
 0x7ef   : > { %1691 = vtanh.f32 %v1309_v38 }
 0x7f0   : > { %1693 = vtanh.f32 %v1320_v58 }
 0x7f7   : > { %v1688_v32 = vpop.eup %1687 }
 0x7f8   : > { %v1690_v53 = vpop.eup %1689  ;;  %v1313_v59 = vadd.f32 1.0, %v1688_v32 }
 0x7f9   : > { %v1317_v60 = vadd.f32 1.0, %v1690_v53  ;;  %v1692_v2 = vpop.eup %1691 }
 0x7fa   : > { %v1314_v61 = vmul.f32 0.5, %v1313_v59  ;;  %v1694_v9 = vpop.eup %1693 }
 0x7fb   : > { %v1318_v4 = vmul.f32 0.5, %v1317_v60  ;;  %v1322_v10 = vadd.f32 1.0, %v1694_v9 }
 0x7fc   : > { %v1325_v6 = vmul.f32 %v1692_v2, %v1314_v61 }
 0x7fd   : > { %v1324_v7 = vmul.f32 %v1318_v4, %v1214_v63  ;;  %v1323_v11 = vmul.f32 0.5, %v1322_v10 }
 0x7ff   : > { %v1326_v8 = vadd.f32 %v1325_v6, %v1324_v7 }
 0x801   : > { %1695 = vtanh.f32 %v1326_v8  ;;  %1333 = vst [vmem:[#allocation3] sm:$0xff] %v1326_v8 }
 0x80b   : > { %v1696_v12 = vpop.eup %1695 }
 0x80c   : > { %v1328_v13 = vmul.f32 %v1696_v12, %v1323_v11 }
 0x80e   : > { %v1329_v14 = vpack.c.bf16 %v1328_v13, %v1328_v13  ;;  %1332 = vst [vmem:[#allocation2] sm:$0xff] %v1328_v13  ;;  %v1331_v15 = vadd.f32 %v1328_v13, %v1220_v43 }
 0x810   : > { %1330 = vst [vmem:[%s1831_s26] sm:$0xf] %v1329_v14  ;;  %v1335_v17 = vmul.f32 0.0625, %v1331_v15 }
 0x812   : > { %v1336_v18 = vadd.f32 %v1335_v17, %v1334_v16 }
 0x814   : > { %1337 = vst [vmem:[#allocation4] sm:$0xff] %v1336_v18 }
 0x815   : > { %1740 = shalt.err (!%p1737_p13)
}
 0x816   : > { %s1741_s15 = scalar_lea.hbm %s2451_s3, 128 }
 0x817   : > { %p1742_p0 = scmp.ne.s32.totalorder %s2451_s3, %s1741_s15  ;;  %p1747_p3 = scmp.lt.u32.totalorder %s1741_s15, %s2451_s3 }
 0x819   : > { %p1743_p1 = pnand %p1742_p0, %p2413_p6 }
 0x81b   : > { %p1744_p2 = pneg %p1743_p1 }
 0x81d   : > { %p1749_p4 = pnand %p1747_p3, %p1744_p2 }
 0x81f   : > { %1752 = shalt.err (!%p1749_p4)
}
 0x820   : > { %1537 = dma.vmem_to_hbm [thread:$0]  (%p2413_p6), %s1362_s24, 128, %s2451_s3, [#allocation5]  }
 0x821   : > { %1766 = dma.done.wait (%p2413_p6), [#allocation5], 128  }
 0x822   : > { %1768 = vsyncadd (%p2413_p6), [#allocation5], 4294967168 }
 0x823 PF: > { %s15_s14 = sadd.s32 1, %s1779_s14   ;;  %s2453_s12 = smov %s1775_s13 }
 0x824   : > { %p12_p5 = scmp.ge.s32.totalorder %s15_s14, 4   ;;  %s2454_s13 = smov %s2456_s16 }
 0x826   :  { %14 = sbr.rel (!%p12_p5) target bundleno = 2 (0x2), region = 86 }
 0x82d   :  { %1386 = vsyncpa [#allocation5], 1 }
 0x82e   :  { %1388 = vsyncpa [#allocation5 + $0x1], 1 }

// kernel: blstm_relu_forward.14
= control target key start
LH: loop header
LB: loop body
LE: loop exit
PB: predicated region body
PF: predicated region fallthrough
CT: control target
= control target key end

     0   :  { %s1626_s9 = smov 0   ;;  %s1628_s10 = smov 0   ;;  %s2223_s0 = inlined_call_operand.vmem [shape: f32[16,8,512], index: 0, kind: input, shape index: {}]   ;;  %s2224_s1 = inlined_call_operand.vmem [shape: bf16[128,512], index: 1, kind: input, shape index: {}]   ;;  %s2225_s2 = inlined_call_operand.vmem [shape: f32[8,128], index: 2, kind: output, shape index: {}]  }
   0x1   :  { %s1630_s11 = smov 0  }
   0x2 LB: > { %s21_s12 = sadd.s32 1, %s1603_s10  ;;  %p1339_p0 = scmp.ge.s32.totalorder %s1607_s11, 1  ;;  %s1607_s11 = sphi %s1630_s11, %s12_s11   ;;  %s1603_s10 = sphi %s1628_s10, %s2227_s10   ;;  %s1599_s9 = sphi %s1626_s9, %s2226_s9  }
   0x3   : > { %p22_p1 = scmp.ge.s32.totalorder %s21_s12, 2  ;;  %p132_p2 = scmp.lt.s32.totalorder %s1607_s11, 3 }
   0x5   : > { %s2229_s12 = smov (%p22_p1, %s21_s12), 0  ;;  %p133_p3 = pnand %p1339_p0, %p132_p2 }
   0x6   : > { %s1340_s13 = sshll.u32 (!%p133_p3), %s1599_s9, 3  ;;  %p1343_p5 = scmp.ne.s32.totalorder (!%p133_p3), %s1599_s9, 0 }
   0x7   : > { %136 = sbr.rel (%p133_p3) target bundleno = 2068 (0x814), region = 28  ;;  %p159_p4 = scmp.lt.s32.totalorder (!%p133_p3), %s1340_s13, 15 }
   0xe   : > { %s2231_s13 = smov (!%p159_p4, %s1340_s13), 15  ;;  %177 = sbr.rel (%p1343_p5) target bundleno = 21 (0x15), region = 32 }
   0xf   : > { %s1407_s14 = sshll.u32 %s2231_s13, 5  ;;  %v1609_v0 = vmov (!%p1343_p5), 0.0  }
  0x10   : > { %s1647_s17 = scalar_lea.vmem %s2223_s0, %s1407_s14  ;;  %178 = vst [vmem:[#allocation2] sm:$0xff] (!%p1343_p5), %v1609_v0  ;;  %179 = vst [vmem:[#allocation3] sm:$0xff] (!%p1343_p5), %v1609_v0 }
  0x11   : > { %180 = vst [vmem:[%s2225_s2] sm:$0xff] (!%p1343_p5), %v1609_v0 }
  0x15 PF: > { %v1655_v1 = vld [vmem:[%s2224_s1 + $0x4] ss:$16 sps:$4 sm:$0xff]   ;;  %v1660_v2 = vld [vmem:[%s2224_s1] ss:$16 sps:$4 sm:$0xff]   ;;  %v1610_v3 = vmov 0   ;;  %v216_v37 = vld [vmem:[%s1647_s17 + $0x8] sm:$0xff] }
  0x16   : > { %412 = vmatprep.mubr.bf16.mxu0 %v1610_v3  ;;  %453 = vmatprep.mubr.bf16.mxu1 %v1610_v3  ;;  %v1668_v4 = vld [vmem:[%s2224_s1 + $0x24] ss:$16 sps:$4 sm:$0xff]   ;;  %v1674_v5 = vld [vmem:[%s2224_s1 + $0xc] ss:$16 sps:$4 sm:$0xff]   ;;  %v1679_v6 = vld [vmem:[%s2224_s1 + $0x20] ss:$16 sps:$4 sm:$0xff]  }
  0x17   : > { %380 = vmatprep.subr.bf16.mxu0 %v1655_v1  ;;  %v1684_v7 = vld [vmem:[%s2224_s1 + $0x8] ss:$16 sps:$4 sm:$0xff]   ;;  %v1690_v8 = vld [vmem:[%s2224_s1 + $0x44] ss:$16 sps:$4 sm:$0xff]   ;;  %421 = vmatprep.subr.bf16.mxu1 %v1674_v5  ;;  %v1696_v9 = vld [vmem:[%s2224_s1 + $0x2c] ss:$16 sps:$4 sm:$0xff]  }
  0x18   : > { %381 = vmatpush1.bf16.msra.mxu0 %v1660_v2  ;;  %422 = vmatpush1.bf16.msra.mxu1 %v1684_v7  ;;  %v1702_v10 = vld [vmem:[%s2224_s1 + $0x28] ss:$16 sps:$4 sm:$0xff]   ;;  %v1709_v11 = vld [vmem:[%s2224_s1 + $0x40] ss:$16 sps:$4 sm:$0xff]   ;;  %v1715_v12 = vld [vmem:[%s2224_s1 + $0x64] ss:$16 sps:$4 sm:$0xff]  }
  0x19   : > { %382 = vmatprep.subr.bf16.mxu0 %v1668_v4  ;;  %423 = vmatprep.subr.bf16.mxu1 %v1696_v9  ;;  %v1720_v13 = vld [vmem:[%s2224_s1 + $0x4c] ss:$16 sps:$4 sm:$0xff]   ;;  %v1726_v14 = vld [vmem:[%s2224_s1 + $0x48] ss:$16 sps:$4 sm:$0xff]   ;;  %v1733_v15 = vld [vmem:[%s2224_s1 + $0x60] ss:$16 sps:$4 sm:$0xff]  }
  0x1a   : > { %v1738_v16 = vld [vmem:[%s2224_s1 + $0x6c] ss:$16 sps:$4 sm:$0xff]   ;;  %v1744_v17 = vld [vmem:[%s2224_s1 + $0x84] ss:$16 sps:$4 sm:$0xff]   ;;  %v1750_v18 = vld [vmem:[%s2224_s1 + $0x80] ss:$16 sps:$4 sm:$0xff]  }
  0x1b   : > { %v1755_v19 = vld [vmem:[%s2224_s1 + $0x68] ss:$16 sps:$4 sm:$0xff]   ;;  %v1762_v20 = vld [vmem:[%s2224_s1 + $0x8c] ss:$16 sps:$4 sm:$0xff]   ;;  %v1768_v21 = vld [vmem:[%s2224_s1 + $0xa4] ss:$16 sps:$4 sm:$0xff]  }
  0x1c   : > { %383 = vmatpush1.bf16.msra.mxu0 %v1679_v6  ;;  %424 = vmatpush1.bf16.msra.mxu1 %v1702_v10  ;;  %v1774_v22 = vld [vmem:[%s2224_s1 + $0x88] ss:$16 sps:$4 sm:$0xff]   ;;  %v1781_v23 = vld [vmem:[%s2224_s1 + $0xa0] ss:$16 sps:$4 sm:$0xff]   ;;  %v1786_v24 = vld [vmem:[%s2224_s1 + $0xac] ss:$16 sps:$4 sm:$0xff]  }
  0x1d   : > { %384 = vmatprep.subr.bf16.mxu0 %v1690_v8  ;;  %425 = vmatprep.subr.bf16.mxu1 %v1720_v13  ;;  %v1792_v25 = vld [vmem:[%s2224_s1 + $0xc4] ss:$16 sps:$4 sm:$0xff]   ;;  %v1798_v26 = vld [vmem:[%s2224_s1 + $0xa8] ss:$16 sps:$4 sm:$0xff]   ;;  %v1805_v27 = vld [vmem:[%s2224_s1 + $0xc0] ss:$16 sps:$4 sm:$0xff]  }
  0x1e   : > { %v1810_v28 = vld [vmem:[%s2224_s1 + $0xcc] ss:$16 sps:$4 sm:$0xff]   ;;  %v1816_v29 = vld [vmem:[%s2224_s1 + $0xe4] ss:$16 sps:$4 sm:$0xff]   ;;  %v1822_v30 = vld [vmem:[%s2224_s1 + $0xc8] ss:$16 sps:$4 sm:$0xff]  }
  0x1f   : > { %v1829_v31 = vld [vmem:[%s2224_s1 + $0xe0] ss:$16 sps:$4 sm:$0xff]   ;;  %v1834_v33 = vld [vmem:[%s2224_s1 + $0xec] ss:$16 sps:$4 sm:$0xff]   ;;  %v1841_v35 = vld [vmem:[%s2224_s1 + $0xe8] ss:$16 sps:$4 sm:$0xff]  }
  0x20   : > { %385 = vmatpush1.bf16.msra.mxu0 %v1709_v11  ;;  %426 = vmatpush1.bf16.msra.mxu1 %v1726_v14  ;;  %v213_v32 = vld [vmem:[#allocation2] sm:$0xff]  ;;  %v217_v41 = vld [vmem:[%s1647_s17 + $0x10] sm:$0xff]  ;;  %v218_v51 = vld [vmem:[%s1647_s17 + $0x18] sm:$0xff] }
  0x21   : > { %386 = vmatprep.subr.bf16.mxu0 %v1715_v12  ;;  %427 = vmatprep.subr.bf16.mxu1 %v1738_v16  ;;  %v219_v34 = vpack.c.bf16 %v213_v32, %v213_v32  ;;  %v215_v36 = vld [vmem:[%s1647_s17] sm:$0xff]  ;;  %v214_v61 = vld [vmem:[#allocation3] sm:$0xff] }
  0x24   : > { %387 = vmatpush1.bf16.msra.mxu0 %v1733_v15  ;;  %428 = vmatpush1.bf16.msra.mxu1 %v1755_v19 }
  0x25   : > { %388 = vmatprep.subr.bf16.mxu0 %v1744_v17  ;;  %429 = vmatprep.subr.bf16.mxu1 %v1762_v20 }
  0x28   : > { %389 = vmatpush1.bf16.msra.mxu0 %v1750_v18  ;;  %430 = vmatpush1.bf16.msra.mxu1 %v1774_v22 }
  0x29   : > { %390 = vmatprep.subr.bf16.mxu0 %v1768_v21  ;;  %431 = vmatprep.subr.bf16.mxu1 %v1786_v24 }
  0x2c   : > { %391 = vmatpush1.bf16.msra.mxu0 %v1781_v23  ;;  %432 = vmatpush1.bf16.msra.mxu1 %v1798_v26 }
  0x2d   : > { %392 = vmatprep.subr.bf16.mxu0 %v1792_v25  ;;  %433 = vmatprep.subr.bf16.mxu1 %v1810_v28 }
  0x30   : > { %393 = vmatpush1.bf16.msra.mxu0 %v1805_v27  ;;  %434 = vmatpush1.bf16.msra.mxu1 %v1822_v30 }
  0x31   : > { %394 = vmatprep.subr.bf16.mxu0 %v1816_v29  ;;  %435 = vmatprep.subr.bf16.mxu1 %v1834_v33 }
  0x34   : > { %395 = vmatpush1.bf16.msra.mxu0 %v1829_v31  ;;  %436 = vmatpush1.bf16.msra.mxu1 %v1841_v35 }
  0x35   : > { %491 = vmatprep.subr.bf16.mxu0 %v1655_v1  ;;  %532 = vmatprep.subr.bf16.mxu1 %v1674_v5 }
  0x37   : > { %413 = vmatmul.mubr.bf16.vlgmr.msra.gmra.mrb[0].mxu0 %v219_v34  ;;  %454 = vmatmul.mubr.bf16.vlgmr.msra.gmra.mrb[0].mxu1 %v219_v34 }
  0x38   : > { %492 = vmatpush1.bf16.msra.mxu0 %v1660_v2  ;;  %523 = vmatprep.mubr.bf16.mxu0 %v1610_v3 }
  0x39   : > { %493 = vmatprep.subr.bf16.mxu0 %v1668_v4  ;;  %533 = vmatpush1.bf16.msra.mxu1 %v1684_v7 }
  0x3a   : > { %564 = vmatprep.mubr.bf16.mxu1 %v1610_v3  ;;  %534 = vmatprep.subr.bf16.mxu1 %v1696_v9 }
  0x3c   : > { %494 = vmatpush1.bf16.msra.mxu0 %v1679_v6 }
  0x3d   : > { %495 = vmatprep.subr.bf16.mxu0 %v1690_v8  ;;  %535 = vmatpush1.bf16.msra.mxu1 %v1702_v10 }
  0x3e   : > { %536 = vmatprep.subr.bf16.mxu1 %v1720_v13 }
  0x40   : > { %496 = vmatpush1.bf16.msra.mxu0 %v1709_v11 }
  0x41   : > { %497 = vmatprep.subr.bf16.mxu0 %v1715_v12  ;;  %537 = vmatpush1.bf16.msra.mxu1 %v1726_v14 }
  0x42   : > { %538 = vmatprep.subr.bf16.mxu1 %v1738_v16 }
  0x44   : > { %498 = vmatpush1.bf16.msra.mxu0 %v1733_v15 }
  0x45   : > { %499 = vmatprep.subr.bf16.mxu0 %v1744_v17  ;;  %539 = vmatpush1.bf16.msra.mxu1 %v1755_v19 }
  0x46   : > { %540 = vmatprep.subr.bf16.mxu1 %v1762_v20 }
  0x48   : > { %500 = vmatpush1.bf16.msra.mxu0 %v1750_v18 }
  0x49   : > { %501 = vmatprep.subr.bf16.mxu0 %v1768_v21  ;;  %541 = vmatpush1.bf16.msra.mxu1 %v1774_v22 }
  0x4a   : > { %542 = vmatprep.subr.bf16.mxu1 %v1786_v24 }
  0x4c   : > { %502 = vmatpush1.bf16.msra.mxu0 %v1781_v23 }
  0x4d   : > { %503 = vmatprep.subr.bf16.mxu0 %v1792_v25  ;;  %543 = vmatpush1.bf16.msra.mxu1 %v1798_v26 }
  0x4e   : > { %544 = vmatprep.subr.bf16.mxu1 %v1810_v28 }
  0x50   : > { %504 = vmatpush1.bf16.msra.mxu0 %v1805_v27 }
  0x51   : > { %505 = vmatprep.subr.bf16.mxu0 %v1816_v29  ;;  %545 = vmatpush1.bf16.msra.mxu1 %v1822_v30 }
  0x52   : > { %546 = vmatprep.subr.bf16.mxu1 %v1834_v33 }
  0x54   : > { %506 = vmatpush1.bf16.msra.mxu0 %v1829_v31 }
  0x55   : > { %602 = vmatprep.subr.bf16.mxu0 %v1655_v1  ;;  %547 = vmatpush1.bf16.msra.mxu1 %v1841_v35 }
  0x56   : > { %643 = vmatprep.subr.bf16.mxu1 %v1674_v5 }
 0x10a   : > { %v414_v38 = vpop.f32.mrb[0].mxu0  ;;  %v455_v46 = vpop.f32.mrb[0].mxu1 }
 0x10b   : > { %v462_v39 = vadd.f32 %v414_v38, %v215_v36  ;;  %v416_v40 = vpop.f32.mrb[1].mxu0  ;;  %v464_v48 = vadd.f32 %v455_v46, %v217_v41  ;;  %v457_v49 = vpop.f32.mrb[1].mxu1  ;;  %v1376_v41 = vld [vmem:[%s1647_s17 + $0x20] sm:$0xff] }
 0x10c   : > { %v463_v42 = vadd.f32 %v416_v40, %v216_v37  ;;  %v418_v43 = vpop.f32.mrb[2].mxu0  ;;  %v459_v50 = vpop.f32.mrb[2].mxu1  ;;  %v465_v53 = vadd.f32 %v457_v49, %v218_v51 }
 0x10d   : > { %v466_v44 = vmul.f32 0.5, %v462_v39  ;;  %v419_v45 = vpop.f32.mrb[3].mxu0  ;;  %v460_v52 = vpop.f32.mrb[3].mxu1 }
 0x10e   : > { %v470_v47 = vmul.f32 0.5, %v463_v42  ;;  %v475_v54 = vmul.f32 0.5, %v465_v53  ;;  %v1377_v42 = vld [vmem:[%s1647_s17 + $0x28] sm:$0xff] }
 0x10f   : > { %1482 = vtanh.f32 %v466_v44 }
 0x110   : > { %1484 = vtanh.f32 %v470_v47 }
 0x111   : > { %1486 = vtanh.f32 %v464_v48  ;;  %v1378_v48 = vld [vmem:[%s1647_s17 + $0x30] sm:$0xff] }
 0x112   : > { %1488 = vtanh.f32 %v475_v54 }
 0x119   : > { %v1483_v55 = vpop.eup %1482 }
 0x11a   : > { %v1485_v56 = vpop.eup %1484  ;;  %v468_v57 = vadd.f32 1.0, %v1483_v55 }
 0x11b   : > { %v1487_v58 = vpop.eup %1486  ;;  %v472_v59 = vadd.f32 1.0, %v1485_v56 }
 0x11c   : > { %v469_v60 = vmul.f32 0.5, %v468_v57  ;;  %v1489_v34 = vpop.eup %1488  ;;  %v1379_v57 = vld [vmem:[%s1647_s17 + $0x38] sm:$0xff] }
 0x11d   : > { %v473_v62 = vmul.f32 0.5, %v472_v59  ;;  %v477_v36 = vadd.f32 1.0, %v1489_v34 }
 0x11e   : > { %v480_v63 = vmul.f32 %v1487_v58, %v469_v60 }
 0x11f   : > { %v479_v0 = vmul.f32 %v473_v62, %v214_v61  ;;  %v478_v37 = vmul.f32 0.5, %v477_v36 }
 0x121   : > { %v1886_v32 = vadd.f32 %v480_v63, %v479_v0 }
 0x123   : > { %1490 = vtanh.f32 %v1886_v32 }
 0x12d   : > { %v1491_v38 = vpop.eup %1490 }
 0x12e   : > { %v1889_v39 = vmul.f32 %v1491_v38, %v478_v37 }
 0x130   : > { %v490_v40 = vpack.c.bf16 %v1889_v39, %v1889_v39 }
 0x132   : > { %524 = vmatmul.mubr.bf16.vlgmr.msra.gmra.mrb[4].mxu0 %v490_v40  ;;  %565 = vmatmul.mubr.bf16.vlgmr.msra.gmra.mrb[4].mxu1 %v490_v40 }
 0x133   : > { %603 = vmatpush1.bf16.msra.mxu0 %v1660_v2  ;;  %644 = vmatpush1.bf16.msra.mxu1 %v1684_v7 }
 0x134   : > { %604 = vmatprep.subr.bf16.mxu0 %v1668_v4  ;;  %645 = vmatprep.subr.bf16.mxu1 %v1696_v9 }
 0x135   : > { %634 = vmatprep.mubr.bf16.mxu0 %v1610_v3  ;;  %675 = vmatprep.mubr.bf16.mxu1 %v1610_v3 }
 0x137   : > { %605 = vmatpush1.bf16.msra.mxu0 %v1679_v6  ;;  %646 = vmatpush1.bf16.msra.mxu1 %v1702_v10 }
 0x138   : > { %606 = vmatprep.subr.bf16.mxu0 %v1690_v8  ;;  %647 = vmatprep.subr.bf16.mxu1 %v1720_v13 }
 0x13b   : > { %607 = vmatpush1.bf16.msra.mxu0 %v1709_v11  ;;  %648 = vmatpush1.bf16.msra.mxu1 %v1726_v14 }
 0x13c   : > { %608 = vmatprep.subr.bf16.mxu0 %v1715_v12  ;;  %649 = vmatprep.subr.bf16.mxu1 %v1738_v16 }
 0x13f   : > { %609 = vmatpush1.bf16.msra.mxu0 %v1733_v15  ;;  %650 = vmatpush1.bf16.msra.mxu1 %v1755_v19 }
 0x140   : > { %610 = vmatprep.subr.bf16.mxu0 %v1744_v17  ;;  %651 = vmatprep.subr.bf16.mxu1 %v1762_v20 }
 0x143   : > { %611 = vmatpush1.bf16.msra.mxu0 %v1750_v18  ;;  %652 = vmatpush1.bf16.msra.mxu1 %v1774_v22 }
 0x144   : > { %612 = vmatprep.subr.bf16.mxu0 %v1768_v21  ;;  %653 = vmatprep.subr.bf16.mxu1 %v1786_v24 }
 0x147   : > { %613 = vmatpush1.bf16.msra.mxu0 %v1781_v23  ;;  %654 = vmatpush1.bf16.msra.mxu1 %v1798_v26 }
 0x148   : > { %614 = vmatprep.subr.bf16.mxu0 %v1792_v25  ;;  %655 = vmatprep.subr.bf16.mxu1 %v1810_v28 }
 0x14b   : > { %615 = vmatpush1.bf16.msra.mxu0 %v1805_v27  ;;  %656 = vmatpush1.bf16.msra.mxu1 %v1822_v30 }
 0x14c   : > { %616 = vmatprep.subr.bf16.mxu0 %v1816_v29  ;;  %657 = vmatprep.subr.bf16.mxu1 %v1834_v33 }
 0x14f   : > { %617 = vmatpush1.bf16.msra.mxu0 %v1829_v31  ;;  %658 = vmatpush1.bf16.msra.mxu1 %v1841_v35 }
 0x150   : > { %713 = vmatprep.subr.bf16.mxu0 %v1655_v1  ;;  %754 = vmatprep.subr.bf16.mxu1 %v1674_v5 }
 0x205   : > { %v525_v43 = vpop.f32.mrb[4].mxu0  ;;  %v566_v44 = vpop.f32.mrb[4].mxu1 }
 0x206   : > { %v573_v45 = vadd.f32 %v1376_v41, %v525_v43  ;;  %v527_v46 = vpop.f32.mrb[5].mxu0  ;;  %v568_v47 = vpop.f32.mrb[5].mxu1  ;;  %v575_v56 = vadd.f32 %v1378_v48, %v566_v44 }
 0x207   : > { %v574_v49 = vadd.f32 %v1377_v42, %v527_v46  ;;  %v529_v50 = vpop.f32.mrb[6].mxu0  ;;  %v570_v51 = vpop.f32.mrb[6].mxu1  ;;  %v576_v58 = vadd.f32 %v1379_v57, %v568_v47  ;;  %v1381_v47 = vld [vmem:[%s1647_s17 + $0x48] sm:$0xff] }
 0x208   : > { %v577_v52 = vmul.f32 0.5, %v573_v45  ;;  %v530_v53 = vpop.f32.mrb[7].mxu0  ;;  %v571_v54 = vpop.f32.mrb[7].mxu1 }
 0x209   : > { %v581_v55 = vmul.f32 0.5, %v574_v49  ;;  %v586_v59 = vmul.f32 0.5, %v576_v58  ;;  %v1382_v53 = vld [vmem:[%s1647_s17 + $0x50] sm:$0xff] }
 0x20a   : > { %1492 = vtanh.f32 %v577_v52 }
 0x20b   : > { %1494 = vtanh.f32 %v581_v55 }
 0x20c   : > { %1496 = vtanh.f32 %v575_v56 }
 0x20d   : > { %1498 = vtanh.f32 %v586_v59 }
 0x214   : > { %v1493_v60 = vpop.eup %1492 }
 0x215   : > { %v1495_v61 = vpop.eup %1494  ;;  %v579_v62 = vadd.f32 1.0, %v1493_v60 }
 0x216   : > { %v583_v63 = vadd.f32 1.0, %v1495_v61  ;;  %v1497_v34 = vpop.eup %1496 }
 0x217   : > { %v580_v0 = vmul.f32 0.5, %v579_v62  ;;  %v1499_v41 = vpop.eup %1498  ;;  %v1383_v62 = vld [vmem:[%s1647_s17 + $0x58] sm:$0xff] }
 0x218   : > { %v584_v36 = vmul.f32 0.5, %v583_v63  ;;  %v588_v42 = vadd.f32 1.0, %v1499_v41 }
 0x219   : > { %v591_v37 = vmul.f32 %v1497_v34, %v580_v0 }
 0x21a   : > { %v590_v38 = vmul.f32 %v584_v36, %v1886_v32  ;;  %v589_v43 = vmul.f32 0.5, %v588_v42  ;;  %v1380_v32 = vld [vmem:[%s1647_s17 + $0x40] sm:$0xff] }
 0x21c   : > { %v1932_v40 = vadd.f32 %v591_v37, %v590_v38 }
 0x21e   : > { %1500 = vtanh.f32 %v1932_v40 }
 0x228   : > { %v1501_v44 = vpop.eup %1500 }
 0x229   : > { %v1935_v45 = vmul.f32 %v1501_v44, %v589_v43 }
 0x22b   : > { %v601_v46 = vpack.c.bf16 %v1935_v45, %v1935_v45 }
 0x22d   : > { %635 = vmatmul.mubr.bf16.vlgmr.msra.gmra.mrb[8].mxu0 %v601_v46  ;;  %676 = vmatmul.mubr.bf16.vlgmr.msra.gmra.mrb[8].mxu1 %v601_v46 }
 0x22e   : > { %714 = vmatpush1.bf16.msra.mxu0 %v1660_v2  ;;  %755 = vmatpush1.bf16.msra.mxu1 %v1684_v7 }
 0x22f   : > { %715 = vmatprep.subr.bf16.mxu0 %v1668_v4  ;;  %756 = vmatprep.subr.bf16.mxu1 %v1696_v9 }
 0x230   : > { %745 = vmatprep.mubr.bf16.mxu0 %v1610_v3  ;;  %786 = vmatprep.mubr.bf16.mxu1 %v1610_v3 }
 0x232   : > { %716 = vmatpush1.bf16.msra.mxu0 %v1679_v6  ;;  %757 = vmatpush1.bf16.msra.mxu1 %v1702_v10 }
 0x233   : > { %717 = vmatprep.subr.bf16.mxu0 %v1690_v8  ;;  %758 = vmatprep.subr.bf16.mxu1 %v1720_v13 }
 0x236   : > { %718 = vmatpush1.bf16.msra.mxu0 %v1709_v11  ;;  %759 = vmatpush1.bf16.msra.mxu1 %v1726_v14 }
 0x237   : > { %719 = vmatprep.subr.bf16.mxu0 %v1715_v12  ;;  %760 = vmatprep.subr.bf16.mxu1 %v1738_v16 }
 0x23a   : > { %720 = vmatpush1.bf16.msra.mxu0 %v1733_v15  ;;  %761 = vmatpush1.bf16.msra.mxu1 %v1755_v19 }
 0x23b   : > { %721 = vmatprep.subr.bf16.mxu0 %v1744_v17  ;;  %762 = vmatprep.subr.bf16.mxu1 %v1762_v20 }
 0x23e   : > { %722 = vmatpush1.bf16.msra.mxu0 %v1750_v18  ;;  %763 = vmatpush1.bf16.msra.mxu1 %v1774_v22 }
 0x23f   : > { %723 = vmatprep.subr.bf16.mxu0 %v1768_v21  ;;  %764 = vmatprep.subr.bf16.mxu1 %v1786_v24 }
 0x242   : > { %724 = vmatpush1.bf16.msra.mxu0 %v1781_v23  ;;  %765 = vmatpush1.bf16.msra.mxu1 %v1798_v26 }
 0x243   : > { %725 = vmatprep.subr.bf16.mxu0 %v1792_v25  ;;  %766 = vmatprep.subr.bf16.mxu1 %v1810_v28 }
 0x246   : > { %726 = vmatpush1.bf16.msra.mxu0 %v1805_v27  ;;  %767 = vmatpush1.bf16.msra.mxu1 %v1822_v30 }
 0x247   : > { %727 = vmatprep.subr.bf16.mxu0 %v1816_v29  ;;  %768 = vmatprep.subr.bf16.mxu1 %v1834_v33 }
 0x24a   : > { %728 = vmatpush1.bf16.msra.mxu0 %v1829_v31  ;;  %769 = vmatpush1.bf16.msra.mxu1 %v1841_v35 }
 0x24b   : > { %824 = vmatprep.subr.bf16.mxu0 %v1655_v1  ;;  %865 = vmatprep.subr.bf16.mxu1 %v1674_v5 }
 0x300   : > { %v636_v48 = vpop.f32.mrb[8].mxu0  ;;  %v677_v49 = vpop.f32.mrb[8].mxu1 }
 0x301   : > { %v684_v50 = vadd.f32 %v1380_v32, %v636_v48  ;;  %v638_v51 = vpop.f32.mrb[9].mxu0  ;;  %v679_v52 = vpop.f32.mrb[9].mxu1  ;;  %v686_v61 = vadd.f32 %v1382_v53, %v677_v49 }
 0x302   : > { %v685_v54 = vadd.f32 %v1381_v47, %v638_v51  ;;  %v640_v55 = vpop.f32.mrb[10].mxu0  ;;  %v681_v56 = vpop.f32.mrb[10].mxu1  ;;  %v687_v63 = vadd.f32 %v1383_v62, %v679_v52  ;;  %v595_v51 = vadd.f32 %v1935_v45, %v1889_v39  ;;  %v1384_v39 = vld [vmem:[%s1647_s17 + $0x60] sm:$0xff] }
 0x303   : > { %v688_v57 = vmul.f32 0.5, %v684_v50  ;;  %v641_v58 = vpop.f32.mrb[11].mxu0  ;;  %v682_v59 = vpop.f32.mrb[11].mxu1 }
 0x304   : > { %v692_v60 = vmul.f32 0.5, %v685_v54  ;;  %v697_v0 = vmul.f32 0.5, %v687_v63  ;;  %v1386_v59 = vld [vmem:[%s1647_s17 + $0x70] sm:$0xff] }
 0x305   : > { %1502 = vtanh.f32 %v688_v57 }
 0x306   : > { %1504 = vtanh.f32 %v692_v60 }
 0x307   : > { %1506 = vtanh.f32 %v686_v61 }
 0x308   : > { %1508 = vtanh.f32 %v697_v0 }
 0x30f   : > { %v1503_v34 = vpop.eup %1502 }
 0x310   : > { %v1505_v36 = vpop.eup %1504  ;;  %v690_v37 = vadd.f32 1.0, %v1503_v34 }
 0x311   : > { %v694_v38 = vadd.f32 1.0, %v1505_v36  ;;  %v1507_v42 = vpop.eup %1506 }
 0x312   : > { %v691_v41 = vmul.f32 0.5, %v690_v37  ;;  %v1509_v47 = vpop.eup %1508 }
 0x313   : > { %v695_v43 = vmul.f32 0.5, %v694_v38  ;;  %v699_v48 = vadd.f32 1.0, %v1509_v47  ;;  %v1387_v38 = vld [vmem:[%s1647_s17 + $0x78] sm:$0xff] }
 0x314   : > { %v702_v44 = vmul.f32 %v1507_v42, %v691_v41 }
 0x315   : > { %v701_v46 = vmul.f32 %v695_v43, %v1932_v40  ;;  %v700_v49 = vmul.f32 0.5, %v699_v48  ;;  %v1385_v40 = vld [vmem:[%s1647_s17 + $0x68] sm:$0xff] }
 0x317   : > { %v1978_v32 = vadd.f32 %v702_v44, %v701_v46 }
 0x319   : > { %1510 = vtanh.f32 %v1978_v32 }
 0x323   : > { %v1511_v50 = vpop.eup %1510 }
 0x324   : > { %v705_v52 = vmul.f32 %v1511_v50, %v700_v49 }
 0x326   : > { %v1983_v53 = vadd.f32 %v705_v52, %v595_v51  ;;  %v712_v54 = vpack.c.bf16 %v705_v52, %v705_v52 }
 0x328   : > { %746 = vmatmul.mubr.bf16.vlgmr.msra.gmra.mrb[12].mxu0 %v712_v54  ;;  %787 = vmatmul.mubr.bf16.vlgmr.msra.gmra.mrb[12].mxu1 %v712_v54 }
 0x329   : > { %825 = vmatpush1.bf16.msra.mxu0 %v1660_v2  ;;  %866 = vmatpush1.bf16.msra.mxu1 %v1684_v7 }
 0x32a   : > { %826 = vmatprep.subr.bf16.mxu0 %v1668_v4  ;;  %867 = vmatprep.subr.bf16.mxu1 %v1696_v9 }
 0x32b   : > { %856 = vmatprep.mubr.bf16.mxu0 %v1610_v3  ;;  %897 = vmatprep.mubr.bf16.mxu1 %v1610_v3 }
 0x32d   : > { %827 = vmatpush1.bf16.msra.mxu0 %v1679_v6  ;;  %868 = vmatpush1.bf16.msra.mxu1 %v1702_v10 }
 0x32e   : > { %828 = vmatprep.subr.bf16.mxu0 %v1690_v8  ;;  %869 = vmatprep.subr.bf16.mxu1 %v1720_v13 }
 0x331   : > { %829 = vmatpush1.bf16.msra.mxu0 %v1709_v11  ;;  %870 = vmatpush1.bf16.msra.mxu1 %v1726_v14 }
 0x332   : > { %830 = vmatprep.subr.bf16.mxu0 %v1715_v12  ;;  %871 = vmatprep.subr.bf16.mxu1 %v1738_v16 }
 0x335   : > { %831 = vmatpush1.bf16.msra.mxu0 %v1733_v15  ;;  %872 = vmatpush1.bf16.msra.mxu1 %v1755_v19 }
 0x336   : > { %832 = vmatprep.subr.bf16.mxu0 %v1744_v17  ;;  %873 = vmatprep.subr.bf16.mxu1 %v1762_v20 }
 0x339   : > { %833 = vmatpush1.bf16.msra.mxu0 %v1750_v18  ;;  %874 = vmatpush1.bf16.msra.mxu1 %v1774_v22 }
 0x33a   : > { %834 = vmatprep.subr.bf16.mxu0 %v1768_v21  ;;  %875 = vmatprep.subr.bf16.mxu1 %v1786_v24 }
 0x33d   : > { %835 = vmatpush1.bf16.msra.mxu0 %v1781_v23  ;;  %876 = vmatpush1.bf16.msra.mxu1 %v1798_v26 }
 0x33e   : > { %836 = vmatprep.subr.bf16.mxu0 %v1792_v25  ;;  %877 = vmatprep.subr.bf16.mxu1 %v1810_v28 }
 0x341   : > { %837 = vmatpush1.bf16.msra.mxu0 %v1805_v27  ;;  %878 = vmatpush1.bf16.msra.mxu1 %v1822_v30 }
 0x342   : > { %838 = vmatprep.subr.bf16.mxu0 %v1816_v29  ;;  %879 = vmatprep.subr.bf16.mxu1 %v1834_v33 }
 0x345   : > { %839 = vmatpush1.bf16.msra.mxu0 %v1829_v31  ;;  %880 = vmatpush1.bf16.msra.mxu1 %v1841_v35 }
 0x346   : > { %935 = vmatprep.subr.bf16.mxu0 %v1655_v1  ;;  %976 = vmatprep.subr.bf16.mxu1 %v1674_v5 }
 0x3fb   : > { %v747_v45 = vpop.f32.mrb[12].mxu0  ;;  %v788_v55 = vpop.f32.mrb[12].mxu1 }
 0x3fc   : > { %v795_v56 = vadd.f32 %v1384_v39, %v747_v45  ;;  %v749_v57 = vpop.f32.mrb[13].mxu0  ;;  %v790_v58 = vpop.f32.mrb[13].mxu1  ;;  %v797_v37 = vadd.f32 %v1386_v59, %v788_v55 }
 0x3fd   : > { %v796_v60 = vadd.f32 %v1385_v40, %v749_v57  ;;  %v751_v61 = vpop.f32.mrb[14].mxu0  ;;  %v792_v62 = vpop.f32.mrb[14].mxu1  ;;  %v798_v41 = vadd.f32 %v1387_v38, %v790_v58 }
 0x3fe   : > { %v799_v63 = vmul.f32 0.5, %v795_v56  ;;  %v752_v0 = vpop.f32.mrb[15].mxu0  ;;  %v793_v34 = vpop.f32.mrb[15].mxu1 }
 0x3ff   : > { %v803_v36 = vmul.f32 0.5, %v796_v60  ;;  %v808_v42 = vmul.f32 0.5, %v798_v41  ;;  %v1390_v0 = vld [vmem:[%s1647_s17 + $0x90] sm:$0xff] }
 0x400   : > { %1512 = vtanh.f32 %v799_v63 }
 0x401   : > { %1514 = vtanh.f32 %v803_v36 }
 0x402   : > { %1516 = vtanh.f32 %v797_v37 }
 0x403   : > { %1518 = vtanh.f32 %v808_v42 }
 0x40a   : > { %v1513_v43 = vpop.eup %1512 }
 0x40b   : > { %v1515_v44 = vpop.eup %1514  ;;  %v801_v46 = vadd.f32 1.0, %v1513_v43 }
 0x40c   : > { %v805_v47 = vadd.f32 1.0, %v1515_v44  ;;  %v1517_v49 = vpop.eup %1516  ;;  %v1391_v44 = vld [vmem:[%s1647_s17 + $0x98] sm:$0xff] }
 0x40d   : > { %v802_v48 = vmul.f32 0.5, %v801_v46  ;;  %v1519_v39 = vpop.eup %1518 }
 0x40e   : > { %v806_v50 = vmul.f32 0.5, %v805_v47  ;;  %v810_v40 = vadd.f32 1.0, %v1519_v39 }
 0x40f   : > { %v813_v51 = vmul.f32 %v1517_v49, %v802_v48 }
 0x410   : > { %v812_v52 = vmul.f32 %v806_v50, %v1978_v32  ;;  %v811_v45 = vmul.f32 0.5, %v810_v40  ;;  %v1388_v32 = vld [vmem:[%s1647_s17 + $0x80] sm:$0xff] }
 0x412   : > { %v2024_v54 = vadd.f32 %v813_v51, %v812_v52 }
 0x414   : > { %1520 = vtanh.f32 %v2024_v54 }
 0x41e   : > { %v1521_v55 = vpop.eup %1520 }
 0x41f   : > { %v816_v56 = vmul.f32 %v1521_v55, %v811_v45 }
 0x421   : > { %v2028_v57 = vadd.f32 %v816_v56, %v1983_v53  ;;  %v823_v58 = vpack.c.bf16 %v816_v56, %v816_v56  ;;  %v1389_v53 = vld [vmem:[%s1647_s17 + $0x88] sm:$0xff] }
 0x423   : > { %857 = vmatmul.mubr.bf16.vlgmr.msra.gmra.mrb[16].mxu0 %v823_v58  ;;  %898 = vmatmul.mubr.bf16.vlgmr.msra.gmra.mrb[16].mxu1 %v823_v58 }
 0x424   : > { %936 = vmatpush1.bf16.msra.mxu0 %v1660_v2  ;;  %977 = vmatpush1.bf16.msra.mxu1 %v1684_v7 }
 0x425   : > { %937 = vmatprep.subr.bf16.mxu0 %v1668_v4  ;;  %978 = vmatprep.subr.bf16.mxu1 %v1696_v9 }
 0x426   : > { %967 = vmatprep.mubr.bf16.mxu0 %v1610_v3  ;;  %1008 = vmatprep.mubr.bf16.mxu1 %v1610_v3 }
 0x428   : > { %938 = vmatpush1.bf16.msra.mxu0 %v1679_v6  ;;  %979 = vmatpush1.bf16.msra.mxu1 %v1702_v10 }
 0x429   : > { %939 = vmatprep.subr.bf16.mxu0 %v1690_v8  ;;  %980 = vmatprep.subr.bf16.mxu1 %v1720_v13 }
 0x42c   : > { %940 = vmatpush1.bf16.msra.mxu0 %v1709_v11  ;;  %981 = vmatpush1.bf16.msra.mxu1 %v1726_v14 }
 0x42d   : > { %941 = vmatprep.subr.bf16.mxu0 %v1715_v12  ;;  %982 = vmatprep.subr.bf16.mxu1 %v1738_v16 }
 0x430   : > { %942 = vmatpush1.bf16.msra.mxu0 %v1733_v15  ;;  %983 = vmatpush1.bf16.msra.mxu1 %v1755_v19 }
 0x431   : > { %943 = vmatprep.subr.bf16.mxu0 %v1744_v17  ;;  %984 = vmatprep.subr.bf16.mxu1 %v1762_v20 }
 0x434   : > { %944 = vmatpush1.bf16.msra.mxu0 %v1750_v18  ;;  %985 = vmatpush1.bf16.msra.mxu1 %v1774_v22 }
 0x435   : > { %945 = vmatprep.subr.bf16.mxu0 %v1768_v21  ;;  %986 = vmatprep.subr.bf16.mxu1 %v1786_v24 }
 0x438   : > { %946 = vmatpush1.bf16.msra.mxu0 %v1781_v23  ;;  %987 = vmatpush1.bf16.msra.mxu1 %v1798_v26 }
 0x439   : > { %947 = vmatprep.subr.bf16.mxu0 %v1792_v25  ;;  %988 = vmatprep.subr.bf16.mxu1 %v1810_v28 }
 0x43c   : > { %948 = vmatpush1.bf16.msra.mxu0 %v1805_v27  ;;  %989 = vmatpush1.bf16.msra.mxu1 %v1822_v30 }
 0x43d   : > { %949 = vmatprep.subr.bf16.mxu0 %v1816_v29  ;;  %990 = vmatprep.subr.bf16.mxu1 %v1834_v33 }
 0x440   : > { %950 = vmatpush1.bf16.msra.mxu0 %v1829_v31  ;;  %991 = vmatpush1.bf16.msra.mxu1 %v1841_v35 }
 0x441   : > { %1046 = vmatprep.subr.bf16.mxu0 %v1655_v1  ;;  %1087 = vmatprep.subr.bf16.mxu1 %v1674_v5 }
 0x4f6   : > { %v858_v59 = vpop.f32.mrb[16].mxu0  ;;  %v899_v60 = vpop.f32.mrb[16].mxu1 }
 0x4f7   : > { %v906_v61 = vadd.f32 %v1388_v32, %v858_v59  ;;  %v860_v62 = vpop.f32.mrb[17].mxu0  ;;  %v901_v63 = vpop.f32.mrb[17].mxu1  ;;  %v908_v1 = vadd.f32 %v1390_v0, %v899_v60 }
 0x4f8   : > { %v907_v34 = vadd.f32 %v1389_v53, %v860_v62  ;;  %v862_v36 = vpop.f32.mrb[18].mxu0  ;;  %v903_v37 = vpop.f32.mrb[18].mxu1  ;;  %v909_v46 = vadd.f32 %v1391_v44, %v901_v63 }
 0x4f9   : > { %v910_v38 = vmul.f32 0.5, %v906_v61  ;;  %v863_v41 = vpop.f32.mrb[19].mxu0  ;;  %v904_v42 = vpop.f32.mrb[19].mxu1 }
 0x4fa   : > { %v914_v43 = vmul.f32 0.5, %v907_v34  ;;  %v919_v47 = vmul.f32 0.5, %v909_v46 }
 0x4fb   : > { %1522 = vtanh.f32 %v910_v38 }
 0x4fc   : > { %1524 = vtanh.f32 %v914_v43 }
 0x4fd   : > { %1526 = vtanh.f32 %v908_v1 }
 0x4fe   : > { %1528 = vtanh.f32 %v919_v47  ;;  %v1563_v47 = vld [vmem:[%s2224_s1] ss:$16 sps:$4 sm:$0xff]  }
 0x505   : > { %v1523_v48 = vpop.eup %1522 }
 0x506   : > { %v1525_v49 = vpop.eup %1524  ;;  %v912_v50 = vadd.f32 1.0, %v1523_v48  ;;  %v1564_v48 = vld [vmem:[%s2224_s1 + $0x8] ss:$16 sps:$4 sm:$0xff]  }
 0x507   : > { %v916_v51 = vadd.f32 1.0, %v1525_v49  ;;  %v1527_v39 = vpop.eup %1526  ;;  %v1565_v49 = vld [vmem:[%s2224_s1 + $0x24] ss:$16 sps:$4 sm:$0xff]  }
 0x508   : > { %v913_v52 = vmul.f32 0.5, %v912_v50  ;;  %v1529_v58 = vpop.eup %1528  ;;  %v1566_v50 = vld [vmem:[%s2224_s1 + $0x2c] ss:$16 sps:$4 sm:$0xff]  }
 0x509   : > { %v917_v40 = vmul.f32 0.5, %v916_v51  ;;  %v921_v32 = vadd.f32 1.0, %v1529_v58  ;;  %v1567_v51 = vld [vmem:[%s2224_s1 + $0x20] ss:$16 sps:$4 sm:$0xff]  }
 0x50a   : > { %v924_v45 = vmul.f32 %v1527_v39, %v913_v52  ;;  %v1568_v52 = vld [vmem:[%s2224_s1 + $0x28] ss:$16 sps:$4 sm:$0xff]   ;;  %v1569_v39 = vld [vmem:[%s2224_s1 + $0x44] ss:$16 sps:$4 sm:$0xff]   ;;  %v1575_v58 = vld [vmem:[%s2224_s1 + $0x60] ss:$16 sps:$4 sm:$0xff]  }
 0x50b   : > { %v923_v55 = vmul.f32 %v917_v40, %v2024_v54  ;;  %v922_v53 = vmul.f32 0.5, %v921_v32  ;;  %v1570_v40 = vld [vmem:[%s2224_s1 + $0x4c] ss:$16 sps:$4 sm:$0xff]   ;;  %v1576_v32 = vld [vmem:[%s2224_s1 + $0x68] ss:$16 sps:$4 sm:$0xff]  }
 0x50d   : > { %v2069_v56 = vadd.f32 %v924_v45, %v923_v55  ;;  %v1572_v45 = vld [vmem:[%s2224_s1 + $0x48] ss:$16 sps:$4 sm:$0xff]   ;;  %v1573_v55 = vld [vmem:[%s2224_s1 + $0x64] ss:$16 sps:$4 sm:$0xff]  }
 0x50f   : > { %1530 = vtanh.f32 %v2069_v56 }
 0x519   : > { %v1531_v59 = vpop.eup %1530 }
 0x51a   : > { %v927_v60 = vmul.f32 %v1531_v59, %v922_v53  ;;  %v1577_v53 = vld [vmem:[%s2224_s1 + $0x84] ss:$16 sps:$4 sm:$0xff]   ;;  %v1578_v59 = vld [vmem:[%s2224_s1 + $0x8c] ss:$16 sps:$4 sm:$0xff]  }
 0x51c   : > { %v2073_v61 = vadd.f32 %v927_v60, %v2028_v57  ;;  %v934_v62 = vpack.c.bf16 %v927_v60, %v927_v60  ;;  %v1579_v60 = vld [vmem:[%s2224_s1 + $0x80] ss:$16 sps:$4 sm:$0xff]  }
 0x51e   : > { %968 = vmatmul.mubr.bf16.vlgmr.msra.gmra.mrb[20].mxu0 %v934_v62  ;;  %1009 = vmatmul.mubr.bf16.vlgmr.msra.gmra.mrb[20].mxu1 %v934_v62  ;;  %v1581_v62 = vld [vmem:[%s2224_s1 + $0xa4] ss:$16 sps:$4 sm:$0xff]  }
 0x51f   : > { %1047 = vmatpush1.bf16.msra.mxu0 %v1660_v2  ;;  %1088 = vmatpush1.bf16.msra.mxu1 %v1684_v7  ;;  %v1562_v2 = vld [vmem:[%s2224_s1 + $0x4] ss:$16 sps:$4 sm:$0xff]  }
 0x520   : > { %1048 = vmatprep.subr.bf16.mxu0 %v1668_v4  ;;  %1089 = vmatprep.subr.bf16.mxu1 %v1696_v9  ;;  %v1392_v4 = vld [vmem:[%s1647_s17 + $0xa0] sm:$0xff] }
 0x521   : > { %1078 = vmatprep.mubr.bf16.mxu0 %v1610_v3  ;;  %1119 = vmatprep.mubr.bf16.mxu1 %v1610_v3 }
 0x523   : > { %1049 = vmatpush1.bf16.msra.mxu0 %v1679_v6  ;;  %1090 = vmatpush1.bf16.msra.mxu1 %v1702_v10  ;;  %v1393_v6 = vld [vmem:[%s1647_s17 + $0xa8] sm:$0xff] }
 0x524   : > { %1050 = vmatprep.subr.bf16.mxu0 %v1690_v8  ;;  %1091 = vmatprep.subr.bf16.mxu1 %v1720_v13 }
 0x527   : > { %1051 = vmatpush1.bf16.msra.mxu0 %v1709_v11  ;;  %1092 = vmatpush1.bf16.msra.mxu1 %v1726_v14 }
 0x528   : > { %1052 = vmatprep.subr.bf16.mxu0 %v1715_v12  ;;  %1093 = vmatprep.subr.bf16.mxu1 %v1738_v16  ;;  %v1394_v12 = vld [vmem:[%s1647_s17 + $0xb0] sm:$0xff] }
 0x52b   : > { %1053 = vmatpush1.bf16.msra.mxu0 %v1733_v15  ;;  %1094 = vmatpush1.bf16.msra.mxu1 %v1755_v19 }
 0x52c   : > { %1054 = vmatprep.subr.bf16.mxu0 %v1744_v17  ;;  %1095 = vmatprep.subr.bf16.mxu1 %v1762_v20 }
 0x52f   : > { %1055 = vmatpush1.bf16.msra.mxu0 %v1750_v18  ;;  %1096 = vmatpush1.bf16.msra.mxu1 %v1774_v22 }
 0x530   : > { %1056 = vmatprep.subr.bf16.mxu0 %v1768_v21  ;;  %1097 = vmatprep.subr.bf16.mxu1 %v1786_v24 }
 0x533   : > { %1057 = vmatpush1.bf16.msra.mxu0 %v1781_v23  ;;  %1098 = vmatpush1.bf16.msra.mxu1 %v1798_v26 }
 0x534   : > { %1058 = vmatprep.subr.bf16.mxu0 %v1792_v25  ;;  %1099 = vmatprep.subr.bf16.mxu1 %v1810_v28 }
 0x537   : > { %1059 = vmatpush1.bf16.msra.mxu0 %v1805_v27  ;;  %1100 = vmatpush1.bf16.msra.mxu1 %v1822_v30 }
 0x538   : > { %1060 = vmatprep.subr.bf16.mxu0 %v1816_v29  ;;  %1101 = vmatprep.subr.bf16.mxu1 %v1834_v33 }
 0x53b   : > { %1061 = vmatpush1.bf16.msra.mxu0 %v1829_v31  ;;  %1102 = vmatpush1.bf16.msra.mxu1 %v1841_v35 }
 0x53c   : > { %1157 = vmatprep.subr.bf16.mxu0 %v1562_v2  ;;  %1198 = vmatprep.subr.bf16.mxu1 %v1674_v5  ;;  %v1395_v5 = vld [vmem:[%s1647_s17 + $0xb8] sm:$0xff] }
 0x53d   : > { %v1582_v2 = vld [vmem:[%s2224_s1 + $0xac] ss:$16 sps:$4 sm:$0xff]  }
 0x5f1   : > { %v969_v7 = vpop.f32.mrb[20].mxu0  ;;  %v1010_v8 = vpop.f32.mrb[20].mxu1 }
 0x5f2   : > { %v1017_v9 = vadd.f32 %v1392_v4, %v969_v7  ;;  %v971_v10 = vpop.f32.mrb[21].mxu0  ;;  %v1012_v11 = vpop.f32.mrb[21].mxu1  ;;  %v1019_v20 = vadd.f32 %v1394_v12, %v1010_v8  ;;  %v1583_v4 = vld [vmem:[%s2224_s1 + $0xa0] ss:$16 sps:$4 sm:$0xff]   ;;  %v1397_v7 = vld [vmem:[%s1647_s17 + $0xc8] sm:$0xff] }
 0x5f3   : > { %v1018_v13 = vadd.f32 %v1393_v6, %v971_v10  ;;  %v973_v14 = vpop.f32.mrb[22].mxu0  ;;  %v1014_v15 = vpop.f32.mrb[22].mxu1  ;;  %v1020_v21 = vadd.f32 %v1395_v5, %v1012_v11  ;;  %v1584_v6 = vld [vmem:[%s2224_s1 + $0xc4] ss:$16 sps:$4 sm:$0xff]  }
 0x5f4   : > { %v1021_v16 = vmul.f32 0.5, %v1017_v9  ;;  %v974_v17 = vpop.f32.mrb[23].mxu0  ;;  %v1015_v18 = vpop.f32.mrb[23].mxu1  ;;  %v1398_v12 = vld [vmem:[%s1647_s17 + $0xd0] sm:$0xff] }
 0x5f5   : > { %v1025_v19 = vmul.f32 0.5, %v1018_v13  ;;  %v1030_v22 = vmul.f32 0.5, %v1020_v21 }
 0x5f6   : > { %1532 = vtanh.f32 %v1021_v16 }
 0x5f7   : > { %1534 = vtanh.f32 %v1025_v19 }
 0x5f8   : > { %1536 = vtanh.f32 %v1019_v20 }
 0x5f9   : > { %1538 = vtanh.f32 %v1030_v22 }
 0x600   : > { %v1533_v23 = vpop.eup %1532 }
 0x601   : > { %v1535_v24 = vpop.eup %1534  ;;  %v1023_v25 = vadd.f32 1.0, %v1533_v23 }
 0x602   : > { %v1027_v54 = vadd.f32 1.0, %v1535_v24  ;;  %v1537_v63 = vpop.eup %1536 }
 0x603   : > { %v1024_v57 = vmul.f32 0.5, %v1023_v25  ;;  %v1539_v38 = vpop.eup %1538 }
 0x604   : > { %v1028_v0 = vmul.f32 0.5, %v1027_v54  ;;  %v1032_v41 = vadd.f32 1.0, %v1539_v38 }
 0x605   : > { %v1035_v34 = vmul.f32 %v1537_v63, %v1024_v57 }
 0x606   : > { %v1034_v36 = vmul.f32 %v1028_v0, %v2069_v56  ;;  %v1033_v42 = vmul.f32 0.5, %v1032_v41  ;;  %v1574_v56 = vld [vmem:[%s2224_s1 + $0x6c] ss:$16 sps:$4 sm:$0xff]  }
 0x608   : > { %v2116_v37 = vadd.f32 %v1035_v34, %v1034_v36 }
 0x60a   : > { %1540 = vtanh.f32 %v2116_v37 }
 0x614   : > { %v1541_v43 = vpop.eup %1540 }
 0x615   : > { %v1038_v1 = vmul.f32 %v1541_v43, %v1033_v42  ;;  %v1400_v42 = vld [vmem:[%s1647_s17 + $0xe0] sm:$0xff]  ;;  %v1401_v43 = vld [vmem:[%s1647_s17 + $0xe8] sm:$0xff] }
 0x617   : > { %v2120_v44 = vadd.f32 %v1038_v1, %v2073_v61  ;;  %v1045_v46 = vpack.c.bf16 %v1038_v1, %v1038_v1  ;;  %v1580_v61 = vld [vmem:[%s2224_s1 + $0x88] ss:$16 sps:$4 sm:$0xff]  }
 0x619   : > { %1079 = vmatmul.mubr.bf16.vlgmr.msra.gmra.mrb[24].mxu0 %v1045_v46  ;;  %1120 = vmatmul.mubr.bf16.vlgmr.msra.gmra.mrb[24].mxu1 %v1045_v46 }
 0x61a   : > { %1158 = vmatpush1.bf16.msra.mxu0 %v1563_v47  ;;  %1199 = vmatpush1.bf16.msra.mxu1 %v1564_v48 }
 0x61b   : > { %1159 = vmatprep.subr.bf16.mxu0 %v1565_v49  ;;  %1200 = vmatprep.subr.bf16.mxu1 %v1566_v50  ;;  %v1402_v49 = vld [vmem:[%s1647_s17 + $0xf0] sm:$0xff] }
 0x61c   : > { %1189 = vmatprep.mubr.bf16.mxu0 %v1610_v3  ;;  %1230 = vmatprep.mubr.bf16.mxu1 %v1610_v3  ;;  %v1571_v3 = vld [vmem:[%s2224_s1 + $0x40] ss:$16 sps:$4 sm:$0xff]  }
 0x61e   : > { %1160 = vmatpush1.bf16.msra.mxu0 %v1567_v51  ;;  %1201 = vmatpush1.bf16.msra.mxu1 %v1568_v52 }
 0x61f   : > { %1161 = vmatprep.subr.bf16.mxu0 %v1569_v39  ;;  %1202 = vmatprep.subr.bf16.mxu1 %v1570_v40 }
 0x622   : > { %1162 = vmatpush1.bf16.msra.mxu0 %v1571_v3  ;;  %1203 = vmatpush1.bf16.msra.mxu1 %v1572_v45 }
 0x623   : > { %1163 = vmatprep.subr.bf16.mxu0 %v1573_v55  ;;  %1204 = vmatprep.subr.bf16.mxu1 %v1574_v56  ;;  %v1403_v55 = vld [vmem:[%s1647_s17 + $0xf8] sm:$0xff] }
 0x626   : > { %1164 = vmatpush1.bf16.msra.mxu0 %v1575_v58  ;;  %1205 = vmatpush1.bf16.msra.mxu1 %v1576_v32 }
 0x627   : > { %1165 = vmatprep.subr.bf16.mxu0 %v1577_v53  ;;  %1206 = vmatprep.subr.bf16.mxu1 %v1578_v59 }
 0x62a   : > { %1166 = vmatpush1.bf16.msra.mxu0 %v1579_v60  ;;  %1207 = vmatpush1.bf16.msra.mxu1 %v1580_v61 }
 0x62b   : > { %1167 = vmatprep.subr.bf16.mxu0 %v1581_v62  ;;  %1208 = vmatprep.subr.bf16.mxu1 %v1582_v2 }
 0x62e   : > { %1168 = vmatpush1.bf16.msra.mxu0 %v1583_v4  ;;  %1209 = vmatpush1.bf16.msra.mxu1 %v1798_v26  ;;  %v1396_v26 = vld [vmem:[%s1647_s17 + $0xc0] sm:$0xff] }
 0x62f   : > { %1169 = vmatprep.subr.bf16.mxu0 %v1584_v6  ;;  %1210 = vmatprep.subr.bf16.mxu1 %v1810_v28 }
 0x632   : > { %1170 = vmatpush1.bf16.msra.mxu0 %v1805_v27  ;;  %1211 = vmatpush1.bf16.msra.mxu1 %v1822_v30 }
 0x633   : > { %1171 = vmatprep.subr.bf16.mxu0 %v1816_v29  ;;  %1212 = vmatprep.subr.bf16.mxu1 %v1834_v33 }
 0x636   : > { %1172 = vmatpush1.bf16.msra.mxu0 %v1829_v31  ;;  %1213 = vmatpush1.bf16.msra.mxu1 %v1841_v35  ;;  %v1399_v35 = vld [vmem:[%s1647_s17 + $0xd8] sm:$0xff] }
 0x6ec   : > { %v1080_v8 = vpop.f32.mrb[24].mxu0  ;;  %v1121_v9 = vpop.f32.mrb[24].mxu1 }
 0x6ed   : > { %v1128_v10 = vadd.f32 %v1396_v26, %v1080_v8  ;;  %v1082_v11 = vpop.f32.mrb[25].mxu0  ;;  %v1123_v28 = vpop.f32.mrb[25].mxu1  ;;  %v1130_v31 = vadd.f32 %v1398_v12, %v1121_v9  ;;  %v1264_v12 = vld [vmem:[%s2225_s2] sm:$0xff] }
 0x6ee   : > { %v1129_v27 = vadd.f32 %v1397_v7, %v1082_v11  ;;  %v1084_v13 = vpop.f32.mrb[26].mxu0  ;;  %v1125_v30 = vpop.f32.mrb[26].mxu1  ;;  %v1131_v16 = vadd.f32 %v1399_v35, %v1123_v28 }
 0x6ef   : > { %v1132_v14 = vmul.f32 0.5, %v1128_v10  ;;  %v1085_v29 = vpop.f32.mrb[27].mxu0  ;;  %v1126_v15 = vpop.f32.mrb[27].mxu1 }
 0x6f0   : > { %v1136_v33 = vmul.f32 0.5, %v1129_v27  ;;  %v1141_v17 = vmul.f32 0.5, %v1131_v16 }
 0x6f1   : > { %1542 = vtanh.f32 %v1132_v14 }
 0x6f2   : > { %1544 = vtanh.f32 %v1136_v33 }
 0x6f3   : > { %1546 = vtanh.f32 %v1130_v31 }
 0x6f4   : > { %1548 = vtanh.f32 %v1141_v17 }
 0x6fb   : > { %v1543_v18 = vpop.eup %1542 }
 0x6fc   : > { %v1545_v19 = vpop.eup %1544  ;;  %v1134_v20 = vadd.f32 1.0, %v1543_v18 }
 0x6fd   : > { %v1138_v5 = vadd.f32 1.0, %v1545_v19  ;;  %v1547_v22 = vpop.eup %1546 }
 0x6fe   : > { %v1135_v21 = vmul.f32 0.5, %v1134_v20  ;;  %v1549_v57 = vpop.eup %1548 }
 0x6ff   : > { %v1139_v23 = vmul.f32 0.5, %v1138_v5  ;;  %v1143_v63 = vadd.f32 1.0, %v1549_v57 }
 0x700   : > { %v1146_v24 = vmul.f32 %v1547_v22, %v1135_v21 }
 0x701   : > { %v1145_v25 = vmul.f32 %v1139_v23, %v2116_v37  ;;  %v1144_v0 = vmul.f32 0.5, %v1143_v63 }
 0x703   : > { %v1147_v54 = vadd.f32 %v1146_v24, %v1145_v25 }
 0x705   : > { %1550 = vtanh.f32 %v1147_v54 }
 0x70f   : > { %v1551_v34 = vpop.eup %1550 }
 0x710   : > { %v1149_v36 = vmul.f32 %v1551_v34, %v1144_v0 }
 0x712   : > { %v1150_v38 = vadd.f32 %v1149_v36, %v2120_v44  ;;  %v1156_v41 = vpack.c.bf16 %v1149_v36, %v1149_v36 }
 0x714   : > { %1190 = vmatmul.mubr.bf16.vlgmr.msra.gmra.mrb[28].mxu0 %v1156_v41  ;;  %1231 = vmatmul.mubr.bf16.vlgmr.msra.gmra.mrb[28].mxu1 %v1156_v41 }
 0x7e7   : > { %v1191_v1 = vpop.f32.mrb[28].mxu0  ;;  %v1232_v46 = vpop.f32.mrb[28].mxu1 }
 0x7e8   : > { %v1239_v47 = vadd.f32 %v1400_v42, %v1191_v1  ;;  %v1193_v37 = vpop.f32.mrb[29].mxu0  ;;  %v1234_v48 = vpop.f32.mrb[29].mxu1  ;;  %v1241_v44 = vadd.f32 %v1402_v49, %v1232_v46 }
 0x7e9   : > { %v1240_v50 = vadd.f32 %v1401_v43, %v1193_v37  ;;  %v1195_v51 = vpop.f32.mrb[30].mxu0  ;;  %v1236_v52 = vpop.f32.mrb[30].mxu1  ;;  %v1242_v56 = vadd.f32 %v1403_v55, %v1234_v48 }
 0x7ea   : > { %v1243_v39 = vmul.f32 0.5, %v1239_v47  ;;  %v1196_v40 = vpop.f32.mrb[31].mxu0  ;;  %v1237_v3 = vpop.f32.mrb[31].mxu1 }
 0x7eb   : > { %v1247_v45 = vmul.f32 0.5, %v1240_v50  ;;  %v1252_v58 = vmul.f32 0.5, %v1242_v56 }
 0x7ec   : > { %1552 = vtanh.f32 %v1243_v39 }
 0x7ed   : > { %1554 = vtanh.f32 %v1247_v45 }
 0x7ee   : > { %1556 = vtanh.f32 %v1241_v44 }
 0x7ef   : > { %1558 = vtanh.f32 %v1252_v58 }
 0x7f6   : > { %v1553_v32 = vpop.eup %1552 }
 0x7f7   : > { %v1555_v53 = vpop.eup %1554  ;;  %v1245_v59 = vadd.f32 1.0, %v1553_v32 }
 0x7f8   : > { %v1249_v60 = vadd.f32 1.0, %v1555_v53  ;;  %v1557_v62 = vpop.eup %1556 }
 0x7f9   : > { %v1246_v61 = vmul.f32 0.5, %v1245_v59  ;;  %v1559_v7 = vpop.eup %1558 }
 0x7fa   : > { %v1250_v2 = vmul.f32 0.5, %v1249_v60  ;;  %v1254_v8 = vadd.f32 1.0, %v1559_v7 }
 0x7fb   : > { %v1257_v4 = vmul.f32 %v1557_v62, %v1246_v61 }
 0x7fc   : > { %v1256_v6 = vmul.f32 %v1250_v2, %v1147_v54  ;;  %v1255_v9 = vmul.f32 0.5, %v1254_v8 }
 0x7fe   : > { %v1258_v26 = vadd.f32 %v1257_v4, %v1256_v6 }
 0x800   : > { %1560 = vtanh.f32 %v1258_v26  ;;  %1263 = vst [vmem:[#allocation3] sm:$0xff] %v1258_v26 }
 0x80a   : > { %v1561_v10 = vpop.eup %1560 }
 0x80b   : > { %v1260_v11 = vmul.f32 %v1561_v10, %v1255_v9 }
 0x80d   : > { %v1261_v28 = vadd.f32 %v1260_v11, %v1150_v38  ;;  %1262 = vst [vmem:[#allocation2] sm:$0xff] %v1260_v11 }
 0x80f   : > { %v1265_v27 = vmul.f32 0.0625, %v1261_v28 }
 0x811   : > { %v1266_v13 = vadd.f32 %v1265_v27, %v1264_v12 }
 0x813   : > { %1267 = vst [vmem:[%s2225_s2] sm:$0xff] %v1266_v13 }
 0x814 PF: > { %s12_s11 = sadd.s32 1, %s1607_s11   ;;  %s2226_s9 = smov %s1603_s10 }
 0x815   : > { %p9_p6 = scmp.ge.s32.totalorder %s12_s11, 4   ;;  %s2227_s10 = smov %s2229_s12 }
 0x817   :  { %11 = sbr.rel (!%p9_p6) target bundleno = 2 (0x2), region = 69 }

// kernel: blstm_relu_forward.17
= control target key start
LH: loop header
LB: loop body
LE: loop exit
PB: predicated region body
PF: predicated region fallthrough
CT: control target
= control target key end

     0   :  { %v411_v2 = vmov 0.0   ;;  %s528_s0 = inlined_call_operand.vmem [shape: f32[8,256], index: 0, kind: input, shape index: {}]   ;;  %s529_s1 = inlined_call_operand.vmem [shape: bf16[256,64], index: 1, kind: input, shape index: {}]   ;;  %s530_s2 = inlined_call_operand.vmem [shape: f32[1,64], index: 2, kind: input, shape index: {}]   ;;  %s531_s3 = inlined_call_operand.vmem [shape: bf16[64,10], index: 3, kind: input, shape index: {}]   ;;  %s532_s4 = inlined_call_operand.vmem [shape: f32[1,10], index: 4, kind: input, shape index: {}]   ;;  %s533_s5 = inlined_call_operand.hbm [shape: f32[8,10], index: 5, kind: output, shape index: {}]  }
   0x1   :  { %v367_v0 = vld [vmem:[%s529_s1 + $0x40] sm:$0xff]   ;;  %352 = vmatprep.subr.bf16.mxu1 %v411_v2  ;;  %v369_v3 = vld [vmem:[%s529_s1 + $0x48] sm:$0xff]   ;;  %v371_v5 = vld [vmem:[%s529_s1 + $0x50] sm:$0xff]  }
   0x2   :  { %v368_v1 = vld [vmem:[%s529_s1] sm:$0xff]   ;;  %325 = vmatprep.subr.bf16.mxu0 %v367_v0  ;;  %v370_v4 = vld [vmem:[%s529_s1 + $0x8] sm:$0xff]   ;;  %v372_v6 = vld [vmem:[%s529_s1 + $0x10] sm:$0xff]  }
   0x3   :  { %326 = vmatpush3.bf16.msra.mxu0 %v368_v1  ;;  %v373_v7 = vld [vmem:[%s529_s1 + $0x58] sm:$0xff]   ;;  %v375_v9 = vld [vmem:[%s529_s1 + $0x60] sm:$0xff]   ;;  %v377_v11 = vld [vmem:[%s529_s1 + $0x68] sm:$0xff]  }
   0x4   :  { %327 = vmatprep.subr.bf16.mxu0 %v369_v3  ;;  %v374_v8 = vld [vmem:[%s529_s1 + $0x18] sm:$0xff]   ;;  %v376_v10 = vld [vmem:[%s529_s1 + $0x20] sm:$0xff]   ;;  %v23_v12 = vld [vmem:[%s528_s0 + $0x8] sm:$0xff] }
   0x5   :  { %v25_v13 = vpack.c.bf16 %v23_v12, %v23_v12  ;;  %v383_v14 = vld [vmem:[%s531_s3] sm:$0xff]   ;;  %v378_v15 = vld [vmem:[%s529_s1 + $0x28] sm:$0xff]   ;;  %v379_v16 = vld [vmem:[%s529_s1 + $0x70] sm:$0xff]  }
   0x6   :  { %353 = vmatpush3.bf16.msra.mxu1 %v383_v14  ;;  %v384_v17 = vld [vmem:[%s531_s3 + $0x8] sm:$0xff]  }
   0x7   :  { %328 = vmatpush3.bf16.msra.mxu0 %v370_v4  ;;  %193 = vmatprep.mubr.bf16.mxu0 %v25_v13 }
   0x8   :  { %329 = vmatprep.subr.bf16.mxu0 %v371_v5 }
   0xb   :  { %330 = vmatpush3.bf16.msra.mxu0 %v372_v6 }
   0xc   :  { %331 = vmatprep.subr.bf16.mxu0 %v373_v7 }
   0xf   :  { %332 = vmatpush3.bf16.msra.mxu0 %v374_v8 }
  0x10   :  { %333 = vmatprep.subr.bf16.mxu0 %v375_v9 }
  0x13   :  { %334 = vmatpush3.bf16.msra.mxu0 %v376_v10 }
  0x14   :  { %335 = vmatprep.subr.bf16.mxu0 %v377_v11 }
  0x15   :  { %10 = vsyncpa [#allocation3], 0  ;;  %354 = vmatprep.subr.bf16.mxu1 %v411_v2  ;;  %v380_v18 = vld [vmem:[%s529_s1 + $0x30] sm:$0xff]   ;;  %v381_v19 = vld [vmem:[%s529_s1 + $0x78] sm:$0xff]   ;;  %vm412_vm0 = vmmov 0   ;;  %vm242_vm1 = vcmask 523264  }
  0x16   :  { %355 = vmatpush3.bf16.msra.mxu1 %v384_v17  ;;  %v382_v20 = vld [vmem:[%s529_s1 + $0x38] sm:$0xff]   ;;  %v22_v21 = vld [vmem:[%s528_s0] sm:$0xff]  ;;  %v385_v23 = vld [vmem:[%s531_s3 + $0x10] sm:$0xff]   ;;  %360 = vmatprep.mubr.msk.bf16.mxu1 %vm412_vm0, %v411_v2  ;;  %vm286_vm2 = vcmask 80896  }
  0x17   :  { %336 = vmatpush3.bf16.msra.mxu0 %v378_v15  ;;  %356 = vmatprep.subr.bf16.mxu1 %v411_v2  ;;  %v24_v22 = vpack.c.bf16 %v22_v21, %v22_v21  ;;  %v386_v24 = vld [vmem:[%s531_s3 + $0x18] sm:$0xff]   ;;  %v302_v26 = vld [vmem:[%s530_s2] ss:$0 sm:$0xff]  ;;  %s413_s3 = smov [#allocation2]  }
  0x18   :  { %337 = vmatprep.subr.bf16.mxu0 %v379_v16  ;;  %v319_v34 = vld [vmem:[%s532_s4] ss:$0 sm:$0xff]  ;;  %s294_s14 = sshll.u32 %s413_s3, 4  ;;  %s295_s14 = int_to_ptr.vmem [resolvable:$true] %s294_s14 }
  0x19   :  { %s387_s2 = scalar_lea.vmem %s295_s14, 128  ;;  %p392_p1 = scmp.lt.s32.totalorder %s295_s14, %s295_s14 }
  0x1a   :  { %357 = vmatpush3.bf16.msra.mxu1 %v385_v23  ;;  %p388_p0 = scmp.ne.s32.totalorder %s295_s14, %s387_s2  ;;  %p393_p2 = scmp.lt.s32.totalorder %s387_s2, %s387_s2 }
  0x1b   :  { %338 = vmatpush3.bf16.msra.mxu0 %v380_v18  ;;  %358 = vmatprep.subr.bf16.mxu1 %v411_v2 }
  0x1c   :  { %339 = vmatprep.subr.bf16.mxu0 %v381_v19  ;;  %p394_p3 = por %p393_p2, %p392_p1 }
  0x1e   :  { %359 = vmatpush3.bf16.msra.mxu1 %v386_v24  ;;  %p395_p4 = pnand %p394_p3, %p388_p0 }
  0x1f   :  { %340 = vmatpush3.bf16.msra.mxu0 %v382_v20 }
  0x22   :  { %194 = vmatmul.mubr.bf16.vlgmr.msra.gmra.mrb[0].mxu0 %v24_v22 }
  0xf5   :  { %v341_v25 = vpop.f32.mrb[0].mxu0 }
  0xf6   :  { %v342_v27 = vpop.f32.mrb[1].mxu0 }
  0xf7   :  { %v343_v28 = vadd.f32 %v342_v27, %v341_v25  ;;  %v344_v29 = vpop.f32.mrb[2].mxu0 }
  0xf8   :  { %v345_v30 = vpop.f32.mrb[3].mxu0 }
  0xf9   :  { %v196_v31 = vadd.f32 %v343_v28, %v302_v26 }
  0xfb   :  { %v201_v32 = vmax.f32 %v196_v31, 0.0 }
  0xfd   :  { %v202_v33 = vpack.c.bf16 %v201_v32, %v201_v32 }
  0xff   :  { %361 = vmatmul.mubr.msk.bf16.vlgmr.msra.gmra.mrb[0].mxu1 %vm242_vm1, %v202_v33 }
 0x1d2   :  { %v280_v35 = vpop.f32.mrb[0].mxu1 }
 0x1d3   :  { %v281_v36 = vadd.f32 %v319_v34, %v280_v35  ;;  %v362_v37 = vpop.f32.mrb[1].mxu1 }
 0x1d4   :  { %v283_v38 = vpop.f32.mrb[2].mxu1 }
 0x1d5   :  { %v363_v39 = vpop.f32.mrb[3].mxu1  ;;  %287 = vst.msk [vmem:[#allocation2] sm:$0xff] %vm286_vm2, %v281_v36 }
 0x1d6   :  { %398 = shalt.err (!%p395_p4)
}
 0x1d7   :  { %s399_s4 = scalar_lea.hbm %s533_s5, 128 }
 0x1d8   :  { %p400_p5 = scmp.ne.s32.totalorder %s533_s5, %s399_s4  ;;  %p403_p6 = scmp.lt.u32.totalorder %s399_s4, %s533_s5 }
 0x1da   :  { %p405_p7 = pnand %p403_p6, %p400_p5 }
 0x1dc   :  { %408 = shalt.err (!%p405_p7)
}
 0x1dd   :  { %297 = dma.vmem_to_hbm [thread:$0]  %s295_s14, 128, %s533_s5, [#allocation3]  }
 0x1de   :  { %409 = dma.done.wait [#allocation3], 128  }
 0x1df   :  { %410 = vsyncadd [#allocation3], 4294967168 }
 0x1e0   :  { %301 = vsyncpa [#allocation3], 1 }

// kernel: blstm_relu_forward.16
= control target key start
LH: loop header
LB: loop body
LE: loop exit
PB: predicated region body
PF: predicated region fallthrough
CT: control target
= control target key end

     0   :  { %s1633_s9 = smov 0   ;;  %s1635_s10 = smov 0   ;;  %s2230_s0 = inlined_call_operand.vmem [shape: f32[16,8,512], index: 0, kind: input, shape index: {}]   ;;  %s2231_s1 = inlined_call_operand.vmem [shape: bf16[128,512], index: 1, kind: input, shape index: {}]   ;;  %s2232_s2 = inlined_call_operand.vmem [shape: f32[8,128], index: 2, kind: output, shape index: {}]  }
   0x1   :  { %s1637_s11 = smov 0  }
   0x2 LB: > { %s21_s12 = sadd.s32 1, %s1610_s10  ;;  %p1346_p0 = scmp.ge.s32.totalorder %s1614_s11, 1  ;;  %s1614_s11 = sphi %s1637_s11, %s12_s11   ;;  %s1610_s10 = sphi %s1635_s10, %s2234_s10   ;;  %s1606_s9 = sphi %s1633_s9, %s2233_s9  }
   0x3   : > { %p22_p1 = scmp.ge.s32.totalorder %s21_s12, 2  ;;  %p136_p2 = scmp.lt.s32.totalorder %s1614_s11, 3 }
   0x5   : > { %s2236_s12 = smov (%p22_p1, %s21_s12), 0  ;;  %p137_p3 = pnand %p1346_p0, %p136_p2 }
   0x6   : > { %s163_s13 = ssub.s32 (!%p137_p3), 1, %s1606_s9  ;;  %p1350_p5 = scmp.ne.s32.totalorder (!%p137_p3), %s1606_s9, 0 }
   0x7   : > { %140 = sbr.rel (%p137_p3) target bundleno = 2068 (0x814), region = 28  ;;  %s1347_s14 = sshll.u32 (!%p137_p3), %s163_s13, 3 }
   0x8   : > { %p165_p4 = scmp.lt.s32.totalorder (!%p137_p3), %s1347_s14, 15 }
   0xe   : > { %s2238_s14 = smov (!%p165_p4, %s1347_s14), 15  ;;  %184 = sbr.rel (%p1350_p5) target bundleno = 21 (0x15), region = 32 }
   0xf   : > { %s1414_s15 = sshll.u32 %s2238_s14, 5  ;;  %v1616_v0 = vmov (!%p1350_p5), 0.0  }
  0x10   : > { %s1654_s18 = scalar_lea.vmem %s2230_s0, %s1414_s15  ;;  %185 = vst [vmem:[#allocation2] sm:$0xff] (!%p1350_p5), %v1616_v0  ;;  %186 = vst [vmem:[#allocation3] sm:$0xff] (!%p1350_p5), %v1616_v0 }
  0x11   : > { %187 = vst [vmem:[%s2232_s2] sm:$0xff] (!%p1350_p5), %v1616_v0 }
  0x15 PF: > { %v1662_v1 = vld [vmem:[%s2231_s1 + $0x4] ss:$16 sps:$4 sm:$0xff]   ;;  %v1667_v2 = vld [vmem:[%s2231_s1] ss:$16 sps:$4 sm:$0xff]   ;;  %v1617_v3 = vmov 0   ;;  %v1352_v37 = vld [vmem:[%s1654_s18 + $0xe8] sm:$0xff] }
  0x16   : > { %420 = vmatprep.mubr.bf16.mxu0 %v1617_v3  ;;  %461 = vmatprep.mubr.bf16.mxu1 %v1617_v3  ;;  %v1675_v4 = vld [vmem:[%s2231_s1 + $0x24] ss:$16 sps:$4 sm:$0xff]   ;;  %v1681_v5 = vld [vmem:[%s2231_s1 + $0xc] ss:$16 sps:$4 sm:$0xff]   ;;  %v1686_v6 = vld [vmem:[%s2231_s1 + $0x20] ss:$16 sps:$4 sm:$0xff]  }
  0x17   : > { %388 = vmatprep.subr.bf16.mxu0 %v1662_v1  ;;  %v1691_v7 = vld [vmem:[%s2231_s1 + $0x8] ss:$16 sps:$4 sm:$0xff]   ;;  %v1697_v8 = vld [vmem:[%s2231_s1 + $0x44] ss:$16 sps:$4 sm:$0xff]   ;;  %429 = vmatprep.subr.bf16.mxu1 %v1681_v5  ;;  %v1703_v9 = vld [vmem:[%s2231_s1 + $0x2c] ss:$16 sps:$4 sm:$0xff]  }
  0x18   : > { %389 = vmatpush1.bf16.msra.mxu0 %v1667_v2  ;;  %430 = vmatpush1.bf16.msra.mxu1 %v1691_v7  ;;  %v1709_v10 = vld [vmem:[%s2231_s1 + $0x28] ss:$16 sps:$4 sm:$0xff]   ;;  %v1716_v11 = vld [vmem:[%s2231_s1 + $0x40] ss:$16 sps:$4 sm:$0xff]   ;;  %v1722_v12 = vld [vmem:[%s2231_s1 + $0x64] ss:$16 sps:$4 sm:$0xff]  }
  0x19   : > { %390 = vmatprep.subr.bf16.mxu0 %v1675_v4  ;;  %431 = vmatprep.subr.bf16.mxu1 %v1703_v9  ;;  %v1727_v13 = vld [vmem:[%s2231_s1 + $0x4c] ss:$16 sps:$4 sm:$0xff]   ;;  %v1733_v14 = vld [vmem:[%s2231_s1 + $0x48] ss:$16 sps:$4 sm:$0xff]   ;;  %v1740_v15 = vld [vmem:[%s2231_s1 + $0x60] ss:$16 sps:$4 sm:$0xff]  }
  0x1a   : > { %v1745_v16 = vld [vmem:[%s2231_s1 + $0x6c] ss:$16 sps:$4 sm:$0xff]   ;;  %v1751_v17 = vld [vmem:[%s2231_s1 + $0x84] ss:$16 sps:$4 sm:$0xff]   ;;  %v1757_v18 = vld [vmem:[%s2231_s1 + $0x80] ss:$16 sps:$4 sm:$0xff]  }
  0x1b   : > { %v1762_v19 = vld [vmem:[%s2231_s1 + $0x68] ss:$16 sps:$4 sm:$0xff]   ;;  %v1769_v20 = vld [vmem:[%s2231_s1 + $0x8c] ss:$16 sps:$4 sm:$0xff]   ;;  %v1775_v21 = vld [vmem:[%s2231_s1 + $0xa4] ss:$16 sps:$4 sm:$0xff]  }
  0x1c   : > { %391 = vmatpush1.bf16.msra.mxu0 %v1686_v6  ;;  %432 = vmatpush1.bf16.msra.mxu1 %v1709_v10  ;;  %v1781_v22 = vld [vmem:[%s2231_s1 + $0x88] ss:$16 sps:$4 sm:$0xff]   ;;  %v1788_v23 = vld [vmem:[%s2231_s1 + $0xa0] ss:$16 sps:$4 sm:$0xff]   ;;  %v1793_v24 = vld [vmem:[%s2231_s1 + $0xac] ss:$16 sps:$4 sm:$0xff]  }
  0x1d   : > { %392 = vmatprep.subr.bf16.mxu0 %v1697_v8  ;;  %433 = vmatprep.subr.bf16.mxu1 %v1727_v13  ;;  %v1799_v25 = vld [vmem:[%s2231_s1 + $0xc4] ss:$16 sps:$4 sm:$0xff]   ;;  %v1805_v26 = vld [vmem:[%s2231_s1 + $0xa8] ss:$16 sps:$4 sm:$0xff]   ;;  %v1812_v27 = vld [vmem:[%s2231_s1 + $0xc0] ss:$16 sps:$4 sm:$0xff]  }
  0x1e   : > { %v1817_v28 = vld [vmem:[%s2231_s1 + $0xcc] ss:$16 sps:$4 sm:$0xff]   ;;  %v1823_v29 = vld [vmem:[%s2231_s1 + $0xe4] ss:$16 sps:$4 sm:$0xff]   ;;  %v1829_v30 = vld [vmem:[%s2231_s1 + $0xc8] ss:$16 sps:$4 sm:$0xff]  }
  0x1f   : > { %v1836_v31 = vld [vmem:[%s2231_s1 + $0xe0] ss:$16 sps:$4 sm:$0xff]   ;;  %v1841_v33 = vld [vmem:[%s2231_s1 + $0xec] ss:$16 sps:$4 sm:$0xff]   ;;  %v1848_v35 = vld [vmem:[%s2231_s1 + $0xe8] ss:$16 sps:$4 sm:$0xff]  }
  0x20   : > { %393 = vmatpush1.bf16.msra.mxu0 %v1716_v11  ;;  %434 = vmatpush1.bf16.msra.mxu1 %v1733_v14  ;;  %v220_v32 = vld [vmem:[#allocation2] sm:$0xff]  ;;  %v1353_v41 = vld [vmem:[%s1654_s18 + $0xf0] sm:$0xff]  ;;  %v1354_v51 = vld [vmem:[%s1654_s18 + $0xf8] sm:$0xff] }
  0x21   : > { %394 = vmatprep.subr.bf16.mxu0 %v1722_v12  ;;  %435 = vmatprep.subr.bf16.mxu1 %v1745_v16  ;;  %v227_v34 = vpack.c.bf16 %v220_v32, %v220_v32  ;;  %v1351_v36 = vld [vmem:[%s1654_s18 + $0xe0] sm:$0xff]  ;;  %v221_v61 = vld [vmem:[#allocation3] sm:$0xff] }
  0x24   : > { %395 = vmatpush1.bf16.msra.mxu0 %v1740_v15  ;;  %436 = vmatpush1.bf16.msra.mxu1 %v1762_v19 }
  0x25   : > { %396 = vmatprep.subr.bf16.mxu0 %v1751_v17  ;;  %437 = vmatprep.subr.bf16.mxu1 %v1769_v20 }
  0x28   : > { %397 = vmatpush1.bf16.msra.mxu0 %v1757_v18  ;;  %438 = vmatpush1.bf16.msra.mxu1 %v1781_v22 }
  0x29   : > { %398 = vmatprep.subr.bf16.mxu0 %v1775_v21  ;;  %439 = vmatprep.subr.bf16.mxu1 %v1793_v24 }
  0x2c   : > { %399 = vmatpush1.bf16.msra.mxu0 %v1788_v23  ;;  %440 = vmatpush1.bf16.msra.mxu1 %v1805_v26 }
  0x2d   : > { %400 = vmatprep.subr.bf16.mxu0 %v1799_v25  ;;  %441 = vmatprep.subr.bf16.mxu1 %v1817_v28 }
  0x30   : > { %401 = vmatpush1.bf16.msra.mxu0 %v1812_v27  ;;  %442 = vmatpush1.bf16.msra.mxu1 %v1829_v30 }
  0x31   : > { %402 = vmatprep.subr.bf16.mxu0 %v1823_v29  ;;  %443 = vmatprep.subr.bf16.mxu1 %v1841_v33 }
  0x34   : > { %403 = vmatpush1.bf16.msra.mxu0 %v1836_v31  ;;  %444 = vmatpush1.bf16.msra.mxu1 %v1848_v35 }
  0x35   : > { %499 = vmatprep.subr.bf16.mxu0 %v1662_v1  ;;  %540 = vmatprep.subr.bf16.mxu1 %v1681_v5 }
  0x37   : > { %421 = vmatmul.mubr.bf16.vlgmr.msra.gmra.mrb[0].mxu0 %v227_v34  ;;  %462 = vmatmul.mubr.bf16.vlgmr.msra.gmra.mrb[0].mxu1 %v227_v34 }
  0x38   : > { %500 = vmatpush1.bf16.msra.mxu0 %v1667_v2  ;;  %531 = vmatprep.mubr.bf16.mxu0 %v1617_v3 }
  0x39   : > { %501 = vmatprep.subr.bf16.mxu0 %v1675_v4  ;;  %541 = vmatpush1.bf16.msra.mxu1 %v1691_v7 }
  0x3a   : > { %572 = vmatprep.mubr.bf16.mxu1 %v1617_v3  ;;  %542 = vmatprep.subr.bf16.mxu1 %v1703_v9 }
  0x3c   : > { %502 = vmatpush1.bf16.msra.mxu0 %v1686_v6 }
  0x3d   : > { %503 = vmatprep.subr.bf16.mxu0 %v1697_v8  ;;  %543 = vmatpush1.bf16.msra.mxu1 %v1709_v10 }
  0x3e   : > { %544 = vmatprep.subr.bf16.mxu1 %v1727_v13 }
  0x40   : > { %504 = vmatpush1.bf16.msra.mxu0 %v1716_v11 }
  0x41   : > { %505 = vmatprep.subr.bf16.mxu0 %v1722_v12  ;;  %545 = vmatpush1.bf16.msra.mxu1 %v1733_v14 }
  0x42   : > { %546 = vmatprep.subr.bf16.mxu1 %v1745_v16 }
  0x44   : > { %506 = vmatpush1.bf16.msra.mxu0 %v1740_v15 }
  0x45   : > { %507 = vmatprep.subr.bf16.mxu0 %v1751_v17  ;;  %547 = vmatpush1.bf16.msra.mxu1 %v1762_v19 }
  0x46   : > { %548 = vmatprep.subr.bf16.mxu1 %v1769_v20 }
  0x48   : > { %508 = vmatpush1.bf16.msra.mxu0 %v1757_v18 }
  0x49   : > { %509 = vmatprep.subr.bf16.mxu0 %v1775_v21  ;;  %549 = vmatpush1.bf16.msra.mxu1 %v1781_v22 }
  0x4a   : > { %550 = vmatprep.subr.bf16.mxu1 %v1793_v24 }
  0x4c   : > { %510 = vmatpush1.bf16.msra.mxu0 %v1788_v23 }
  0x4d   : > { %511 = vmatprep.subr.bf16.mxu0 %v1799_v25  ;;  %551 = vmatpush1.bf16.msra.mxu1 %v1805_v26 }
  0x4e   : > { %552 = vmatprep.subr.bf16.mxu1 %v1817_v28 }
  0x50   : > { %512 = vmatpush1.bf16.msra.mxu0 %v1812_v27 }
  0x51   : > { %513 = vmatprep.subr.bf16.mxu0 %v1823_v29  ;;  %553 = vmatpush1.bf16.msra.mxu1 %v1829_v30 }
  0x52   : > { %554 = vmatprep.subr.bf16.mxu1 %v1841_v33 }
  0x54   : > { %514 = vmatpush1.bf16.msra.mxu0 %v1836_v31 }
  0x55   : > { %610 = vmatprep.subr.bf16.mxu0 %v1662_v1  ;;  %555 = vmatpush1.bf16.msra.mxu1 %v1848_v35 }
  0x56   : > { %651 = vmatprep.subr.bf16.mxu1 %v1681_v5 }
 0x10a   : > { %v422_v38 = vpop.f32.mrb[0].mxu0  ;;  %v463_v46 = vpop.f32.mrb[0].mxu1 }
 0x10b   : > { %v470_v39 = vadd.f32 %v1351_v36, %v422_v38  ;;  %v424_v40 = vpop.f32.mrb[1].mxu0  ;;  %v472_v48 = vadd.f32 %v1353_v41, %v463_v46  ;;  %v465_v49 = vpop.f32.mrb[1].mxu1  ;;  %v1387_v41 = vld [vmem:[%s1654_s18 + $0xc0] sm:$0xff] }
 0x10c   : > { %v471_v42 = vadd.f32 %v1352_v37, %v424_v40  ;;  %v426_v43 = vpop.f32.mrb[2].mxu0  ;;  %v467_v50 = vpop.f32.mrb[2].mxu1  ;;  %v473_v53 = vadd.f32 %v1354_v51, %v465_v49 }
 0x10d   : > { %v474_v44 = vmul.f32 0.5, %v470_v39  ;;  %v427_v45 = vpop.f32.mrb[3].mxu0  ;;  %v468_v52 = vpop.f32.mrb[3].mxu1 }
 0x10e   : > { %v478_v47 = vmul.f32 0.5, %v471_v42  ;;  %v483_v54 = vmul.f32 0.5, %v473_v53  ;;  %v1388_v42 = vld [vmem:[%s1654_s18 + $0xc8] sm:$0xff] }
 0x10f   : > { %1489 = vtanh.f32 %v474_v44 }
 0x110   : > { %1491 = vtanh.f32 %v478_v47 }
 0x111   : > { %1493 = vtanh.f32 %v472_v48  ;;  %v1389_v48 = vld [vmem:[%s1654_s18 + $0xd0] sm:$0xff] }
 0x112   : > { %1495 = vtanh.f32 %v483_v54 }
 0x119   : > { %v1490_v55 = vpop.eup %1489 }
 0x11a   : > { %v1492_v56 = vpop.eup %1491  ;;  %v476_v57 = vadd.f32 1.0, %v1490_v55 }
 0x11b   : > { %v1494_v58 = vpop.eup %1493  ;;  %v480_v59 = vadd.f32 1.0, %v1492_v56 }
 0x11c   : > { %v477_v60 = vmul.f32 0.5, %v476_v57  ;;  %v1496_v34 = vpop.eup %1495  ;;  %v1390_v57 = vld [vmem:[%s1654_s18 + $0xd8] sm:$0xff] }
 0x11d   : > { %v481_v62 = vmul.f32 0.5, %v480_v59  ;;  %v485_v36 = vadd.f32 1.0, %v1496_v34 }
 0x11e   : > { %v488_v63 = vmul.f32 %v1494_v58, %v477_v60 }
 0x11f   : > { %v487_v0 = vmul.f32 %v481_v62, %v221_v61  ;;  %v486_v37 = vmul.f32 0.5, %v485_v36 }
 0x121   : > { %v1893_v32 = vadd.f32 %v488_v63, %v487_v0 }
 0x123   : > { %1497 = vtanh.f32 %v1893_v32 }
 0x12d   : > { %v1498_v38 = vpop.eup %1497 }
 0x12e   : > { %v1896_v39 = vmul.f32 %v1498_v38, %v486_v37 }
 0x130   : > { %v498_v40 = vpack.c.bf16 %v1896_v39, %v1896_v39 }
 0x132   : > { %532 = vmatmul.mubr.bf16.vlgmr.msra.gmra.mrb[4].mxu0 %v498_v40  ;;  %573 = vmatmul.mubr.bf16.vlgmr.msra.gmra.mrb[4].mxu1 %v498_v40 }
 0x133   : > { %611 = vmatpush1.bf16.msra.mxu0 %v1667_v2  ;;  %652 = vmatpush1.bf16.msra.mxu1 %v1691_v7 }
 0x134   : > { %612 = vmatprep.subr.bf16.mxu0 %v1675_v4  ;;  %653 = vmatprep.subr.bf16.mxu1 %v1703_v9 }
 0x135   : > { %642 = vmatprep.mubr.bf16.mxu0 %v1617_v3  ;;  %683 = vmatprep.mubr.bf16.mxu1 %v1617_v3 }
 0x137   : > { %613 = vmatpush1.bf16.msra.mxu0 %v1686_v6  ;;  %654 = vmatpush1.bf16.msra.mxu1 %v1709_v10 }
 0x138   : > { %614 = vmatprep.subr.bf16.mxu0 %v1697_v8  ;;  %655 = vmatprep.subr.bf16.mxu1 %v1727_v13 }
 0x13b   : > { %615 = vmatpush1.bf16.msra.mxu0 %v1716_v11  ;;  %656 = vmatpush1.bf16.msra.mxu1 %v1733_v14 }
 0x13c   : > { %616 = vmatprep.subr.bf16.mxu0 %v1722_v12  ;;  %657 = vmatprep.subr.bf16.mxu1 %v1745_v16 }
 0x13f   : > { %617 = vmatpush1.bf16.msra.mxu0 %v1740_v15  ;;  %658 = vmatpush1.bf16.msra.mxu1 %v1762_v19 }
 0x140   : > { %618 = vmatprep.subr.bf16.mxu0 %v1751_v17  ;;  %659 = vmatprep.subr.bf16.mxu1 %v1769_v20 }
 0x143   : > { %619 = vmatpush1.bf16.msra.mxu0 %v1757_v18  ;;  %660 = vmatpush1.bf16.msra.mxu1 %v1781_v22 }
 0x144   : > { %620 = vmatprep.subr.bf16.mxu0 %v1775_v21  ;;  %661 = vmatprep.subr.bf16.mxu1 %v1793_v24 }
 0x147   : > { %621 = vmatpush1.bf16.msra.mxu0 %v1788_v23  ;;  %662 = vmatpush1.bf16.msra.mxu1 %v1805_v26 }
 0x148   : > { %622 = vmatprep.subr.bf16.mxu0 %v1799_v25  ;;  %663 = vmatprep.subr.bf16.mxu1 %v1817_v28 }
 0x14b   : > { %623 = vmatpush1.bf16.msra.mxu0 %v1812_v27  ;;  %664 = vmatpush1.bf16.msra.mxu1 %v1829_v30 }
 0x14c   : > { %624 = vmatprep.subr.bf16.mxu0 %v1823_v29  ;;  %665 = vmatprep.subr.bf16.mxu1 %v1841_v33 }
 0x14f   : > { %625 = vmatpush1.bf16.msra.mxu0 %v1836_v31  ;;  %666 = vmatpush1.bf16.msra.mxu1 %v1848_v35 }
 0x150   : > { %721 = vmatprep.subr.bf16.mxu0 %v1662_v1  ;;  %762 = vmatprep.subr.bf16.mxu1 %v1681_v5 }
 0x205   : > { %v533_v43 = vpop.f32.mrb[4].mxu0  ;;  %v574_v44 = vpop.f32.mrb[4].mxu1 }
 0x206   : > { %v581_v45 = vadd.f32 %v1387_v41, %v533_v43  ;;  %v535_v46 = vpop.f32.mrb[5].mxu0  ;;  %v576_v47 = vpop.f32.mrb[5].mxu1  ;;  %v583_v56 = vadd.f32 %v1389_v48, %v574_v44 }
 0x207   : > { %v582_v49 = vadd.f32 %v1388_v42, %v535_v46  ;;  %v537_v50 = vpop.f32.mrb[6].mxu0  ;;  %v578_v51 = vpop.f32.mrb[6].mxu1  ;;  %v584_v58 = vadd.f32 %v1390_v57, %v576_v47  ;;  %v1392_v47 = vld [vmem:[%s1654_s18 + $0xa8] sm:$0xff] }
 0x208   : > { %v585_v52 = vmul.f32 0.5, %v581_v45  ;;  %v538_v53 = vpop.f32.mrb[7].mxu0  ;;  %v579_v54 = vpop.f32.mrb[7].mxu1 }
 0x209   : > { %v589_v55 = vmul.f32 0.5, %v582_v49  ;;  %v594_v59 = vmul.f32 0.5, %v584_v58  ;;  %v1393_v53 = vld [vmem:[%s1654_s18 + $0xb0] sm:$0xff] }
 0x20a   : > { %1499 = vtanh.f32 %v585_v52 }
 0x20b   : > { %1501 = vtanh.f32 %v589_v55 }
 0x20c   : > { %1503 = vtanh.f32 %v583_v56 }
 0x20d   : > { %1505 = vtanh.f32 %v594_v59 }
 0x214   : > { %v1500_v60 = vpop.eup %1499 }
 0x215   : > { %v1502_v61 = vpop.eup %1501  ;;  %v587_v62 = vadd.f32 1.0, %v1500_v60 }
 0x216   : > { %v591_v63 = vadd.f32 1.0, %v1502_v61  ;;  %v1504_v34 = vpop.eup %1503 }
 0x217   : > { %v588_v0 = vmul.f32 0.5, %v587_v62  ;;  %v1506_v41 = vpop.eup %1505  ;;  %v1394_v62 = vld [vmem:[%s1654_s18 + $0xb8] sm:$0xff] }
 0x218   : > { %v592_v36 = vmul.f32 0.5, %v591_v63  ;;  %v596_v42 = vadd.f32 1.0, %v1506_v41 }
 0x219   : > { %v599_v37 = vmul.f32 %v1504_v34, %v588_v0 }
 0x21a   : > { %v598_v38 = vmul.f32 %v592_v36, %v1893_v32  ;;  %v597_v43 = vmul.f32 0.5, %v596_v42  ;;  %v1391_v32 = vld [vmem:[%s1654_s18 + $0xa0] sm:$0xff] }
 0x21c   : > { %v1939_v40 = vadd.f32 %v599_v37, %v598_v38 }
 0x21e   : > { %1507 = vtanh.f32 %v1939_v40 }
 0x228   : > { %v1508_v44 = vpop.eup %1507 }
 0x229   : > { %v1942_v45 = vmul.f32 %v1508_v44, %v597_v43 }
 0x22b   : > { %v609_v46 = vpack.c.bf16 %v1942_v45, %v1942_v45 }
 0x22d   : > { %643 = vmatmul.mubr.bf16.vlgmr.msra.gmra.mrb[8].mxu0 %v609_v46  ;;  %684 = vmatmul.mubr.bf16.vlgmr.msra.gmra.mrb[8].mxu1 %v609_v46 }
 0x22e   : > { %722 = vmatpush1.bf16.msra.mxu0 %v1667_v2  ;;  %763 = vmatpush1.bf16.msra.mxu1 %v1691_v7 }
 0x22f   : > { %723 = vmatprep.subr.bf16.mxu0 %v1675_v4  ;;  %764 = vmatprep.subr.bf16.mxu1 %v1703_v9 }
 0x230   : > { %753 = vmatprep.mubr.bf16.mxu0 %v1617_v3  ;;  %794 = vmatprep.mubr.bf16.mxu1 %v1617_v3 }
 0x232   : > { %724 = vmatpush1.bf16.msra.mxu0 %v1686_v6  ;;  %765 = vmatpush1.bf16.msra.mxu1 %v1709_v10 }
 0x233   : > { %725 = vmatprep.subr.bf16.mxu0 %v1697_v8  ;;  %766 = vmatprep.subr.bf16.mxu1 %v1727_v13 }
 0x236   : > { %726 = vmatpush1.bf16.msra.mxu0 %v1716_v11  ;;  %767 = vmatpush1.bf16.msra.mxu1 %v1733_v14 }
 0x237   : > { %727 = vmatprep.subr.bf16.mxu0 %v1722_v12  ;;  %768 = vmatprep.subr.bf16.mxu1 %v1745_v16 }
 0x23a   : > { %728 = vmatpush1.bf16.msra.mxu0 %v1740_v15  ;;  %769 = vmatpush1.bf16.msra.mxu1 %v1762_v19 }
 0x23b   : > { %729 = vmatprep.subr.bf16.mxu0 %v1751_v17  ;;  %770 = vmatprep.subr.bf16.mxu1 %v1769_v20 }
 0x23e   : > { %730 = vmatpush1.bf16.msra.mxu0 %v1757_v18  ;;  %771 = vmatpush1.bf16.msra.mxu1 %v1781_v22 }
 0x23f   : > { %731 = vmatprep.subr.bf16.mxu0 %v1775_v21  ;;  %772 = vmatprep.subr.bf16.mxu1 %v1793_v24 }
 0x242   : > { %732 = vmatpush1.bf16.msra.mxu0 %v1788_v23  ;;  %773 = vmatpush1.bf16.msra.mxu1 %v1805_v26 }
 0x243   : > { %733 = vmatprep.subr.bf16.mxu0 %v1799_v25  ;;  %774 = vmatprep.subr.bf16.mxu1 %v1817_v28 }
 0x246   : > { %734 = vmatpush1.bf16.msra.mxu0 %v1812_v27  ;;  %775 = vmatpush1.bf16.msra.mxu1 %v1829_v30 }
 0x247   : > { %735 = vmatprep.subr.bf16.mxu0 %v1823_v29  ;;  %776 = vmatprep.subr.bf16.mxu1 %v1841_v33 }
 0x24a   : > { %736 = vmatpush1.bf16.msra.mxu0 %v1836_v31  ;;  %777 = vmatpush1.bf16.msra.mxu1 %v1848_v35 }
 0x24b   : > { %832 = vmatprep.subr.bf16.mxu0 %v1662_v1  ;;  %873 = vmatprep.subr.bf16.mxu1 %v1681_v5 }
 0x300   : > { %v644_v48 = vpop.f32.mrb[8].mxu0  ;;  %v685_v49 = vpop.f32.mrb[8].mxu1 }
 0x301   : > { %v692_v50 = vadd.f32 %v1391_v32, %v644_v48  ;;  %v646_v51 = vpop.f32.mrb[9].mxu0  ;;  %v687_v52 = vpop.f32.mrb[9].mxu1  ;;  %v694_v61 = vadd.f32 %v1393_v53, %v685_v49 }
 0x302   : > { %v693_v54 = vadd.f32 %v1392_v47, %v646_v51  ;;  %v648_v55 = vpop.f32.mrb[10].mxu0  ;;  %v689_v56 = vpop.f32.mrb[10].mxu1  ;;  %v695_v63 = vadd.f32 %v1394_v62, %v687_v52  ;;  %v603_v51 = vadd.f32 %v1942_v45, %v1896_v39  ;;  %v1395_v39 = vld [vmem:[%s1654_s18 + $0x80] sm:$0xff] }
 0x303   : > { %v696_v57 = vmul.f32 0.5, %v692_v50  ;;  %v649_v58 = vpop.f32.mrb[11].mxu0  ;;  %v690_v59 = vpop.f32.mrb[11].mxu1 }
 0x304   : > { %v700_v60 = vmul.f32 0.5, %v693_v54  ;;  %v705_v0 = vmul.f32 0.5, %v695_v63  ;;  %v1397_v59 = vld [vmem:[%s1654_s18 + $0x90] sm:$0xff] }
 0x305   : > { %1509 = vtanh.f32 %v696_v57 }
 0x306   : > { %1511 = vtanh.f32 %v700_v60 }
 0x307   : > { %1513 = vtanh.f32 %v694_v61 }
 0x308   : > { %1515 = vtanh.f32 %v705_v0 }
 0x30f   : > { %v1510_v34 = vpop.eup %1509 }
 0x310   : > { %v1512_v36 = vpop.eup %1511  ;;  %v698_v37 = vadd.f32 1.0, %v1510_v34 }
 0x311   : > { %v702_v38 = vadd.f32 1.0, %v1512_v36  ;;  %v1514_v42 = vpop.eup %1513 }
 0x312   : > { %v699_v41 = vmul.f32 0.5, %v698_v37  ;;  %v1516_v47 = vpop.eup %1515 }
 0x313   : > { %v703_v43 = vmul.f32 0.5, %v702_v38  ;;  %v707_v48 = vadd.f32 1.0, %v1516_v47  ;;  %v1398_v38 = vld [vmem:[%s1654_s18 + $0x98] sm:$0xff] }
 0x314   : > { %v710_v44 = vmul.f32 %v1514_v42, %v699_v41 }
 0x315   : > { %v709_v46 = vmul.f32 %v703_v43, %v1939_v40  ;;  %v708_v49 = vmul.f32 0.5, %v707_v48  ;;  %v1396_v40 = vld [vmem:[%s1654_s18 + $0x88] sm:$0xff] }
 0x317   : > { %v1985_v32 = vadd.f32 %v710_v44, %v709_v46 }
 0x319   : > { %1517 = vtanh.f32 %v1985_v32 }
 0x323   : > { %v1518_v50 = vpop.eup %1517 }
 0x324   : > { %v713_v52 = vmul.f32 %v1518_v50, %v708_v49 }
 0x326   : > { %v1990_v53 = vadd.f32 %v713_v52, %v603_v51  ;;  %v720_v54 = vpack.c.bf16 %v713_v52, %v713_v52 }
 0x328   : > { %754 = vmatmul.mubr.bf16.vlgmr.msra.gmra.mrb[12].mxu0 %v720_v54  ;;  %795 = vmatmul.mubr.bf16.vlgmr.msra.gmra.mrb[12].mxu1 %v720_v54 }
 0x329   : > { %833 = vmatpush1.bf16.msra.mxu0 %v1667_v2  ;;  %874 = vmatpush1.bf16.msra.mxu1 %v1691_v7 }
 0x32a   : > { %834 = vmatprep.subr.bf16.mxu0 %v1675_v4  ;;  %875 = vmatprep.subr.bf16.mxu1 %v1703_v9 }
 0x32b   : > { %864 = vmatprep.mubr.bf16.mxu0 %v1617_v3  ;;  %905 = vmatprep.mubr.bf16.mxu1 %v1617_v3 }
 0x32d   : > { %835 = vmatpush1.bf16.msra.mxu0 %v1686_v6  ;;  %876 = vmatpush1.bf16.msra.mxu1 %v1709_v10 }
 0x32e   : > { %836 = vmatprep.subr.bf16.mxu0 %v1697_v8  ;;  %877 = vmatprep.subr.bf16.mxu1 %v1727_v13 }
 0x331   : > { %837 = vmatpush1.bf16.msra.mxu0 %v1716_v11  ;;  %878 = vmatpush1.bf16.msra.mxu1 %v1733_v14 }
 0x332   : > { %838 = vmatprep.subr.bf16.mxu0 %v1722_v12  ;;  %879 = vmatprep.subr.bf16.mxu1 %v1745_v16 }
 0x335   : > { %839 = vmatpush1.bf16.msra.mxu0 %v1740_v15  ;;  %880 = vmatpush1.bf16.msra.mxu1 %v1762_v19 }
 0x336   : > { %840 = vmatprep.subr.bf16.mxu0 %v1751_v17  ;;  %881 = vmatprep.subr.bf16.mxu1 %v1769_v20 }
 0x339   : > { %841 = vmatpush1.bf16.msra.mxu0 %v1757_v18  ;;  %882 = vmatpush1.bf16.msra.mxu1 %v1781_v22 }
 0x33a   : > { %842 = vmatprep.subr.bf16.mxu0 %v1775_v21  ;;  %883 = vmatprep.subr.bf16.mxu1 %v1793_v24 }
 0x33d   : > { %843 = vmatpush1.bf16.msra.mxu0 %v1788_v23  ;;  %884 = vmatpush1.bf16.msra.mxu1 %v1805_v26 }
 0x33e   : > { %844 = vmatprep.subr.bf16.mxu0 %v1799_v25  ;;  %885 = vmatprep.subr.bf16.mxu1 %v1817_v28 }
 0x341   : > { %845 = vmatpush1.bf16.msra.mxu0 %v1812_v27  ;;  %886 = vmatpush1.bf16.msra.mxu1 %v1829_v30 }
 0x342   : > { %846 = vmatprep.subr.bf16.mxu0 %v1823_v29  ;;  %887 = vmatprep.subr.bf16.mxu1 %v1841_v33 }
 0x345   : > { %847 = vmatpush1.bf16.msra.mxu0 %v1836_v31  ;;  %888 = vmatpush1.bf16.msra.mxu1 %v1848_v35 }
 0x346   : > { %943 = vmatprep.subr.bf16.mxu0 %v1662_v1  ;;  %984 = vmatprep.subr.bf16.mxu1 %v1681_v5 }
 0x3fb   : > { %v755_v45 = vpop.f32.mrb[12].mxu0  ;;  %v796_v55 = vpop.f32.mrb[12].mxu1 }
 0x3fc   : > { %v803_v56 = vadd.f32 %v1395_v39, %v755_v45  ;;  %v757_v57 = vpop.f32.mrb[13].mxu0  ;;  %v798_v58 = vpop.f32.mrb[13].mxu1  ;;  %v805_v37 = vadd.f32 %v1397_v59, %v796_v55 }
 0x3fd   : > { %v804_v60 = vadd.f32 %v1396_v40, %v757_v57  ;;  %v759_v61 = vpop.f32.mrb[14].mxu0  ;;  %v800_v62 = vpop.f32.mrb[14].mxu1  ;;  %v806_v41 = vadd.f32 %v1398_v38, %v798_v58 }
 0x3fe   : > { %v807_v63 = vmul.f32 0.5, %v803_v56  ;;  %v760_v0 = vpop.f32.mrb[15].mxu0  ;;  %v801_v34 = vpop.f32.mrb[15].mxu1 }
 0x3ff   : > { %v811_v36 = vmul.f32 0.5, %v804_v60  ;;  %v816_v42 = vmul.f32 0.5, %v806_v41  ;;  %v1401_v0 = vld [vmem:[%s1654_s18 + $0x70] sm:$0xff] }
 0x400   : > { %1519 = vtanh.f32 %v807_v63 }
 0x401   : > { %1521 = vtanh.f32 %v811_v36 }
 0x402   : > { %1523 = vtanh.f32 %v805_v37 }
 0x403   : > { %1525 = vtanh.f32 %v816_v42 }
 0x40a   : > { %v1520_v43 = vpop.eup %1519 }
 0x40b   : > { %v1522_v44 = vpop.eup %1521  ;;  %v809_v46 = vadd.f32 1.0, %v1520_v43 }
 0x40c   : > { %v813_v47 = vadd.f32 1.0, %v1522_v44  ;;  %v1524_v49 = vpop.eup %1523  ;;  %v1402_v44 = vld [vmem:[%s1654_s18 + $0x78] sm:$0xff] }
 0x40d   : > { %v810_v48 = vmul.f32 0.5, %v809_v46  ;;  %v1526_v39 = vpop.eup %1525 }
 0x40e   : > { %v814_v50 = vmul.f32 0.5, %v813_v47  ;;  %v818_v40 = vadd.f32 1.0, %v1526_v39 }
 0x40f   : > { %v821_v51 = vmul.f32 %v1524_v49, %v810_v48 }
 0x410   : > { %v820_v52 = vmul.f32 %v814_v50, %v1985_v32  ;;  %v819_v45 = vmul.f32 0.5, %v818_v40  ;;  %v1399_v32 = vld [vmem:[%s1654_s18 + $0x60] sm:$0xff] }
 0x412   : > { %v2031_v54 = vadd.f32 %v821_v51, %v820_v52 }
 0x414   : > { %1527 = vtanh.f32 %v2031_v54 }
 0x41e   : > { %v1528_v55 = vpop.eup %1527 }
 0x41f   : > { %v824_v56 = vmul.f32 %v1528_v55, %v819_v45 }
 0x421   : > { %v2035_v57 = vadd.f32 %v824_v56, %v1990_v53  ;;  %v831_v58 = vpack.c.bf16 %v824_v56, %v824_v56  ;;  %v1400_v53 = vld [vmem:[%s1654_s18 + $0x68] sm:$0xff] }
 0x423   : > { %865 = vmatmul.mubr.bf16.vlgmr.msra.gmra.mrb[16].mxu0 %v831_v58  ;;  %906 = vmatmul.mubr.bf16.vlgmr.msra.gmra.mrb[16].mxu1 %v831_v58 }
 0x424   : > { %944 = vmatpush1.bf16.msra.mxu0 %v1667_v2  ;;  %985 = vmatpush1.bf16.msra.mxu1 %v1691_v7 }
 0x425   : > { %945 = vmatprep.subr.bf16.mxu0 %v1675_v4  ;;  %986 = vmatprep.subr.bf16.mxu1 %v1703_v9 }
 0x426   : > { %975 = vmatprep.mubr.bf16.mxu0 %v1617_v3  ;;  %1016 = vmatprep.mubr.bf16.mxu1 %v1617_v3 }
 0x428   : > { %946 = vmatpush1.bf16.msra.mxu0 %v1686_v6  ;;  %987 = vmatpush1.bf16.msra.mxu1 %v1709_v10 }
 0x429   : > { %947 = vmatprep.subr.bf16.mxu0 %v1697_v8  ;;  %988 = vmatprep.subr.bf16.mxu1 %v1727_v13 }
 0x42c   : > { %948 = vmatpush1.bf16.msra.mxu0 %v1716_v11  ;;  %989 = vmatpush1.bf16.msra.mxu1 %v1733_v14 }
 0x42d   : > { %949 = vmatprep.subr.bf16.mxu0 %v1722_v12  ;;  %990 = vmatprep.subr.bf16.mxu1 %v1745_v16 }
 0x430   : > { %950 = vmatpush1.bf16.msra.mxu0 %v1740_v15  ;;  %991 = vmatpush1.bf16.msra.mxu1 %v1762_v19 }
 0x431   : > { %951 = vmatprep.subr.bf16.mxu0 %v1751_v17  ;;  %992 = vmatprep.subr.bf16.mxu1 %v1769_v20 }
 0x434   : > { %952 = vmatpush1.bf16.msra.mxu0 %v1757_v18  ;;  %993 = vmatpush1.bf16.msra.mxu1 %v1781_v22 }
 0x435   : > { %953 = vmatprep.subr.bf16.mxu0 %v1775_v21  ;;  %994 = vmatprep.subr.bf16.mxu1 %v1793_v24 }
 0x438   : > { %954 = vmatpush1.bf16.msra.mxu0 %v1788_v23  ;;  %995 = vmatpush1.bf16.msra.mxu1 %v1805_v26 }
 0x439   : > { %955 = vmatprep.subr.bf16.mxu0 %v1799_v25  ;;  %996 = vmatprep.subr.bf16.mxu1 %v1817_v28 }
 0x43c   : > { %956 = vmatpush1.bf16.msra.mxu0 %v1812_v27  ;;  %997 = vmatpush1.bf16.msra.mxu1 %v1829_v30 }
 0x43d   : > { %957 = vmatprep.subr.bf16.mxu0 %v1823_v29  ;;  %998 = vmatprep.subr.bf16.mxu1 %v1841_v33 }
 0x440   : > { %958 = vmatpush1.bf16.msra.mxu0 %v1836_v31  ;;  %999 = vmatpush1.bf16.msra.mxu1 %v1848_v35 }
 0x441   : > { %1054 = vmatprep.subr.bf16.mxu0 %v1662_v1  ;;  %1095 = vmatprep.subr.bf16.mxu1 %v1681_v5 }
 0x4f6   : > { %v866_v59 = vpop.f32.mrb[16].mxu0  ;;  %v907_v60 = vpop.f32.mrb[16].mxu1 }
 0x4f7   : > { %v914_v61 = vadd.f32 %v1399_v32, %v866_v59  ;;  %v868_v62 = vpop.f32.mrb[17].mxu0  ;;  %v909_v63 = vpop.f32.mrb[17].mxu1  ;;  %v916_v1 = vadd.f32 %v1401_v0, %v907_v60 }
 0x4f8   : > { %v915_v34 = vadd.f32 %v1400_v53, %v868_v62  ;;  %v870_v36 = vpop.f32.mrb[18].mxu0  ;;  %v911_v37 = vpop.f32.mrb[18].mxu1  ;;  %v917_v46 = vadd.f32 %v1402_v44, %v909_v63 }
 0x4f9   : > { %v918_v38 = vmul.f32 0.5, %v914_v61  ;;  %v871_v41 = vpop.f32.mrb[19].mxu0  ;;  %v912_v42 = vpop.f32.mrb[19].mxu1 }
 0x4fa   : > { %v922_v43 = vmul.f32 0.5, %v915_v34  ;;  %v927_v47 = vmul.f32 0.5, %v917_v46 }
 0x4fb   : > { %1529 = vtanh.f32 %v918_v38 }
 0x4fc   : > { %1531 = vtanh.f32 %v922_v43 }
 0x4fd   : > { %1533 = vtanh.f32 %v916_v1 }
 0x4fe   : > { %1535 = vtanh.f32 %v927_v47  ;;  %v1570_v47 = vld [vmem:[%s2231_s1] ss:$16 sps:$4 sm:$0xff]  }
 0x505   : > { %v1530_v48 = vpop.eup %1529 }
 0x506   : > { %v1532_v49 = vpop.eup %1531  ;;  %v920_v50 = vadd.f32 1.0, %v1530_v48  ;;  %v1571_v48 = vld [vmem:[%s2231_s1 + $0x8] ss:$16 sps:$4 sm:$0xff]  }
 0x507   : > { %v924_v51 = vadd.f32 1.0, %v1532_v49  ;;  %v1534_v39 = vpop.eup %1533  ;;  %v1572_v49 = vld [vmem:[%s2231_s1 + $0x24] ss:$16 sps:$4 sm:$0xff]  }
 0x508   : > { %v921_v52 = vmul.f32 0.5, %v920_v50  ;;  %v1536_v58 = vpop.eup %1535  ;;  %v1573_v50 = vld [vmem:[%s2231_s1 + $0x2c] ss:$16 sps:$4 sm:$0xff]  }
 0x509   : > { %v925_v40 = vmul.f32 0.5, %v924_v51  ;;  %v929_v32 = vadd.f32 1.0, %v1536_v58  ;;  %v1574_v51 = vld [vmem:[%s2231_s1 + $0x20] ss:$16 sps:$4 sm:$0xff]  }
 0x50a   : > { %v932_v45 = vmul.f32 %v1534_v39, %v921_v52  ;;  %v1575_v52 = vld [vmem:[%s2231_s1 + $0x28] ss:$16 sps:$4 sm:$0xff]   ;;  %v1576_v39 = vld [vmem:[%s2231_s1 + $0x44] ss:$16 sps:$4 sm:$0xff]   ;;  %v1582_v58 = vld [vmem:[%s2231_s1 + $0x60] ss:$16 sps:$4 sm:$0xff]  }
 0x50b   : > { %v931_v55 = vmul.f32 %v925_v40, %v2031_v54  ;;  %v930_v53 = vmul.f32 0.5, %v929_v32  ;;  %v1577_v40 = vld [vmem:[%s2231_s1 + $0x4c] ss:$16 sps:$4 sm:$0xff]   ;;  %v1583_v32 = vld [vmem:[%s2231_s1 + $0x68] ss:$16 sps:$4 sm:$0xff]  }
 0x50d   : > { %v2076_v56 = vadd.f32 %v932_v45, %v931_v55  ;;  %v1579_v45 = vld [vmem:[%s2231_s1 + $0x48] ss:$16 sps:$4 sm:$0xff]   ;;  %v1580_v55 = vld [vmem:[%s2231_s1 + $0x64] ss:$16 sps:$4 sm:$0xff]  }
 0x50f   : > { %1537 = vtanh.f32 %v2076_v56 }
 0x519   : > { %v1538_v59 = vpop.eup %1537 }
 0x51a   : > { %v935_v60 = vmul.f32 %v1538_v59, %v930_v53  ;;  %v1584_v53 = vld [vmem:[%s2231_s1 + $0x84] ss:$16 sps:$4 sm:$0xff]   ;;  %v1585_v59 = vld [vmem:[%s2231_s1 + $0x8c] ss:$16 sps:$4 sm:$0xff]  }
 0x51c   : > { %v2080_v61 = vadd.f32 %v935_v60, %v2035_v57  ;;  %v942_v62 = vpack.c.bf16 %v935_v60, %v935_v60  ;;  %v1586_v60 = vld [vmem:[%s2231_s1 + $0x80] ss:$16 sps:$4 sm:$0xff]  }
 0x51e   : > { %976 = vmatmul.mubr.bf16.vlgmr.msra.gmra.mrb[20].mxu0 %v942_v62  ;;  %1017 = vmatmul.mubr.bf16.vlgmr.msra.gmra.mrb[20].mxu1 %v942_v62  ;;  %v1588_v62 = vld [vmem:[%s2231_s1 + $0xa4] ss:$16 sps:$4 sm:$0xff]  }
 0x51f   : > { %1055 = vmatpush1.bf16.msra.mxu0 %v1667_v2  ;;  %1096 = vmatpush1.bf16.msra.mxu1 %v1691_v7  ;;  %v1569_v2 = vld [vmem:[%s2231_s1 + $0x4] ss:$16 sps:$4 sm:$0xff]  }
 0x520   : > { %1056 = vmatprep.subr.bf16.mxu0 %v1675_v4  ;;  %1097 = vmatprep.subr.bf16.mxu1 %v1703_v9  ;;  %v1403_v4 = vld [vmem:[%s1654_s18 + $0x40] sm:$0xff] }
 0x521   : > { %1086 = vmatprep.mubr.bf16.mxu0 %v1617_v3  ;;  %1127 = vmatprep.mubr.bf16.mxu1 %v1617_v3 }
 0x523   : > { %1057 = vmatpush1.bf16.msra.mxu0 %v1686_v6  ;;  %1098 = vmatpush1.bf16.msra.mxu1 %v1709_v10  ;;  %v1404_v6 = vld [vmem:[%s1654_s18 + $0x48] sm:$0xff] }
 0x524   : > { %1058 = vmatprep.subr.bf16.mxu0 %v1697_v8  ;;  %1099 = vmatprep.subr.bf16.mxu1 %v1727_v13 }
 0x527   : > { %1059 = vmatpush1.bf16.msra.mxu0 %v1716_v11  ;;  %1100 = vmatpush1.bf16.msra.mxu1 %v1733_v14 }
 0x528   : > { %1060 = vmatprep.subr.bf16.mxu0 %v1722_v12  ;;  %1101 = vmatprep.subr.bf16.mxu1 %v1745_v16  ;;  %v1405_v12 = vld [vmem:[%s1654_s18 + $0x50] sm:$0xff] }
 0x52b   : > { %1061 = vmatpush1.bf16.msra.mxu0 %v1740_v15  ;;  %1102 = vmatpush1.bf16.msra.mxu1 %v1762_v19 }
 0x52c   : > { %1062 = vmatprep.subr.bf16.mxu0 %v1751_v17  ;;  %1103 = vmatprep.subr.bf16.mxu1 %v1769_v20 }
 0x52f   : > { %1063 = vmatpush1.bf16.msra.mxu0 %v1757_v18  ;;  %1104 = vmatpush1.bf16.msra.mxu1 %v1781_v22 }
 0x530   : > { %1064 = vmatprep.subr.bf16.mxu0 %v1775_v21  ;;  %1105 = vmatprep.subr.bf16.mxu1 %v1793_v24 }
 0x533   : > { %1065 = vmatpush1.bf16.msra.mxu0 %v1788_v23  ;;  %1106 = vmatpush1.bf16.msra.mxu1 %v1805_v26 }
 0x534   : > { %1066 = vmatprep.subr.bf16.mxu0 %v1799_v25  ;;  %1107 = vmatprep.subr.bf16.mxu1 %v1817_v28 }
 0x537   : > { %1067 = vmatpush1.bf16.msra.mxu0 %v1812_v27  ;;  %1108 = vmatpush1.bf16.msra.mxu1 %v1829_v30 }
 0x538   : > { %1068 = vmatprep.subr.bf16.mxu0 %v1823_v29  ;;  %1109 = vmatprep.subr.bf16.mxu1 %v1841_v33 }
 0x53b   : > { %1069 = vmatpush1.bf16.msra.mxu0 %v1836_v31  ;;  %1110 = vmatpush1.bf16.msra.mxu1 %v1848_v35 }
 0x53c   : > { %1164 = vmatprep.subr.bf16.mxu0 %v1569_v2  ;;  %1205 = vmatprep.subr.bf16.mxu1 %v1681_v5  ;;  %v1406_v5 = vld [vmem:[%s1654_s18 + $0x58] sm:$0xff] }
 0x53d   : > { %v1589_v2 = vld [vmem:[%s2231_s1 + $0xac] ss:$16 sps:$4 sm:$0xff]  }
 0x5f1   : > { %v977_v7 = vpop.f32.mrb[20].mxu0  ;;  %v1018_v8 = vpop.f32.mrb[20].mxu1 }
 0x5f2   : > { %v1025_v9 = vadd.f32 %v1403_v4, %v977_v7  ;;  %v979_v10 = vpop.f32.mrb[21].mxu0  ;;  %v1020_v11 = vpop.f32.mrb[21].mxu1  ;;  %v1027_v20 = vadd.f32 %v1405_v12, %v1018_v8  ;;  %v1590_v4 = vld [vmem:[%s2231_s1 + $0xa0] ss:$16 sps:$4 sm:$0xff]   ;;  %v1408_v7 = vld [vmem:[%s1654_s18 + $0x28] sm:$0xff] }
 0x5f3   : > { %v1026_v13 = vadd.f32 %v1404_v6, %v979_v10  ;;  %v981_v14 = vpop.f32.mrb[22].mxu0  ;;  %v1022_v15 = vpop.f32.mrb[22].mxu1  ;;  %v1028_v21 = vadd.f32 %v1406_v5, %v1020_v11  ;;  %v1591_v6 = vld [vmem:[%s2231_s1 + $0xc4] ss:$16 sps:$4 sm:$0xff]  }
 0x5f4   : > { %v1029_v16 = vmul.f32 0.5, %v1025_v9  ;;  %v982_v17 = vpop.f32.mrb[23].mxu0  ;;  %v1023_v18 = vpop.f32.mrb[23].mxu1  ;;  %v1409_v12 = vld [vmem:[%s1654_s18 + $0x30] sm:$0xff] }
 0x5f5   : > { %v1033_v19 = vmul.f32 0.5, %v1026_v13  ;;  %v1038_v22 = vmul.f32 0.5, %v1028_v21 }
 0x5f6   : > { %1539 = vtanh.f32 %v1029_v16 }
 0x5f7   : > { %1541 = vtanh.f32 %v1033_v19 }
 0x5f8   : > { %1543 = vtanh.f32 %v1027_v20 }
 0x5f9   : > { %1545 = vtanh.f32 %v1038_v22 }
 0x600   : > { %v1540_v23 = vpop.eup %1539 }
 0x601   : > { %v1542_v24 = vpop.eup %1541  ;;  %v1031_v25 = vadd.f32 1.0, %v1540_v23 }
 0x602   : > { %v1035_v54 = vadd.f32 1.0, %v1542_v24  ;;  %v1544_v63 = vpop.eup %1543 }
 0x603   : > { %v1032_v57 = vmul.f32 0.5, %v1031_v25  ;;  %v1546_v38 = vpop.eup %1545 }
 0x604   : > { %v1036_v0 = vmul.f32 0.5, %v1035_v54  ;;  %v1040_v41 = vadd.f32 1.0, %v1546_v38 }
 0x605   : > { %v1043_v34 = vmul.f32 %v1544_v63, %v1032_v57 }
 0x606   : > { %v1042_v36 = vmul.f32 %v1036_v0, %v2076_v56  ;;  %v1041_v42 = vmul.f32 0.5, %v1040_v41  ;;  %v1581_v56 = vld [vmem:[%s2231_s1 + $0x6c] ss:$16 sps:$4 sm:$0xff]  }
 0x608   : > { %v2123_v37 = vadd.f32 %v1043_v34, %v1042_v36 }
 0x60a   : > { %1547 = vtanh.f32 %v2123_v37 }
 0x614   : > { %v1548_v43 = vpop.eup %1547 }
 0x615   : > { %v1046_v1 = vmul.f32 %v1548_v43, %v1041_v42  ;;  %v1159_v42 = vld [vmem:[%s1654_s18] sm:$0xff]  ;;  %v1160_v43 = vld [vmem:[%s1654_s18 + $0x8] sm:$0xff] }
 0x617   : > { %v2127_v44 = vadd.f32 %v1046_v1, %v2080_v61  ;;  %v1053_v46 = vpack.c.bf16 %v1046_v1, %v1046_v1  ;;  %v1587_v61 = vld [vmem:[%s2231_s1 + $0x88] ss:$16 sps:$4 sm:$0xff]  }
 0x619   : > { %1087 = vmatmul.mubr.bf16.vlgmr.msra.gmra.mrb[24].mxu0 %v1053_v46  ;;  %1128 = vmatmul.mubr.bf16.vlgmr.msra.gmra.mrb[24].mxu1 %v1053_v46 }
 0x61a   : > { %1165 = vmatpush1.bf16.msra.mxu0 %v1570_v47  ;;  %1206 = vmatpush1.bf16.msra.mxu1 %v1571_v48 }
 0x61b   : > { %1166 = vmatprep.subr.bf16.mxu0 %v1572_v49  ;;  %1207 = vmatprep.subr.bf16.mxu1 %v1573_v50  ;;  %v1161_v49 = vld [vmem:[%s1654_s18 + $0x10] sm:$0xff] }
 0x61c   : > { %1196 = vmatprep.mubr.bf16.mxu0 %v1617_v3  ;;  %1237 = vmatprep.mubr.bf16.mxu1 %v1617_v3  ;;  %v1578_v3 = vld [vmem:[%s2231_s1 + $0x40] ss:$16 sps:$4 sm:$0xff]  }
 0x61e   : > { %1167 = vmatpush1.bf16.msra.mxu0 %v1574_v51  ;;  %1208 = vmatpush1.bf16.msra.mxu1 %v1575_v52 }
 0x61f   : > { %1168 = vmatprep.subr.bf16.mxu0 %v1576_v39  ;;  %1209 = vmatprep.subr.bf16.mxu1 %v1577_v40 }
 0x622   : > { %1169 = vmatpush1.bf16.msra.mxu0 %v1578_v3  ;;  %1210 = vmatpush1.bf16.msra.mxu1 %v1579_v45 }
 0x623   : > { %1170 = vmatprep.subr.bf16.mxu0 %v1580_v55  ;;  %1211 = vmatprep.subr.bf16.mxu1 %v1581_v56  ;;  %v1162_v55 = vld [vmem:[%s1654_s18 + $0x18] sm:$0xff] }
 0x626   : > { %1171 = vmatpush1.bf16.msra.mxu0 %v1582_v58  ;;  %1212 = vmatpush1.bf16.msra.mxu1 %v1583_v32 }
 0x627   : > { %1172 = vmatprep.subr.bf16.mxu0 %v1584_v53  ;;  %1213 = vmatprep.subr.bf16.mxu1 %v1585_v59 }
 0x62a   : > { %1173 = vmatpush1.bf16.msra.mxu0 %v1586_v60  ;;  %1214 = vmatpush1.bf16.msra.mxu1 %v1587_v61 }
 0x62b   : > { %1174 = vmatprep.subr.bf16.mxu0 %v1588_v62  ;;  %1215 = vmatprep.subr.bf16.mxu1 %v1589_v2 }
 0x62e   : > { %1175 = vmatpush1.bf16.msra.mxu0 %v1590_v4  ;;  %1216 = vmatpush1.bf16.msra.mxu1 %v1805_v26  ;;  %v1407_v26 = vld [vmem:[%s1654_s18 + $0x20] sm:$0xff] }
 0x62f   : > { %1176 = vmatprep.subr.bf16.mxu0 %v1591_v6  ;;  %1217 = vmatprep.subr.bf16.mxu1 %v1817_v28 }
 0x632   : > { %1177 = vmatpush1.bf16.msra.mxu0 %v1812_v27  ;;  %1218 = vmatpush1.bf16.msra.mxu1 %v1829_v30 }
 0x633   : > { %1178 = vmatprep.subr.bf16.mxu0 %v1823_v29  ;;  %1219 = vmatprep.subr.bf16.mxu1 %v1841_v33 }
 0x636   : > { %1179 = vmatpush1.bf16.msra.mxu0 %v1836_v31  ;;  %1220 = vmatpush1.bf16.msra.mxu1 %v1848_v35  ;;  %v1410_v35 = vld [vmem:[%s1654_s18 + $0x38] sm:$0xff] }
 0x6ec   : > { %v1088_v8 = vpop.f32.mrb[24].mxu0  ;;  %v1129_v9 = vpop.f32.mrb[24].mxu1 }
 0x6ed   : > { %v1136_v10 = vadd.f32 %v1407_v26, %v1088_v8  ;;  %v1090_v11 = vpop.f32.mrb[25].mxu0  ;;  %v1131_v28 = vpop.f32.mrb[25].mxu1  ;;  %v1138_v31 = vadd.f32 %v1409_v12, %v1129_v9  ;;  %v1271_v12 = vld [vmem:[%s2232_s2] sm:$0xff] }
 0x6ee   : > { %v1137_v27 = vadd.f32 %v1408_v7, %v1090_v11  ;;  %v1092_v13 = vpop.f32.mrb[26].mxu0  ;;  %v1133_v30 = vpop.f32.mrb[26].mxu1  ;;  %v1139_v16 = vadd.f32 %v1410_v35, %v1131_v28 }
 0x6ef   : > { %v1140_v14 = vmul.f32 0.5, %v1136_v10  ;;  %v1093_v29 = vpop.f32.mrb[27].mxu0  ;;  %v1134_v15 = vpop.f32.mrb[27].mxu1 }
 0x6f0   : > { %v1144_v33 = vmul.f32 0.5, %v1137_v27  ;;  %v1149_v17 = vmul.f32 0.5, %v1139_v16 }
 0x6f1   : > { %1549 = vtanh.f32 %v1140_v14 }
 0x6f2   : > { %1551 = vtanh.f32 %v1144_v33 }
 0x6f3   : > { %1553 = vtanh.f32 %v1138_v31 }
 0x6f4   : > { %1555 = vtanh.f32 %v1149_v17 }
 0x6fb   : > { %v1550_v18 = vpop.eup %1549 }
 0x6fc   : > { %v1552_v19 = vpop.eup %1551  ;;  %v1142_v20 = vadd.f32 1.0, %v1550_v18 }
 0x6fd   : > { %v1146_v5 = vadd.f32 1.0, %v1552_v19  ;;  %v1554_v22 = vpop.eup %1553 }
 0x6fe   : > { %v1143_v21 = vmul.f32 0.5, %v1142_v20  ;;  %v1556_v57 = vpop.eup %1555 }
 0x6ff   : > { %v1147_v23 = vmul.f32 0.5, %v1146_v5  ;;  %v1151_v63 = vadd.f32 1.0, %v1556_v57 }
 0x700   : > { %v1154_v24 = vmul.f32 %v1554_v22, %v1143_v21 }
 0x701   : > { %v1153_v25 = vmul.f32 %v1147_v23, %v2123_v37  ;;  %v1152_v0 = vmul.f32 0.5, %v1151_v63 }
 0x703   : > { %v1155_v54 = vadd.f32 %v1154_v24, %v1153_v25 }
 0x705   : > { %1557 = vtanh.f32 %v1155_v54 }
 0x70f   : > { %v1558_v34 = vpop.eup %1557 }
 0x710   : > { %v1157_v36 = vmul.f32 %v1558_v34, %v1152_v0 }
 0x712   : > { %v1158_v38 = vadd.f32 %v1157_v36, %v2127_v44  ;;  %v1163_v41 = vpack.c.bf16 %v1157_v36, %v1157_v36 }
 0x714   : > { %1197 = vmatmul.mubr.bf16.vlgmr.msra.gmra.mrb[28].mxu0 %v1163_v41  ;;  %1238 = vmatmul.mubr.bf16.vlgmr.msra.gmra.mrb[28].mxu1 %v1163_v41 }
 0x7e7   : > { %v1198_v1 = vpop.f32.mrb[28].mxu0  ;;  %v1239_v46 = vpop.f32.mrb[28].mxu1 }
 0x7e8   : > { %v1246_v47 = vadd.f32 %v1198_v1, %v1159_v42  ;;  %v1200_v37 = vpop.f32.mrb[29].mxu0  ;;  %v1241_v48 = vpop.f32.mrb[29].mxu1  ;;  %v1248_v44 = vadd.f32 %v1239_v46, %v1161_v49 }
 0x7e9   : > { %v1247_v50 = vadd.f32 %v1200_v37, %v1160_v43  ;;  %v1202_v51 = vpop.f32.mrb[30].mxu0  ;;  %v1243_v52 = vpop.f32.mrb[30].mxu1  ;;  %v1249_v56 = vadd.f32 %v1241_v48, %v1162_v55 }
 0x7ea   : > { %v1250_v39 = vmul.f32 0.5, %v1246_v47  ;;  %v1203_v40 = vpop.f32.mrb[31].mxu0  ;;  %v1244_v3 = vpop.f32.mrb[31].mxu1 }
 0x7eb   : > { %v1254_v45 = vmul.f32 0.5, %v1247_v50  ;;  %v1259_v58 = vmul.f32 0.5, %v1249_v56 }
 0x7ec   : > { %1559 = vtanh.f32 %v1250_v39 }
 0x7ed   : > { %1561 = vtanh.f32 %v1254_v45 }
 0x7ee   : > { %1563 = vtanh.f32 %v1248_v44 }
 0x7ef   : > { %1565 = vtanh.f32 %v1259_v58 }
 0x7f6   : > { %v1560_v32 = vpop.eup %1559 }
 0x7f7   : > { %v1562_v53 = vpop.eup %1561  ;;  %v1252_v59 = vadd.f32 1.0, %v1560_v32 }
 0x7f8   : > { %v1256_v60 = vadd.f32 1.0, %v1562_v53  ;;  %v1564_v62 = vpop.eup %1563 }
 0x7f9   : > { %v1253_v61 = vmul.f32 0.5, %v1252_v59  ;;  %v1566_v7 = vpop.eup %1565 }
 0x7fa   : > { %v1257_v2 = vmul.f32 0.5, %v1256_v60  ;;  %v1261_v8 = vadd.f32 1.0, %v1566_v7 }
 0x7fb   : > { %v1264_v4 = vmul.f32 %v1564_v62, %v1253_v61 }
 0x7fc   : > { %v1263_v6 = vmul.f32 %v1257_v2, %v1155_v54  ;;  %v1262_v9 = vmul.f32 0.5, %v1261_v8 }
 0x7fe   : > { %v1265_v26 = vadd.f32 %v1264_v4, %v1263_v6 }
 0x800   : > { %1567 = vtanh.f32 %v1265_v26  ;;  %1270 = vst [vmem:[#allocation3] sm:$0xff] %v1265_v26 }
 0x80a   : > { %v1568_v10 = vpop.eup %1567 }
 0x80b   : > { %v1267_v11 = vmul.f32 %v1568_v10, %v1262_v9 }
 0x80d   : > { %v1268_v28 = vadd.f32 %v1267_v11, %v1158_v38  ;;  %1269 = vst [vmem:[#allocation2] sm:$0xff] %v1267_v11 }
 0x80f   : > { %v1272_v27 = vmul.f32 0.0625, %v1268_v28 }
 0x811   : > { %v1273_v13 = vadd.f32 %v1272_v27, %v1271_v12 }
 0x813   : > { %1274 = vst [vmem:[%s2232_s2] sm:$0xff] %v1273_v13 }
 0x814 PF: > { %s12_s11 = sadd.s32 1, %s1614_s11   ;;  %s2233_s9 = smov %s1610_s10 }
 0x815   : > { %p9_p6 = scmp.ge.s32.totalorder %s12_s11, 4   ;;  %s2234_s10 = smov %s2236_s12 }
 0x817   :  { %11 = sbr.rel (!%p9_p6) target bundleno = 2 (0x2), region = 69 }

</bundles_post_ra>
